<compile_context>
chip_gen: v7x
topology: tpu7x:2x2x1
jax: 0.10.0
libtpu: 0.0.40
codegen_flags: <defaults>
</compile_context>

<pallas_src>
import math

import jax
import jax.numpy as jnp
from jax.experimental import pallas as pl
from jax.experimental.pallas import tpu as pltpu


def _round_up(x, m):
    return (x + m - 1) // m * m


# ------------------------------ Static config --------------------------------

_ALEXNET_CONVS = [
    # (out_ch, in_ch, kh, kw, stride, padding, pool_after)
    (64, 3, 11, 11, 4, 2, True),
    (192, 64, 5, 5, 1, 2, True),
    (384, 192, 3, 3, 1, 1, False),
    (256, 384, 3, 3, 1, 1, False),
    (256, 256, 3, 3, 1, 1, True),
]


# ------------------------------ Pallas kernel --------------------------------

def _conv_gemm_kernel(x_ref, w_ref, b_ref, o_ref):
    """Single-pass GEMM (full K resident) + bias + ReLU, f32 MXU accumulation."""
    acc = jnp.dot(x_ref[...], w_ref[...], preferred_element_type=jnp.float32)
    o_ref[...] = jnp.maximum(acc + b_ref[...], 0.0).astype(o_ref.dtype)


def _gemm_bias_relu(patches, w_mat, bias2d, tm, tn):
    """patches (M,K) bf16 @ w_mat (K,C) bf16 + bias (1,C) f32 -> relu, bf16 out.

    Caller guarantees: tm | M, tn | C, tm % 16 == 0, tn % 128 == 0, K % 128 == 0.
    Grid is (C//tn, M//tm) with M fastest so the (K, tn) weight block is DMA'd
    once per j and stays VMEM-resident across all M blocks.
    """
    M, K = patches.shape
    Kw, C = w_mat.shape
    assert K == Kw and K % 128 == 0 and C % 128 == 0
    assert M % tm == 0 and C % tn == 0 and tm % 16 == 0 and tn % 128 == 0

    grid = (C // tn, M // tm)

    return pl.pallas_call(
        _conv_gemm_kernel,
        out_shape=jax.ShapeDtypeStruct((M, C), jnp.bfloat16),
        grid_spec=pltpu.PrefetchScalarGridSpec(
            num_scalar_prefetch=0,
            grid=grid,
            in_specs=[
                pl.BlockSpec((tm, K), lambda j, i: (i, 0)),   # patch block, streams
                pl.BlockSpec((K, tn), lambda j, i: (0, j)),   # weights, resident per j
                pl.BlockSpec((1, tn), lambda j, i: (0, j)),   # bias
            ],
            out_specs=pl.BlockSpec((tm, tn), lambda j, i: (i, j)),
        ),
        compiler_params=pltpu.CompilerParams(
            dimension_semantics=("parallel", "parallel"),
            # Worst-case double-buffered footprint (tm<=512, K<=3456, tn<=384,
            # bf16) is ~13 MiB, so 32 MiB is safe on v5e/v6e/v7x and above
            # v5e's 16 MiB scoped default.
            vmem_limit_bytes=32 * 1024 * 1024,
        ),
    )(patches, w_mat, bias2d)


# ------------------------------ Layer wrappers --------------------------------

def conv2d_nhwc(x, w_mat, bias2d, oc, cin, kh, kw, stride, padding):
    """NHWC conv + ReLU (nn.Conv2d semantics) via im2col + single-pass GEMM."""
    N, H, W, C = x.shape
    assert C == cin and x.dtype == jnp.bfloat16
    OH = (H + 2 * padding - kh) // stride + 1
    OW = (W + 2 * padding - kw) // stride + 1

    xp = jnp.pad(x, ((0, 0), (padding, padding), (padding, padding), (0, 0)))

    # Host-side im2col with (kh, kw, cin) K-ordering, matching the
    # pre-transposed weights.  All in bf16 (x is already bf16).
    # TODO(synk): fuse patch extraction into the kernel to avoid the HBM
    # patch matrix (kh*kw/stride^2 read inflation).
    slices = []
    for dh in range(kh):
        for dw in range(kw):
            slices.append(
                xp[:, dh:dh + stride * (OH - 1) + 1:stride,
                   dw:dw + stride * (OW - 1) + 1:stride, :])
    K = kh * kw * cin
    K_pad, C_pad = w_mat.shape
    if K_pad > K:  # zero K-padding folded into the concat (no second copy)
        slices.append(jnp.zeros((N, OH, OW, K_pad - K), jnp.bfloat16))
    pat = jnp.concatenate(slices, axis=-1).reshape(N * OH * OW, K_pad)

    M = N * OH * OW
    # bf16 sublane tile is 16 rows: round tm / M padding to multiples of 16.
    tm = min(512, _round_up(M, 16))
    M_pad = _round_up(M, tm)
    if M_pad > M:
        pat = jnp.pad(pat, ((0, M_pad - M), (0, 0)))

    m_blocks = M_pad // tm
    if m_blocks >= 2 or C_pad == 128:
        tn = C_pad                 # full width: weights resident, single j block
    else:
        tn = 128                   # split Cout so both v7x TensorCores get a block
    if m_blocks * (C_pad // tn) < 2 and M_pad % 32 == 0:
        tm = M_pad // 2            # last resort: split M to get >=2 parallel blocks

    out = _gemm_bias_relu(pat, w_mat, bias2d, tm, tn)   # (M_pad, C_pad) bf16
    return out[:M, :oc].reshape(N, OH, OW, oc)


def maxpool2d_nhwc(x, k=3, s=2):
    """NHWC max pool (k=3, s=2, no padding), matches nn.MaxPool2d(3, 2).

    Left to XLA's reduce_window (runs in bf16); a Pallas version would need a
    9x-expanded HBM stack which the perf review rejected.
    """
    return jax.lax.reduce_window(
        x, jnp.asarray(-jnp.inf, x.dtype), jax.lax.max,
        window_dimensions=(1, k, k, 1),
        window_strides=(1, s, s, 1),
        padding="VALID")


# ------------------------------ Parameter init --------------------------------

def init_alexnet_params(key):
    """Deterministic init matching DepthCNN.init_weights for Conv2d:
    weight ~ N(0, sqrt(2 / (kh*kw*out_channels))), bias = 0.

    Weight prep (transpose to (K, OC), 128-granular K/OC zero-padding, bf16
    cast) is hoisted here so the forward pass does no per-call layout work.
    """
    params = []
    keys = jax.random.split(key, len(_ALEXNET_CONVS))
    for kk, (oc, ic, kh, kw, _st, _pd, _pool) in zip(keys, _ALEXNET_CONVS):
        n = kh * kw * oc
        std = math.sqrt(2.0 / n)
        w = std * jax.random.normal(kk, (oc, ic, kh, kw), jnp.float32)
        b = jnp.zeros((oc,), jnp.float32)

        K = kh * kw * ic
        K_pad = _round_up(K, 128)
        C_pad = _round_up(oc, 128)
        # (OC, Cin, KH, KW) -> (KH, KW, Cin, OC) -> (K, OC); pad to (K_pad, C_pad)
        w_mat = jnp.transpose(w, (2, 3, 1, 0)).reshape(K, oc)
        w_mat = jnp.pad(w_mat, ((0, K_pad - K), (0, C_pad - oc))).astype(jnp.bfloat16)
        b2d = jnp.pad(b, (0, C_pad - oc)).reshape(1, C_pad).astype(jnp.float32)
        params.append({"w_mat": w_mat, "b": b2d})
    return params


# --------------------------------- Forward ------------------------------------

def depth_cnn_forward(x, params):
    """AlexNet `features` trunk (= DepthCNN('alexnet').forward). x: NCHW f32."""
    x = jnp.transpose(x, (0, 2, 3, 1)).astype(jnp.bfloat16)   # NCHW -> NHWC bf16, once
    for (oc, ic, kh, kw, st, pd, pool), p in zip(_ALEXNET_CONVS, params):
        x = conv2d_nhwc(x, p["w_mat"], p["b"], oc, ic, kh, kw, st, pd)
        if pool:
            x = maxpool2d_nhwc(x)
    # NHWC -> NCHW and back to f32 at the public boundary.
    return jnp.transpose(x, (0, 3, 1, 2)).astype(jnp.float32)


if __name__ == "__main__":
    key = jax.random.PRNGKey(0)
    k_in, k_w = jax.random.split(key)

    params = init_alexnet_params(k_w)
    # Small input consistent with AlexNet's stride/pool cascade:
    # (2, 3, 67, 67) -> conv1 16x16 -> pool 7x7 -> pool 3x3 -> pool 1x1
    depth_imgs = jax.random.normal(k_in, (2, 3, 67, 67), jnp.float32)

    fwd = jax.jit(depth_cnn_forward)
    out = jax.block_until_ready(fwd(depth_imgs, params))

    assert out.shape == (2, 256, 1, 1), out.shape
    assert bool(jnp.all(jnp.isfinite(out)))
    print("KERNEL_OK")
</pallas_src>

<mosaic_0001>
module attributes {stable_mosaic.version = 11 : i64} {
  func.func @_conv_gemm_kernel(%arg0: i32, %arg1: i32, %arg2: memref<256x384xbf16, #tpu.memory_space<vmem>>, %arg3: memref<384x128xbf16, #tpu.memory_space<vmem>>, %arg4: memref<1x128xf32, #tpu.memory_space<vmem>>, %arg5: memref<256x128xbf16, #tpu.memory_space<vmem>>) attributes {dimension_semantics = [#tpu.dimension_semantics<parallel>, #tpu.dimension_semantics<parallel>], iteration_bounds = array<i64: 1, 2>, scalar_prefetch = 0 : i64, scratch_operands = 0 : i64, tpu.core_type = #tpu.core_type<tc>, window_params = [{transform_indices = @transform_0, window_bounds = array<i64: 256, 384>}, {transform_indices = @transform_1, window_bounds = array<i64: 384, 128>}, {transform_indices = @transform_2, window_bounds = array<i64: 1, 128>}, {transform_indices = @transform_3, window_bounds = array<i64: 256, 128>}]} {
    %c0 = arith.constant 0 : index
    %c0_0 = arith.constant 0 : index
    %0 = vector.load %arg2[%c0, %c0_0] : memref<256x384xbf16, #tpu.memory_space<vmem>>, vector<256x384xbf16>
    %c0_1 = arith.constant 0 : index
    %c0_2 = arith.constant 0 : index
    %1 = vector.load %arg3[%c0_1, %c0_2] : memref<384x128xbf16, #tpu.memory_space<vmem>>, vector<384x128xbf16>
    %cst = arith.constant dense<0.000000e+00> : vector<256x128xf32>
    %2 = tpu.matmul %0, %1, %cst {dimension_numbers = #tpu.dot_dimension_numbers<[1], [0], [0], [1], [0, 0, 1, 1], [], []>} : vector<256x384xbf16>, vector<384x128xbf16>, vector<256x128xf32> -> vector<256x128xf32>
    %c0_3 = arith.constant 0 : index
    %c0_4 = arith.constant 0 : index
    %3 = vector.load %arg4[%c0_3, %c0_4] : memref<1x128xf32, #tpu.memory_space<vmem>>, vector<1x128xf32>
    %4 = vector.broadcast %3 : vector<1x128xf32> to vector<256x128xf32>
    %5 = arith.addf %2, %4 : vector<256x128xf32>
    %cst_5 = arith.constant 0.000000e+00 : f32
    %6 = vector.broadcast %cst_5 : f32 to vector<256x128xf32>
    %7 = arith.maximumf %5, %6 : vector<256x128xf32>
    %8 = arith.truncf %7 : vector<256x128xf32> to vector<256x128xbf16>
    %c0_6 = arith.constant 0 : index
    %c0_7 = arith.constant 0 : index
    %9 = vector.load %arg5[%c0_6, %c0_7] : memref<256x128xbf16, #tpu.memory_space<vmem>>, vector<256x128xbf16>
    tpu.vector_store %arg5[%c0_6, %c0_7], %8 {strides = array<i32>} : memref<256x128xbf16, #tpu.memory_space<vmem>>, vector<256x128xbf16>,
    return
  }
  func.func @transform_0(%arg0: i32, %arg1: i32) -> (i32, i32) {
    %c0_i32 = arith.constant 0 : i32
    %c0_i32_0 = arith.constant 0 : i32
    return %arg1, %c0_i32 : i32, i32
  }
  func.func @transform_1(%arg0: i32, %arg1: i32) -> (i32, i32) {
    %c0_i32 = arith.constant 0 : i32
    %c0_i32_0 = arith.constant 0 : i32
    return %c0_i32, %arg0 : i32, i32
  }
  func.func @transform_2(%arg0: i32, %arg1: i32) -> (i32, i32) {
    %c0_i32 = arith.constant 0 : i32
    %c0_i32_0 = arith.constant 0 : i32
    return %c0_i32, %arg0 : i32, i32
  }
  func.func @transform_3(%arg0: i32, %arg1: i32) -> (i32, i32) {
    %c0_i32 = arith.constant 0 : i32
    return %arg1, %arg0 : i32, i32
  }
}

module attributes {stable_mosaic.version = 11 : i64} {
  func.func @_conv_gemm_kernel(%arg0: i32, %arg1: i32, %arg2: memref<112x1664xbf16, #tpu.memory_space<vmem>>, %arg3: memref<1664x128xbf16, #tpu.memory_space<vmem>>, %arg4: memref<1x128xf32, #tpu.memory_space<vmem>>, %arg5: memref<112x128xbf16, #tpu.memory_space<vmem>>) attributes {dimension_semantics = [#tpu.dimension_semantics<parallel>, #tpu.dimension_semantics<parallel>], iteration_bounds = array<i64: 2, 1>, scalar_prefetch = 0 : i64, scratch_operands = 0 : i64, tpu.core_type = #tpu.core_type<tc>, window_params = [{transform_indices = @transform_0, window_bounds = array<i64: 112, 1664>}, {transform_indices = @transform_1, window_bounds = array<i64: 1664, 128>}, {transform_indices = @transform_2, window_bounds = array<i64: 1, 128>}, {transform_indices = @transform_3, window_bounds = array<i64: 112, 128>}]} {
    %c0 = arith.constant 0 : index
    %c0_0 = arith.constant 0 : index
    %0 = vector.load %arg2[%c0, %c0_0] : memref<112x1664xbf16, #tpu.memory_space<vmem>>, vector<112x1664xbf16>
    %c0_1 = arith.constant 0 : index
    %c0_2 = arith.constant 0 : index
    %1 = vector.load %arg3[%c0_1, %c0_2] : memref<1664x128xbf16, #tpu.memory_space<vmem>>, vector<1664x128xbf16>
    %cst = arith.constant dense<0.000000e+00> : vector<112x128xf32>
    %2 = tpu.matmul %0, %1, %cst {dimension_numbers = #tpu.dot_dimension_numbers<[1], [0], [0], [1], [0, 0, 1, 1], [], []>} : vector<112x1664xbf16>, vector<1664x128xbf16>, vector<112x128xf32> -> vector<112x128xf32>
    %c0_3 = arith.constant 0 : index
    %c0_4 = arith.constant 0 : index
    %3 = vector.load %arg4[%c0_3, %c0_4] : memref<1x128xf32, #tpu.memory_space<vmem>>, vector<1x128xf32>
    %4 = vector.broadcast %3 : vector<1x128xf32> to vector<112x128xf32>
    %5 = arith.addf %2, %4 : vector<112x128xf32>
    %cst_5 = arith.constant 0.000000e+00 : f32
    %6 = vector.broadcast %cst_5 : f32 to vector<112x128xf32>
    %7 = arith.maximumf %5, %6 : vector<112x128xf32>
    %8 = arith.truncf %7 : vector<112x128xf32> to vector<112x128xbf16>
    %c0_6 = arith.constant 0 : index
    %c0_7 = arith.constant 0 : index
    %9 = vector.load %arg5[%c0_6, %c0_7] : memref<112x128xbf16, #tpu.memory_space<vmem>>, vector<112x128xbf16>
    tpu.vector_store %arg5[%c0_6, %c0_7], %8 {strides = array<i32>} : memref<112x128xbf16, #tpu.memory_space<vmem>>, vector<112x128xbf16>,
    return
  }
  func.func @transform_0(%arg0: i32, %arg1: i32) -> (i32, i32) {
    %c0_i32 = arith.constant 0 : i32
    %c0_i32_0 = arith.constant 0 : i32
    return %arg1, %c0_i32 : i32, i32
  }
  func.func @transform_1(%arg0: i32, %arg1: i32) -> (i32, i32) {
    %c0_i32 = arith.constant 0 : i32
    %c0_i32_0 = arith.constant 0 : i32
    return %c0_i32, %arg0 : i32, i32
  }
  func.func @transform_2(%arg0: i32, %arg1: i32) -> (i32, i32) {
    %c0_i32 = arith.constant 0 : i32
    %c0_i32_0 = arith.constant 0 : i32
    return %c0_i32, %arg0 : i32, i32
  }
  func.func @transform_3(%arg0: i32, %arg1: i32) -> (i32, i32) {
    %c0_i32 = arith.constant 0 : i32
    return %arg1, %arg0 : i32, i32
  }
}

module attributes {stable_mosaic.version = 11 : i64} {
  func.func @_conv_gemm_kernel(%arg0: i32, %arg1: i32, %arg2: memref<32x1792xbf16, #tpu.memory_space<vmem>>, %arg3: memref<1792x128xbf16, #tpu.memory_space<vmem>>, %arg4: memref<1x128xf32, #tpu.memory_space<vmem>>, %arg5: memref<32x128xbf16, #tpu.memory_space<vmem>>) attributes {dimension_semantics = [#tpu.dimension_semantics<parallel>, #tpu.dimension_semantics<parallel>], iteration_bounds = array<i64: 3, 1>, scalar_prefetch = 0 : i64, scratch_operands = 0 : i64, tpu.core_type = #tpu.core_type<tc>, window_params = [{transform_indices = @transform_0, window_bounds = array<i64: 32, 1792>}, {transform_indices = @transform_1, window_bounds = array<i64: 1792, 128>}, {transform_indices = @transform_2, window_bounds = array<i64: 1, 128>}, {transform_indices = @transform_3, window_bounds = array<i64: 32, 128>}]} {
    %c0 = arith.constant 0 : index
    %c0_0 = arith.constant 0 : index
    %0 = vector.load %arg2[%c0, %c0_0] : memref<32x1792xbf16, #tpu.memory_space<vmem>>, vector<32x1792xbf16>
    %c0_1 = arith.constant 0 : index
    %c0_2 = arith.constant 0 : index
    %1 = vector.load %arg3[%c0_1, %c0_2] : memref<1792x128xbf16, #tpu.memory_space<vmem>>, vector<1792x128xbf16>
    %cst = arith.constant dense<0.000000e+00> : vector<32x128xf32>
    %2 = tpu.matmul %0, %1, %cst {dimension_numbers = #tpu.dot_dimension_numbers<[1], [0], [0], [1], [0, 0, 1, 1], [], []>} : vector<32x1792xbf16>, vector<1792x128xbf16>, vector<32x128xf32> -> vector<32x128xf32>
    %c0_3 = arith.constant 0 : index
    %c0_4 = arith.constant 0 : index
    %3 = vector.load %arg4[%c0_3, %c0_4] : memref<1x128xf32, #tpu.memory_space<vmem>>, vector<1x128xf32>
    %4 = vector.broadcast %3 : vector<1x128xf32> to vector<32x128xf32>
    %5 = arith.addf %2, %4 : vector<32x128xf32>
    %cst_5 = arith.constant 0.000000e+00 : f32
    %6 = vector.broadcast %cst_5 : f32 to vector<32x128xf32>
    %7 = arith.maximumf %5, %6 : vector<32x128xf32>
    %8 = arith.truncf %7 : vector<32x128xf32> to vector<32x128xbf16>
    %c0_6 = arith.constant 0 : index
    %c0_7 = arith.constant 0 : index
    %9 = vector.load %arg5[%c0_6, %c0_7] : memref<32x128xbf16, #tpu.memory_space<vmem>>, vector<32x128xbf16>
    tpu.vector_store %arg5[%c0_6, %c0_7], %8 {strides = array<i32>} : memref<32x128xbf16, #tpu.memory_space<vmem>>, vector<32x128xbf16>,
    return
  }
  func.func @transform_0(%arg0: i32, %arg1: i32) -> (i32, i32) {
    %c0_i32 = arith.constant 0 : i32
    %c0_i32_0 = arith.constant 0 : i32
    return %arg1, %c0_i32 : i32, i32
  }
  func.func @transform_1(%arg0: i32, %arg1: i32) -> (i32, i32) {
    %c0_i32 = arith.constant 0 : i32
    %c0_i32_0 = arith.constant 0 : i32
    return %c0_i32, %arg0 : i32, i32
  }
  func.func @transform_2(%arg0: i32, %arg1: i32) -> (i32, i32) {
    %c0_i32 = arith.constant 0 : i32
    %c0_i32_0 = arith.constant 0 : i32
    return %c0_i32, %arg0 : i32, i32
  }
  func.func @transform_3(%arg0: i32, %arg1: i32) -> (i32, i32) {
    %c0_i32 = arith.constant 0 : i32
    return %arg1, %arg0 : i32, i32
  }
}

module attributes {stable_mosaic.version = 11 : i64} {
  func.func @_conv_gemm_kernel(%arg0: i32, %arg1: i32, %arg2: memref<32x3456xbf16, #tpu.memory_space<vmem>>, %arg3: memref<3456x128xbf16, #tpu.memory_space<vmem>>, %arg4: memref<1x128xf32, #tpu.memory_space<vmem>>, %arg5: memref<32x128xbf16, #tpu.memory_space<vmem>>) attributes {dimension_semantics = [#tpu.dimension_semantics<parallel>, #tpu.dimension_semantics<parallel>], iteration_bounds = array<i64: 2, 1>, scalar_prefetch = 0 : i64, scratch_operands = 0 : i64, tpu.core_type = #tpu.core_type<tc>, window_params = [{transform_indices = @transform_0, window_bounds = array<i64: 32, 3456>}, {transform_indices = @transform_1, window_bounds = array<i64: 3456, 128>}, {transform_indices = @transform_2, window_bounds = array<i64: 1, 128>}, {transform_indices = @transform_3, window_bounds = array<i64: 32, 128>}]} {
    %c0 = arith.constant 0 : index
    %c0_0 = arith.constant 0 : index
    %0 = vector.load %arg2[%c0, %c0_0] : memref<32x3456xbf16, #tpu.memory_space<vmem>>, vector<32x3456xbf16>
    %c0_1 = arith.constant 0 : index
    %c0_2 = arith.constant 0 : index
    %1 = vector.load %arg3[%c0_1, %c0_2] : memref<3456x128xbf16, #tpu.memory_space<vmem>>, vector<3456x128xbf16>
    %cst = arith.constant dense<0.000000e+00> : vector<32x128xf32>
    %2 = tpu.matmul %0, %1, %cst {dimension_numbers = #tpu.dot_dimension_numbers<[1], [0], [0], [1], [0, 0, 1, 1], [], []>} : vector<32x3456xbf16>, vector<3456x128xbf16>, vector<32x128xf32> -> vector<32x128xf32>
    %c0_3 = arith.constant 0 : index
    %c0_4 = arith.constant 0 : index
    %3 = vector.load %arg4[%c0_3, %c0_4] : memref<1x128xf32, #tpu.memory_space<vmem>>, vector<1x128xf32>
    %4 = vector.broadcast %3 : vector<1x128xf32> to vector<32x128xf32>
    %5 = arith.addf %2, %4 : vector<32x128xf32>
    %cst_5 = arith.constant 0.000000e+00 : f32
    %6 = vector.broadcast %cst_5 : f32 to vector<32x128xf32>
    %7 = arith.maximumf %5, %6 : vector<32x128xf32>
    %8 = arith.truncf %7 : vector<32x128xf32> to vector<32x128xbf16>
    %c0_6 = arith.constant 0 : index
    %c0_7 = arith.constant 0 : index
    %9 = vector.load %arg5[%c0_6, %c0_7] : memref<32x128xbf16, #tpu.memory_space<vmem>>, vector<32x128xbf16>
    tpu.vector_store %arg5[%c0_6, %c0_7], %8 {strides = array<i32>} : memref<32x128xbf16, #tpu.memory_space<vmem>>, vector<32x128xbf16>,
    return
  }
  func.func @transform_0(%arg0: i32, %arg1: i32) -> (i32, i32) {
    %c0_i32 = arith.constant 0 : i32
    %c0_i32_0 = arith.constant 0 : i32
    return %arg1, %c0_i32 : i32, i32
  }
  func.func @transform_1(%arg0: i32, %arg1: i32) -> (i32, i32) {
    %c0_i32 = arith.constant 0 : i32
    %c0_i32_0 = arith.constant 0 : i32
    return %c0_i32, %arg0 : i32, i32
  }
  func.func @transform_2(%arg0: i32, %arg1: i32) -> (i32, i32) {
    %c0_i32 = arith.constant 0 : i32
    %c0_i32_0 = arith.constant 0 : i32
    return %c0_i32, %arg0 : i32, i32
  }
  func.func @transform_3(%arg0: i32, %arg1: i32) -> (i32, i32) {
    %c0_i32 = arith.constant 0 : i32
    return %arg1, %arg0 : i32, i32
  }
}

module attributes {stable_mosaic.version = 11 : i64} {
  func.func @_conv_gemm_kernel(%arg0: i32, %arg1: i32, %arg2: memref<32x2304xbf16, #tpu.memory_space<vmem>>, %arg3: memref<2304x128xbf16, #tpu.memory_space<vmem>>, %arg4: memref<1x128xf32, #tpu.memory_space<vmem>>, %arg5: memref<32x128xbf16, #tpu.memory_space<vmem>>) attributes {dimension_semantics = [#tpu.dimension_semantics<parallel>, #tpu.dimension_semantics<parallel>], iteration_bounds = array<i64: 2, 1>, scalar_prefetch = 0 : i64, scratch_operands = 0 : i64, tpu.core_type = #tpu.core_type<tc>, window_params = [{transform_indices = @transform_0, window_bounds = array<i64: 32, 2304>}, {transform_indices = @transform_1, window_bounds = array<i64: 2304, 128>}, {transform_indices = @transform_2, window_bounds = array<i64: 1, 128>}, {transform_indices = @transform_3, window_bounds = array<i64: 32, 128>}]} {
    %c0 = arith.constant 0 : index
    %c0_0 = arith.constant 0 : index
    %0 = vector.load %arg2[%c0, %c0_0] : memref<32x2304xbf16, #tpu.memory_space<vmem>>, vector<32x2304xbf16>
    %c0_1 = arith.constant 0 : index
    %c0_2 = arith.constant 0 : index
    %1 = vector.load %arg3[%c0_1, %c0_2] : memref<2304x128xbf16, #tpu.memory_space<vmem>>, vector<2304x128xbf16>
    %cst = arith.constant dense<0.000000e+00> : vector<32x128xf32>
    %2 = tpu.matmul %0, %1, %cst {dimension_numbers = #tpu.dot_dimension_numbers<[1], [0], [0], [1], [0, 0, 1, 1], [], []>} : vector<32x2304xbf16>, vector<2304x128xbf16>, vector<32x128xf32> -> vector<32x128xf32>
    %c0_3 = arith.constant 0 : index
    %c0_4 = arith.constant 0 : index
    %3 = vector.load %arg4[%c0_3, %c0_4] : memref<1x128xf32, #tpu.memory_space<vmem>>, vector<1x128xf32>
    %4 = vector.broadcast %3 : vector<1x128xf32> to vector<32x128xf32>
    %5 = arith.addf %2, %4 : vector<32x128xf32>
    %cst_5 = arith.constant 0.000000e+00 : f32
    %6 = vector.broadcast %cst_5 : f32 to vector<32x128xf32>
    %7 = arith.maximumf %5, %6 : vector<32x128xf32>
    %8 = arith.truncf %7 : vector<32x128xf32> to vector<32x128xbf16>
    %c0_6 = arith.constant 0 : index
    %c0_7 = arith.constant 0 : index
    %9 = vector.load %arg5[%c0_6, %c0_7] : memref<32x128xbf16, #tpu.memory_space<vmem>>, vector<32x128xbf16>
    tpu.vector_store %arg5[%c0_6, %c0_7], %8 {strides = array<i32>} : memref<32x128xbf16, #tpu.memory_space<vmem>>, vector<32x128xbf16>,
    return
  }
  func.func @transform_0(%arg0: i32, %arg1: i32) -> (i32, i32) {
    %c0_i32 = arith.constant 0 : i32
    %c0_i32_0 = arith.constant 0 : i32
    return %arg1, %c0_i32 : i32, i32
  }
  func.func @transform_1(%arg0: i32, %arg1: i32) -> (i32, i32) {
    %c0_i32 = arith.constant 0 : i32
    %c0_i32_0 = arith.constant 0 : i32
    return %c0_i32, %arg0 : i32, i32
  }
  func.func @transform_2(%arg0: i32, %arg1: i32) -> (i32, i32) {
    %c0_i32 = arith.constant 0 : i32
    %c0_i32_0 = arith.constant 0 : i32
    return %c0_i32, %arg0 : i32, i32
  }
  func.func @transform_3(%arg0: i32, %arg1: i32) -> (i32, i32) {
    %c0_i32 = arith.constant 0 : i32
    return %arg1, %arg0 : i32, i32
  }
}

</mosaic_0001>

<bundles_post_ra>
// kernel: depth_cnn_forward.5
= control target key start
LH: loop header
LB: loop body
LE: loop exit
PB: predicated region body
PF: predicated region fallthrough
CT: control target
= control target key end

     0   :  { %s1966_s12 = smov 0   ;;  %s1968_s13 = smov 0   ;;  %s2210_s0 = inlined_call_operand.vmem [shape: bf16[512,384], index: 0, kind: input, shape index: {}]   ;;  %s2211_s1 = inlined_call_operand.vmem [shape: bf16[384,128], index: 1, kind: input, shape index: {}]   ;;  %s2212_s2 = inlined_call_operand.vmem [shape: f32[1,128], index: 2, kind: input, shape index: {}]   ;;  %s2213_s3 = inlined_call_operand.vmem [shape: bf16[512,128], index: 3, kind: output, shape index: {}]  }
   0x1   :  { %s1970_s14 = smov 0  }
   0x2 LB: > { %s22_s15 = sadd.s32 1, %s1940_s13  ;;  %p1370_p0 = scmp.ge.s32.totalorder %s1944_s14, 1  ;;  %s1944_s14 = sphi %s1970_s14, %s13_s14   ;;  %s1940_s13 = sphi %s1968_s13, %s2215_s13   ;;  %s1936_s12 = sphi %s1966_s12, %s2214_s12  }
   0x3   : > { %p23_p1 = scmp.ge.s32.totalorder %s22_s15, 2  ;;  %p170_p2 = scmp.lt.s32.totalorder %s1944_s14, 3 }
   0x5   : > { %s2217_s15 = smov (%p23_p1, %s22_s15), 0  ;;  %p171_p3 = pnand %p1370_p0, %p170_p2 }
   0x6   : > { %v1834_v0 = vld [vmem:[%s2211_s1 + $0x40] sm:$0xff] (!%p171_p3)   ;;  %s1371_s18 = sshll.u32 (!%p171_p3), %s1936_s12, 5  ;;  %v1836_v2 = vld [vmem:[%s2211_s1 + $0x48] sm:$0xff] (!%p171_p3)   ;;  %v1838_v4 = vld [vmem:[%s2211_s1 + $0x50] sm:$0xff] (!%p171_p3)  }
   0x7   : > { %174 = sbr.rel (%p171_p3) target bundleno = 353 (0x161), region = 32  ;;  %v1835_v1 = vld [vmem:[%s2211_s1] sm:$0xff] (!%p171_p3)   ;;  %1609 = vmatprep.subr.bf16.mxu0 (!%p171_p3), %v1834_v0  ;;  %1793 = vmatprep.subr.bf16.mxu1 (!%p171_p3), %v1834_v0  ;;  %p206_p4 = scmp.lt.s32.totalorder (!%p171_p3), %s1371_s18, 63  ;;  %v1837_v3 = vld [vmem:[%s2211_s1 + $0x8] sm:$0xff] (!%p171_p3)   ;;  %v1839_v5 = vld [vmem:[%s2211_s1 + $0x10] sm:$0xff] (!%p171_p3)  }
   0x8   : > { %1610 = vmatpush3.bf16.msra.mxu0 (!%p171_p3), %v1835_v1  ;;  %1801 = vmatpush3.bf16.msra.mxu1 (!%p171_p3), %v1835_v1  ;;  %v1840_v6 = vld [vmem:[%s2211_s1 + $0x58] sm:$0xff] (!%p171_p3)   ;;  %v1842_v8 = vld [vmem:[%s2211_s1 + $0x60] sm:$0xff] (!%p171_p3)   ;;  %v1844_v10 = vld [vmem:[%s2211_s1 + $0x68] sm:$0xff] (!%p171_p3)  }
   0x9   : > { %1611 = vmatprep.subr.bf16.mxu0 (!%p171_p3), %v1836_v2  ;;  %1794 = vmatprep.subr.bf16.mxu1 (!%p171_p3), %v1836_v2  ;;  %v1841_v7 = vld [vmem:[%s2211_s1 + $0x18] sm:$0xff] (!%p171_p3)   ;;  %v1843_v9 = vld [vmem:[%s2211_s1 + $0x20] sm:$0xff] (!%p171_p3)   ;;  %v1845_v13 = vld [vmem:[%s2211_s1 + $0x28] sm:$0xff] (!%p171_p3)  }
   0xa   : > { %v1846_v14 = vld [vmem:[%s2211_s1 + $0x70] sm:$0xff] (!%p171_p3)   ;;  %v1848_v16 = vld [vmem:[%s2211_s1 + $0x78] sm:$0xff] (!%p171_p3)   ;;  %v1856_v18 = vld [vmem:[%s2211_s1 + $0x80] sm:$0xff] (!%p171_p3)  }
   0xb   : > { %v1847_v15 = vld [vmem:[%s2211_s1 + $0x30] sm:$0xff] (!%p171_p3)   ;;  %v1849_v17 = vld [vmem:[%s2211_s1 + $0x38] sm:$0xff] (!%p171_p3)   ;;  %v1857_v22 = vld [vmem:[%s2211_s1 + $0x88] sm:$0xff] (!%p171_p3)  }
   0xc   : > { %1612 = vmatpush3.bf16.msra.mxu0 (!%p171_p3), %v1837_v3  ;;  %1802 = vmatpush3.bf16.msra.mxu1 (!%p171_p3), %v1837_v3  ;;  %v1864_v25 = vld [vmem:[%s2211_s1 + $0x90] sm:$0xff] (!%p171_p3)   ;;  %v1865_v27 = vld [vmem:[%s2211_s1 + $0x98] sm:$0xff] (!%p171_p3)   ;;  %v1872_v30 = vld [vmem:[%s2211_s1 + $0xa0] sm:$0xff] (!%p171_p3)  }
   0xd   : > { %1613 = vmatprep.subr.bf16.mxu0 (!%p171_p3), %v1838_v4  ;;  %1795 = vmatprep.subr.bf16.mxu1 (!%p171_p3), %v1838_v4  ;;  %v1873_v33 = vld [vmem:[%s2211_s1 + $0xa8] sm:$0xff] (!%p171_p3)   ;;  %v1880_v36 = vld [vmem:[%s2211_s1 + $0xb0] sm:$0xff] (!%p171_p3)   ;;  %v1881_v40 = vld [vmem:[%s2211_s1 + $0xb8] sm:$0xff] (!%p171_p3)  }
   0xe   : > { %s2219_s18 = smov (!%p206_p4, %s1371_s18), 63 }
   0xf   : > { %s1809_s4 = smul.u32 12, %s2219_s18  ;;  %s1374_s25 = sshll.u32 %s2219_s18, 2 }
  0x10   : > { %1614 = vmatpush3.bf16.msra.mxu0 %v1839_v5  ;;  %1803 = vmatpush3.bf16.msra.mxu1 %v1839_v5  ;;  %s2141_s28 = scalar_lea.vmem %s2213_s3, %s1374_s25 }
  0x11   : > { %1615 = vmatprep.subr.bf16.mxu0 %v1840_v6  ;;  %1796 = vmatprep.subr.bf16.mxu1 %v1840_v6  ;;  %s2017_s11 = scalar_lea.vmem %s2210_s0, %s1809_s4 }
  0x12   : > { %v1852_v11 = vld [vmem:[%s2017_s11 + $0x4] ss:$12 sps:$4 sm:$0xff]   ;;  %v1850_v19 = vld [vmem:[%s2017_s11] ss:$12 sps:$4 sm:$0xff]   ;;  %v1858_v21 = vld [vmem:[%s2017_s11 + $0x1c] ss:$12 sps:$4 sm:$0xff]  }
  0x13   : > { %v1855_v12 = vld [vmem:[%s2017_s11 + $0x124] ss:$12 sps:$4 sm:$0xff]   ;;  %780 = vmatprep.mubr.bf16.mxu0 %v1852_v11  ;;  %v1853_v20 = vld [vmem:[%s2017_s11 + $0x120] ss:$12 sps:$4 sm:$0xff]   ;;  %v1860_v23 = vld [vmem:[%s2017_s11 + $0x13c] ss:$12 sps:$4 sm:$0xff]  }
  0x14   : > { %1616 = vmatpush3.bf16.msra.mxu0 %v1841_v7  ;;  %1804 = vmatpush3.bf16.msra.mxu1 %v1841_v7  ;;  %v1862_v24 = vld [vmem:[%s2017_s11 + $0x18] ss:$12 sps:$4 sm:$0xff]   ;;  %v1866_v28 = vld [vmem:[%s2017_s11 + $0x34] ss:$12 sps:$4 sm:$0xff]   ;;  %v1870_v31 = vld [vmem:[%s2017_s11 + $0x30] ss:$12 sps:$4 sm:$0xff]  }
  0x15   : > { %1617 = vmatprep.subr.bf16.mxu0 %v1842_v8  ;;  %1797 = vmatprep.subr.bf16.mxu1 %v1842_v8  ;;  %v1863_v26 = vld [vmem:[%s2017_s11 + $0x138] ss:$12 sps:$4 sm:$0xff]   ;;  %v1868_v29 = vld [vmem:[%s2017_s11 + $0x154] ss:$12 sps:$4 sm:$0xff]   ;;  %v1871_v32 = vld [vmem:[%s2017_s11 + $0x150] ss:$12 sps:$4 sm:$0xff]  }
  0x16   : > { %876 = vmatprep.mubr.bf16.mxu1 %v1855_v12  ;;  %v1874_v34 = vld [vmem:[%s2017_s11 + $0x4c] ss:$12 sps:$4 sm:$0xff]   ;;  %v1878_v37 = vld [vmem:[%s2017_s11 + $0x48] ss:$12 sps:$4 sm:$0xff]   ;;  %v1882_v39 = vld [vmem:[%s2017_s11 + $0x64] ss:$12 sps:$4 sm:$0xff]  }
  0x17   : > { %v1876_v35 = vld [vmem:[%s2017_s11 + $0x16c] ss:$12 sps:$4 sm:$0xff]   ;;  %v1879_v38 = vld [vmem:[%s2017_s11 + $0x168] ss:$12 sps:$4 sm:$0xff]   ;;  %v1891_v47 = vld [vmem:[%s2017_s11 + $0x50] ss:$12 sps:$4 sm:$0xff]  }
  0x18   : > { %1618 = vmatpush3.bf16.msra.mxu0 %v1843_v9  ;;  %1805 = vmatpush3.bf16.msra.mxu1 %v1843_v9  ;;  %v1884_v41 = vld [vmem:[%s2017_s11 + $0x8] ss:$12 sps:$4 sm:$0xff]   ;;  %v1885_v42 = vld [vmem:[%s2017_s11 + $0x60] ss:$12 sps:$4 sm:$0xff]   ;;  %v1889_v45 = vld [vmem:[%s2017_s11 + $0x38] ss:$12 sps:$4 sm:$0xff]  }
  0x19   : > { %1619 = vmatprep.subr.bf16.mxu0 %v1844_v10  ;;  %1798 = vmatprep.subr.bf16.mxu1 %v1844_v10  ;;  %v1886_v43 = vld [vmem:[%s2017_s11 + $0x20] ss:$12 sps:$4 sm:$0xff]   ;;  %v1887_v44 = vld [vmem:[%s2017_s11 + $0x7c] ss:$12 sps:$4 sm:$0xff]   ;;  %v1890_v46 = vld [vmem:[%s2017_s11 + $0x78] ss:$12 sps:$4 sm:$0xff]  }
  0x1a   : > { %v1892_v48 = vld [vmem:[%s2017_s11 + $0x94] ss:$12 sps:$4 sm:$0xff]   ;;  %v1895_v50 = vld [vmem:[%s2017_s11 + $0x90] ss:$12 sps:$4 sm:$0xff]   ;;  %v1897_v52 = vld [vmem:[%s2017_s11 + $0xac] ss:$12 sps:$4 sm:$0xff]  }
  0x1b   : > { %v1894_v49 = vld [vmem:[%s2017_s11 + $0x68] ss:$12 sps:$4 sm:$0xff]   ;;  %v1896_v51 = vld [vmem:[%s2017_s11 + $0x80] ss:$12 sps:$4 sm:$0xff]   ;;  %v1899_v53 = vld [vmem:[%s2017_s11 + $0x98] ss:$12 sps:$4 sm:$0xff]  }
  0x1c   : > { %1620 = vmatpush3.bf16.msra.mxu0 %v1845_v13  ;;  %1806 = vmatpush3.bf16.msra.mxu1 %v1845_v13  ;;  %v1900_v54 = vld [vmem:[%s2017_s11 + $0xa8] ss:$12 sps:$4 sm:$0xff]   ;;  %v1901_v55 = vld [vmem:[%s2017_s11 + $0xb0] ss:$12 sps:$4 sm:$0xff]   ;;  %v1905_v58 = vld [vmem:[%s2017_s11 + $0xc0] ss:$12 sps:$4 sm:$0xff]  }
  0x1d   : > { %1621 = vmatprep.subr.bf16.mxu0 %v1846_v14  ;;  %1799 = vmatprep.subr.bf16.mxu1 %v1846_v14  ;;  %v1902_v56 = vld [vmem:[%s2017_s11 + $0xc4] ss:$12 sps:$4 sm:$0xff]   ;;  %v1904_v57 = vld [vmem:[%s2017_s11 + $0xc8] ss:$12 sps:$4 sm:$0xff]   ;;  %v1906_v59 = vld [vmem:[%s2017_s11 + $0xe0] ss:$12 sps:$4 sm:$0xff]  }
  0x1e   : > { %v1907_v60 = vld [vmem:[%s2017_s11 + $0xdc] ss:$12 sps:$4 sm:$0xff]   ;;  %v1909_v61 = vld [vmem:[%s2017_s11 + $0xf8] ss:$12 sps:$4 sm:$0xff]   ;;  %v1912_v0 = vld [vmem:[%s2017_s11 + $0xf4] ss:$12 sps:$4 sm:$0xff]  }
  0x1f   : > { %v1910_v62 = vld [vmem:[%s2017_s11 + $0xd8] ss:$12 sps:$4 sm:$0xff]   ;;  %v1911_v63 = vld [vmem:[%s2017_s11 + $0x110] ss:$12 sps:$4 sm:$0xff]   ;;  %v1914_v1 = vld [vmem:[%s2017_s11 + $0x128] ss:$12 sps:$4 sm:$0xff]  }
  0x20   : > { %1622 = vmatpush3.bf16.msra.mxu0 %v1847_v15  ;;  %1807 = vmatpush3.bf16.msra.mxu1 %v1847_v15  ;;  %v1915_v2 = vld [vmem:[%s2017_s11 + $0xf0] ss:$12 sps:$4 sm:$0xff]   ;;  %v1916_v3 = vld [vmem:[%s2017_s11 + $0x140] ss:$12 sps:$4 sm:$0xff]   ;;  %v1919_v5 = vld [vmem:[%s2017_s11 + $0x158] ss:$12 sps:$4 sm:$0xff]  }
  0x21   : > { %1623 = vmatprep.subr.bf16.mxu0 %v1848_v16  ;;  %1800 = vmatprep.subr.bf16.mxu1 %v1848_v16  ;;  %v1917_v4 = vld [vmem:[%s2017_s11 + $0x10c] ss:$12 sps:$4 sm:$0xff]   ;;  %v1920_v6 = vld [vmem:[%s2017_s11 + $0x108] ss:$12 sps:$4 sm:$0xff]   ;;  %v1921_v7 = vld [vmem:[%s2017_s11 + $0x170] ss:$12 sps:$4 sm:$0xff]  }
  0x24   : > { %1624 = vmatpush3.bf16.msra.mxu0 %v1849_v17  ;;  %1808 = vmatpush3.bf16.msra.mxu1 %v1849_v17 }
  0x25   : > { %1745 = vmatprep.subr.bf16.mxu1 %v1856_v18 }
  0x27   : > { %781 = vmatmul.mubr.bf16.vlgmr.msra.gmra.mrb[0].mxu0 %v1850_v19  ;;  %877 = vmatmul.mubr.bf16.vlgmr.msra.gmra.mrb[0].mxu1 %v1853_v20 }
  0x28   : > { %1746 = vmatpush3.bf16.msra.mxu1 %v1856_v18  ;;  %788 = vmatprep.mubr.bf16.mxu0 %v1858_v21 }
  0x29   : > { %1747 = vmatprep.subr.bf16.mxu1 %v1857_v22  ;;  %884 = vmatprep.mubr.bf16.mxu1 %v1860_v23 }
  0x2c   : > { %1748 = vmatpush3.bf16.msra.mxu1 %v1857_v22 }
  0x2d   : > { %1749 = vmatprep.subr.bf16.mxu1 %v1864_v25 }
  0x2f   : > { %789 = vmatmul.mubr.bf16.gmra.mrb[4].mxu0 %v1862_v24  ;;  %885 = vmatmul.mubr.bf16.gmra.mrb[4].mxu1 %v1863_v26 }
  0x30   : > { %1750 = vmatpush3.bf16.msra.mxu1 %v1864_v25  ;;  %796 = vmatprep.mubr.bf16.mxu0 %v1866_v28 }
  0x31   : > { %1751 = vmatprep.subr.bf16.mxu1 %v1865_v27  ;;  %892 = vmatprep.mubr.bf16.mxu1 %v1868_v29 }
  0x34   : > { %1752 = vmatpush3.bf16.msra.mxu1 %v1865_v27 }
  0x35   : > { %1753 = vmatprep.subr.bf16.mxu1 %v1872_v30 }
  0x37   : > { %797 = vmatmul.mubr.bf16.gmra.mrb[8].mxu0 %v1870_v31  ;;  %893 = vmatmul.mubr.bf16.gmra.mrb[8].mxu1 %v1871_v32 }
  0x38   : > { %1754 = vmatpush3.bf16.msra.mxu1 %v1872_v30  ;;  %804 = vmatprep.mubr.bf16.mxu0 %v1874_v34 }
  0x39   : > { %1755 = vmatprep.subr.bf16.mxu1 %v1873_v33  ;;  %900 = vmatprep.mubr.bf16.mxu1 %v1876_v35 }
  0x3c   : > { %1756 = vmatpush3.bf16.msra.mxu1 %v1873_v33 }
  0x3d   : > { %1757 = vmatprep.subr.bf16.mxu1 %v1880_v36 }
  0x3f   : > { %805 = vmatmul.mubr.bf16.gmra.mrb[12].mxu0 %v1878_v37  ;;  %901 = vmatmul.mubr.bf16.gmra.mrb[12].mxu1 %v1879_v38 }
  0x40   : > { %1758 = vmatpush3.bf16.msra.mxu1 %v1880_v36  ;;  %812 = vmatprep.mubr.bf16.mxu0 %v1882_v39 }
  0x41   : > { %1759 = vmatprep.subr.bf16.mxu1 %v1881_v40  ;;  %1761 = vmatprep.mubr.bf16.mxu1 %v1884_v41 }
  0x44   : > { %1760 = vmatpush3.bf16.msra.mxu1 %v1881_v40 }
  0x47   : > { %813 = vmatmul.mubr.bf16.gmra.mrb[16].mxu0 %v1885_v42  ;;  %1762 = vmatmul.mubr.bf16.vlgmr.msra.gmra.mrb[16].mxu1 %v1886_v43 }
  0x48   : > { %820 = vmatprep.mubr.bf16.mxu0 %v1887_v44  ;;  %1765 = vmatprep.mubr.bf16.mxu1 %v1889_v45 }
  0x4f   : > { %821 = vmatmul.mubr.bf16.gmra.mrb[20].mxu0 %v1890_v46  ;;  %1766 = vmatmul.mubr.bf16.gmra.mrb[20].mxu1 %v1891_v47 }
  0x50   : > { %828 = vmatprep.mubr.bf16.mxu0 %v1892_v48  ;;  %1769 = vmatprep.mubr.bf16.mxu1 %v1894_v49 }
  0x57   : > { %829 = vmatmul.mubr.bf16.gmra.mrb[24].mxu0 %v1895_v50  ;;  %1770 = vmatmul.mubr.bf16.gmra.mrb[24].mxu1 %v1896_v51 }
  0x58   : > { %836 = vmatprep.mubr.bf16.mxu0 %v1897_v52  ;;  %1773 = vmatprep.mubr.bf16.mxu1 %v1899_v53 }
  0x5f   : > { %837 = vmatmul.mubr.bf16.gmra.mrb[28].mxu0 %v1900_v54  ;;  %1774 = vmatmul.mubr.bf16.gmra.mrb[28].mxu1 %v1901_v55 }
  0x60   : > { %844 = vmatprep.mubr.bf16.mxu0 %v1902_v56  ;;  %1777 = vmatprep.mubr.bf16.mxu1 %v1904_v57  ;;  %v2131_v56 = vld [vmem:[%s2212_s2] ss:$0 sm:$0xff] }
  0x67   : > { %845 = vmatmul.mubr.bf16.gmra.mrb[32].mxu0 %v1905_v58  ;;  %1778 = vmatmul.mubr.bf16.gmra.mrb[32].mxu1 %v1906_v59 }
  0x68   : > { %852 = vmatprep.mubr.bf16.mxu0 %v1907_v60  ;;  %1781 = vmatprep.mubr.bf16.mxu1 %v1909_v61 }
  0x6f   : > { %853 = vmatmul.mubr.bf16.gmra.mrb[36].mxu0 %v1910_v62  ;;  %1782 = vmatmul.mubr.bf16.gmra.mrb[36].mxu1 %v1911_v63 }
  0x70   : > { %860 = vmatprep.mubr.bf16.mxu0 %v1912_v0  ;;  %1785 = vmatprep.mubr.bf16.mxu1 %v1914_v1 }
  0x77   : > { %861 = vmatmul.mubr.bf16.gmra.mrb[40].mxu0 %v1915_v2  ;;  %1786 = vmatmul.mubr.bf16.gmra.mrb[40].mxu1 %v1916_v3 }
  0x78   : > { %868 = vmatprep.mubr.bf16.mxu0 %v1917_v4  ;;  %1789 = vmatprep.mubr.bf16.mxu1 %v1919_v5 }
  0x7f   : > { %869 = vmatmul.mubr.bf16.gmra.mrb[44].mxu0 %v1920_v6  ;;  %1790 = vmatmul.mubr.bf16.gmra.mrb[44].mxu1 %v1921_v7 }
  0xfa   : > { %v1625_v8 = vpop.f32.mrb[0].mxu0  ;;  %v1697_v9 = vpop.f32.mrb[0].mxu1 }
  0xfb   : > { %v1626_v10 = vpop.f32.mrb[1].mxu0  ;;  %v1698_v11 = vpop.f32.mrb[1].mxu1 }
  0xfc   : > { %v1627_v12 = vadd.f32 %v1626_v10, %v1625_v8  ;;  %v1628_v13 = vpop.f32.mrb[2].mxu0  ;;  %v2112_v14 = vadd.f32 %v1698_v11, %v1697_v9  ;;  %v1700_v15 = vpop.f32.mrb[2].mxu1 }
  0xfd   : > { %v1629_v16 = vpop.f32.mrb[3].mxu0  ;;  %v1701_v17 = vpop.f32.mrb[3].mxu1 }
  0xfe   : > { %v1630_v18 = vadd.f32 %v1629_v16, %v1628_v13  ;;  %v2114_v19 = vadd.f32 %v1701_v17, %v1700_v15  ;;  %v783_v60 = vadd.f32 %v1627_v12, %v2131_v56 }
 0x100   : > { %v786_v5 = vadd.f32 %v1630_v18, %v2131_v56 }
 0x102   : > { %v1631_v20 = vpop.f32.mrb[4].mxu0  ;;  %v1703_v21 = vpop.f32.mrb[4].mxu1 }
 0x103   : > { %v1632_v22 = vpop.f32.mrb[5].mxu0  ;;  %v1704_v23 = vpop.f32.mrb[5].mxu1 }
 0x104   : > { %v1633_v24 = vadd.f32 %v1632_v22, %v1631_v20  ;;  %v1634_v25 = vpop.f32.mrb[6].mxu0  ;;  %v2116_v26 = vadd.f32 %v1704_v23, %v1703_v21  ;;  %v1706_v27 = vpop.f32.mrb[6].mxu1 }
 0x105   : > { %v1635_v28 = vpop.f32.mrb[7].mxu0  ;;  %v1707_v29 = vpop.f32.mrb[7].mxu1 }
 0x106   : > { %v1636_v30 = vadd.f32 %v1635_v28, %v1634_v25  ;;  %v2118_v31 = vadd.f32 %v1707_v29, %v1706_v27  ;;  %v791_v57 = vadd.f32 %v1633_v24, %v2131_v56 }
 0x108   : > { %v794_v0 = vadd.f32 %v1636_v30, %v2131_v56 }
 0x10a   : > { %v1637_v32 = vpop.f32.mrb[8].mxu0  ;;  %v1709_v33 = vpop.f32.mrb[8].mxu1 }
 0x10b   : > { %v1638_v34 = vpop.f32.mrb[9].mxu0  ;;  %v1710_v35 = vpop.f32.mrb[9].mxu1 }
 0x10c   : > { %v1639_v36 = vadd.f32 %v1638_v34, %v1637_v32  ;;  %v1640_v37 = vpop.f32.mrb[10].mxu0  ;;  %v2120_v38 = vadd.f32 %v1710_v35, %v1709_v33  ;;  %v1712_v39 = vpop.f32.mrb[10].mxu1 }
 0x10d   : > { %v1641_v40 = vpop.f32.mrb[11].mxu0  ;;  %v1713_v41 = vpop.f32.mrb[11].mxu1 }
 0x10e   : > { %v1642_v42 = vadd.f32 %v1641_v40, %v1640_v37  ;;  %v2122_v43 = vadd.f32 %v1713_v41, %v1712_v39  ;;  %v799_v22 = vadd.f32 %v1639_v36, %v2131_v56 }
 0x110   : > { %v802_v33 = vadd.f32 %v1642_v42, %v2131_v56 }
 0x112   : > { %v1643_v44 = vpop.f32.mrb[12].mxu0  ;;  %v1715_v45 = vpop.f32.mrb[12].mxu1 }
 0x113   : > { %v1644_v46 = vpop.f32.mrb[13].mxu0  ;;  %v1716_v47 = vpop.f32.mrb[13].mxu1 }
 0x114   : > { %v1645_v48 = vadd.f32 %v1644_v46, %v1643_v44  ;;  %v1646_v49 = vpop.f32.mrb[14].mxu0  ;;  %v2124_v50 = vadd.f32 %v1716_v47, %v1715_v45  ;;  %v1718_v51 = vpop.f32.mrb[14].mxu1 }
 0x115   : > { %v1647_v52 = vpop.f32.mrb[15].mxu0  ;;  %v1719_v53 = vpop.f32.mrb[15].mxu1 }
 0x116   : > { %v1648_v54 = vadd.f32 %v1647_v52, %v1646_v49  ;;  %v2126_v55 = vadd.f32 %v1719_v53, %v1718_v51  ;;  %v807_v17 = vadd.f32 %v1645_v48, %v2131_v56 }
 0x118   : > { %v810_v27 = vadd.f32 %v1648_v54, %v2131_v56 }
 0x11a   : > { %v1649_v58 = vpop.f32.mrb[16].mxu0  ;;  %v1763_v59 = vpop.f32.mrb[16].mxu1 }
 0x11b   : > { %v952_v61 = vadd.f32 %v1763_v59, %v791_v57  ;;  %v1650_v62 = vpop.f32.mrb[17].mxu0  ;;  %v943_v63 = vpop.f32.mrb[17].mxu1 }
 0x11c   : > { %v1651_v1 = vadd.f32 %v1650_v62, %v1649_v58  ;;  %v944_v2 = vadd.f32 %v943_v63, %v783_v60  ;;  %v1652_v3 = vpop.f32.mrb[18].mxu0  ;;  %v1764_v4 = vpop.f32.mrb[18].mxu1 }
 0x11d   : > { %v955_v6 = vadd.f32 %v1764_v4, %v794_v0  ;;  %v1653_v7 = vpop.f32.mrb[19].mxu0  ;;  %v946_v8 = vpop.f32.mrb[19].mxu1  ;;  %v1072_v11 = vmax.f32 %v952_v61, 0.0 }
 0x11e   : > { %v1654_v9 = vadd.f32 %v1653_v7, %v1652_v3  ;;  %v947_v10 = vadd.f32 %v946_v8, %v786_v5  ;;  %v1070_v12 = vmax.f32 %v944_v2, 0.0  ;;  %v815_v52 = vadd.f32 %v1651_v1, %v2131_v56 }
 0x11f   : > { %v1073_v13 = vmax.f32 %v955_v6, 0.0 }
 0x120   : > { %v1071_v15 = vmax.f32 %v947_v10, 0.0  ;;  %v818_v62 = vadd.f32 %v1654_v9, %v2131_v56 }
 0x121   : > { %v1522_v16 = vpack.c.bf16 %v1073_v13, %v1072_v11 }
 0x122   : > { %v1517_v18 = vpack.c.bf16 %v1071_v15, %v1070_v12  ;;  %v1655_v20 = vpop.f32.mrb[20].mxu0  ;;  %v1767_v21 = vpop.f32.mrb[20].mxu1 }
 0x123   : > { %1594 = vst [vmem:[%s2141_s28 + $0x8] sm:$0xff] %v1522_v16   ;;  %v968_v23 = vadd.f32 %v1767_v21, %v807_v17  ;;  %v1656_v24 = vpop.f32.mrb[21].mxu0  ;;  %v959_v25 = vpop.f32.mrb[21].mxu1 }
 0x124   : > { %1518 = vst [vmem:[%s2141_s28] sm:$0xff] %v1517_v18   ;;  %v1657_v28 = vadd.f32 %v1656_v24, %v1655_v20  ;;  %v960_v29 = vadd.f32 %v959_v25, %v799_v22  ;;  %v1658_v30 = vpop.f32.mrb[22].mxu0  ;;  %v1768_v32 = vpop.f32.mrb[22].mxu1 }
 0x125   : > { %v971_v34 = vadd.f32 %v1768_v32, %v810_v27  ;;  %v1659_v35 = vpop.f32.mrb[23].mxu0  ;;  %v962_v37 = vpop.f32.mrb[23].mxu1  ;;  %v1076_v36 = vmax.f32 %v968_v23, 0.0 }
 0x126   : > { %v1660_v39 = vadd.f32 %v1659_v35, %v1658_v30  ;;  %v963_v40 = vadd.f32 %v962_v37, %v802_v33  ;;  %v1074_v44 = vmax.f32 %v960_v29, 0.0  ;;  %v823_v47 = vadd.f32 %v1657_v28, %v2131_v56 }
 0x127   : > { %v1077_v41 = vmax.f32 %v971_v34, 0.0 }
 0x128   : > { %v1075_v45 = vmax.f32 %v963_v40, 0.0  ;;  %v826_v57 = vadd.f32 %v1660_v39, %v2131_v56 }
 0x129   : > { %v1532_v46 = vpack.c.bf16 %v1077_v41, %v1076_v36 }
 0x12a   : > { %v1527_v48 = vpack.c.bf16 %v1075_v45, %v1074_v44  ;;  %v1661_v49 = vpop.f32.mrb[24].mxu0  ;;  %v1771_v51 = vpop.f32.mrb[24].mxu1 }
 0x12b   : > { %1596 = vst [vmem:[%s2141_s28 + $0x18] sm:$0xff] %v1532_v46   ;;  %v984_v42 = vadd.f32 %v1771_v51, %v823_v47  ;;  %v1662_v53 = vpop.f32.mrb[25].mxu0  ;;  %v975_v54 = vpop.f32.mrb[25].mxu1 }
 0x12c   : > { %1595 = vst [vmem:[%s2141_s28 + $0x10] sm:$0xff] %v1527_v48   ;;  %v1663_v58 = vadd.f32 %v1662_v53, %v1661_v49  ;;  %v976_v59 = vadd.f32 %v975_v54, %v815_v52  ;;  %v1664_v60 = vpop.f32.mrb[26].mxu0  ;;  %v1772_v61 = vpop.f32.mrb[26].mxu1 }
 0x12d   : > { %v987_v63 = vadd.f32 %v1772_v61, %v826_v57  ;;  %v1665_v0 = vpop.f32.mrb[27].mxu0  ;;  %v978_v2 = vpop.f32.mrb[27].mxu1  ;;  %v1080_v4 = vmax.f32 %v984_v42, 0.0 }
 0x12e   : > { %v1666_v3 = vadd.f32 %v1665_v0, %v1664_v60  ;;  %v979_v1 = vadd.f32 %v978_v2, %v818_v62  ;;  %v1078_v6 = vmax.f32 %v976_v59, 0.0  ;;  %v831_v12 = vadd.f32 %v1663_v58, %v2131_v56 }
 0x12f   : > { %v1081_v5 = vmax.f32 %v987_v63, 0.0 }
 0x130   : > { %v1079_v7 = vmax.f32 %v979_v1, 0.0  ;;  %v834_v21 = vadd.f32 %v1666_v3, %v2131_v56 }
 0x131   : > { %v1542_v8 = vpack.c.bf16 %v1081_v5, %v1080_v4 }
 0x132   : > { %v1537_v10 = vpack.c.bf16 %v1079_v7, %v1078_v6  ;;  %v1667_v11 = vpop.f32.mrb[28].mxu0  ;;  %v1775_v13 = vpop.f32.mrb[28].mxu1 }
 0x133   : > { %1598 = vst [vmem:[%s2141_s28 + $0x28] sm:$0xff] %v1542_v8   ;;  %v1668_v15 = vpop.f32.mrb[29].mxu0  ;;  %v991_v16 = vpop.f32.mrb[29].mxu1 }
 0x134   : > { %1597 = vst [vmem:[%s2141_s28 + $0x20] sm:$0xff] %v1537_v10   ;;  %v1669_v9 = vadd.f32 %v1668_v15, %v1667_v11  ;;  %v992_v17 = vadd.f32 %v991_v16, %v831_v12  ;;  %v1670_v18 = vpop.f32.mrb[30].mxu0  ;;  %v1776_v20 = vpop.f32.mrb[30].mxu1  ;;  %v887_v10 = vadd.f32 %v2116_v26, %v2131_v56  ;;  %v879_v15 = vadd.f32 %v2112_v14, %v2131_v56 }
 0x135   : > { %v1671_v22 = vpop.f32.mrb[31].mxu0  ;;  %v994_v23 = vpop.f32.mrb[31].mxu1 }
 0x136   : > { %v839_v24 = vadd.f32 %v1669_v9, %v2131_v56  ;;  %v1672_v25 = vadd.f32 %v1671_v22, %v1670_v18  ;;  %v995_v27 = vadd.f32 %v994_v23, %v834_v21  ;;  %v1082_v29 = vmax.f32 %v992_v17, 0.0 }
 0x137   : > { %v890_v18 = vadd.f32 %v2118_v31, %v2131_v56 }
 0x138   : > { %v1000_v28 = vadd.f32 %v1775_v13, %v839_v24  ;;  %v842_v30 = vadd.f32 %v1672_v25, %v2131_v56  ;;  %v1083_v32 = vmax.f32 %v995_v27, 0.0 }
 0x13a   : > { %v1003_v33 = vadd.f32 %v1776_v20, %v842_v30  ;;  %v1547_v34 = vpack.c.bf16 %v1083_v32, %v1082_v29  ;;  %v1673_v35 = vpop.f32.mrb[32].mxu0  ;;  %v1779_v37 = vpop.f32.mrb[32].mxu1  ;;  %v1084_v36 = vmax.f32 %v1000_v28, 0.0  ;;  %v882_v28 = vadd.f32 %v2114_v19, %v2131_v56 }
 0x13b   : > { %v1674_v39 = vpop.f32.mrb[33].mxu0  ;;  %v1007_v40 = vpop.f32.mrb[33].mxu1 }
 0x13c   : > { %v1085_v41 = vmax.f32 %v1003_v33, 0.0  ;;  %1599 = vst [vmem:[%s2141_s28 + $0x30] sm:$0xff] %v1547_v34   ;;  %v1675_v44 = vadd.f32 %v1674_v39, %v1673_v35  ;;  %v1676_v45 = vpop.f32.mrb[34].mxu0  ;;  %v1780_v46 = vpop.f32.mrb[34].mxu1 }
 0x13d   : > { %v1677_v47 = vpop.f32.mrb[35].mxu0  ;;  %v1010_v48 = vpop.f32.mrb[35].mxu1 }
 0x13e   : > { %v1552_v49 = vpack.c.bf16 %v1085_v41, %v1084_v36  ;;  %v847_v51 = vadd.f32 %v1675_v44, %v2131_v56  ;;  %v1678_v52 = vadd.f32 %v1677_v47, %v1676_v45  ;;  %v903_v41 = vadd.f32 %v2124_v50, %v2131_v56 }
 0x140   : > { %1600 = vst [vmem:[%s2141_s28 + $0x38] sm:$0xff] %v1552_v49   ;;  %v1008_v42 = vadd.f32 %v1007_v40, %v847_v51  ;;  %v850_v53 = vadd.f32 %v1678_v52, %v2131_v56  ;;  %v906_v52 = vadd.f32 %v2126_v55, %v2131_v56 }
 0x142   : > { %v1011_v54 = vadd.f32 %v1010_v48, %v850_v53  ;;  %v1679_v57 = vpop.f32.mrb[36].mxu0  ;;  %v2165_v58 = vpop.f32.mrb[36].mxu1  ;;  %v1086_v61 = vmax.f32 %v1008_v42, 0.0 }
 0x143   : > { %v1680_v59 = vpop.f32.mrb[37].mxu0  ;;  %v1023_v60 = vpop.f32.mrb[37].mxu1 }
 0x144   : > { %v1087_v62 = vmax.f32 %v1011_v54, 0.0  ;;  %v1681_v63 = vadd.f32 %v1680_v59, %v1679_v57  ;;  %v1682_v0 = vpop.f32.mrb[38].mxu0  ;;  %v2167_v2 = vpop.f32.mrb[38].mxu1 }
 0x145   : > { %v1683_v3 = vpop.f32.mrb[39].mxu0  ;;  %v1026_v1 = vpop.f32.mrb[39].mxu1 }
 0x146   : > { %v1557_v4 = vpack.c.bf16 %v1087_v62, %v1086_v61  ;;  %v855_v5 = vadd.f32 %v1681_v63, %v2131_v56  ;;  %v1684_v6 = vadd.f32 %v1683_v3, %v1682_v0 }
 0x148   : > { %1601 = vst [vmem:[%s2141_s28 + $0x40] sm:$0xff] %v1557_v4   ;;  %v1016_v7 = vadd.f32 %v1779_v37, %v855_v5  ;;  %v858_v8 = vadd.f32 %v1684_v6, %v2131_v56 }
 0x14a   : > { %v1019_v11 = vadd.f32 %v1780_v46, %v858_v8  ;;  %v1685_v13 = vpop.f32.mrb[40].mxu0  ;;  %v1787_v12 = vpop.f32.mrb[40].mxu1  ;;  %v1088_v20 = vmax.f32 %v1016_v7, 0.0  ;;  %v895_v46 = vadd.f32 %v2120_v38, %v2131_v56  ;;  %v898_v38 = vadd.f32 %v2122_v43, %v2131_v56 }
 0x14b   : > { %v1048_v16 = vadd.f32 %v1787_v12, %v887_v10  ;;  %v1686_v9 = vpop.f32.mrb[41].mxu0  ;;  %v1039_v17 = vpop.f32.mrb[41].mxu1 }
 0x14c   : > { %v1089_v21 = vmax.f32 %v1019_v11, 0.0  ;;  %v1687_v22 = vadd.f32 %v1686_v9, %v1685_v13  ;;  %v1040_v23 = vadd.f32 %v1039_v17, %v879_v15  ;;  %v1688_v24 = vpop.f32.mrb[42].mxu0  ;;  %v1788_v25 = vpop.f32.mrb[42].mxu1 }
 0x14d   : > { %v1051_v26 = vadd.f32 %v1788_v25, %v890_v18  ;;  %v1689_v27 = vpop.f32.mrb[43].mxu0  ;;  %v1042_v29 = vpop.f32.mrb[43].mxu1  ;;  %v1096_v33 = vmax.f32 %v1048_v16, 0.0 }
 0x14e   : > { %v1562_v14 = vpack.c.bf16 %v1089_v21, %v1088_v20  ;;  %v863_v30 = vadd.f32 %v1687_v22, %v2131_v56  ;;  %v1690_v32 = vadd.f32 %v1689_v27, %v1688_v24  ;;  %v1043_v34 = vadd.f32 %v1042_v29, %v882_v28 }
 0x14f   : > { %v1097_v31 = vmax.f32 %v1051_v26, 0.0  ;;  %v1094_v39 = vmax.f32 %v1040_v23, 0.0 }
 0x150   : > { %1602 = vst [vmem:[%s2141_s28 + $0x48] sm:$0xff] %v1562_v14   ;;  %v1024_v35 = vadd.f32 %v1023_v60, %v863_v30  ;;  %v866_v37 = vadd.f32 %v1690_v32, %v2131_v56  ;;  %v1095_v36 = vmax.f32 %v1043_v34, 0.0 }
 0x151   : > { %v1582_v40 = vpack.c.bf16 %v1097_v31, %v1096_v33 }
 0x152   : > { %v1027_v19 = vadd.f32 %v1026_v1, %v866_v37  ;;  %v1691_v44 = vpop.f32.mrb[44].mxu0  ;;  %v1791_v45 = vpop.f32.mrb[44].mxu1  ;;  %v1577_v47 = vpack.c.bf16 %v1095_v36, %v1094_v39  ;;  %v1090_v42 = vmax.f32 %v1024_v35, 0.0 }
 0x153   : > { %1606 = vst [vmem:[%s2141_s28 + $0x68] sm:$0xff] %v1582_v40   ;;  %v1064_v48 = vadd.f32 %v1791_v45, %v903_v41  ;;  %v1692_v49 = vpop.f32.mrb[45].mxu0  ;;  %v1055_v51 = vpop.f32.mrb[45].mxu1 }
 0x154   : > { %v1091_v53 = vmax.f32 %v1027_v19, 0.0  ;;  %v1693_v54 = vadd.f32 %v1692_v49, %v1691_v44  ;;  %v1056_v50 = vadd.f32 %v1055_v51, %v895_v46  ;;  %v1694_v57 = vpop.f32.mrb[46].mxu0  ;;  %v1792_v59 = vpop.f32.mrb[46].mxu1  ;;  %1605 = vst [vmem:[%s2141_s28 + $0x60] sm:$0xff] %v1577_v47  }
 0x155   : > { %v1067_v60 = vadd.f32 %v1792_v59, %v906_v52  ;;  %v1695_v61 = vpop.f32.mrb[47].mxu0  ;;  %v1058_v62 = vpop.f32.mrb[47].mxu1  ;;  %v1100_v3 = vmax.f32 %v1064_v48, 0.0 }
 0x156   : > { %v1567_v63 = vpack.c.bf16 %v1091_v53, %v1090_v42  ;;  %v871_v0 = vadd.f32 %v1693_v54, %v2131_v56  ;;  %v1696_v55 = vadd.f32 %v1695_v61, %v1694_v57  ;;  %v1059_v4 = vadd.f32 %v1058_v62, %v898_v38 }
 0x157   : > { %v1101_v1 = vmax.f32 %v1067_v60, 0.0  ;;  %v1098_v7 = vmax.f32 %v1056_v50, 0.0 }
 0x158   : > { %1603 = vst [vmem:[%s2141_s28 + $0x50] sm:$0xff] %v1567_v63   ;;  %v1032_v5 = vadd.f32 %v2165_v58, %v871_v0  ;;  %v874_v6 = vadd.f32 %v1696_v55, %v2131_v56  ;;  %v1099_v10 = vmax.f32 %v1059_v4, 0.0 }
 0x159   : > { %v1592_v8 = vpack.c.bf16 %v1101_v1, %v1100_v3 }
 0x15a   : > { %v1035_v43 = vadd.f32 %v2167_v2, %v874_v6  ;;  %v1587_v11 = vpack.c.bf16 %v1099_v10, %v1098_v7  ;;  %v1092_v13 = vmax.f32 %v1032_v5, 0.0 }
 0x15b   : > { %1608 = vst [vmem:[%s2141_s28 + $0x78] sm:$0xff] %v1592_v8  }
 0x15c   : > { %v1093_v12 = vmax.f32 %v1035_v43, 0.0  ;;  %1607 = vst [vmem:[%s2141_s28 + $0x70] sm:$0xff] %v1587_v11  }
 0x15e   : > { %v1572_v15 = vpack.c.bf16 %v1093_v12, %v1092_v13 }
 0x160   : > { %1604 = vst [vmem:[%s2141_s28 + $0x58] sm:$0xff] %v1572_v15  }
 0x161 PF: > { %s13_s14 = sadd.s32 1, %s1944_s14   ;;  %s2214_s12 = smov %s1940_s13 }
 0x162   : > { %p10_p5 = scmp.ge.s32.totalorder %s13_s14, 4   ;;  %s2215_s13 = smov %s2217_s15 }
 0x164   :  { %12 = sbr.rel (!%p10_p5) target bundleno = 2 (0x2), region = 68 }

// kernel: depth_cnn_forward.6
= control target key start
LH: loop header
LB: loop body
LE: loop exit
PB: predicated region body
PF: predicated region fallthrough
CT: control target
= control target key end

     0   :  { %s4431_s12 = smov 0   ;;  %s4433_s13 = smov 0   ;;  %s5480_s0 = inlined_call_operand.vmem [shape: bf16[112,1664], index: 0, kind: input, shape index: {}]   ;;  %s5481_s1 = inlined_call_operand.vmem [shape: bf16[1664,256], index: 1, kind: input, shape index: {}]   ;;  %s5482_s2 = inlined_call_operand.vmem [shape: f32[1,256], index: 2, kind: input, shape index: {}]   ;;  %s5483_s3 = inlined_call_operand.vmem [shape: bf16[112,256], index: 3, kind: output, shape index: {}]  }
   0x1   :  { %s4435_s14 = smov 0   ;;  %s4437_s15 = smov 0  }
   0x2   :  { %s4439_s16 = smov 0  }
   0x3 LB: > { %s25_s17 = sadd.s32 1, %s4403_s15  ;;  %s3389_s18 = sadd.s32 4294967295, %s4407_s16   ;;  %s4407_s16 = sphi %s4439_s16, %s13_s16   ;;  %s4403_s15 = sphi %s4437_s15, %s5488_s15   ;;  %s4399_s14 = sphi %s4435_s14, %s5487_s14   ;;  %s4395_s13 = sphi %s4433_s13, %s5486_s13   ;;  %s4391_s12 = sphi %s4431_s12, %s5485_s12  }
   0x4   : > { %p27_p0 = scmp.ge.s32.totalorder %s25_s17, 2  ;;  %p65_p1 = scmp.ne.s32.totalorder %s4395_s13, %s4391_s12 }
   0x5   : > { %p66_p2 = scmp.eq.s32.totalorder %s4407_s16, 0  ;;  %p123_p4 = scmp.eq.s32.totalorder %s3389_s18, 1 }
   0x6   : > { %s5490_s17 = smov (%p27_p0, %s25_s17), 0  ;;  %s58_s20 = sadd.s32 1, %s4395_s13 }
   0x7   : > { %p67_p3 = por %p66_p2, %p65_p1  ;;  %s55_s19 = ssub.s32 %s4403_s15, %s5490_s17 }
   0x8   : > { %p56_p5 = scmp.eq.s32.totalorder %s55_s19, 0  ;;  %p4466_p6 = por %p123_p4, %p65_p1 }
   0x9   : > { %p3393_p7 = scmp.ge.s32.totalorder %s4407_s16, 2 }
   0xa   : > { %s4471_s22 = scalar_select %p56_p5, %s4395_s13, %s58_s20  }
   0xb   : > { %155 = sbr.rel (%p3393_p7) target bundleno = 161 (0xa1), region = 20 }
  0x12   : > { %158 = sbr.rel (!%p67_p3) target bundleno = 161 (0xa1), region = 24  ;;  %s160_s23 = sand.u32 (%p67_p3), 1, %s4395_s13  }
  0x13   : > { %s3394_s24 = sshll.u32 (%p67_p3), %s4403_s15, 2  ;;  %s4087_s25 = smul.u32 (%p67_p3), 832, %s160_s23 }
  0x14   : > { %s4479_s28 = scalar_lea.vmem (%p67_p3), %s5481_s1, %s3394_s24 }
  0x15   : > { %v180_v0 = vld [vmem:[%s4479_s28] sm:$0xf] (%p67_p3)  ;;  %v182_v1 = vld [vmem:[%s4479_s28 + $0x8] sm:$0xf] (%p67_p3)  ;;  %v184_v2 = vld [vmem:[%s4479_s28 + $0x10] sm:$0xf] (%p67_p3) }
  0x16   : > { %v186_v3 = vld [vmem:[%s4479_s28 + $0x18] sm:$0xf] (%p67_p3)  ;;  %v188_v4 = vld [vmem:[%s4479_s28 + $0x20] sm:$0xf] (%p67_p3)  ;;  %s4486_s29 = scalar_lea.vmem (%p67_p3), [#allocation2], %s4087_s25 }
  0x17   : > { %181 = vst [vmem:[%s4486_s29] sm:$0xf] (%p67_p3), %v180_v0  ;;  %183 = vst [vmem:[%s4486_s29 + $0x4] sm:$0xf] (%p67_p3), %v182_v1  ;;  %v190_v5 = vld [vmem:[%s4479_s28 + $0x28] sm:$0xf] (%p67_p3) }
  0x18   : > { %185 = vst [vmem:[%s4486_s29 + $0x8] sm:$0xf] (%p67_p3), %v184_v2  ;;  %187 = vst [vmem:[%s4486_s29 + $0xc] sm:$0xf] (%p67_p3), %v186_v3  ;;  %v192_v6 = vld [vmem:[%s4479_s28 + $0x30] sm:$0xf] (%p67_p3) }
  0x19   : > { %189 = vst [vmem:[%s4486_s29 + $0x10] sm:$0xf] %v188_v4  ;;  %v194_v7 = vld [vmem:[%s4479_s28 + $0x38] sm:$0xf]  ;;  %191 = vst [vmem:[%s4486_s29 + $0x14] sm:$0xf] %v190_v5 }
  0x1a   : > { %193 = vst [vmem:[%s4486_s29 + $0x18] sm:$0xf] %v192_v6  ;;  %195 = vst [vmem:[%s4486_s29 + $0x1c] sm:$0xf] %v194_v7  ;;  %v196_v8 = vld [vmem:[%s4479_s28 + $0x40] sm:$0xf] }
  0x1b   : > { %v198_v9 = vld [vmem:[%s4479_s28 + $0x48] sm:$0xf]  ;;  %v200_v10 = vld [vmem:[%s4479_s28 + $0x50] sm:$0xf]  ;;  %197 = vst [vmem:[%s4486_s29 + $0x20] sm:$0xf] %v196_v8 }
  0x1c   : > { %199 = vst [vmem:[%s4486_s29 + $0x24] sm:$0xf] %v198_v9  ;;  %201 = vst [vmem:[%s4486_s29 + $0x28] sm:$0xf] %v200_v10  ;;  %v202_v11 = vld [vmem:[%s4479_s28 + $0x58] sm:$0xf] }
  0x1d   : > { %v204_v12 = vld [vmem:[%s4479_s28 + $0x60] sm:$0xf]  ;;  %v206_v13 = vld [vmem:[%s4479_s28 + $0x68] sm:$0xf]  ;;  %203 = vst [vmem:[%s4486_s29 + $0x2c] sm:$0xf] %v202_v11 }
  0x1e   : > { %205 = vst [vmem:[%s4486_s29 + $0x30] sm:$0xf] %v204_v12  ;;  %207 = vst [vmem:[%s4486_s29 + $0x34] sm:$0xf] %v206_v13  ;;  %v208_v14 = vld [vmem:[%s4479_s28 + $0x70] sm:$0xf] }
  0x1f   : > { %v210_v15 = vld [vmem:[%s4479_s28 + $0x78] sm:$0xf]  ;;  %v212_v16 = vld [vmem:[%s4479_s28 + $0x80] sm:$0xf]  ;;  %209 = vst [vmem:[%s4486_s29 + $0x38] sm:$0xf] %v208_v14 }
  0x20   : > { %211 = vst [vmem:[%s4486_s29 + $0x3c] sm:$0xf] %v210_v15  ;;  %213 = vst [vmem:[%s4486_s29 + $0x40] sm:$0xf] %v212_v16  ;;  %v214_v17 = vld [vmem:[%s4479_s28 + $0x88] sm:$0xf] }
  0x21   : > { %v216_v18 = vld [vmem:[%s4479_s28 + $0x90] sm:$0xf]  ;;  %v218_v19 = vld [vmem:[%s4479_s28 + $0x98] sm:$0xf]  ;;  %215 = vst [vmem:[%s4486_s29 + $0x44] sm:$0xf] %v214_v17 }
  0x22   : > { %217 = vst [vmem:[%s4486_s29 + $0x48] sm:$0xf] %v216_v18  ;;  %219 = vst [vmem:[%s4486_s29 + $0x4c] sm:$0xf] %v218_v19  ;;  %v220_v20 = vld [vmem:[%s4479_s28 + $0xa0] sm:$0xf] }
  0x23   : > { %v222_v21 = vld [vmem:[%s4479_s28 + $0xa8] sm:$0xf]  ;;  %v224_v22 = vld [vmem:[%s4479_s28 + $0xb0] sm:$0xf]  ;;  %221 = vst [vmem:[%s4486_s29 + $0x50] sm:$0xf] %v220_v20 }
  0x24   : > { %223 = vst [vmem:[%s4486_s29 + $0x54] sm:$0xf] %v222_v21  ;;  %225 = vst [vmem:[%s4486_s29 + $0x58] sm:$0xf] %v224_v22  ;;  %v226_v23 = vld [vmem:[%s4479_s28 + $0xb8] sm:$0xf] }
  0x25   : > { %v228_v24 = vld [vmem:[%s4479_s28 + $0xc0] sm:$0xf]  ;;  %v230_v25 = vld [vmem:[%s4479_s28 + $0xc8] sm:$0xf]  ;;  %227 = vst [vmem:[%s4486_s29 + $0x5c] sm:$0xf] %v226_v23 }
  0x26   : > { %229 = vst [vmem:[%s4486_s29 + $0x60] sm:$0xf] %v228_v24  ;;  %231 = vst [vmem:[%s4486_s29 + $0x64] sm:$0xf] %v230_v25  ;;  %v232_v26 = vld [vmem:[%s4479_s28 + $0xd0] sm:$0xf] }
  0x27   : > { %v234_v27 = vld [vmem:[%s4479_s28 + $0xd8] sm:$0xf]  ;;  %v236_v28 = vld [vmem:[%s4479_s28 + $0xe0] sm:$0xf]  ;;  %233 = vst [vmem:[%s4486_s29 + $0x68] sm:$0xf] %v232_v26 }
  0x28   : > { %235 = vst [vmem:[%s4486_s29 + $0x6c] sm:$0xf] %v234_v27  ;;  %237 = vst [vmem:[%s4486_s29 + $0x70] sm:$0xf] %v236_v28  ;;  %v238_v29 = vld [vmem:[%s4479_s28 + $0xe8] sm:$0xf] }
  0x29   : > { %v240_v30 = vld [vmem:[%s4479_s28 + $0xf0] sm:$0xf]  ;;  %v242_v31 = vld [vmem:[%s4479_s28 + $0xf8] sm:$0xf]  ;;  %239 = vst [vmem:[%s4486_s29 + $0x74] sm:$0xf] %v238_v29 }
  0x2a   : > { %241 = vst [vmem:[%s4486_s29 + $0x78] sm:$0xf] %v240_v30  ;;  %243 = vst [vmem:[%s4486_s29 + $0x7c] sm:$0xf] %v242_v31  ;;  %v244_v32 = vld [vmem:[%s4479_s28 + $0x100] sm:$0xf] }
  0x2b   : > { %v246_v33 = vld [vmem:[%s4479_s28 + $0x108] sm:$0xf]  ;;  %v248_v34 = vld [vmem:[%s4479_s28 + $0x110] sm:$0xf]  ;;  %245 = vst [vmem:[%s4486_s29 + $0x80] sm:$0xf] %v244_v32 }
  0x2c   : > { %247 = vst [vmem:[%s4486_s29 + $0x84] sm:$0xf] %v246_v33  ;;  %249 = vst [vmem:[%s4486_s29 + $0x88] sm:$0xf] %v248_v34  ;;  %v250_v35 = vld [vmem:[%s4479_s28 + $0x118] sm:$0xf] }
  0x2d   : > { %v252_v36 = vld [vmem:[%s4479_s28 + $0x120] sm:$0xf]  ;;  %v254_v37 = vld [vmem:[%s4479_s28 + $0x128] sm:$0xf]  ;;  %251 = vst [vmem:[%s4486_s29 + $0x8c] sm:$0xf] %v250_v35 }
  0x2e   : > { %253 = vst [vmem:[%s4486_s29 + $0x90] sm:$0xf] %v252_v36  ;;  %255 = vst [vmem:[%s4486_s29 + $0x94] sm:$0xf] %v254_v37  ;;  %v256_v38 = vld [vmem:[%s4479_s28 + $0x130] sm:$0xf] }
  0x2f   : > { %v258_v39 = vld [vmem:[%s4479_s28 + $0x138] sm:$0xf]  ;;  %v260_v40 = vld [vmem:[%s4479_s28 + $0x140] sm:$0xf]  ;;  %257 = vst [vmem:[%s4486_s29 + $0x98] sm:$0xf] %v256_v38 }
  0x30   : > { %259 = vst [vmem:[%s4486_s29 + $0x9c] sm:$0xf] %v258_v39  ;;  %261 = vst [vmem:[%s4486_s29 + $0xa0] sm:$0xf] %v260_v40  ;;  %v262_v41 = vld [vmem:[%s4479_s28 + $0x148] sm:$0xf] }
  0x31   : > { %v264_v42 = vld [vmem:[%s4479_s28 + $0x150] sm:$0xf]  ;;  %v266_v43 = vld [vmem:[%s4479_s28 + $0x158] sm:$0xf]  ;;  %263 = vst [vmem:[%s4486_s29 + $0xa4] sm:$0xf] %v262_v41 }
  0x32   : > { %265 = vst [vmem:[%s4486_s29 + $0xa8] sm:$0xf] %v264_v42  ;;  %267 = vst [vmem:[%s4486_s29 + $0xac] sm:$0xf] %v266_v43  ;;  %v268_v44 = vld [vmem:[%s4479_s28 + $0x160] sm:$0xf] }
  0x33   : > { %v270_v45 = vld [vmem:[%s4479_s28 + $0x168] sm:$0xf]  ;;  %v272_v46 = vld [vmem:[%s4479_s28 + $0x170] sm:$0xf]  ;;  %269 = vst [vmem:[%s4486_s29 + $0xb0] sm:$0xf] %v268_v44 }
  0x34   : > { %271 = vst [vmem:[%s4486_s29 + $0xb4] sm:$0xf] %v270_v45  ;;  %273 = vst [vmem:[%s4486_s29 + $0xb8] sm:$0xf] %v272_v46  ;;  %v274_v47 = vld [vmem:[%s4479_s28 + $0x178] sm:$0xf] }
  0x35   : > { %v276_v48 = vld [vmem:[%s4479_s28 + $0x180] sm:$0xf]  ;;  %v278_v49 = vld [vmem:[%s4479_s28 + $0x188] sm:$0xf]  ;;  %275 = vst [vmem:[%s4486_s29 + $0xbc] sm:$0xf] %v274_v47 }
  0x36   : > { %277 = vst [vmem:[%s4486_s29 + $0xc0] sm:$0xf] %v276_v48  ;;  %279 = vst [vmem:[%s4486_s29 + $0xc4] sm:$0xf] %v278_v49  ;;  %v280_v50 = vld [vmem:[%s4479_s28 + $0x190] sm:$0xf] }
  0x37   : > { %v282_v51 = vld [vmem:[%s4479_s28 + $0x198] sm:$0xf]  ;;  %v284_v52 = vld [vmem:[%s4479_s28 + $0x1a0] sm:$0xf]  ;;  %281 = vst [vmem:[%s4486_s29 + $0xc8] sm:$0xf] %v280_v50 }
  0x38   : > { %283 = vst [vmem:[%s4486_s29 + $0xcc] sm:$0xf] %v282_v51  ;;  %285 = vst [vmem:[%s4486_s29 + $0xd0] sm:$0xf] %v284_v52  ;;  %v286_v53 = vld [vmem:[%s4479_s28 + $0x1a8] sm:$0xf] }
  0x39   : > { %v288_v54 = vld [vmem:[%s4479_s28 + $0x1b0] sm:$0xf]  ;;  %v290_v55 = vld [vmem:[%s4479_s28 + $0x1b8] sm:$0xf]  ;;  %287 = vst [vmem:[%s4486_s29 + $0xd4] sm:$0xf] %v286_v53 }
  0x3a   : > { %289 = vst [vmem:[%s4486_s29 + $0xd8] sm:$0xf] %v288_v54  ;;  %291 = vst [vmem:[%s4486_s29 + $0xdc] sm:$0xf] %v290_v55  ;;  %v292_v56 = vld [vmem:[%s4479_s28 + $0x1c0] sm:$0xf] }
  0x3b   : > { %v294_v57 = vld [vmem:[%s4479_s28 + $0x1c8] sm:$0xf]  ;;  %v296_v58 = vld [vmem:[%s4479_s28 + $0x1d0] sm:$0xf]  ;;  %293 = vst [vmem:[%s4486_s29 + $0xe0] sm:$0xf] %v292_v56 }
  0x3c   : > { %295 = vst [vmem:[%s4486_s29 + $0xe4] sm:$0xf] %v294_v57  ;;  %297 = vst [vmem:[%s4486_s29 + $0xe8] sm:$0xf] %v296_v58  ;;  %v298_v59 = vld [vmem:[%s4479_s28 + $0x1d8] sm:$0xf] }
  0x3d   : > { %v300_v60 = vld [vmem:[%s4479_s28 + $0x1e0] sm:$0xf]  ;;  %v302_v61 = vld [vmem:[%s4479_s28 + $0x1e8] sm:$0xf]  ;;  %299 = vst [vmem:[%s4486_s29 + $0xec] sm:$0xf] %v298_v59 }
  0x3e   : > { %301 = vst [vmem:[%s4486_s29 + $0xf0] sm:$0xf] %v300_v60  ;;  %303 = vst [vmem:[%s4486_s29 + $0xf4] sm:$0xf] %v302_v61  ;;  %v304_v62 = vld [vmem:[%s4479_s28 + $0x1f0] sm:$0xf] }
  0x3f   : > { %v306_v63 = vld [vmem:[%s4479_s28 + $0x1f8] sm:$0xf]  ;;  %v308_v0 = vld [vmem:[%s4479_s28 + $0x200] sm:$0xf]  ;;  %305 = vst [vmem:[%s4486_s29 + $0xf8] sm:$0xf] %v304_v62 }
  0x40   : > { %307 = vst [vmem:[%s4486_s29 + $0xfc] sm:$0xf] %v306_v63  ;;  %309 = vst [vmem:[%s4486_s29 + $0x100] sm:$0xf] %v308_v0  ;;  %v310_v1 = vld [vmem:[%s4479_s28 + $0x208] sm:$0xf] }
  0x41   : > { %v312_v2 = vld [vmem:[%s4479_s28 + $0x210] sm:$0xf]  ;;  %v314_v3 = vld [vmem:[%s4479_s28 + $0x218] sm:$0xf]  ;;  %311 = vst [vmem:[%s4486_s29 + $0x104] sm:$0xf] %v310_v1 }
  0x42   : > { %313 = vst [vmem:[%s4486_s29 + $0x108] sm:$0xf] %v312_v2  ;;  %315 = vst [vmem:[%s4486_s29 + $0x10c] sm:$0xf] %v314_v3  ;;  %v316_v4 = vld [vmem:[%s4479_s28 + $0x220] sm:$0xf] }
  0x43   : > { %v318_v5 = vld [vmem:[%s4479_s28 + $0x228] sm:$0xf]  ;;  %v320_v6 = vld [vmem:[%s4479_s28 + $0x230] sm:$0xf]  ;;  %317 = vst [vmem:[%s4486_s29 + $0x110] sm:$0xf] %v316_v4 }
  0x44   : > { %319 = vst [vmem:[%s4486_s29 + $0x114] sm:$0xf] %v318_v5  ;;  %321 = vst [vmem:[%s4486_s29 + $0x118] sm:$0xf] %v320_v6  ;;  %v322_v7 = vld [vmem:[%s4479_s28 + $0x238] sm:$0xf] }
  0x45   : > { %v324_v8 = vld [vmem:[%s4479_s28 + $0x240] sm:$0xf]  ;;  %v326_v9 = vld [vmem:[%s4479_s28 + $0x248] sm:$0xf]  ;;  %323 = vst [vmem:[%s4486_s29 + $0x11c] sm:$0xf] %v322_v7 }
  0x46   : > { %325 = vst [vmem:[%s4486_s29 + $0x120] sm:$0xf] %v324_v8  ;;  %327 = vst [vmem:[%s4486_s29 + $0x124] sm:$0xf] %v326_v9  ;;  %v328_v10 = vld [vmem:[%s4479_s28 + $0x250] sm:$0xf] }
  0x47   : > { %v330_v11 = vld [vmem:[%s4479_s28 + $0x258] sm:$0xf]  ;;  %v332_v12 = vld [vmem:[%s4479_s28 + $0x260] sm:$0xf]  ;;  %329 = vst [vmem:[%s4486_s29 + $0x128] sm:$0xf] %v328_v10 }
  0x48   : > { %331 = vst [vmem:[%s4486_s29 + $0x12c] sm:$0xf] %v330_v11  ;;  %333 = vst [vmem:[%s4486_s29 + $0x130] sm:$0xf] %v332_v12  ;;  %v334_v13 = vld [vmem:[%s4479_s28 + $0x268] sm:$0xf] }
  0x49   : > { %v336_v14 = vld [vmem:[%s4479_s28 + $0x270] sm:$0xf]  ;;  %v338_v15 = vld [vmem:[%s4479_s28 + $0x278] sm:$0xf]  ;;  %335 = vst [vmem:[%s4486_s29 + $0x134] sm:$0xf] %v334_v13 }
  0x4a   : > { %337 = vst [vmem:[%s4486_s29 + $0x138] sm:$0xf] %v336_v14  ;;  %339 = vst [vmem:[%s4486_s29 + $0x13c] sm:$0xf] %v338_v15  ;;  %v340_v16 = vld [vmem:[%s4479_s28 + $0x280] sm:$0xf] }
  0x4b   : > { %v342_v17 = vld [vmem:[%s4479_s28 + $0x288] sm:$0xf]  ;;  %v344_v18 = vld [vmem:[%s4479_s28 + $0x290] sm:$0xf]  ;;  %341 = vst [vmem:[%s4486_s29 + $0x140] sm:$0xf] %v340_v16 }
  0x4c   : > { %343 = vst [vmem:[%s4486_s29 + $0x144] sm:$0xf] %v342_v17  ;;  %345 = vst [vmem:[%s4486_s29 + $0x148] sm:$0xf] %v344_v18  ;;  %v346_v19 = vld [vmem:[%s4479_s28 + $0x298] sm:$0xf] }
  0x4d   : > { %v348_v20 = vld [vmem:[%s4479_s28 + $0x2a0] sm:$0xf]  ;;  %v350_v21 = vld [vmem:[%s4479_s28 + $0x2a8] sm:$0xf]  ;;  %347 = vst [vmem:[%s4486_s29 + $0x14c] sm:$0xf] %v346_v19 }
  0x4e   : > { %349 = vst [vmem:[%s4486_s29 + $0x150] sm:$0xf] %v348_v20  ;;  %351 = vst [vmem:[%s4486_s29 + $0x154] sm:$0xf] %v350_v21  ;;  %v352_v22 = vld [vmem:[%s4479_s28 + $0x2b0] sm:$0xf] }
  0x4f   : > { %v354_v23 = vld [vmem:[%s4479_s28 + $0x2b8] sm:$0xf]  ;;  %v356_v24 = vld [vmem:[%s4479_s28 + $0x2c0] sm:$0xf]  ;;  %353 = vst [vmem:[%s4486_s29 + $0x158] sm:$0xf] %v352_v22 }
  0x50   : > { %355 = vst [vmem:[%s4486_s29 + $0x15c] sm:$0xf] %v354_v23  ;;  %357 = vst [vmem:[%s4486_s29 + $0x160] sm:$0xf] %v356_v24  ;;  %v358_v25 = vld [vmem:[%s4479_s28 + $0x2c8] sm:$0xf] }
  0x51   : > { %v360_v26 = vld [vmem:[%s4479_s28 + $0x2d0] sm:$0xf]  ;;  %v362_v27 = vld [vmem:[%s4479_s28 + $0x2d8] sm:$0xf]  ;;  %359 = vst [vmem:[%s4486_s29 + $0x164] sm:$0xf] %v358_v25 }
  0x52   : > { %361 = vst [vmem:[%s4486_s29 + $0x168] sm:$0xf] %v360_v26  ;;  %363 = vst [vmem:[%s4486_s29 + $0x16c] sm:$0xf] %v362_v27  ;;  %v364_v28 = vld [vmem:[%s4479_s28 + $0x2e0] sm:$0xf] }
  0x53   : > { %v366_v29 = vld [vmem:[%s4479_s28 + $0x2e8] sm:$0xf]  ;;  %v368_v30 = vld [vmem:[%s4479_s28 + $0x2f0] sm:$0xf]  ;;  %365 = vst [vmem:[%s4486_s29 + $0x170] sm:$0xf] %v364_v28 }
  0x54   : > { %367 = vst [vmem:[%s4486_s29 + $0x174] sm:$0xf] %v366_v29  ;;  %369 = vst [vmem:[%s4486_s29 + $0x178] sm:$0xf] %v368_v30  ;;  %v370_v31 = vld [vmem:[%s4479_s28 + $0x2f8] sm:$0xf] }
  0x55   : > { %v372_v32 = vld [vmem:[%s4479_s28 + $0x300] sm:$0xf]  ;;  %v374_v33 = vld [vmem:[%s4479_s28 + $0x308] sm:$0xf]  ;;  %371 = vst [vmem:[%s4486_s29 + $0x17c] sm:$0xf] %v370_v31 }
  0x56   : > { %373 = vst [vmem:[%s4486_s29 + $0x180] sm:$0xf] %v372_v32  ;;  %375 = vst [vmem:[%s4486_s29 + $0x184] sm:$0xf] %v374_v33  ;;  %v376_v34 = vld [vmem:[%s4479_s28 + $0x310] sm:$0xf] }
  0x57   : > { %v378_v35 = vld [vmem:[%s4479_s28 + $0x318] sm:$0xf]  ;;  %v380_v36 = vld [vmem:[%s4479_s28 + $0x320] sm:$0xf]  ;;  %377 = vst [vmem:[%s4486_s29 + $0x188] sm:$0xf] %v376_v34 }
  0x58   : > { %379 = vst [vmem:[%s4486_s29 + $0x18c] sm:$0xf] %v378_v35  ;;  %381 = vst [vmem:[%s4486_s29 + $0x190] sm:$0xf] %v380_v36  ;;  %v382_v37 = vld [vmem:[%s4479_s28 + $0x328] sm:$0xf] }
  0x59   : > { %v384_v38 = vld [vmem:[%s4479_s28 + $0x330] sm:$0xf]  ;;  %v386_v39 = vld [vmem:[%s4479_s28 + $0x338] sm:$0xf]  ;;  %383 = vst [vmem:[%s4486_s29 + $0x194] sm:$0xf] %v382_v37 }
  0x5a   : > { %385 = vst [vmem:[%s4486_s29 + $0x198] sm:$0xf] %v384_v38  ;;  %387 = vst [vmem:[%s4486_s29 + $0x19c] sm:$0xf] %v386_v39  ;;  %v388_v40 = vld [vmem:[%s4479_s28 + $0x340] sm:$0xf] }
  0x5b   : > { %v390_v41 = vld [vmem:[%s4479_s28 + $0x348] sm:$0xf]  ;;  %v392_v42 = vld [vmem:[%s4479_s28 + $0x350] sm:$0xf]  ;;  %389 = vst [vmem:[%s4486_s29 + $0x1a0] sm:$0xf] %v388_v40 }
  0x5c   : > { %391 = vst [vmem:[%s4486_s29 + $0x1a4] sm:$0xf] %v390_v41  ;;  %393 = vst [vmem:[%s4486_s29 + $0x1a8] sm:$0xf] %v392_v42  ;;  %v394_v43 = vld [vmem:[%s4479_s28 + $0x358] sm:$0xf] }
  0x5d   : > { %v396_v44 = vld [vmem:[%s4479_s28 + $0x360] sm:$0xf]  ;;  %v398_v45 = vld [vmem:[%s4479_s28 + $0x368] sm:$0xf]  ;;  %395 = vst [vmem:[%s4486_s29 + $0x1ac] sm:$0xf] %v394_v43 }
  0x5e   : > { %397 = vst [vmem:[%s4486_s29 + $0x1b0] sm:$0xf] %v396_v44  ;;  %399 = vst [vmem:[%s4486_s29 + $0x1b4] sm:$0xf] %v398_v45  ;;  %v400_v46 = vld [vmem:[%s4479_s28 + $0x370] sm:$0xf] }
  0x5f   : > { %v402_v47 = vld [vmem:[%s4479_s28 + $0x378] sm:$0xf]  ;;  %v404_v48 = vld [vmem:[%s4479_s28 + $0x380] sm:$0xf]  ;;  %401 = vst [vmem:[%s4486_s29 + $0x1b8] sm:$0xf] %v400_v46 }
  0x60   : > { %403 = vst [vmem:[%s4486_s29 + $0x1bc] sm:$0xf] %v402_v47  ;;  %405 = vst [vmem:[%s4486_s29 + $0x1c0] sm:$0xf] %v404_v48  ;;  %v406_v49 = vld [vmem:[%s4479_s28 + $0x388] sm:$0xf] }
  0x61   : > { %v408_v50 = vld [vmem:[%s4479_s28 + $0x390] sm:$0xf]  ;;  %v410_v51 = vld [vmem:[%s4479_s28 + $0x398] sm:$0xf]  ;;  %407 = vst [vmem:[%s4486_s29 + $0x1c4] sm:$0xf] %v406_v49 }
  0x62   : > { %409 = vst [vmem:[%s4486_s29 + $0x1c8] sm:$0xf] %v408_v50  ;;  %411 = vst [vmem:[%s4486_s29 + $0x1cc] sm:$0xf] %v410_v51  ;;  %v412_v52 = vld [vmem:[%s4479_s28 + $0x3a0] sm:$0xf] }
  0x63   : > { %v414_v53 = vld [vmem:[%s4479_s28 + $0x3a8] sm:$0xf]  ;;  %v416_v54 = vld [vmem:[%s4479_s28 + $0x3b0] sm:$0xf]  ;;  %413 = vst [vmem:[%s4486_s29 + $0x1d0] sm:$0xf] %v412_v52 }
  0x64   : > { %415 = vst [vmem:[%s4486_s29 + $0x1d4] sm:$0xf] %v414_v53  ;;  %417 = vst [vmem:[%s4486_s29 + $0x1d8] sm:$0xf] %v416_v54  ;;  %v418_v55 = vld [vmem:[%s4479_s28 + $0x3b8] sm:$0xf] }
  0x65   : > { %v420_v56 = vld [vmem:[%s4479_s28 + $0x3c0] sm:$0xf]  ;;  %v422_v57 = vld [vmem:[%s4479_s28 + $0x3c8] sm:$0xf]  ;;  %419 = vst [vmem:[%s4486_s29 + $0x1dc] sm:$0xf] %v418_v55 }
  0x66   : > { %421 = vst [vmem:[%s4486_s29 + $0x1e0] sm:$0xf] %v420_v56  ;;  %423 = vst [vmem:[%s4486_s29 + $0x1e4] sm:$0xf] %v422_v57  ;;  %v424_v58 = vld [vmem:[%s4479_s28 + $0x3d0] sm:$0xf] }
  0x67   : > { %v426_v59 = vld [vmem:[%s4479_s28 + $0x3d8] sm:$0xf]  ;;  %v428_v60 = vld [vmem:[%s4479_s28 + $0x3e0] sm:$0xf]  ;;  %425 = vst [vmem:[%s4486_s29 + $0x1e8] sm:$0xf] %v424_v58 }
  0x68   : > { %427 = vst [vmem:[%s4486_s29 + $0x1ec] sm:$0xf] %v426_v59  ;;  %429 = vst [vmem:[%s4486_s29 + $0x1f0] sm:$0xf] %v428_v60  ;;  %v430_v61 = vld [vmem:[%s4479_s28 + $0x3e8] sm:$0xf] }
  0x69   : > { %v432_v62 = vld [vmem:[%s4479_s28 + $0x3f0] sm:$0xf]  ;;  %v434_v63 = vld [vmem:[%s4479_s28 + $0x3f8] sm:$0xf]  ;;  %431 = vst [vmem:[%s4486_s29 + $0x1f4] sm:$0xf] %v430_v61 }
  0x6a   : > { %433 = vst [vmem:[%s4486_s29 + $0x1f8] sm:$0xf] %v432_v62  ;;  %435 = vst [vmem:[%s4486_s29 + $0x1fc] sm:$0xf] %v434_v63  ;;  %v436_v0 = vld [vmem:[%s4479_s28 + $0x400] sm:$0xf] }
  0x6b   : > { %v438_v1 = vld [vmem:[%s4479_s28 + $0x408] sm:$0xf]  ;;  %v440_v2 = vld [vmem:[%s4479_s28 + $0x410] sm:$0xf]  ;;  %437 = vst [vmem:[%s4486_s29 + $0x200] sm:$0xf] %v436_v0 }
  0x6c   : > { %439 = vst [vmem:[%s4486_s29 + $0x204] sm:$0xf] %v438_v1  ;;  %441 = vst [vmem:[%s4486_s29 + $0x208] sm:$0xf] %v440_v2  ;;  %v442_v3 = vld [vmem:[%s4479_s28 + $0x418] sm:$0xf] }
  0x6d   : > { %v444_v4 = vld [vmem:[%s4479_s28 + $0x420] sm:$0xf]  ;;  %v446_v5 = vld [vmem:[%s4479_s28 + $0x428] sm:$0xf]  ;;  %443 = vst [vmem:[%s4486_s29 + $0x20c] sm:$0xf] %v442_v3 }
  0x6e   : > { %445 = vst [vmem:[%s4486_s29 + $0x210] sm:$0xf] %v444_v4  ;;  %447 = vst [vmem:[%s4486_s29 + $0x214] sm:$0xf] %v446_v5  ;;  %v448_v6 = vld [vmem:[%s4479_s28 + $0x430] sm:$0xf] }
  0x6f   : > { %v450_v7 = vld [vmem:[%s4479_s28 + $0x438] sm:$0xf]  ;;  %v452_v8 = vld [vmem:[%s4479_s28 + $0x440] sm:$0xf]  ;;  %449 = vst [vmem:[%s4486_s29 + $0x218] sm:$0xf] %v448_v6 }
  0x70   : > { %451 = vst [vmem:[%s4486_s29 + $0x21c] sm:$0xf] %v450_v7  ;;  %453 = vst [vmem:[%s4486_s29 + $0x220] sm:$0xf] %v452_v8  ;;  %v454_v9 = vld [vmem:[%s4479_s28 + $0x448] sm:$0xf] }
  0x71   : > { %v456_v10 = vld [vmem:[%s4479_s28 + $0x450] sm:$0xf]  ;;  %v458_v11 = vld [vmem:[%s4479_s28 + $0x458] sm:$0xf]  ;;  %455 = vst [vmem:[%s4486_s29 + $0x224] sm:$0xf] %v454_v9 }
  0x72   : > { %457 = vst [vmem:[%s4486_s29 + $0x228] sm:$0xf] %v456_v10  ;;  %459 = vst [vmem:[%s4486_s29 + $0x22c] sm:$0xf] %v458_v11  ;;  %v460_v12 = vld [vmem:[%s4479_s28 + $0x460] sm:$0xf] }
  0x73   : > { %v462_v13 = vld [vmem:[%s4479_s28 + $0x468] sm:$0xf]  ;;  %v464_v14 = vld [vmem:[%s4479_s28 + $0x470] sm:$0xf]  ;;  %461 = vst [vmem:[%s4486_s29 + $0x230] sm:$0xf] %v460_v12 }
  0x74   : > { %463 = vst [vmem:[%s4486_s29 + $0x234] sm:$0xf] %v462_v13  ;;  %465 = vst [vmem:[%s4486_s29 + $0x238] sm:$0xf] %v464_v14  ;;  %v466_v15 = vld [vmem:[%s4479_s28 + $0x478] sm:$0xf] }
  0x75   : > { %v468_v16 = vld [vmem:[%s4479_s28 + $0x480] sm:$0xf]  ;;  %v470_v17 = vld [vmem:[%s4479_s28 + $0x488] sm:$0xf]  ;;  %467 = vst [vmem:[%s4486_s29 + $0x23c] sm:$0xf] %v466_v15 }
  0x76   : > { %469 = vst [vmem:[%s4486_s29 + $0x240] sm:$0xf] %v468_v16  ;;  %471 = vst [vmem:[%s4486_s29 + $0x244] sm:$0xf] %v470_v17  ;;  %v472_v18 = vld [vmem:[%s4479_s28 + $0x490] sm:$0xf] }
  0x77   : > { %v474_v19 = vld [vmem:[%s4479_s28 + $0x498] sm:$0xf]  ;;  %v476_v20 = vld [vmem:[%s4479_s28 + $0x4a0] sm:$0xf]  ;;  %473 = vst [vmem:[%s4486_s29 + $0x248] sm:$0xf] %v472_v18 }
  0x78   : > { %475 = vst [vmem:[%s4486_s29 + $0x24c] sm:$0xf] %v474_v19  ;;  %477 = vst [vmem:[%s4486_s29 + $0x250] sm:$0xf] %v476_v20  ;;  %v478_v21 = vld [vmem:[%s4479_s28 + $0x4a8] sm:$0xf] }
  0x79   : > { %v480_v22 = vld [vmem:[%s4479_s28 + $0x4b0] sm:$0xf]  ;;  %v482_v23 = vld [vmem:[%s4479_s28 + $0x4b8] sm:$0xf]  ;;  %479 = vst [vmem:[%s4486_s29 + $0x254] sm:$0xf] %v478_v21 }
  0x7a   : > { %481 = vst [vmem:[%s4486_s29 + $0x258] sm:$0xf] %v480_v22  ;;  %483 = vst [vmem:[%s4486_s29 + $0x25c] sm:$0xf] %v482_v23  ;;  %v484_v24 = vld [vmem:[%s4479_s28 + $0x4c0] sm:$0xf] }
  0x7b   : > { %v486_v25 = vld [vmem:[%s4479_s28 + $0x4c8] sm:$0xf]  ;;  %v488_v26 = vld [vmem:[%s4479_s28 + $0x4d0] sm:$0xf]  ;;  %485 = vst [vmem:[%s4486_s29 + $0x260] sm:$0xf] %v484_v24 }
  0x7c   : > { %487 = vst [vmem:[%s4486_s29 + $0x264] sm:$0xf] %v486_v25  ;;  %489 = vst [vmem:[%s4486_s29 + $0x268] sm:$0xf] %v488_v26  ;;  %v490_v27 = vld [vmem:[%s4479_s28 + $0x4d8] sm:$0xf] }
  0x7d   : > { %v492_v28 = vld [vmem:[%s4479_s28 + $0x4e0] sm:$0xf]  ;;  %v494_v29 = vld [vmem:[%s4479_s28 + $0x4e8] sm:$0xf]  ;;  %491 = vst [vmem:[%s4486_s29 + $0x26c] sm:$0xf] %v490_v27 }
  0x7e   : > { %493 = vst [vmem:[%s4486_s29 + $0x270] sm:$0xf] %v492_v28  ;;  %495 = vst [vmem:[%s4486_s29 + $0x274] sm:$0xf] %v494_v29  ;;  %v496_v30 = vld [vmem:[%s4479_s28 + $0x4f0] sm:$0xf] }
  0x7f   : > { %v498_v31 = vld [vmem:[%s4479_s28 + $0x4f8] sm:$0xf]  ;;  %v500_v32 = vld [vmem:[%s4479_s28 + $0x500] sm:$0xf]  ;;  %497 = vst [vmem:[%s4486_s29 + $0x278] sm:$0xf] %v496_v30 }
  0x80   : > { %499 = vst [vmem:[%s4486_s29 + $0x27c] sm:$0xf] %v498_v31  ;;  %501 = vst [vmem:[%s4486_s29 + $0x280] sm:$0xf] %v500_v32  ;;  %v502_v33 = vld [vmem:[%s4479_s28 + $0x508] sm:$0xf] }
  0x81   : > { %v504_v34 = vld [vmem:[%s4479_s28 + $0x510] sm:$0xf]  ;;  %v506_v35 = vld [vmem:[%s4479_s28 + $0x518] sm:$0xf]  ;;  %503 = vst [vmem:[%s4486_s29 + $0x284] sm:$0xf] %v502_v33 }
  0x82   : > { %505 = vst [vmem:[%s4486_s29 + $0x288] sm:$0xf] %v504_v34  ;;  %507 = vst [vmem:[%s4486_s29 + $0x28c] sm:$0xf] %v506_v35  ;;  %v508_v36 = vld [vmem:[%s4479_s28 + $0x520] sm:$0xf] }
  0x83   : > { %v510_v37 = vld [vmem:[%s4479_s28 + $0x528] sm:$0xf]  ;;  %v512_v38 = vld [vmem:[%s4479_s28 + $0x530] sm:$0xf]  ;;  %509 = vst [vmem:[%s4486_s29 + $0x290] sm:$0xf] %v508_v36 }
  0x84   : > { %511 = vst [vmem:[%s4486_s29 + $0x294] sm:$0xf] %v510_v37  ;;  %513 = vst [vmem:[%s4486_s29 + $0x298] sm:$0xf] %v512_v38  ;;  %v514_v39 = vld [vmem:[%s4479_s28 + $0x538] sm:$0xf] }
  0x85   : > { %v516_v40 = vld [vmem:[%s4479_s28 + $0x540] sm:$0xf]  ;;  %v518_v41 = vld [vmem:[%s4479_s28 + $0x548] sm:$0xf]  ;;  %515 = vst [vmem:[%s4486_s29 + $0x29c] sm:$0xf] %v514_v39 }
  0x86   : > { %517 = vst [vmem:[%s4486_s29 + $0x2a0] sm:$0xf] %v516_v40  ;;  %519 = vst [vmem:[%s4486_s29 + $0x2a4] sm:$0xf] %v518_v41  ;;  %v520_v42 = vld [vmem:[%s4479_s28 + $0x550] sm:$0xf] }
  0x87   : > { %v522_v43 = vld [vmem:[%s4479_s28 + $0x558] sm:$0xf]  ;;  %v524_v44 = vld [vmem:[%s4479_s28 + $0x560] sm:$0xf]  ;;  %521 = vst [vmem:[%s4486_s29 + $0x2a8] sm:$0xf] %v520_v42 }
  0x88   : > { %523 = vst [vmem:[%s4486_s29 + $0x2ac] sm:$0xf] %v522_v43  ;;  %525 = vst [vmem:[%s4486_s29 + $0x2b0] sm:$0xf] %v524_v44  ;;  %v526_v45 = vld [vmem:[%s4479_s28 + $0x568] sm:$0xf] }
  0x89   : > { %v528_v46 = vld [vmem:[%s4479_s28 + $0x570] sm:$0xf]  ;;  %v530_v47 = vld [vmem:[%s4479_s28 + $0x578] sm:$0xf]  ;;  %527 = vst [vmem:[%s4486_s29 + $0x2b4] sm:$0xf] %v526_v45 }
  0x8a   : > { %529 = vst [vmem:[%s4486_s29 + $0x2b8] sm:$0xf] %v528_v46  ;;  %531 = vst [vmem:[%s4486_s29 + $0x2bc] sm:$0xf] %v530_v47  ;;  %v532_v48 = vld [vmem:[%s4479_s28 + $0x580] sm:$0xf] }
  0x8b   : > { %v534_v49 = vld [vmem:[%s4479_s28 + $0x588] sm:$0xf]  ;;  %v536_v50 = vld [vmem:[%s4479_s28 + $0x590] sm:$0xf]  ;;  %533 = vst [vmem:[%s4486_s29 + $0x2c0] sm:$0xf] %v532_v48 }
  0x8c   : > { %535 = vst [vmem:[%s4486_s29 + $0x2c4] sm:$0xf] %v534_v49  ;;  %537 = vst [vmem:[%s4486_s29 + $0x2c8] sm:$0xf] %v536_v50  ;;  %v538_v51 = vld [vmem:[%s4479_s28 + $0x598] sm:$0xf] }
  0x8d   : > { %v540_v52 = vld [vmem:[%s4479_s28 + $0x5a0] sm:$0xf]  ;;  %v542_v53 = vld [vmem:[%s4479_s28 + $0x5a8] sm:$0xf]  ;;  %539 = vst [vmem:[%s4486_s29 + $0x2cc] sm:$0xf] %v538_v51 }
  0x8e   : > { %541 = vst [vmem:[%s4486_s29 + $0x2d0] sm:$0xf] %v540_v52  ;;  %543 = vst [vmem:[%s4486_s29 + $0x2d4] sm:$0xf] %v542_v53  ;;  %v544_v54 = vld [vmem:[%s4479_s28 + $0x5b0] sm:$0xf] }
  0x8f   : > { %v546_v55 = vld [vmem:[%s4479_s28 + $0x5b8] sm:$0xf]  ;;  %v548_v56 = vld [vmem:[%s4479_s28 + $0x5c0] sm:$0xf]  ;;  %545 = vst [vmem:[%s4486_s29 + $0x2d8] sm:$0xf] %v544_v54 }
  0x90   : > { %547 = vst [vmem:[%s4486_s29 + $0x2dc] sm:$0xf] %v546_v55  ;;  %549 = vst [vmem:[%s4486_s29 + $0x2e0] sm:$0xf] %v548_v56  ;;  %v550_v57 = vld [vmem:[%s4479_s28 + $0x5c8] sm:$0xf] }
  0x91   : > { %v552_v58 = vld [vmem:[%s4479_s28 + $0x5d0] sm:$0xf]  ;;  %v554_v59 = vld [vmem:[%s4479_s28 + $0x5d8] sm:$0xf]  ;;  %551 = vst [vmem:[%s4486_s29 + $0x2e4] sm:$0xf] %v550_v57 }
  0x92   : > { %553 = vst [vmem:[%s4486_s29 + $0x2e8] sm:$0xf] %v552_v58  ;;  %555 = vst [vmem:[%s4486_s29 + $0x2ec] sm:$0xf] %v554_v59  ;;  %v556_v60 = vld [vmem:[%s4479_s28 + $0x5e0] sm:$0xf] }
  0x93   : > { %v558_v61 = vld [vmem:[%s4479_s28 + $0x5e8] sm:$0xf]  ;;  %v560_v62 = vld [vmem:[%s4479_s28 + $0x5f0] sm:$0xf]  ;;  %557 = vst [vmem:[%s4486_s29 + $0x2f0] sm:$0xf] %v556_v60 }
  0x94   : > { %559 = vst [vmem:[%s4486_s29 + $0x2f4] sm:$0xf] %v558_v61  ;;  %561 = vst [vmem:[%s4486_s29 + $0x2f8] sm:$0xf] %v560_v62  ;;  %v562_v63 = vld [vmem:[%s4479_s28 + $0x5f8] sm:$0xf] }
  0x95   : > { %v564_v0 = vld [vmem:[%s4479_s28 + $0x600] sm:$0xf]  ;;  %v566_v1 = vld [vmem:[%s4479_s28 + $0x608] sm:$0xf]  ;;  %563 = vst [vmem:[%s4486_s29 + $0x2fc] sm:$0xf] %v562_v63 }
  0x96   : > { %565 = vst [vmem:[%s4486_s29 + $0x300] sm:$0xf] %v564_v0  ;;  %567 = vst [vmem:[%s4486_s29 + $0x304] sm:$0xf] %v566_v1  ;;  %v568_v2 = vld [vmem:[%s4479_s28 + $0x610] sm:$0xf] }
  0x97   : > { %v570_v3 = vld [vmem:[%s4479_s28 + $0x618] sm:$0xf]  ;;  %v572_v4 = vld [vmem:[%s4479_s28 + $0x620] sm:$0xf]  ;;  %569 = vst [vmem:[%s4486_s29 + $0x308] sm:$0xf] %v568_v2 }
  0x98   : > { %571 = vst [vmem:[%s4486_s29 + $0x30c] sm:$0xf] %v570_v3  ;;  %573 = vst [vmem:[%s4486_s29 + $0x310] sm:$0xf] %v572_v4  ;;  %v574_v5 = vld [vmem:[%s4479_s28 + $0x628] sm:$0xf] }
  0x99   : > { %v576_v6 = vld [vmem:[%s4479_s28 + $0x630] sm:$0xf]  ;;  %v578_v7 = vld [vmem:[%s4479_s28 + $0x638] sm:$0xf]  ;;  %575 = vst [vmem:[%s4486_s29 + $0x314] sm:$0xf] %v574_v5 }
  0x9a   : > { %577 = vst [vmem:[%s4486_s29 + $0x318] sm:$0xf] %v576_v6  ;;  %579 = vst [vmem:[%s4486_s29 + $0x31c] sm:$0xf] %v578_v7  ;;  %v580_v8 = vld [vmem:[%s4479_s28 + $0x640] sm:$0xf] }
  0x9b   : > { %v582_v9 = vld [vmem:[%s4479_s28 + $0x648] sm:$0xf]  ;;  %v584_v10 = vld [vmem:[%s4479_s28 + $0x650] sm:$0xf]  ;;  %581 = vst [vmem:[%s4486_s29 + $0x320] sm:$0xf] %v580_v8 }
  0x9c   : > { %583 = vst [vmem:[%s4486_s29 + $0x324] sm:$0xf] %v582_v9  ;;  %585 = vst [vmem:[%s4486_s29 + $0x328] sm:$0xf] %v584_v10  ;;  %v586_v11 = vld [vmem:[%s4479_s28 + $0x658] sm:$0xf] }
  0x9d   : > { %v588_v12 = vld [vmem:[%s4479_s28 + $0x660] sm:$0xf]  ;;  %v590_v13 = vld [vmem:[%s4479_s28 + $0x668] sm:$0xf]  ;;  %587 = vst [vmem:[%s4486_s29 + $0x32c] sm:$0xf] %v586_v11 }
  0x9e   : > { %589 = vst [vmem:[%s4486_s29 + $0x330] sm:$0xf] %v588_v12  ;;  %591 = vst [vmem:[%s4486_s29 + $0x334] sm:$0xf] %v590_v13  ;;  %v592_v14 = vld [vmem:[%s4479_s28 + $0x670] sm:$0xf] }
  0x9f   : > { %v594_v15 = vld [vmem:[%s4479_s28 + $0x678] sm:$0xf]  ;;  %593 = vst [vmem:[%s4486_s29 + $0x338] sm:$0xf] %v592_v14 }
  0xa0   : > { %595 = vst [vmem:[%s4486_s29 + $0x33c] sm:$0xf] %v594_v15 }
  0xa1 PF: > { %p3395_p8 = scmp.ge.s32.totalorder %s4407_s16, 1  ;;  %p1039_p9 = scmp.lt.s32.totalorder %s4407_s16, 3 }
  0xa3   : > { %p1040_p10 = pnand %p3395_p8, %p1039_p9 }
  0xa4   : > { %s1046_s30 = sand.u32 (!%p1040_p10), 1, %s4391_s12   ;;  %v4150_v16 = vld [vmem:[%s5480_s0 + $0x1a4] ss:$52 sps:$4 sm:$0xff] (!%p1040_p10)   ;;  %v4148_v35 = vld [vmem:[%s5480_s0 + $0x1a0] ss:$52 sps:$4 sm:$0xff] (!%p1040_p10)   ;;  %vm4410_vm0 = vmmov (!%p1040_p10), 0  }
  0xa5   : > { %1043 = sbr.rel (%p1040_p10) target bundleno = 628 (0x274), region = 69  ;;  %v4154_v17 = vld [vmem:[%s5480_s0 + $0x4] ss:$52 sps:$4 sm:$0xff] (!%p1040_p10)   ;;  %2552 = vmatprep.mubr.bf16.mxu1 (!%p1040_p10), %v4150_v16  ;;  %v4152_v36 = vld [vmem:[%s5480_s0] ss:$52 sps:$4 sm:$0xff] (!%p1040_p10)   ;;  %p1084_p11 = scmp.lt.s32.totalorder (!%p1040_p10), %s4399_s14, 1 }
  0xa6   : > { %s4088_s4 = smul.u32 (!%p1040_p10), 832, %s1046_s30  ;;  %2520 = vmatprep.mubr.bf16.mxu0 (!%p1040_p10), %v4154_v17  ;;  %v4163_v41 = vld [vmem:[%s5480_s0 + $0x6c] ss:$52 sps:$4 sm:$0xff] (!%p1040_p10)   ;;  %v4166_v47 = vld [vmem:[%s5480_s0 + $0x68] ss:$52 sps:$4 sm:$0xff] (!%p1040_p10)  }
  0xa7   : > { %v4170_v43 = vld [vmem:[%s5480_s0 + $0x20c] ss:$52 sps:$4 sm:$0xff] (!%p1040_p10)   ;;  %v4173_v51 = vld [vmem:[%s5480_s0 + $0x208] ss:$52 sps:$4 sm:$0xff] (!%p1040_p10)   ;;  %v4180_v59 = vld [vmem:[%s5480_s0 + $0xd0] ss:$52 sps:$4 sm:$0xff] (!%p1040_p10)  }
  0xa8   : > { %s4910_s9 = scalar_lea.vmem (!%p1040_p10), [#allocation2], %s4088_s4  ;;  %v4177_v55 = vld [vmem:[%s5480_s0 + $0xd4] ss:$52 sps:$4 sm:$0xff] (!%p1040_p10)   ;;  %v4187_v63 = vld [vmem:[%s5480_s0 + $0x270] ss:$52 sps:$4 sm:$0xff] (!%p1040_p10)   ;;  %s4089_s26 = smul.u32 (!%p1040_p10), 56, %s1046_s30 }
  0xa9   : > { %v4132_v18 = vld [vmem:[%s4910_s9 + $0x40] sm:$0xff] (!%p1040_p10)   ;;  %v4134_v20 = vld [vmem:[%s4910_s9 + $0x48] sm:$0xff] (!%p1040_p10)   ;;  %v4136_v22 = vld [vmem:[%s4910_s9 + $0x50] sm:$0xff] (!%p1040_p10)  }
  0xaa   : > { %v4133_v19 = vld [vmem:[%s4910_s9] sm:$0xff] (!%p1040_p10)   ;;  %4071 = vmatprep.subr.bf16.mxu1 (!%p1040_p10), %v4132_v18  ;;  %3664 = vmatprep.subr.bf16.mxu0 (!%p1040_p10), %v4132_v18  ;;  %v4135_v21 = vld [vmem:[%s4910_s9 + $0x8] sm:$0xff] (!%p1040_p10)   ;;  %v4137_v23 = vld [vmem:[%s4910_s9 + $0x10] sm:$0xff] (!%p1040_p10)   ;;  %s5425_s27 = scalar_lea.vmem (!%p1040_p10), [#allocation3], %s4089_s26 }
  0xab   : > { %4079 = vmatpush3.bf16.msra.mxu1 (!%p1040_p10), %v4133_v19  ;;  %3665 = vmatpush3.bf16.msra.mxu0 (!%p1040_p10), %v4133_v19  ;;  %v4138_v24 = vld [vmem:[%s4910_s9 + $0x58] sm:$0xff] (!%p1040_p10)   ;;  %v4140_v26 = vld [vmem:[%s4910_s9 + $0x60] sm:$0xff] (!%p1040_p10)   ;;  %v4142_v28 = vld [vmem:[%s4910_s9 + $0x68] sm:$0xff] (!%p1040_p10)  }
  0xac   : > { %4072 = vmatprep.subr.bf16.mxu1 %v4134_v20  ;;  %3666 = vmatprep.subr.bf16.mxu0 %v4134_v20  ;;  %v4139_v25 = vld [vmem:[%s4910_s9 + $0x18] sm:$0xff]   ;;  %v4141_v27 = vld [vmem:[%s4910_s9 + $0x20] sm:$0xff]   ;;  %v4143_v29 = vld [vmem:[%s4910_s9 + $0x28] sm:$0xff]   ;;  %s3606_s12 = sshll.u32 (%p4466_p6), %s4399_s14, 2 }
  0xad   : > { %v4144_v30 = vld [vmem:[%s4910_s9 + $0x70] sm:$0xff]   ;;  %v4146_v32 = vld [vmem:[%s4910_s9 + $0x78] sm:$0xff]   ;;  %v4151_v34 = vld [vmem:[%s4910_s9 + $0xc0] sm:$0xff]   ;;  %s3206_s29 = scalar_lea.vmem (%p4466_p6), %s5483_s3, %s3606_s12 }
  0xae   : > { %v4145_v31 = vld [vmem:[%s4910_s9 + $0x30] sm:$0xff]   ;;  %v4147_v33 = vld [vmem:[%s4910_s9 + $0x38] sm:$0xff]   ;;  %v4156_v37 = vld [vmem:[%s4910_s9 + $0x140] sm:$0xff]  }
  0xaf   : > { %4080 = vmatpush3.bf16.msra.mxu1 %v4135_v21  ;;  %3667 = vmatpush3.bf16.msra.mxu0 %v4135_v21  ;;  %v4155_v38 = vld [vmem:[%s4910_s9 + $0x80] sm:$0xff]   ;;  %v4158_v40 = vld [vmem:[%s4910_s9 + $0xc8] sm:$0xff]   ;;  %v4162_v46 = vld [vmem:[%s4910_s9 + $0xd0] sm:$0xff]  }
  0xb0   : > { %4073 = vmatprep.subr.bf16.mxu1 %v4136_v22  ;;  %3668 = vmatprep.subr.bf16.mxu0 %v4136_v22  ;;  %v4157_v39 = vld [vmem:[%s4910_s9 + $0x100] sm:$0xff]   ;;  %v4160_v42 = vld [vmem:[%s4910_s9 + $0x148] sm:$0xff]   ;;  %v4167_v48 = vld [vmem:[%s4910_s9 + $0x150] sm:$0xff]  }
  0xb1   : > { %v4159_v44 = vld [vmem:[%s4910_s9 + $0x88] sm:$0xff]   ;;  %v4165_v49 = vld [vmem:[%s4910_s9 + $0x90] sm:$0xff]   ;;  %v4169_v52 = vld [vmem:[%s4910_s9 + $0xd8] sm:$0xff]  }
  0xb2   : > { %v4161_v45 = vld [vmem:[%s4910_s9 + $0x108] sm:$0xff]   ;;  %v4168_v50 = vld [vmem:[%s4910_s9 + $0x110] sm:$0xff]   ;;  %v4174_v53 = vld [vmem:[%s4910_s9 + $0x158] sm:$0xff]  }
  0xb3   : > { %4081 = vmatpush3.bf16.msra.mxu1 %v4137_v23  ;;  %3669 = vmatpush3.bf16.msra.mxu0 %v4137_v23  ;;  %v4172_v54 = vld [vmem:[%s4910_s9 + $0x98] sm:$0xff]   ;;  %v4184_v56 = vld [vmem:[%s5480_s0 + $0x274] ss:$52 sps:$4 sm:$0xff]   ;;  %v4176_v58 = vld [vmem:[%s4910_s9 + $0xe0] sm:$0xff]  }
  0xb4   : > { %4074 = vmatprep.subr.bf16.mxu1 %v4138_v24  ;;  %3670 = vmatprep.subr.bf16.mxu0 %v4138_v24  ;;  %v4175_v57 = vld [vmem:[%s4910_s9 + $0x118] sm:$0xff]   ;;  %v4181_v60 = vld [vmem:[%s4910_s9 + $0x160] sm:$0xff]   ;;  %v4183_v0 = vld [vmem:[%s4910_s9 + $0xe8] sm:$0xff]  }
  0xb5   : > { %v4179_v61 = vld [vmem:[%s4910_s9 + $0xa0] sm:$0xff]   ;;  %v4188_v1 = vld [vmem:[%s4910_s9 + $0x168] sm:$0xff]   ;;  %v4191_v3 = vld [vmem:[%s5480_s0 + $0x13c] ss:$52 sps:$4 sm:$0xff]  }
  0xb6   : > { %v4182_v62 = vld [vmem:[%s4910_s9 + $0x120] sm:$0xff]   ;;  %v4186_v2 = vld [vmem:[%s4910_s9 + $0xa8] sm:$0xff]   ;;  %v4190_v5 = vld [vmem:[%s4910_s9 + $0xf0] sm:$0xff]  }
  0xb7   : > { %4082 = vmatpush3.bf16.msra.mxu1 %v4139_v25  ;;  %3671 = vmatpush3.bf16.msra.mxu0 %v4139_v25  ;;  %v4189_v4 = vld [vmem:[%s4910_s9 + $0x128] sm:$0xff]   ;;  %v4195_v6 = vld [vmem:[%s4910_s9 + $0x170] sm:$0xff]   ;;  %v4197_v11 = vld [vmem:[%s4910_s9 + $0xf8] sm:$0xff]  }
  0xb8   : > { %4075 = vmatprep.subr.bf16.mxu1 %v4140_v26  ;;  %3672 = vmatprep.subr.bf16.mxu0 %v4140_v26  ;;  %v4193_v7 = vld [vmem:[%s4910_s9 + $0xb0] sm:$0xff]   ;;  %v4202_v8 = vld [vmem:[%s5480_s0 + $0xc] ss:$52 sps:$4 sm:$0xff]   ;;  %v4199_v12 = vld [vmem:[%s4910_s9 + $0x178] sm:$0xff]  }
  0xb9   : > { %v4194_v9 = vld [vmem:[%s5480_s0 + $0x138] ss:$52 sps:$4 sm:$0xff]   ;;  %v4196_v10 = vld [vmem:[%s4910_s9 + $0x130] sm:$0xff]   ;;  %v4204_v16 = vld [vmem:[%s4910_s9 + $0x1c0] sm:$0xff]  }
  0xba   : > { %v4198_v13 = vld [vmem:[%s4910_s9 + $0xb8] sm:$0xff]   ;;  %v4207_v14 = vld [vmem:[%s5480_s0 + $0x14] ss:$52 sps:$4 sm:$0xff]   ;;  %v4205_v18 = vld [vmem:[%s5480_s0 + $0x10] ss:$52 sps:$4 sm:$0xff]  }
  0xbb   : > { %4083 = vmatpush3.bf16.msra.mxu1 %v4141_v27  ;;  %3673 = vmatpush3.bf16.msra.mxu0 %v4141_v27  ;;  %v4203_v15 = vld [vmem:[%s4910_s9 + $0x138] sm:$0xff]   ;;  %v4209_v19 = vld [vmem:[%s4910_s9 + $0x240] sm:$0xff]   ;;  %v4211_v22 = vld [vmem:[%s5480_s0 + $0x74] ss:$52 sps:$4 sm:$0xff]  }
  0xbc   : > { %4076 = vmatprep.subr.bf16.mxu1 %v4142_v28  ;;  %3674 = vmatprep.subr.bf16.mxu0 %v4142_v28  ;;  %v4200_v17 = vld [vmem:[%s5480_s0 + $0x8] ss:$52 sps:$4 sm:$0xff]   ;;  %v4208_v20 = vld [vmem:[%s4910_s9 + $0x180] sm:$0xff]  }
  0xbd   : > { %v4210_v21 = vld [vmem:[%s4910_s9 + $0x200] sm:$0xff]   ;;  %v4213_v23 = vld [vmem:[%s4910_s9 + $0x1c8] sm:$0xff]   ;;  %v4216_v24 = vld [vmem:[%s5480_s0 + $0x7c] ss:$52 sps:$4 sm:$0xff]  }
  0xbe   : > { %v4219_v25 = vld [vmem:[%s4910_s9 + $0x248] sm:$0xff]   ;;  %v4214_v28 = vld [vmem:[%s5480_s0 + $0x70] ss:$52 sps:$4 sm:$0xff]  }
  0xbf   : > { %4084 = vmatpush3.bf16.msra.mxu1 %v4143_v29  ;;  %3675 = vmatpush3.bf16.msra.mxu0 %v4143_v29  ;;  %v4215_v26 = vld [vmem:[%s4910_s9 + $0x188] sm:$0xff]   ;;  %v4221_v29 = vld [vmem:[%s4910_s9 + $0x1d0] sm:$0xff]  }
  0xc0   : > { %4077 = vmatprep.subr.bf16.mxu1 %v4144_v30  ;;  %3676 = vmatprep.subr.bf16.mxu0 %v4144_v30  ;;  %v4220_v27 = vld [vmem:[%s4910_s9 + $0x208] sm:$0xff]  }
  0xc1   : > { %v4218_v30 = vld [vmem:[%s5480_s0 + $0x78] ss:$52 sps:$4 sm:$0xff]  }
  0xc3   : > { %4085 = vmatpush3.bf16.msra.mxu1 %v4145_v31  ;;  %3677 = vmatpush3.bf16.msra.mxu0 %v4145_v31  ;;  %v4222_v31 = vld [vmem:[%s5480_s0 + $0xdc] ss:$52 sps:$4 sm:$0xff]  }
  0xc4   : > { %4078 = vmatprep.subr.bf16.mxu1 %v4146_v32  ;;  %3678 = vmatprep.subr.bf16.mxu0 %v4146_v32  ;;  %v4224_v32 = vld [vmem:[%s4910_s9 + $0x190] sm:$0xff]  }
  0xc7   : > { %4086 = vmatpush3.bf16.msra.mxu1 %v4147_v33  ;;  %3679 = vmatpush3.bf16.msra.mxu0 %v4147_v33  ;;  %v4226_v33 = vld [vmem:[%s5480_s0 + $0xe4] ss:$52 sps:$4 sm:$0xff]  }
  0xc8   : > { %3722 = vmatprep.subr.bf16.mxu1 %v4151_v34  ;;  %3780 = vmatprep.subr.bf16.mxu0 %v4156_v37  ;;  %v4229_v34 = vld [vmem:[%s4910_s9 + $0x250] sm:$0xff]   ;;  %v4232_v37 = vld [vmem:[%s4910_s9 + $0x198] sm:$0xff]  }
  0xca   : > { %2553 = vmatmul.mubr.bf16.vlgmr.msra.gmra.mrb[0].mxu1 %v4148_v35  ;;  %2521 = vmatmul.mubr.bf16.vlgmr.msra.gmra.mrb[0].mxu0 %v4152_v36  ;;  %v4230_v35 = vld [vmem:[%s4910_s9 + $0x210] sm:$0xff]   ;;  %v4231_v36 = vld [vmem:[%s4910_s9 + $0x1d8] sm:$0xff]  }
  0xcb   : > { %3723 = vmatpush3.bf16.msra.mxu1 %v4155_v38  ;;  %3781 = vmatpush3.bf16.msra.mxu0 %v4157_v39  ;;  %v4225_v38 = vld [vmem:[%s5480_s0 + $0xd8] ss:$52 sps:$4 sm:$0xff]   ;;  %v4228_v39 = vld [vmem:[%s5480_s0 + $0xe0] ss:$52 sps:$4 sm:$0xff]  }
  0xcc   : > { %3724 = vmatprep.subr.bf16.mxu1 %v4158_v40  ;;  %3782 = vmatprep.subr.bf16.mxu0 %v4160_v42  ;;  %v4233_v40 = vld [vmem:[%s5480_s0 + $0x144] ss:$52 sps:$4 sm:$0xff]  }
  0xcd   : > { %2528 = vmatprep.mubr.bf16.mxu0 %v4163_v41  ;;  %2560 = vmatprep.mubr.bf16.mxu1 %v4170_v43  ;;  %v4236_v41 = vld [vmem:[%s5480_s0 + $0x14c] ss:$52 sps:$4 sm:$0xff]   ;;  %v4239_v42 = vld [vmem:[%s4910_s9 + $0x258] sm:$0xff]  }
  0xce   : > { %v4240_v43 = vld [vmem:[%s4910_s9 + $0x218] sm:$0xff]  }
  0xcf   : > { %3725 = vmatpush3.bf16.msra.mxu1 %v4159_v44  ;;  %3783 = vmatpush3.bf16.msra.mxu0 %v4161_v45  ;;  %v4241_v44 = vld [vmem:[%s4910_s9 + $0x1e0] sm:$0xff]  }
  0xd0   : > { %3726 = vmatprep.subr.bf16.mxu1 %v4162_v46  ;;  %3784 = vmatprep.subr.bf16.mxu0 %v4167_v48  ;;  %v4242_v45 = vld [vmem:[%s4910_s9 + $0x1a0] sm:$0xff]  }
  0xd1   : > { %v4235_v46 = vld [vmem:[%s5480_s0 + $0x140] ss:$52 sps:$4 sm:$0xff]  }
  0xd2   : > { %2529 = vmatmul.mubr.bf16.gmra.mrb[4].mxu0 %v4166_v47  ;;  %2561 = vmatmul.mubr.bf16.gmra.mrb[4].mxu1 %v4173_v51  ;;  %v4238_v47 = vld [vmem:[%s5480_s0 + $0x148] ss:$52 sps:$4 sm:$0xff]   ;;  %v4243_v48 = vld [vmem:[%s5480_s0 + $0x1ac] ss:$52 sps:$4 sm:$0xff]  }
  0xd3   : > { %3727 = vmatpush3.bf16.msra.mxu1 %v4165_v49  ;;  %3785 = vmatpush3.bf16.msra.mxu0 %v4168_v50  ;;  %v4246_v49 = vld [vmem:[%s5480_s0 + $0x1b4] ss:$52 sps:$4 sm:$0xff]   ;;  %v4248_v50 = vld [vmem:[%s4910_s9 + $0x260] sm:$0xff]  }
  0xd4   : > { %3728 = vmatprep.subr.bf16.mxu1 %v4169_v52  ;;  %3786 = vmatprep.subr.bf16.mxu0 %v4174_v53  ;;  %v4250_v51 = vld [vmem:[%s4910_s9 + $0x220] sm:$0xff]   ;;  %v4251_v52 = vld [vmem:[%s4910_s9 + $0x1e8] sm:$0xff]  }
  0xd5   : > { %2536 = vmatprep.mubr.bf16.mxu0 %v4177_v55  ;;  %2568 = vmatprep.mubr.bf16.mxu1 %v4184_v56  ;;  %v4252_v53 = vld [vmem:[%s4910_s9 + $0x1a8] sm:$0xff]   ;;  %v4249_v56 = vld [vmem:[%s5480_s0 + $0x1b0] ss:$52 sps:$4 sm:$0xff]  }
  0xd6   : > { %v4245_v55 = vld [vmem:[%s5480_s0 + $0x1a8] ss:$52 sps:$4 sm:$0xff]  }
  0xd7   : > { %3729 = vmatpush3.bf16.msra.mxu1 %v4172_v54  ;;  %3787 = vmatpush3.bf16.msra.mxu0 %v4175_v57  ;;  %v4256_v54 = vld [vmem:[%s4910_s9 + $0x268] sm:$0xff]  }
  0xd8   : > { %3730 = vmatprep.subr.bf16.mxu1 %v4176_v58  ;;  %3788 = vmatprep.subr.bf16.mxu0 %v4181_v60  ;;  %v4259_v57 = vld [vmem:[%s4910_s9 + $0x228] sm:$0xff]   ;;  %v4261_v60 = vld [vmem:[%s4910_s9 + $0x1f0] sm:$0xff]  }
  0xd9   : > { %v4253_v58 = vld [vmem:[%s5480_s0 + $0x214] ss:$52 sps:$4 sm:$0xff]  }
  0xda   : > { %2537 = vmatmul.mubr.bf16.gmra.mrb[8].mxu0 %v4180_v59  ;;  %2569 = vmatmul.mubr.bf16.gmra.mrb[8].mxu1 %v4187_v63  ;;  %v4257_v59 = vld [vmem:[%s5480_s0 + $0x21c] ss:$52 sps:$4 sm:$0xff]  }
  0xdb   : > { %3731 = vmatpush3.bf16.msra.mxu1 %v4179_v61  ;;  %3789 = vmatpush3.bf16.msra.mxu0 %v4182_v62  ;;  %v4262_v61 = vld [vmem:[%s4910_s9 + $0x1b0] sm:$0xff]  }
  0xdc   : > { %3732 = vmatprep.subr.bf16.mxu1 %v4183_v0  ;;  %3790 = vmatprep.subr.bf16.mxu0 %v4188_v1  ;;  %v4265_v62 = vld [vmem:[%s4910_s9 + $0x270] sm:$0xff]   ;;  %v4260_v1 = vld [vmem:[%s5480_s0 + $0x218] ss:$52 sps:$4 sm:$0xff]  }
  0xdd   : > { %2544 = vmatprep.mubr.bf16.mxu0 %v4191_v3  ;;  %2609 = vmatprep.mubr.bf16.mxu1 %v4202_v8  ;;  %v4267_v63 = vld [vmem:[%s4910_s9 + $0x230] sm:$0xff]   ;;  %v4278_v8 = vld [vmem:[%s4910_s9 + $0x2c0] sm:$0xff]  }
  0xde   : > { %v4255_v0 = vld [vmem:[%s5480_s0 + $0x210] ss:$52 sps:$4 sm:$0xff]  }
  0xdf   : > { %3733 = vmatpush3.bf16.msra.mxu1 %v4186_v2  ;;  %3791 = vmatpush3.bf16.msra.mxu0 %v4189_v4  ;;  %v4270_v2 = vld [vmem:[%s4910_s9 + $0x1f8] sm:$0xff]  }
  0xe0   : > { %3734 = vmatprep.subr.bf16.mxu1 %v4190_v5  ;;  %3792 = vmatprep.subr.bf16.mxu0 %v4195_v6  ;;  %v4263_v3 = vld [vmem:[%s5480_s0 + $0x27c] ss:$52 sps:$4 sm:$0xff]   ;;  %v4268_v6 = vld [vmem:[%s5480_s0 + $0x284] ss:$52 sps:$4 sm:$0xff]  }
  0xe1   : > { %v4272_v4 = vld [vmem:[%s4910_s9 + $0x1b8] sm:$0xff]  }
  0xe2   : > { %2545 = vmatmul.mubr.bf16.gmra.mrb[12].mxu0 %v4194_v9  ;;  %v4273_v5 = vld [vmem:[%s4910_s9 + $0x278] sm:$0xff]  }
  0xe3   : > { %3735 = vmatpush3.bf16.msra.mxu1 %v4193_v7  ;;  %3793 = vmatpush3.bf16.msra.mxu0 %v4196_v10  ;;  %v4277_v7 = vld [vmem:[%s4910_s9 + $0x238] sm:$0xff]   ;;  %v4409_v10 = vmov 0.0  }
  0xe4   : > { %3736 = vmatprep.subr.bf16.mxu1 %v4197_v11  ;;  %3794 = vmatprep.subr.bf16.mxu0 %v4199_v12  ;;  %v4266_v9 = vld [vmem:[%s5480_s0 + $0x278] ss:$52 sps:$4 sm:$0xff]   ;;  %v4271_v11 = vld [vmem:[%s5480_s0 + $0x280] ss:$52 sps:$4 sm:$0xff]   ;;  %v4276_v12 = vld [vmem:[%s5480_s0 + $0x1c] ss:$52 sps:$4 sm:$0xff]  }
  0xe5   : > { %2698 = vmatprep.mubr.bf16.mxu0 %v4207_v14  ;;  %v4274_v14 = vld [vmem:[%s5480_s0 + $0x18] ss:$52 sps:$4 sm:$0xff]  }
  0xe7   : > { %3737 = vmatpush3.bf16.msra.mxu1 %v4198_v13  ;;  %3795 = vmatpush3.bf16.msra.mxu0 %v4203_v15  ;;  %v4281_v13 = vld [vmem:[%s5480_s0 + $0x24] ss:$52 sps:$4 sm:$0xff]   ;;  %v4279_v15 = vld [vmem:[%s5480_s0 + $0x20] ss:$52 sps:$4 sm:$0xff]  }
  0xe8   : > { %3838 = vmatprep.subr.bf16.mxu1 %v4204_v16  ;;  %3896 = vmatprep.subr.bf16.mxu0 %v4209_v19  ;;  %v4282_v16 = vld [vmem:[%s4910_s9 + $0x280] sm:$0xff]   ;;  %v4286_v19 = vld [vmem:[%s4910_s9 + $0x2c8] sm:$0xff]  }
  0xea   : > { %2610 = vmatmul.mubr.bf16.vlgmr.msra.gmra.mrb[12].mxu1 %v4200_v17  ;;  %2699 = vmatmul.mubr.bf16.vlgmr.msra.gmra.mrb[16].mxu0 %v4205_v18  ;;  %v4283_v17 = vld [vmem:[%s4910_s9 + $0x300] sm:$0xff]  }
  0xeb   : > { %3839 = vmatpush3.bf16.msra.mxu1 %v4208_v20  ;;  %3897 = vmatpush3.bf16.msra.mxu0 %v4210_v21  ;;  %v4284_v18 = vld [vmem:[%s5480_s0 + $0x84] ss:$52 sps:$4 sm:$0xff]   ;;  %v4289_v20 = vld [vmem:[%s5480_s0 + $0x8c] ss:$52 sps:$4 sm:$0xff]  }
  0xec   : > { %2617 = vmatprep.mubr.bf16.mxu1 %v4211_v22  ;;  %3840 = vmatprep.subr.bf16.mxu1 %v4213_v23  ;;  %v4288_v21 = vld [vmem:[%s4910_s9 + $0x288] sm:$0xff]   ;;  %v4287_v23 = vld [vmem:[%s5480_s0 + $0x80] ss:$52 sps:$4 sm:$0xff]  }
  0xed   : > { %2706 = vmatprep.mubr.bf16.mxu0 %v4216_v24  ;;  %3898 = vmatprep.subr.bf16.mxu0 %v4219_v25  ;;  %v4292_v22 = vld [vmem:[%s4910_s9 + $0x308] sm:$0xff]   ;;  %v4293_v24 = vld [vmem:[%s4910_s9 + $0x2d0] sm:$0xff]  }
  0xee   : > { %v4291_v25 = vld [vmem:[%s5480_s0 + $0x88] ss:$52 sps:$4 sm:$0xff]  }
  0xef   : > { %3841 = vmatpush3.bf16.msra.mxu1 %v4215_v26  ;;  %3899 = vmatpush3.bf16.msra.mxu0 %v4220_v27  ;;  %v4294_v26 = vld [vmem:[%s5480_s0 + $0xec] ss:$52 sps:$4 sm:$0xff]   ;;  %v4296_v27 = vld [vmem:[%s4910_s9 + $0x290] sm:$0xff]  }
  0xf0   : > { %3842 = vmatprep.subr.bf16.mxu1 %v4221_v29  ;;  %3900 = vmatprep.subr.bf16.mxu0 %v4229_v34  ;;  %v4301_v29 = vld [vmem:[%s4910_s9 + $0x310] sm:$0xff]   ;;  %v4311_v34 = vld [vmem:[%s4910_s9 + $0x2e0] sm:$0xff]  }
  0xf2   : > { %2618 = vmatmul.mubr.bf16.gmra.mrb[16].mxu1 %v4214_v28  ;;  %2707 = vmatmul.mubr.bf16.gmra.mrb[20].mxu0 %v4218_v30  ;;  %v4298_v28 = vld [vmem:[%s5480_s0 + $0xf4] ss:$52 sps:$4 sm:$0xff]   ;;  %v4302_v30 = vld [vmem:[%s4910_s9 + $0x2d8] sm:$0xff]  }
  0xf3   : > { %2625 = vmatprep.mubr.bf16.mxu1 %v4222_v31  ;;  %3843 = vmatpush3.bf16.msra.mxu1 %v4224_v32  ;;  %v4303_v31 = vld [vmem:[%s4910_s9 + $0x298] sm:$0xff]  }
  0xf4   : > { %2714 = vmatprep.mubr.bf16.mxu0 %v4226_v33  ;;  %3901 = vmatpush3.bf16.msra.mxu0 %v4230_v35  ;;  %v4310_v32 = vld [vmem:[%s4910_s9 + $0x318] sm:$0xff]   ;;  %v4300_v35 = vld [vmem:[%s5480_s0 + $0xf0] ss:$52 sps:$4 sm:$0xff]  }
  0xf5   : > { %3844 = vmatprep.subr.bf16.mxu1 %v4231_v36  ;;  %3902 = vmatprep.subr.bf16.mxu0 %v4239_v42  ;;  %v4297_v33 = vld [vmem:[%s5480_s0 + $0xe8] ss:$52 sps:$4 sm:$0xff]   ;;  %v4306_v42 = vld [vmem:[%s5480_s0 + $0x150] ss:$52 sps:$4 sm:$0xff]  }
  0xf6   : > { %v4304_v36 = vld [vmem:[%s5480_s0 + $0x154] ss:$52 sps:$4 sm:$0xff]  }
  0xf7   : > { %3845 = vmatpush3.bf16.msra.mxu1 %v4232_v37  ;;  %v4307_v37 = vld [vmem:[%s5480_s0 + $0x15c] ss:$52 sps:$4 sm:$0xff]  }
  0xf8   : > { %3903 = vmatpush3.bf16.msra.mxu0 %v4240_v43  ;;  %3846 = vmatprep.subr.bf16.mxu1 %v4241_v44  ;;  %v4309_v43 = vld [vmem:[%s5480_s0 + $0x158] ss:$52 sps:$4 sm:$0xff]  }
  0xf9   : > { %3904 = vmatprep.subr.bf16.mxu0 %v4248_v50  ;;  %v4327_v44 = vld [vmem:[%s4910_s9 + $0x328] sm:$0xff]   ;;  %v4337_v50 = vld [vmem:[%s4910_s9 + $0x2f8] sm:$0xff]  }
  0xfa   : > { %2626 = vmatmul.mubr.bf16.gmra.mrb[20].mxu1 %v4225_v38  ;;  %2715 = vmatmul.mubr.bf16.gmra.mrb[24].mxu0 %v4228_v39  ;;  %v4312_v38 = vld [vmem:[%s4910_s9 + $0x2a0] sm:$0xff]  }
  0xfb   : > { %2633 = vmatprep.mubr.bf16.mxu1 %v4233_v40  ;;  %2722 = vmatprep.mubr.bf16.mxu0 %v4236_v41  ;;  %v4319_v39 = vld [vmem:[%s4910_s9 + $0x320] sm:$0xff]   ;;  %v4320_v40 = vld [vmem:[%s4910_s9 + $0x2e8] sm:$0xff]  }
  0xfc   : > { %3847 = vmatpush3.bf16.msra.mxu1 %v4242_v45  ;;  %3905 = vmatpush3.bf16.msra.mxu0 %v4250_v51  ;;  %v4321_v41 = vld [vmem:[%s4910_s9 + $0x2a8] sm:$0xff]   ;;  %v4329_v45 = vld [vmem:[%s4910_s9 + $0x2f0] sm:$0xff]   ;;  %v4339_v51 = vld [vmem:[%s4910_s9 + $0x2b8] sm:$0xff]  }
  0xfd   : > { %3848 = vmatprep.subr.bf16.mxu1 %v4251_v52  ;;  %3906 = vmatprep.subr.bf16.mxu0 %v4256_v54  ;;  %v4315_v52 = vld [vmem:[%s5480_s0 + $0x1b8] ss:$52 sps:$4 sm:$0xff]   ;;  %v4318_v54 = vld [vmem:[%s5480_s0 + $0x1c0] ss:$52 sps:$4 sm:$0xff]  }
 0x100   : > { %3849 = vmatpush3.bf16.msra.mxu1 %v4252_v53  ;;  %3907 = vmatpush3.bf16.msra.mxu0 %v4259_v57  ;;  %v4343_v53 = vld [vmem:[%s4910_s9 + $0x338] sm:$0xff]   ;;  %v4324_v57 = vld [vmem:[%s5480_s0 + $0x220] ss:$52 sps:$4 sm:$0xff]  }
 0x101   : > { %3850 = vmatprep.subr.bf16.mxu1 %v4261_v60  ;;  %3908 = vmatprep.subr.bf16.mxu0 %v4265_v62  ;;  %v4335_v60 = vld [vmem:[%s5480_s0 + $0x294] ss:$52 sps:$4 sm:$0xff]   ;;  %v4338_v62 = vld [vmem:[%s5480_s0 + $0x290] ss:$52 sps:$4 sm:$0xff]  }
 0x102   : > { %2634 = vmatmul.mubr.bf16.gmra.mrb[24].mxu1 %v4235_v46  ;;  %2723 = vmatmul.mubr.bf16.gmra.mrb[28].mxu0 %v4238_v47  ;;  %v4313_v46 = vld [vmem:[%s5480_s0 + $0x1bc] ss:$52 sps:$4 sm:$0xff]   ;;  %v4316_v47 = vld [vmem:[%s5480_s0 + $0x1c4] ss:$52 sps:$4 sm:$0xff]  }
 0x103   : > { %2641 = vmatprep.mubr.bf16.mxu1 %v4243_v48  ;;  %2730 = vmatprep.mubr.bf16.mxu0 %v4246_v49  ;;  %v4330_v48 = vld [vmem:[%s4910_s9 + $0x2b0] sm:$0xff]  }
 0x104   : > { %3851 = vmatpush3.bf16.msra.mxu1 %v4262_v61  ;;  %3909 = vmatpush3.bf16.msra.mxu0 %v4267_v63  ;;  %v4334_v49 = vld [vmem:[%s4910_s9 + $0x330] sm:$0xff]   ;;  %v4333_v61 = vld [vmem:[%s5480_s0 + $0x288] ss:$52 sps:$4 sm:$0xff]   ;;  %v4342_v63 = vld [vmem:[%s5480_s0 + $0x2c] ss:$52 sps:$4 sm:$0xff]   ;;  %s1085_s9 = scalar_select %p1084_p11, %s4399_s14, 1 }
 0x105   : > { %3852 = vmatprep.subr.bf16.mxu1 %v4270_v2  ;;  %3910 = vmatprep.subr.bf16.mxu0 %v4273_v5  ;;  %v4345_v2 = vld [vmem:[%s5480_s0 + $0x94] ss:$52 sps:$4 sm:$0xff]   ;;  %v4349_v5 = vld [vmem:[%s5480_s0 + $0xfc] ss:$52 sps:$4 sm:$0xff]  }
 0x106   : > { %s1086_s25 = scalar_lea.vmem %s5482_s2, %s1085_s9 }
 0x108   : > { %3853 = vmatpush3.bf16.msra.mxu1 %v4272_v4  ;;  %3911 = vmatpush3.bf16.msra.mxu0 %v4277_v7  ;;  %v4348_v4 = vld [vmem:[%s5480_s0 + $0x98] ss:$52 sps:$4 sm:$0xff]   ;;  %v4352_v7 = vld [vmem:[%s5480_s0 + $0x100] ss:$52 sps:$4 sm:$0xff]  }
 0x109   : > { %3954 = vmatprep.subr.bf16.mxu1 %v4278_v8  ;;  %4027 = vmatprep.subr.bf16.mxu0 %v4409_v10  ;;  %v4353_v8 = vld [vmem:[%s5480_s0 + $0x164] ss:$52 sps:$4 sm:$0xff]  }
 0x10a   : > { %2642 = vmatmul.mubr.bf16.gmra.mrb[28].mxu1 %v4245_v55  ;;  %2731 = vmatmul.mubr.bf16.gmra.mrb[32].mxu0 %v4249_v56  ;;  %v4322_v55 = vld [vmem:[%s5480_s0 + $0x224] ss:$52 sps:$4 sm:$0xff]   ;;  %v4325_v56 = vld [vmem:[%s5480_s0 + $0x22c] ss:$52 sps:$4 sm:$0xff]  }
 0x10b   : > { %2649 = vmatprep.mubr.bf16.mxu1 %v4253_v58  ;;  %2738 = vmatprep.mubr.bf16.mxu0 %v4257_v59  ;;  %v4328_v58 = vld [vmem:[%s5480_s0 + $0x228] ss:$52 sps:$4 sm:$0xff]   ;;  %v4331_v59 = vld [vmem:[%s5480_s0 + $0x28c] ss:$52 sps:$4 sm:$0xff]  }
 0x112   : > { %2650 = vmatmul.mubr.bf16.gmra.mrb[32].mxu1 %v4255_v0  ;;  %2739 = vmatmul.mubr.bf16.gmra.mrb[36].mxu0 %v4260_v1  ;;  %v4340_v0 = vld [vmem:[%s5480_s0 + $0x28] ss:$52 sps:$4 sm:$0xff]   ;;  %v4344_v1 = vld [vmem:[%s5480_s0 + $0x30] ss:$52 sps:$4 sm:$0xff]  }
 0x113   : > { %2657 = vmatprep.mubr.bf16.mxu1 %v4263_v3  ;;  %2746 = vmatprep.mubr.bf16.mxu0 %v4268_v6  ;;  %v4347_v3 = vld [vmem:[%s5480_s0 + $0x90] ss:$52 sps:$4 sm:$0xff]   ;;  %v4351_v6 = vld [vmem:[%s5480_s0 + $0xf8] ss:$52 sps:$4 sm:$0xff]  }
 0x11a   : > { %2658 = vmatmul.mubr.bf16.gmra.mrb[36].mxu1 %v4266_v9  ;;  %2747 = vmatmul.mubr.bf16.gmra.mrb[40].mxu0 %v4271_v11  ;;  %v4355_v9 = vld [vmem:[%s5480_s0 + $0x160] ss:$52 sps:$4 sm:$0xff]   ;;  %v4356_v11 = vld [vmem:[%s5480_s0 + $0x168] ss:$52 sps:$4 sm:$0xff]  }
 0x11b   : > { %2787 = vmatprep.mubr.bf16.mxu1 %v4276_v12  ;;  %2876 = vmatprep.mubr.bf16.mxu0 %v4281_v13  ;;  %v4357_v12 = vld [vmem:[%s5480_s0 + $0x1cc] ss:$52 sps:$4 sm:$0xff]   ;;  %v4359_v13 = vld [vmem:[%s5480_s0 + $0x1c8] ss:$52 sps:$4 sm:$0xff]  }
 0x122   : > { %2788 = vmatmul.mubr.bf16.vlgmr.msra.gmra.mrb[40].mxu1 %v4274_v14  ;;  %2877 = vmatmul.mubr.bf16.vlgmr.msra.gmra.mrb[44].mxu0 %v4279_v15  ;;  %v4360_v14 = vld [vmem:[%s5480_s0 + $0x1d0] ss:$52 sps:$4 sm:$0xff]   ;;  %v4361_v15 = vld [vmem:[%s5480_s0 + $0x234] ss:$52 sps:$4 sm:$0xff]  }
 0x123   : > { %3955 = vmatpush3.bf16.msra.mxu1 %v4282_v16  ;;  %4028 = vmatpush3.bf16.msra.mxu0 %v4283_v17  ;;  %v4363_v16 = vld [vmem:[%s5480_s0 + $0x230] ss:$52 sps:$4 sm:$0xff]   ;;  %v4364_v17 = vld [vmem:[%s5480_s0 + $0x238] ss:$52 sps:$4 sm:$0xff]  }
 0x124   : > { %2795 = vmatprep.mubr.bf16.mxu1 %v4284_v18  ;;  %3956 = vmatprep.subr.bf16.mxu1 %v4286_v19  ;;  %v4365_v18 = vld [vmem:[%s5480_s0 + $0x29c] ss:$52 sps:$4 sm:$0xff]   ;;  %v4367_v19 = vld [vmem:[%s5480_s0 + $0x298] ss:$52 sps:$4 sm:$0xff]  }
 0x125   : > { %2884 = vmatprep.mubr.bf16.mxu0 %v4289_v20  ;;  %4029 = vmatprep.subr.bf16.mxu0 %v4409_v10  ;;  %v4368_v20 = vld [vmem:[%s5480_s0 + $0x2a0] ss:$52 sps:$4 sm:$0xff]  }
 0x127   : > { %3957 = vmatpush3.bf16.msra.mxu1 %v4288_v21  ;;  %4030 = vmatpush3.bf16.msra.mxu0 %v4292_v22 }
 0x128   : > { %3958 = vmatprep.subr.bf16.mxu1 %v4293_v24  ;;  %4031 = vmatprep.subr.bf16.mxu0 %v4409_v10 }
 0x12a   : > { %2796 = vmatmul.mubr.bf16.gmra.mrb[44].mxu1 %v4287_v23  ;;  %2885 = vmatmul.mubr.bf16.gmra.mrb[48].mxu0 %v4291_v25 }
 0x12b   : > { %2803 = vmatprep.mubr.bf16.mxu1 %v4294_v26  ;;  %3959 = vmatpush3.bf16.msra.mxu1 %v4296_v27 }
 0x12c   : > { %2892 = vmatprep.mubr.bf16.mxu0 %v4298_v28  ;;  %4032 = vmatpush3.bf16.msra.mxu0 %v4301_v29 }
 0x12d   : > { %3960 = vmatprep.subr.bf16.mxu1 %v4302_v30  ;;  %4033 = vmatprep.subr.bf16.mxu0 %v4409_v10 }
 0x12f   : > { %3961 = vmatpush3.bf16.msra.mxu1 %v4303_v31 }
 0x130   : > { %4034 = vmatpush3.bf16.msra.mxu0 %v4310_v32  ;;  %3962 = vmatprep.subr.bf16.mxu1 %v4311_v34 }
 0x131   : > { %4035 = vmatprep.subr.bf16.mxu0 %v4409_v10 }
 0x132   : > { %2804 = vmatmul.mubr.bf16.gmra.mrb[48].mxu1 %v4297_v33  ;;  %2893 = vmatmul.mubr.bf16.gmra.mrb[52].mxu0 %v4300_v35 }
 0x133   : > { %2811 = vmatprep.mubr.bf16.mxu1 %v4304_v36  ;;  %2900 = vmatprep.mubr.bf16.mxu0 %v4307_v37 }
 0x134   : > { %3963 = vmatpush3.bf16.msra.mxu1 %v4312_v38  ;;  %4036 = vmatpush3.bf16.msra.mxu0 %v4319_v39 }
 0x135   : > { %3964 = vmatprep.subr.bf16.mxu1 %v4320_v40  ;;  %4037 = vmatprep.subr.bf16.mxu0 %v4409_v10 }
 0x138   : > { %3965 = vmatpush3.bf16.msra.mxu1 %v4321_v41  ;;  %4038 = vmatpush3.bf16.msra.mxu0 %v4327_v44 }
 0x139   : > { %3966 = vmatprep.subr.bf16.mxu1 %v4329_v45  ;;  %4039 = vmatprep.subr.bf16.mxu0 %v4409_v10 }
 0x13a   : > { %2812 = vmatmul.mubr.bf16.gmra.mrb[52].mxu1 %v4306_v42  ;;  %2901 = vmatmul.mubr.bf16.gmra.mrb[56].mxu0 %v4309_v43 }
 0x13b   : > { %2819 = vmatprep.mubr.bf16.mxu1 %v4313_v46  ;;  %2908 = vmatprep.mubr.bf16.mxu0 %v4316_v47 }
 0x13c   : > { %3967 = vmatpush3.bf16.msra.mxu1 %v4330_v48  ;;  %4040 = vmatpush3.bf16.msra.mxu0 %v4334_v49 }
 0x13d   : > { %3968 = vmatprep.subr.bf16.mxu1 %v4337_v50  ;;  %4041 = vmatprep.subr.bf16.mxu0 %v4409_v10 }
 0x140   : > { %3969 = vmatpush3.bf16.msra.mxu1 %v4339_v51  ;;  %4042 = vmatpush3.bf16.msra.mxu0 %v4343_v53 }
 0x142   : > { %2820 = vmatmul.mubr.bf16.gmra.mrb[56].mxu1 %v4315_v52  ;;  %2909 = vmatmul.mubr.bf16.gmra.mrb[60].mxu0 %v4318_v54 }
 0x143   : > { %2827 = vmatprep.mubr.bf16.mxu1 %v4322_v55  ;;  %2916 = vmatprep.mubr.bf16.mxu0 %v4325_v56 }
 0x14a   : > { %2828 = vmatmul.mubr.bf16.gmra.mrb[60].mxu1 %v4324_v57  ;;  %2917 = vmatmul.mubr.bf16.gmra.mrb[64].mxu0 %v4328_v58 }
 0x14b   : > { %2835 = vmatprep.mubr.bf16.mxu1 %v4331_v59  ;;  %2924 = vmatprep.mubr.bf16.mxu0 %v4335_v60 }
 0x152   : > { %2836 = vmatmul.mubr.bf16.gmra.mrb[64].mxu1 %v4333_v61  ;;  %2925 = vmatmul.mubr.bf16.gmra.mrb[68].mxu0 %v4338_v62 }
 0x153   : > { %2965 = vmatprep.mubr.bf16.mxu1 %v4342_v63  ;;  %4043 = vmatprep.mubr.msk.bf16.mxu0 %vm4410_vm0, %v4409_v10 }
 0x15a   : > { %2966 = vmatmul.mubr.bf16.vlgmr.msra.gmra.mrb[68].mxu1 %v4340_v0  ;;  %4044 = vmatmul.mubr.bf16.vlgmr.msra.gmra.mrb[72].mxu0 %v4344_v1  ;;  %v5326_v0 = vld [vmem:[%s1086_s25] ss:$0 sm:$0xff] }
 0x15b   : > { %2973 = vmatprep.mubr.bf16.mxu1 %v4345_v2  ;;  %4047 = vmatprep.mubr.msk.bf16.mxu0 %vm4410_vm0, %v4409_v10 }
 0x162   : > { %2974 = vmatmul.mubr.bf16.gmra.mrb[72].mxu1 %v4347_v3  ;;  %4048 = vmatmul.mubr.bf16.gmra.mrb[76].mxu0 %v4348_v4 }
 0x163   : > { %2981 = vmatprep.mubr.bf16.mxu1 %v4349_v5  ;;  %4051 = vmatprep.mubr.msk.bf16.mxu0 %vm4410_vm0, %v4409_v10 }
 0x16a   : > { %2982 = vmatmul.mubr.bf16.gmra.mrb[76].mxu1 %v4351_v6  ;;  %4052 = vmatmul.mubr.bf16.gmra.mrb[80].mxu0 %v4352_v7 }
 0x16b   : > { %2989 = vmatprep.mubr.bf16.mxu1 %v4353_v8  ;;  %4055 = vmatprep.mubr.msk.bf16.mxu0 %vm4410_vm0, %v4409_v10 }
 0x172   : > { %2990 = vmatmul.mubr.bf16.gmra.mrb[80].mxu1 %v4355_v9  ;;  %4056 = vmatmul.mubr.bf16.gmra.mrb[84].mxu0 %v4356_v11 }
 0x173   : > { %2997 = vmatprep.mubr.bf16.mxu1 %v4357_v12  ;;  %4059 = vmatprep.mubr.msk.bf16.mxu0 %vm4410_vm0, %v4409_v10 }
 0x17a   : > { %2998 = vmatmul.mubr.bf16.gmra.mrb[84].mxu1 %v4359_v13  ;;  %4060 = vmatmul.mubr.bf16.gmra.mrb[88].mxu0 %v4360_v14 }
 0x17b   : > { %3005 = vmatprep.mubr.bf16.mxu1 %v4361_v15  ;;  %4063 = vmatprep.mubr.msk.bf16.mxu0 %vm4410_vm0, %v4409_v10 }
 0x182   : > { %3006 = vmatmul.mubr.bf16.gmra.mrb[88].mxu1 %v4363_v16  ;;  %4064 = vmatmul.mubr.bf16.gmra.mrb[92].mxu0 %v4364_v17 }
 0x183   : > { %3013 = vmatprep.mubr.bf16.mxu1 %v4365_v18  ;;  %4067 = vmatprep.mubr.msk.bf16.mxu0 %vm4410_vm0, %v4409_v10 }
 0x18a   : > { %3014 = vmatmul.mubr.bf16.gmra.mrb[92].mxu1 %v4367_v19  ;;  %4068 = vmatmul.mubr.bf16.gmra.mrb[96].mxu0 %v4368_v20 }
 0x19d   : > { %v3704_v21 = vpop.f32.mrb[0].mxu1  ;;  %v3680_v22 = vpop.f32.mrb[0].mxu0 }
 0x19e   : > { %v3705_v23 = vpop.f32.mrb[1].mxu1  ;;  %v3681_v24 = vpop.f32.mrb[1].mxu0 }
 0x19f   : > { %v5305_v25 = vadd.f32 %v3705_v23, %v3704_v21  ;;  %v3707_v26 = vpop.f32.mrb[2].mxu1  ;;  %v3682_v27 = vadd.f32 %v3681_v24, %v3680_v22  ;;  %v3683_v28 = vpop.f32.mrb[2].mxu0 }
 0x1a0   : > { %v3708_v10 = vpop.f32.mrb[3].mxu1  ;;  %v3684_v29 = vpop.f32.mrb[3].mxu0 }
 0x1a1   : > { %v5307_v30 = vadd.f32 %v3708_v10, %v3707_v26  ;;  %v3685_v31 = vadd.f32 %v3684_v29, %v3683_v28  ;;  %v2523_v3 = vadd.f32 %v3682_v27, %v5326_v0 }
 0x1a3   : > { %v2526_v11 = vadd.f32 %v3685_v31, %v5326_v0 }
 0x1a5   : > { %v3686_v32 = vpop.f32.mrb[4].mxu0  ;;  %v3710_v33 = vpop.f32.mrb[4].mxu1 }
 0x1a6   : > { %v3687_v34 = vpop.f32.mrb[5].mxu0  ;;  %v3711_v35 = vpop.f32.mrb[5].mxu1 }
 0x1a7   : > { %v3688_v36 = vadd.f32 %v3687_v34, %v3686_v32  ;;  %v3689_v37 = vpop.f32.mrb[6].mxu0  ;;  %v5309_v38 = vadd.f32 %v3711_v35, %v3710_v33  ;;  %v3713_v39 = vpop.f32.mrb[6].mxu1 }
 0x1a8   : > { %v3690_v40 = vpop.f32.mrb[7].mxu0  ;;  %v3714_v41 = vpop.f32.mrb[7].mxu1 }
 0x1a9   : > { %v3691_v42 = vadd.f32 %v3690_v40, %v3689_v37  ;;  %v5311_v43 = vadd.f32 %v3714_v41, %v3713_v39  ;;  %v2531_v22 = vadd.f32 %v3688_v36, %v5326_v0 }
 0x1ab   : > { %v2534_v29 = vadd.f32 %v3691_v42, %v5326_v0 }
 0x1ad   : > { %v3692_v44 = vpop.f32.mrb[8].mxu0  ;;  %v3716_v45 = vpop.f32.mrb[8].mxu1 }
 0x1ae   : > { %v3693_v46 = vpop.f32.mrb[9].mxu0  ;;  %v3717_v47 = vpop.f32.mrb[9].mxu1 }
 0x1af   : > { %v3694_v48 = vadd.f32 %v3693_v46, %v3692_v44  ;;  %v3695_v49 = vpop.f32.mrb[10].mxu0  ;;  %v5313_v50 = vadd.f32 %v3717_v47, %v3716_v45  ;;  %v3719_v51 = vpop.f32.mrb[10].mxu1 }
 0x1b0   : > { %v3696_v52 = vpop.f32.mrb[11].mxu0  ;;  %v3720_v53 = vpop.f32.mrb[11].mxu1 }
 0x1b1   : > { %v3697_v54 = vadd.f32 %v3696_v52, %v3695_v49  ;;  %v5315_v55 = vadd.f32 %v3720_v53, %v3719_v51  ;;  %v2539_v44 = vadd.f32 %v3694_v48, %v5326_v0 }
 0x1b3   : > { %v2542_v52 = vadd.f32 %v3697_v54, %v5326_v0 }
 0x1b5   : > { %v3698_v56 = vpop.f32.mrb[12].mxu0 }
 0x1b6   : > { %v3699_v57 = vpop.f32.mrb[13].mxu0 }
 0x1b7   : > { %v5319_v58 = vadd.f32 %v3699_v57, %v3698_v56  ;;  %v3701_v59 = vpop.f32.mrb[14].mxu0 }
 0x1b8   : > { %v3702_v60 = vpop.f32.mrb[15].mxu0 }
 0x1b9   : > { %v5321_v61 = vadd.f32 %v3702_v60, %v3701_v59 }
 0x1bd   : > { %v3738_v62 = vpop.f32.mrb[12].mxu1  ;;  %v3796_v63 = vpop.f32.mrb[16].mxu0 }
 0x1be   : > { %v3739_v1 = vpop.f32.mrb[13].mxu1  ;;  %v3797_v2 = vpop.f32.mrb[17].mxu0 }
 0x1bf   : > { %v3740_v4 = vadd.f32 %v3739_v1, %v3738_v62  ;;  %v3741_v5 = vpop.f32.mrb[14].mxu1  ;;  %v3798_v6 = vadd.f32 %v3797_v2, %v3796_v63  ;;  %v3799_v7 = vpop.f32.mrb[18].mxu0 }
 0x1c0   : > { %v3742_v8 = vpop.f32.mrb[15].mxu1  ;;  %v3800_v9 = vpop.f32.mrb[19].mxu0 }
 0x1c1   : > { %v2612_v12 = vadd.f32 %v3740_v4, %v2523_v3  ;;  %v3743_v13 = vadd.f32 %v3742_v8, %v3741_v5  ;;  %v3801_v14 = vadd.f32 %v3800_v9, %v3799_v7  ;;  %v2547_v3 = vadd.f32 %v5319_v58, %v5326_v0 }
 0x1c2   : > { %v2550_v9 = vadd.f32 %v5321_v61, %v5326_v0 }
 0x1c3   : > { %v2615_v15 = vadd.f32 %v3743_v13, %v2526_v11  ;;  %v5330_v16 = vadd.f32 %v3798_v6, %v2612_v12 }
 0x1c5   : > { %v5332_v17 = vadd.f32 %v3801_v14, %v2615_v15  ;;  %v3744_v18 = vpop.f32.mrb[16].mxu1  ;;  %v3802_v19 = vpop.f32.mrb[20].mxu0 }
 0x1c6   : > { %v3745_v20 = vpop.f32.mrb[17].mxu1  ;;  %v3803_v21 = vpop.f32.mrb[21].mxu0 }
 0x1c7   : > { %v3746_v23 = vadd.f32 %v3745_v20, %v3744_v18  ;;  %v3747_v24 = vpop.f32.mrb[18].mxu1  ;;  %v3804_v26 = vadd.f32 %v3803_v21, %v3802_v19  ;;  %v3805_v27 = vpop.f32.mrb[22].mxu0 }
 0x1c8   : > { %v3748_v28 = vpop.f32.mrb[19].mxu1  ;;  %v3806_v10 = vpop.f32.mrb[23].mxu0 }
 0x1c9   : > { %v2620_v31 = vadd.f32 %v3746_v23, %v2531_v22  ;;  %v3749_v32 = vadd.f32 %v3748_v28, %v3747_v24  ;;  %v3807_v33 = vadd.f32 %v3806_v10, %v3805_v27  ;;  %v2555_v22 = vadd.f32 %v5305_v25, %v5326_v0 }
 0x1ca   : > { %v2558_v10 = vadd.f32 %v5307_v30, %v5326_v0 }
 0x1cb   : > { %v2623_v34 = vadd.f32 %v3749_v32, %v2534_v29  ;;  %v5336_v35 = vadd.f32 %v3804_v26, %v2620_v31 }
 0x1cd   : > { %v5338_v37 = vadd.f32 %v3807_v33, %v2623_v34  ;;  %v3750_v39 = vpop.f32.mrb[20].mxu1  ;;  %v3808_v40 = vpop.f32.mrb[24].mxu0 }
 0x1ce   : > { %v3751_v41 = vpop.f32.mrb[21].mxu1  ;;  %v3809_v36 = vpop.f32.mrb[25].mxu0 }
 0x1cf   : > { %v3752_v45 = vadd.f32 %v3751_v41, %v3750_v39  ;;  %v3753_v46 = vpop.f32.mrb[22].mxu1  ;;  %v3810_v47 = vadd.f32 %v3809_v36, %v3808_v40  ;;  %v3811_v49 = vpop.f32.mrb[26].mxu0 }
 0x1d0   : > { %v3754_v51 = vpop.f32.mrb[23].mxu1  ;;  %v3812_v42 = vpop.f32.mrb[27].mxu0 }
 0x1d1   : > { %v2628_v53 = vadd.f32 %v3752_v45, %v2539_v44  ;;  %v3755_v56 = vadd.f32 %v3754_v51, %v3753_v46  ;;  %v3813_v57 = vadd.f32 %v3812_v42, %v3811_v49  ;;  %v2563_v44 = vadd.f32 %v5309_v38, %v5326_v0 }
 0x1d2   : > { %v2566_v42 = vadd.f32 %v5311_v43, %v5326_v0 }
 0x1d3   : > { %v2631_v59 = vadd.f32 %v3755_v56, %v2542_v52  ;;  %v5342_v60 = vadd.f32 %v3810_v47, %v2628_v53 }
 0x1d5   : > { %v5344_v62 = vadd.f32 %v3813_v57, %v2631_v59  ;;  %v3756_v63 = vpop.f32.mrb[24].mxu1  ;;  %v3814_v1 = vpop.f32.mrb[28].mxu0 }
 0x1d6   : > { %v3757_v2 = vpop.f32.mrb[25].mxu1  ;;  %v3815_v48 = vpop.f32.mrb[29].mxu0 }
 0x1d7   : > { %v3758_v4 = vadd.f32 %v3757_v2, %v3756_v63  ;;  %v3759_v5 = vpop.f32.mrb[26].mxu1  ;;  %v3816_v6 = vadd.f32 %v3815_v48, %v3814_v1  ;;  %v3817_v7 = vpop.f32.mrb[30].mxu0 }
 0x1d8   : > { %v3760_v54 = vpop.f32.mrb[27].mxu1  ;;  %v3818_v8 = vpop.f32.mrb[31].mxu0 }
 0x1d9   : > { %v2636_v11 = vadd.f32 %v3758_v4, %v2547_v3  ;;  %v3761_v12 = vadd.f32 %v3760_v54, %v3759_v5  ;;  %v3819_v13 = vadd.f32 %v3818_v8, %v3817_v7  ;;  %v2571_v3 = vadd.f32 %v5313_v50, %v5326_v0 }
 0x1da   : > { %v2574_v8 = vadd.f32 %v5315_v55, %v5326_v0 }
 0x1db   : > { %v2639_v14 = vadd.f32 %v3761_v12, %v2550_v9  ;;  %v5350_v15 = vadd.f32 %v3816_v6, %v2636_v11 }
 0x1dd   : > { %v5352_v18 = vadd.f32 %v3819_v13, %v2639_v14  ;;  %v3762_v19 = vpop.f32.mrb[28].mxu1  ;;  %v3820_v20 = vpop.f32.mrb[32].mxu0 }
 0x1de   : > { %v3763_v58 = vpop.f32.mrb[29].mxu1  ;;  %v3821_v21 = vpop.f32.mrb[33].mxu0 }
 0x1df   : > { %v3764_v23 = vadd.f32 %v3763_v58, %v3762_v19  ;;  %v3765_v24 = vpop.f32.mrb[30].mxu1  ;;  %v3822_v26 = vadd.f32 %v3821_v21, %v3820_v20  ;;  %v3823_v27 = vpop.f32.mrb[34].mxu0 }
 0x1e0   : > { %v3766_v61 = vpop.f32.mrb[31].mxu1  ;;  %v3824_v28 = vpop.f32.mrb[35].mxu0 }
 0x1e1   : > { %v2644_v29 = vadd.f32 %v3764_v23, %v2555_v22  ;;  %v3767_v31 = vadd.f32 %v3766_v61, %v3765_v24  ;;  %v3825_v32 = vadd.f32 %v3824_v28, %v3823_v27 }
 0x1e3   : > { %v2647_v33 = vadd.f32 %v3767_v31, %v2558_v10  ;;  %v5358_v34 = vadd.f32 %v3822_v26, %v2644_v29 }
 0x1e5   : > { %v5360_v39 = vadd.f32 %v3825_v32, %v2647_v33  ;;  %v3768_v40 = vpop.f32.mrb[32].mxu1  ;;  %v3826_v41 = vpop.f32.mrb[36].mxu0 }
 0x1e6   : > { %v3769_v25 = vpop.f32.mrb[33].mxu1  ;;  %v3827_v36 = vpop.f32.mrb[37].mxu0 }
 0x1e7   : > { %v3770_v45 = vadd.f32 %v3769_v25, %v3768_v40  ;;  %v3771_v46 = vpop.f32.mrb[34].mxu1  ;;  %v3828_v47 = vadd.f32 %v3827_v36, %v3826_v41  ;;  %v3829_v49 = vpop.f32.mrb[38].mxu0 }
 0x1e8   : > { %v3772_v30 = vpop.f32.mrb[35].mxu1  ;;  %v3830_v51 = vpop.f32.mrb[39].mxu0 }
 0x1e9   : > { %v2652_v52 = vadd.f32 %v3770_v45, %v2563_v44  ;;  %v3773_v53 = vadd.f32 %v3772_v30, %v3771_v46  ;;  %v3831_v56 = vadd.f32 %v3830_v51, %v3829_v49 }
 0x1eb   : > { %v2655_v57 = vadd.f32 %v3773_v53, %v2566_v42  ;;  %v5366_v59 = vadd.f32 %v3828_v47, %v2652_v52 }
 0x1ed   : > { %v5368_v63 = vadd.f32 %v3831_v56, %v2655_v57  ;;  %v3774_v1 = vpop.f32.mrb[36].mxu1  ;;  %v3832_v2 = vpop.f32.mrb[40].mxu0 }
 0x1ee   : > { %v3775_v38 = vpop.f32.mrb[37].mxu1  ;;  %v3833_v48 = vpop.f32.mrb[41].mxu0 }
 0x1ef   : > { %v3776_v4 = vadd.f32 %v3775_v38, %v3774_v1  ;;  %v3777_v5 = vpop.f32.mrb[38].mxu1  ;;  %v3834_v6 = vadd.f32 %v3833_v48, %v3832_v2  ;;  %v3835_v7 = vpop.f32.mrb[42].mxu0 }
 0x1f0   : > { %v3778_v43 = vpop.f32.mrb[39].mxu1  ;;  %v3836_v54 = vpop.f32.mrb[43].mxu0 }
 0x1f1   : > { %v2660_v9 = vadd.f32 %v3776_v4, %v2571_v3  ;;  %v3779_v11 = vadd.f32 %v3778_v43, %v3777_v5  ;;  %v3837_v12 = vadd.f32 %v3836_v54, %v3835_v7 }
 0x1f3   : > { %v2663_v13 = vadd.f32 %v3779_v11, %v2574_v8  ;;  %v5374_v14 = vadd.f32 %v3834_v6, %v2660_v9 }
 0x1f5   : > { %v5376_v19 = vadd.f32 %v3837_v12, %v2663_v13  ;;  %v3854_v20 = vpop.f32.mrb[40].mxu1  ;;  %v3912_v58 = vpop.f32.mrb[44].mxu0 }
 0x1f6   : > { %v3855_v50 = vpop.f32.mrb[41].mxu1  ;;  %v3913_v21 = vpop.f32.mrb[45].mxu0 }
 0x1f7   : > { %v3856_v22 = vadd.f32 %v3855_v50, %v3854_v20  ;;  %v3857_v23 = vpop.f32.mrb[42].mxu1  ;;  %v3914_v24 = vadd.f32 %v3913_v21, %v3912_v58  ;;  %v3915_v26 = vpop.f32.mrb[46].mxu0 }
 0x1f8   : > { %v3858_v27 = vpop.f32.mrb[43].mxu1  ;;  %v3916_v61 = vpop.f32.mrb[47].mxu0 }
 0x1f9   : > { %v2790_v55 = vadd.f32 %v3856_v22, %v5330_v16  ;;  %v3859_v0 = vadd.f32 %v3858_v27, %v3857_v23  ;;  %v3917_v28 = vadd.f32 %v3916_v61, %v3915_v26 }
 0x1fb   : > { %v2793_v10 = vadd.f32 %v3859_v0, %v5332_v17  ;;  %v5380_v29 = vadd.f32 %v3914_v24, %v2790_v55 }
 0x1fd   : > { %v5382_v31 = vadd.f32 %v3917_v28, %v2793_v10  ;;  %v3860_v32 = vpop.f32.mrb[44].mxu1  ;;  %v3918_v33 = vpop.f32.mrb[48].mxu0 }
 0x1fe   : > { %v3861_v40 = vpop.f32.mrb[45].mxu1  ;;  %v3919_v41 = vpop.f32.mrb[49].mxu0 }
 0x1ff   : > { %v3862_v25 = vadd.f32 %v3861_v40, %v3860_v32  ;;  %v3863_v36 = vpop.f32.mrb[46].mxu1  ;;  %v3920_v44 = vadd.f32 %v3919_v41, %v3918_v33  ;;  %v3921_v45 = vpop.f32.mrb[50].mxu0 }
 0x200   : > { %v3864_v46 = vpop.f32.mrb[47].mxu1  ;;  %v3922_v47 = vpop.f32.mrb[51].mxu0 }
 0x201   : > { %v2798_v16 = vadd.f32 %v3862_v25, %v5336_v35  ;;  %v3865_v49 = vadd.f32 %v3864_v46, %v3863_v36  ;;  %v3923_v30 = vadd.f32 %v3922_v47, %v3921_v45 }
 0x203   : > { %v2801_v17 = vadd.f32 %v3865_v49, %v5338_v37  ;;  %v5386_v51 = vadd.f32 %v3920_v44, %v2798_v16 }
 0x205   : > { %v5388_v42 = vadd.f32 %v3923_v30, %v2801_v17  ;;  %v3866_v52 = vpop.f32.mrb[48].mxu1  ;;  %v3924_v53 = vpop.f32.mrb[52].mxu0 }
 0x206   : > { %v3867_v56 = vpop.f32.mrb[49].mxu1  ;;  %v3925_v57 = vpop.f32.mrb[53].mxu0 }
 0x207   : > { %v3868_v1 = vadd.f32 %v3867_v56, %v3866_v52  ;;  %v3869_v2 = vpop.f32.mrb[50].mxu1  ;;  %v3926_v38 = vadd.f32 %v3925_v57, %v3924_v53  ;;  %v3927_v48 = vpop.f32.mrb[54].mxu0 }
 0x208   : > { %v3870_v3 = vpop.f32.mrb[51].mxu1  ;;  %v3928_v4 = vpop.f32.mrb[55].mxu0 }
 0x209   : > { %v2806_v35 = vadd.f32 %v3868_v1, %v5342_v60  ;;  %v3871_v5 = vadd.f32 %v3870_v3, %v3869_v2  ;;  %v3929_v6 = vadd.f32 %v3928_v4, %v3927_v48 }
 0x20b   : > { %v2809_v37 = vadd.f32 %v3871_v5, %v5344_v62  ;;  %v5392_v7 = vadd.f32 %v3926_v38, %v2806_v35 }
 0x20d   : > { %v5394_v43 = vadd.f32 %v3929_v6, %v2809_v37  ;;  %v3872_v54 = vpop.f32.mrb[52].mxu1  ;;  %v3930_v8 = vpop.f32.mrb[56].mxu0 }
 0x20e   : > { %v3873_v9 = vpop.f32.mrb[53].mxu1  ;;  %v3931_v11 = vpop.f32.mrb[57].mxu0 }
 0x20f   : > { %v3874_v12 = vadd.f32 %v3873_v9, %v3872_v54  ;;  %v3875_v13 = vpop.f32.mrb[54].mxu1  ;;  %v3932_v20 = vadd.f32 %v3931_v11, %v3930_v8  ;;  %v3933_v58 = vpop.f32.mrb[58].mxu0 }
 0x210   : > { %v3876_v50 = vpop.f32.mrb[55].mxu1  ;;  %v3934_v21 = vpop.f32.mrb[59].mxu0 }
 0x211   : > { %v2814_v60 = vadd.f32 %v3874_v12, %v5350_v15  ;;  %v3877_v22 = vadd.f32 %v3876_v50, %v3875_v13  ;;  %v3935_v23 = vadd.f32 %v3934_v21, %v3933_v58 }
 0x213   : > { %v2817_v62 = vadd.f32 %v3877_v22, %v5352_v18  ;;  %v5398_v24 = vadd.f32 %v3932_v20, %v2814_v60 }
 0x215   : > { %v5400_v26 = vadd.f32 %v3935_v23, %v2817_v62  ;;  %v3878_v27 = vpop.f32.mrb[56].mxu1  ;;  %v3936_v61 = vpop.f32.mrb[60].mxu0 }
 0x216   : > { %v3879_v55 = vpop.f32.mrb[57].mxu1  ;;  %v3937_v0 = vpop.f32.mrb[61].mxu0 }
 0x217   : > { %v3880_v28 = vadd.f32 %v3879_v55, %v3878_v27  ;;  %v3881_v10 = vpop.f32.mrb[58].mxu1  ;;  %v3938_v32 = vadd.f32 %v3937_v0, %v3936_v61  ;;  %v3939_v33 = vpop.f32.mrb[62].mxu0 }
 0x218   : > { %v3882_v40 = vpop.f32.mrb[59].mxu1  ;;  %v3940_v41 = vpop.f32.mrb[63].mxu0 }
 0x219   : > { %v2822_v15 = vadd.f32 %v3880_v28, %v5358_v34  ;;  %v3883_v25 = vadd.f32 %v3882_v40, %v3881_v10  ;;  %v3941_v36 = vadd.f32 %v3940_v41, %v3939_v33 }
 0x21b   : > { %v2825_v18 = vadd.f32 %v3883_v25, %v5360_v39  ;;  %v5404_v44 = vadd.f32 %v3938_v32, %v2822_v15 }
 0x21d   : > { %v5406_v45 = vadd.f32 %v3941_v36, %v2825_v18  ;;  %v3884_v46 = vpop.f32.mrb[60].mxu1  ;;  %v3942_v47 = vpop.f32.mrb[64].mxu0 }
 0x21e   : > { %v3885_v16 = vpop.f32.mrb[61].mxu1  ;;  %v3943_v49 = vpop.f32.mrb[65].mxu0 }
 0x21f   : > { %v3886_v30 = vadd.f32 %v3885_v16, %v3884_v46  ;;  %v3887_v17 = vpop.f32.mrb[62].mxu1  ;;  %v3944_v52 = vadd.f32 %v3943_v49, %v3942_v47  ;;  %v3945_v53 = vpop.f32.mrb[66].mxu0 }
 0x220   : > { %v3888_v56 = vpop.f32.mrb[63].mxu1  ;;  %v3946_v57 = vpop.f32.mrb[67].mxu0 }
 0x221   : > { %v2830_v34 = vadd.f32 %v3886_v30, %v5366_v59  ;;  %v3889_v1 = vadd.f32 %v3888_v56, %v3887_v17  ;;  %v3947_v2 = vadd.f32 %v3946_v57, %v3945_v53 }
 0x223   : > { %v2833_v39 = vadd.f32 %v3889_v1, %v5368_v63  ;;  %v5410_v38 = vadd.f32 %v3944_v52, %v2830_v34 }
 0x225   : > { %v5412_v48 = vadd.f32 %v3947_v2, %v2833_v39  ;;  %v3890_v3 = vpop.f32.mrb[64].mxu1  ;;  %v3948_v4 = vpop.f32.mrb[68].mxu0 }
 0x226   : > { %v3891_v35 = vpop.f32.mrb[65].mxu1  ;;  %v3949_v5 = vpop.f32.mrb[69].mxu0 }
 0x227   : > { %v3892_v6 = vadd.f32 %v3891_v35, %v3890_v3  ;;  %v3893_v37 = vpop.f32.mrb[66].mxu1  ;;  %v3950_v54 = vadd.f32 %v3949_v5, %v3948_v4  ;;  %v3951_v8 = vpop.f32.mrb[70].mxu0 }
 0x228   : > { %v3894_v9 = vpop.f32.mrb[67].mxu1  ;;  %v3952_v11 = vpop.f32.mrb[71].mxu0 }
 0x229   : > { %v2838_v59 = vadd.f32 %v3892_v6, %v5374_v14  ;;  %v3895_v12 = vadd.f32 %v3894_v9, %v3893_v37  ;;  %v3953_v13 = vadd.f32 %v3952_v11, %v3951_v8 }
 0x22b   : > { %v2841_v63 = vadd.f32 %v3895_v12, %v5376_v19  ;;  %v5416_v20 = vadd.f32 %v3950_v54, %v2838_v59 }
 0x22d   : > { %v5418_v58 = vadd.f32 %v3953_v13, %v2841_v63  ;;  %v3970_v50 = vpop.f32.mrb[68].mxu1  ;;  %v3056_v21 = vpop.f32.mrb[72].mxu0 }
 0x22e   : > { %v3971_v60 = vpop.f32.mrb[69].mxu1  ;;  %v4045_v22 = vpop.f32.mrb[73].mxu0 }
 0x22f   : > { %v3972_v23 = vadd.f32 %v3971_v60, %v3970_v50  ;;  %v3973_v62 = vpop.f32.mrb[70].mxu1  ;;  %v3059_v27 = vpop.f32.mrb[74].mxu0 }
 0x230   : > { %v3974_v61 = vpop.f32.mrb[71].mxu1  ;;  %v4046_v55 = vpop.f32.mrb[75].mxu0 }
 0x231   : > { %v3975_v0 = vadd.f32 %v3974_v61, %v3973_v62  ;;  %v2968_v14 = vadd.f32 %v3972_v23, %v5380_v29 }
 0x233   : > { %v3057_v28 = vadd.f32 %v3056_v21, %v2968_v14  ;;  %v2971_v19 = vadd.f32 %v3975_v0, %v5382_v31 }
 0x235   : > { %v3060_v10 = vadd.f32 %v3059_v27, %v2971_v19  ;;  %v3976_v32 = vpop.f32.mrb[72].mxu1  ;;  %v3064_v33 = vpop.f32.mrb[76].mxu0  ;;  %v3111_v15 = vmax.f32 %v3057_v28, 0.0 }
 0x236   : > { %v3977_v40 = vpop.f32.mrb[73].mxu1  ;;  %v4049_v41 = vpop.f32.mrb[77].mxu0 }
 0x237   : > { %v3112_v25 = vmax.f32 %v3060_v10, 0.0  ;;  %v3978_v36 = vadd.f32 %v3977_v40, %v3976_v32  ;;  %v3979_v18 = vpop.f32.mrb[74].mxu1  ;;  %v3067_v46 = vpop.f32.mrb[78].mxu0 }
 0x238   : > { %v3980_v47 = vpop.f32.mrb[75].mxu1  ;;  %v4050_v16 = vpop.f32.mrb[79].mxu0 }
 0x239   : > { %v3626_v49 = vpack.c.bf16 %v3112_v25, %v3111_v15  ;;  %v3981_v30 = vadd.f32 %v3980_v47, %v3979_v18  ;;  %v2976_v29 = vadd.f32 %v3978_v36, %v5386_v51 }
 0x23b   : > { %3627 = vst [vmem:[%s5425_s27] sm:$0xff] %v3626_v49   ;;  %v3065_v31 = vadd.f32 %v3064_v33, %v2976_v29  ;;  %v2979_v17 = vadd.f32 %v3981_v30, %v5388_v42 }
 0x23d   : > { %v3068_v52 = vadd.f32 %v3067_v46, %v2979_v17  ;;  %v3982_v53 = vpop.f32.mrb[76].mxu1  ;;  %v3072_v56 = vpop.f32.mrb[80].mxu0  ;;  %v3113_v1 = vmax.f32 %v3065_v31, 0.0 }
 0x23e   : > { %v3983_v57 = vpop.f32.mrb[77].mxu1  ;;  %v4053_v34 = vpop.f32.mrb[81].mxu0 }
 0x23f   : > { %v3114_v2 = vmax.f32 %v3068_v52, 0.0  ;;  %v3984_v39 = vadd.f32 %v3983_v57, %v3982_v53  ;;  %v3985_v3 = vpop.f32.mrb[78].mxu1  ;;  %v3075_v4 = vpop.f32.mrb[82].mxu0 }
 0x240   : > { %v3986_v35 = vpop.f32.mrb[79].mxu1  ;;  %v4054_v51 = vpop.f32.mrb[83].mxu0 }
 0x241   : > { %v3631_v5 = vpack.c.bf16 %v3114_v2, %v3113_v1  ;;  %v3987_v6 = vadd.f32 %v3986_v35, %v3985_v3  ;;  %v2984_v37 = vadd.f32 %v3984_v39, %v5392_v7 }
 0x243   : > { %3658 = vst [vmem:[%s5425_s27 + $0x8] sm:$0xff] %v3631_v5   ;;  %v3073_v54 = vadd.f32 %v3072_v56, %v2984_v37  ;;  %v2987_v42 = vadd.f32 %v3987_v6, %v5394_v43 }
 0x245   : > { %v3076_v8 = vadd.f32 %v3075_v4, %v2987_v42  ;;  %v3988_v9 = vpop.f32.mrb[80].mxu1  ;;  %v3080_v11 = vpop.f32.mrb[84].mxu0  ;;  %v3115_v13 = vmax.f32 %v3073_v54, 0.0 }
 0x246   : > { %v3989_v59 = vpop.f32.mrb[81].mxu1  ;;  %v4057_v12 = vpop.f32.mrb[85].mxu0 }
 0x247   : > { %v3116_v63 = vmax.f32 %v3076_v8, 0.0  ;;  %v3990_v50 = vadd.f32 %v3989_v59, %v3988_v9  ;;  %v3991_v21 = vpop.f32.mrb[82].mxu1  ;;  %v3083_v60 = vpop.f32.mrb[86].mxu0 }
 0x248   : > { %v3992_v22 = vpop.f32.mrb[83].mxu1  ;;  %v4058_v23 = vpop.f32.mrb[87].mxu0 }
 0x249   : > { %v3636_v62 = vpack.c.bf16 %v3116_v63, %v3115_v13  ;;  %v3993_v27 = vadd.f32 %v3992_v22, %v3991_v21  ;;  %v2992_v7 = vadd.f32 %v3990_v50, %v5398_v24 }
 0x24a   : > { %v3226_v22 = vld [vmem:[%s5425_s27 + $0x8] sm:$0xf] (%p4466_p6)  ;;  %v3228_v23 = vld [vmem:[%s5425_s27 + $0xc] sm:$0xf] (%p4466_p6) }
 0x24b   : > { %3659 = vst [vmem:[%s5425_s27 + $0x10] sm:$0xff] %v3636_v62   ;;  %v3081_v61 = vadd.f32 %v3080_v11, %v2992_v7  ;;  %v2995_v43 = vadd.f32 %v3993_v27, %v5400_v26  ;;  %3227 = vst [vmem:[%s3206_s29 + $0x10] sm:$0xf] (%p4466_p6), %v3226_v22 }
 0x24c   : > { %3229 = vst [vmem:[%s3206_s29 + $0x18] sm:$0xf] (%p4466_p6), %v3228_v23 }
 0x24d   : > { %v3084_v55 = vadd.f32 %v3083_v60, %v2995_v43  ;;  %v3994_v0 = vpop.f32.mrb[84].mxu1  ;;  %v3088_v14 = vpop.f32.mrb[88].mxu0  ;;  %v3117_v10 = vmax.f32 %v3081_v61, 0.0 }
 0x24e   : > { %v3995_v28 = vpop.f32.mrb[85].mxu1  ;;  %v4061_v19 = vpop.f32.mrb[89].mxu0 }
 0x24f   : > { %v3118_v32 = vmax.f32 %v3084_v55, 0.0  ;;  %v3996_v33 = vadd.f32 %v3995_v28, %v3994_v0  ;;  %v3997_v40 = vpop.f32.mrb[86].mxu1  ;;  %v3091_v41 = vpop.f32.mrb[90].mxu0 }
 0x250   : > { %v3998_v15 = vpop.f32.mrb[87].mxu1  ;;  %v4062_v25 = vpop.f32.mrb[91].mxu0 }
 0x251   : > { %v3641_v36 = vpack.c.bf16 %v3118_v32, %v3117_v10  ;;  %v3999_v18 = vadd.f32 %v3998_v15, %v3997_v40  ;;  %v3000_v24 = vadd.f32 %v3996_v33, %v5404_v44 }
 0x252   : > { %v3230_v62 = vld [vmem:[%s5425_s27 + $0x10] sm:$0xf] (%p4466_p6)  ;;  %v3232_v27 = vld [vmem:[%s5425_s27 + $0x14] sm:$0xf] (%p4466_p6) }
 0x253   : > { %3660 = vst [vmem:[%s5425_s27 + $0x18] sm:$0xff] %v3641_v36   ;;  %v3089_v46 = vadd.f32 %v3088_v14, %v3000_v24  ;;  %v3003_v26 = vadd.f32 %v3999_v18, %v5406_v45  ;;  %3231 = vst [vmem:[%s3206_s29 + $0x20] sm:$0xf] (%p4466_p6), %v3230_v62 }
 0x254   : > { %3233 = vst [vmem:[%s3206_s29 + $0x28] sm:$0xf] (%p4466_p6), %v3232_v27 }
 0x255   : > { %v3092_v47 = vadd.f32 %v3091_v41, %v3003_v26  ;;  %v4000_v16 = vpop.f32.mrb[88].mxu1  ;;  %v3096_v49 = vpop.f32.mrb[92].mxu0  ;;  %v3119_v31 = vmax.f32 %v3089_v46, 0.0 }
 0x256   : > { %v4001_v30 = vpop.f32.mrb[89].mxu1  ;;  %v4065_v29 = vpop.f32.mrb[93].mxu0 }
 0x257   : > { %v3120_v17 = vmax.f32 %v3092_v47, 0.0  ;;  %v4002_v52 = vadd.f32 %v4001_v30, %v4000_v16  ;;  %v4003_v53 = vpop.f32.mrb[90].mxu1  ;;  %v3099_v56 = vpop.f32.mrb[94].mxu0 }
 0x258   : > { %v4004_v57 = vpop.f32.mrb[91].mxu1  ;;  %v4066_v34 = vpop.f32.mrb[95].mxu0 }
 0x259   : > { %v3646_v1 = vpack.c.bf16 %v3120_v17, %v3119_v31  ;;  %v4005_v2 = vadd.f32 %v4004_v57, %v4003_v53  ;;  %v3008_v44 = vadd.f32 %v4002_v52, %v5410_v38 }
 0x25a   : > { %v3234_v7 = vld [vmem:[%s5425_s27 + $0x18] sm:$0xf] (%p4466_p6)  ;;  %v3236_v61 = vld [vmem:[%s5425_s27 + $0x1c] sm:$0xf] (%p4466_p6) }
 0x25b   : > { %3661 = vst [vmem:[%s5425_s27 + $0x20] sm:$0xff] %v3646_v1   ;;  %v3097_v39 = vadd.f32 %v3096_v49, %v3008_v44  ;;  %v3011_v45 = vadd.f32 %v4005_v2, %v5412_v48  ;;  %3235 = vst [vmem:[%s3206_s29 + $0x30] sm:$0xf] (%p4466_p6), %v3234_v7 }
 0x25c   : > { %3237 = vst [vmem:[%s3206_s29 + $0x38] sm:$0xf] (%p4466_p6), %v3236_v61 }
 0x25d   : > { %v3100_v3 = vadd.f32 %v3099_v56, %v3011_v45  ;;  %v4006_v4 = vpop.f32.mrb[92].mxu1  ;;  %v3104_v35 = vpop.f32.mrb[96].mxu0  ;;  %v3121_v6 = vmax.f32 %v3097_v39, 0.0 }
 0x25e   : > { %v4007_v51 = vpop.f32.mrb[93].mxu1  ;;  %v4069_v5 = vpop.f32.mrb[97].mxu0 }
 0x25f   : > { %v3122_v37 = vmax.f32 %v3100_v3, 0.0  ;;  %v4008_v54 = vadd.f32 %v4007_v51, %v4006_v4  ;;  %v4009_v42 = vpop.f32.mrb[94].mxu1  ;;  %v3107_v8 = vpop.f32.mrb[98].mxu0 }
 0x260   : > { %v4010_v9 = vpop.f32.mrb[95].mxu1  ;;  %v4070_v11 = vpop.f32.mrb[99].mxu0 }
 0x261   : > { %v3651_v59 = vpack.c.bf16 %v3122_v37, %v3121_v6  ;;  %v4011_v38 = vadd.f32 %v4010_v9, %v4009_v42  ;;  %v3016_v12 = vadd.f32 %v4008_v54, %v5416_v20  ;;  %v3222_v20 = vld [vmem:[%s5425_s27] sm:$0xf] (%p4466_p6) }
 0x262   : > { %3223 = vst [vmem:[%s3206_s29] sm:$0xf] (%p4466_p6), %v3222_v20  ;;  %v3238_v43 = vld [vmem:[%s5425_s27 + $0x20] sm:$0xf] (%p4466_p6)  ;;  %v3240_v55 = vld [vmem:[%s5425_s27 + $0x24] sm:$0xf] (%p4466_p6) }
 0x263   : > { %3662 = vst [vmem:[%s5425_s27 + $0x28] sm:$0xff] %v3651_v59   ;;  %v3105_v48 = vadd.f32 %v3104_v35, %v3016_v12  ;;  %v3019_v13 = vadd.f32 %v4011_v38, %v5418_v58  ;;  %v3224_v58 = vld [vmem:[%s5425_s27 + $0x4] sm:$0xf] (%p4466_p6)  ;;  %3239 = vst [vmem:[%s3206_s29 + $0x40] sm:$0xf] (%p4466_p6), %v3238_v43 }
 0x264   : > { %3225 = vst [vmem:[%s3206_s29 + $0x8] sm:$0xf] (%p4466_p6), %v3224_v58  ;;  %3241 = vst [vmem:[%s3206_s29 + $0x48] sm:$0xf] (%p4466_p6), %v3240_v55 }
 0x265   : > { %v3108_v63 = vadd.f32 %v3107_v8, %v3019_v13  ;;  %v3123_v50 = vmax.f32 %v3105_v48, 0.0  ;;  %3201 = sbr.rel (!%p4466_p6) target bundleno = 628 (0x274), region = 77 }
 0x267   : > { %v3124_v21 = vmax.f32 %v3108_v63, 0.0 }
 0x269   : > { %v3656_v60 = vpack.c.bf16 %v3124_v21, %v3123_v50 }
 0x26a   : > { %v3242_v0 = vld [vmem:[%s5425_s27 + $0x28] sm:$0xf] (%p4466_p6)  ;;  %v3244_v14 = vld [vmem:[%s5425_s27 + $0x2c] sm:$0xf] (%p4466_p6) }
 0x26b   : > { %3663 = vst [vmem:[%s5425_s27 + $0x30] sm:$0xff] %v3656_v60   ;;  %3243 = vst [vmem:[%s3206_s29 + $0x50] sm:$0xf] (%p4466_p6), %v3242_v0 }
 0x26c   : > { %3245 = vst [vmem:[%s3206_s29 + $0x58] sm:$0xf] %v3244_v14 }
 0x272   : > { %v3246_v28 = vld [vmem:[%s5425_s27 + $0x30] sm:$0xf]  ;;  %v3248_v19 = vld [vmem:[%s5425_s27 + $0x34] sm:$0xf] }
 0x273   : > { %3247 = vst [vmem:[%s3206_s29 + $0x60] sm:$0xf] %v3246_v28  ;;  %3249 = vst [vmem:[%s3206_s29 + $0x68] sm:$0xf] %v3248_v19 }
 0x274 PF: > { %s13_s16 = sadd.s32 1, %s4407_s16   ;;  %s5485_s12 = smov %s4395_s13 }
 0x275   : > { %p10_p12 = scmp.ge.s32.totalorder %s13_s16, 4   ;;  %s5486_s13 = smov %s4471_s22 }
 0x276   : > { %s5487_s14 = smov %s4403_s15  ;;  %s5488_s15 = smov %s5490_s17 }
 0x277   :  { %12 = sbr.rel (!%p10_p12) target bundleno = 3 (0x3), region = 155 }

// kernel: depth_cnn_forward.7
= control target key start
LH: loop header
LB: loop body
LE: loop exit
PB: predicated region body
PF: predicated region fallthrough
CT: control target
= control target key end

     0   :  { %s3385_s12 = smov 0   ;;  %s3387_s13 = smov 0   ;;  %s4116_s0 = inlined_call_operand.vmem [shape: bf16[32,1792], index: 0, kind: input, shape index: {}]   ;;  %s4117_s1 = inlined_call_operand.vmem [shape: bf16[1792,384], index: 1, kind: input, shape index: {}]   ;;  %s4118_s2 = inlined_call_operand.vmem [shape: f32[1,384], index: 2, kind: input, shape index: {}]   ;;  %s4119_s3 = inlined_call_operand.vmem [shape: bf16[32,384], index: 3, kind: output, shape index: {}]  }
   0x1   :  { %s3389_s14 = smov 0   ;;  %s3391_s15 = smov 0  }
   0x2   :  { %s3393_s16 = smov 0  }
   0x3 LB: > { %s25_s17 = sadd.s32 1, %s3359_s15  ;;  %s2745_s18 = sadd.s32 4294967295, %s3363_s16   ;;  %s3363_s16 = sphi %s3393_s16, %s13_s16   ;;  %s3359_s15 = sphi %s3391_s15, %s4124_s15   ;;  %s3355_s14 = sphi %s3389_s14, %s4123_s14   ;;  %s3351_s13 = sphi %s3387_s13, %s4122_s13   ;;  %s3347_s12 = sphi %s3385_s12, %s4121_s12  }
   0x4   : > { %p27_p0 = scmp.ge.s32.totalorder %s25_s17, 3  ;;  %p65_p1 = scmp.ne.s32.totalorder %s3351_s13, %s3347_s12 }
   0x5   : > { %p66_p2 = scmp.eq.s32.totalorder %s3363_s16, 0  ;;  %p123_p4 = scmp.eq.s32.totalorder %s2745_s18, 2 }
   0x6   : > { %s4126_s17 = smov (%p27_p0, %s25_s17), 0  ;;  %s58_s20 = sadd.s32 1, %s3351_s13 }
   0x7   : > { %p67_p3 = por %p66_p2, %p65_p1  ;;  %s55_s19 = ssub.s32 %s3359_s15, %s4126_s17 }
   0x8   : > { %p56_p5 = scmp.eq.s32.totalorder %s55_s19, 0  ;;  %p3420_p6 = por %p123_p4, %p65_p1 }
   0x9   : > { %p2749_p7 = scmp.ge.s32.totalorder %s3363_s16, 3 }
   0xa   : > { %s3425_s22 = scalar_select %p56_p5, %s3351_s13, %s58_s20  }
   0xb   : > { %155 = sbr.rel (%p2749_p7) target bundleno = 171 (0xab), region = 20 }
  0x12   : > { %158 = sbr.rel (!%p67_p3) target bundleno = 171 (0xab), region = 24  ;;  %s160_s23 = sand.u32 (%p67_p3), 1, %s3351_s13  }
  0x13   : > { %s2750_s24 = sshll.u32 (%p67_p3), %s3359_s15, 2  ;;  %s3129_s25 = smul.u32 (%p67_p3), 896, %s160_s23 }
  0x14   : > { %s3433_s28 = scalar_lea.vmem (%p67_p3), %s4117_s1, %s2750_s24 }
  0x15   : > { %v180_v0 = vld [vmem:[%s3433_s28] sm:$0xf] (%p67_p3)  ;;  %v182_v1 = vld [vmem:[%s3433_s28 + $0xc] sm:$0xf] (%p67_p3)  ;;  %v184_v2 = vld [vmem:[%s3433_s28 + $0x18] sm:$0xf] (%p67_p3) }
  0x16   : > { %v186_v3 = vld [vmem:[%s3433_s28 + $0x24] sm:$0xf] (%p67_p3)  ;;  %v188_v4 = vld [vmem:[%s3433_s28 + $0x30] sm:$0xf] (%p67_p3)  ;;  %s3440_s29 = scalar_lea.vmem (%p67_p3), [#allocation2], %s3129_s25 }
  0x17   : > { %181 = vst [vmem:[%s3440_s29] sm:$0xf] (%p67_p3), %v180_v0  ;;  %183 = vst [vmem:[%s3440_s29 + $0x4] sm:$0xf] (%p67_p3), %v182_v1  ;;  %v190_v5 = vld [vmem:[%s3433_s28 + $0x3c] sm:$0xf] (%p67_p3) }
  0x18   : > { %185 = vst [vmem:[%s3440_s29 + $0x8] sm:$0xf] (%p67_p3), %v184_v2  ;;  %187 = vst [vmem:[%s3440_s29 + $0xc] sm:$0xf] (%p67_p3), %v186_v3  ;;  %v192_v6 = vld [vmem:[%s3433_s28 + $0x48] sm:$0xf] (%p67_p3) }
  0x19   : > { %189 = vst [vmem:[%s3440_s29 + $0x10] sm:$0xf] %v188_v4  ;;  %v194_v7 = vld [vmem:[%s3433_s28 + $0x54] sm:$0xf]  ;;  %191 = vst [vmem:[%s3440_s29 + $0x14] sm:$0xf] %v190_v5 }
  0x1a   : > { %193 = vst [vmem:[%s3440_s29 + $0x18] sm:$0xf] %v192_v6  ;;  %195 = vst [vmem:[%s3440_s29 + $0x1c] sm:$0xf] %v194_v7  ;;  %v196_v8 = vld [vmem:[%s3433_s28 + $0x60] sm:$0xf] }
  0x1b   : > { %v198_v9 = vld [vmem:[%s3433_s28 + $0x6c] sm:$0xf]  ;;  %v200_v10 = vld [vmem:[%s3433_s28 + $0x78] sm:$0xf]  ;;  %197 = vst [vmem:[%s3440_s29 + $0x20] sm:$0xf] %v196_v8 }
  0x1c   : > { %199 = vst [vmem:[%s3440_s29 + $0x24] sm:$0xf] %v198_v9  ;;  %201 = vst [vmem:[%s3440_s29 + $0x28] sm:$0xf] %v200_v10  ;;  %v202_v11 = vld [vmem:[%s3433_s28 + $0x84] sm:$0xf] }
  0x1d   : > { %v204_v12 = vld [vmem:[%s3433_s28 + $0x90] sm:$0xf]  ;;  %v206_v13 = vld [vmem:[%s3433_s28 + $0x9c] sm:$0xf]  ;;  %203 = vst [vmem:[%s3440_s29 + $0x2c] sm:$0xf] %v202_v11 }
  0x1e   : > { %205 = vst [vmem:[%s3440_s29 + $0x30] sm:$0xf] %v204_v12  ;;  %207 = vst [vmem:[%s3440_s29 + $0x34] sm:$0xf] %v206_v13  ;;  %v208_v14 = vld [vmem:[%s3433_s28 + $0xa8] sm:$0xf] }
  0x1f   : > { %v210_v15 = vld [vmem:[%s3433_s28 + $0xb4] sm:$0xf]  ;;  %v212_v16 = vld [vmem:[%s3433_s28 + $0xc0] sm:$0xf]  ;;  %209 = vst [vmem:[%s3440_s29 + $0x38] sm:$0xf] %v208_v14 }
  0x20   : > { %211 = vst [vmem:[%s3440_s29 + $0x3c] sm:$0xf] %v210_v15  ;;  %213 = vst [vmem:[%s3440_s29 + $0x40] sm:$0xf] %v212_v16  ;;  %v214_v17 = vld [vmem:[%s3433_s28 + $0xcc] sm:$0xf] }
  0x21   : > { %v216_v18 = vld [vmem:[%s3433_s28 + $0xd8] sm:$0xf]  ;;  %v218_v19 = vld [vmem:[%s3433_s28 + $0xe4] sm:$0xf]  ;;  %215 = vst [vmem:[%s3440_s29 + $0x44] sm:$0xf] %v214_v17 }
  0x22   : > { %217 = vst [vmem:[%s3440_s29 + $0x48] sm:$0xf] %v216_v18  ;;  %219 = vst [vmem:[%s3440_s29 + $0x4c] sm:$0xf] %v218_v19  ;;  %v220_v20 = vld [vmem:[%s3433_s28 + $0xf0] sm:$0xf] }
  0x23   : > { %v222_v21 = vld [vmem:[%s3433_s28 + $0xfc] sm:$0xf]  ;;  %v224_v22 = vld [vmem:[%s3433_s28 + $0x108] sm:$0xf]  ;;  %221 = vst [vmem:[%s3440_s29 + $0x50] sm:$0xf] %v220_v20 }
  0x24   : > { %223 = vst [vmem:[%s3440_s29 + $0x54] sm:$0xf] %v222_v21  ;;  %225 = vst [vmem:[%s3440_s29 + $0x58] sm:$0xf] %v224_v22  ;;  %v226_v23 = vld [vmem:[%s3433_s28 + $0x114] sm:$0xf] }
  0x25   : > { %v228_v24 = vld [vmem:[%s3433_s28 + $0x120] sm:$0xf]  ;;  %v230_v25 = vld [vmem:[%s3433_s28 + $0x12c] sm:$0xf]  ;;  %227 = vst [vmem:[%s3440_s29 + $0x5c] sm:$0xf] %v226_v23 }
  0x26   : > { %229 = vst [vmem:[%s3440_s29 + $0x60] sm:$0xf] %v228_v24  ;;  %231 = vst [vmem:[%s3440_s29 + $0x64] sm:$0xf] %v230_v25  ;;  %v232_v26 = vld [vmem:[%s3433_s28 + $0x138] sm:$0xf] }
  0x27   : > { %v234_v27 = vld [vmem:[%s3433_s28 + $0x144] sm:$0xf]  ;;  %v236_v28 = vld [vmem:[%s3433_s28 + $0x150] sm:$0xf]  ;;  %233 = vst [vmem:[%s3440_s29 + $0x68] sm:$0xf] %v232_v26 }
  0x28   : > { %235 = vst [vmem:[%s3440_s29 + $0x6c] sm:$0xf] %v234_v27  ;;  %237 = vst [vmem:[%s3440_s29 + $0x70] sm:$0xf] %v236_v28  ;;  %v238_v29 = vld [vmem:[%s3433_s28 + $0x15c] sm:$0xf] }
  0x29   : > { %v240_v30 = vld [vmem:[%s3433_s28 + $0x168] sm:$0xf]  ;;  %v242_v31 = vld [vmem:[%s3433_s28 + $0x174] sm:$0xf]  ;;  %239 = vst [vmem:[%s3440_s29 + $0x74] sm:$0xf] %v238_v29 }
  0x2a   : > { %241 = vst [vmem:[%s3440_s29 + $0x78] sm:$0xf] %v240_v30  ;;  %243 = vst [vmem:[%s3440_s29 + $0x7c] sm:$0xf] %v242_v31  ;;  %v244_v32 = vld [vmem:[%s3433_s28 + $0x180] sm:$0xf] }
  0x2b   : > { %v246_v33 = vld [vmem:[%s3433_s28 + $0x18c] sm:$0xf]  ;;  %v248_v34 = vld [vmem:[%s3433_s28 + $0x198] sm:$0xf]  ;;  %245 = vst [vmem:[%s3440_s29 + $0x80] sm:$0xf] %v244_v32 }
  0x2c   : > { %247 = vst [vmem:[%s3440_s29 + $0x84] sm:$0xf] %v246_v33  ;;  %249 = vst [vmem:[%s3440_s29 + $0x88] sm:$0xf] %v248_v34  ;;  %v250_v35 = vld [vmem:[%s3433_s28 + $0x1a4] sm:$0xf] }
  0x2d   : > { %v252_v36 = vld [vmem:[%s3433_s28 + $0x1b0] sm:$0xf]  ;;  %v254_v37 = vld [vmem:[%s3433_s28 + $0x1bc] sm:$0xf]  ;;  %251 = vst [vmem:[%s3440_s29 + $0x8c] sm:$0xf] %v250_v35 }
  0x2e   : > { %253 = vst [vmem:[%s3440_s29 + $0x90] sm:$0xf] %v252_v36  ;;  %255 = vst [vmem:[%s3440_s29 + $0x94] sm:$0xf] %v254_v37  ;;  %v256_v38 = vld [vmem:[%s3433_s28 + $0x1c8] sm:$0xf] }
  0x2f   : > { %v258_v39 = vld [vmem:[%s3433_s28 + $0x1d4] sm:$0xf]  ;;  %v260_v40 = vld [vmem:[%s3433_s28 + $0x1e0] sm:$0xf]  ;;  %257 = vst [vmem:[%s3440_s29 + $0x98] sm:$0xf] %v256_v38 }
  0x30   : > { %259 = vst [vmem:[%s3440_s29 + $0x9c] sm:$0xf] %v258_v39  ;;  %261 = vst [vmem:[%s3440_s29 + $0xa0] sm:$0xf] %v260_v40  ;;  %v262_v41 = vld [vmem:[%s3433_s28 + $0x1ec] sm:$0xf] }
  0x31   : > { %v264_v42 = vld [vmem:[%s3433_s28 + $0x1f8] sm:$0xf]  ;;  %v266_v43 = vld [vmem:[%s3433_s28 + $0x204] sm:$0xf]  ;;  %263 = vst [vmem:[%s3440_s29 + $0xa4] sm:$0xf] %v262_v41 }
  0x32   : > { %265 = vst [vmem:[%s3440_s29 + $0xa8] sm:$0xf] %v264_v42  ;;  %267 = vst [vmem:[%s3440_s29 + $0xac] sm:$0xf] %v266_v43  ;;  %v268_v44 = vld [vmem:[%s3433_s28 + $0x210] sm:$0xf] }
  0x33   : > { %v270_v45 = vld [vmem:[%s3433_s28 + $0x21c] sm:$0xf]  ;;  %v272_v46 = vld [vmem:[%s3433_s28 + $0x228] sm:$0xf]  ;;  %269 = vst [vmem:[%s3440_s29 + $0xb0] sm:$0xf] %v268_v44 }
  0x34   : > { %271 = vst [vmem:[%s3440_s29 + $0xb4] sm:$0xf] %v270_v45  ;;  %273 = vst [vmem:[%s3440_s29 + $0xb8] sm:$0xf] %v272_v46  ;;  %v274_v47 = vld [vmem:[%s3433_s28 + $0x234] sm:$0xf] }
  0x35   : > { %v276_v48 = vld [vmem:[%s3433_s28 + $0x240] sm:$0xf]  ;;  %v278_v49 = vld [vmem:[%s3433_s28 + $0x24c] sm:$0xf]  ;;  %275 = vst [vmem:[%s3440_s29 + $0xbc] sm:$0xf] %v274_v47 }
  0x36   : > { %277 = vst [vmem:[%s3440_s29 + $0xc0] sm:$0xf] %v276_v48  ;;  %279 = vst [vmem:[%s3440_s29 + $0xc4] sm:$0xf] %v278_v49  ;;  %v280_v50 = vld [vmem:[%s3433_s28 + $0x258] sm:$0xf] }
  0x37   : > { %v282_v51 = vld [vmem:[%s3433_s28 + $0x264] sm:$0xf]  ;;  %v284_v52 = vld [vmem:[%s3433_s28 + $0x270] sm:$0xf]  ;;  %281 = vst [vmem:[%s3440_s29 + $0xc8] sm:$0xf] %v280_v50 }
  0x38   : > { %283 = vst [vmem:[%s3440_s29 + $0xcc] sm:$0xf] %v282_v51  ;;  %285 = vst [vmem:[%s3440_s29 + $0xd0] sm:$0xf] %v284_v52  ;;  %v286_v53 = vld [vmem:[%s3433_s28 + $0x27c] sm:$0xf] }
  0x39   : > { %v288_v54 = vld [vmem:[%s3433_s28 + $0x288] sm:$0xf]  ;;  %v290_v55 = vld [vmem:[%s3433_s28 + $0x294] sm:$0xf]  ;;  %287 = vst [vmem:[%s3440_s29 + $0xd4] sm:$0xf] %v286_v53 }
  0x3a   : > { %289 = vst [vmem:[%s3440_s29 + $0xd8] sm:$0xf] %v288_v54  ;;  %291 = vst [vmem:[%s3440_s29 + $0xdc] sm:$0xf] %v290_v55  ;;  %v292_v56 = vld [vmem:[%s3433_s28 + $0x2a0] sm:$0xf] }
  0x3b   : > { %v294_v57 = vld [vmem:[%s3433_s28 + $0x2ac] sm:$0xf]  ;;  %v296_v58 = vld [vmem:[%s3433_s28 + $0x2b8] sm:$0xf]  ;;  %293 = vst [vmem:[%s3440_s29 + $0xe0] sm:$0xf] %v292_v56 }
  0x3c   : > { %295 = vst [vmem:[%s3440_s29 + $0xe4] sm:$0xf] %v294_v57  ;;  %297 = vst [vmem:[%s3440_s29 + $0xe8] sm:$0xf] %v296_v58  ;;  %v298_v59 = vld [vmem:[%s3433_s28 + $0x2c4] sm:$0xf] }
  0x3d   : > { %v300_v60 = vld [vmem:[%s3433_s28 + $0x2d0] sm:$0xf]  ;;  %v302_v61 = vld [vmem:[%s3433_s28 + $0x2dc] sm:$0xf]  ;;  %299 = vst [vmem:[%s3440_s29 + $0xec] sm:$0xf] %v298_v59 }
  0x3e   : > { %301 = vst [vmem:[%s3440_s29 + $0xf0] sm:$0xf] %v300_v60  ;;  %303 = vst [vmem:[%s3440_s29 + $0xf4] sm:$0xf] %v302_v61  ;;  %v304_v62 = vld [vmem:[%s3433_s28 + $0x2e8] sm:$0xf] }
  0x3f   : > { %v306_v63 = vld [vmem:[%s3433_s28 + $0x2f4] sm:$0xf]  ;;  %v308_v0 = vld [vmem:[%s3433_s28 + $0x300] sm:$0xf]  ;;  %305 = vst [vmem:[%s3440_s29 + $0xf8] sm:$0xf] %v304_v62 }
  0x40   : > { %307 = vst [vmem:[%s3440_s29 + $0xfc] sm:$0xf] %v306_v63  ;;  %309 = vst [vmem:[%s3440_s29 + $0x100] sm:$0xf] %v308_v0  ;;  %v310_v1 = vld [vmem:[%s3433_s28 + $0x30c] sm:$0xf] }
  0x41   : > { %v312_v2 = vld [vmem:[%s3433_s28 + $0x318] sm:$0xf]  ;;  %v314_v3 = vld [vmem:[%s3433_s28 + $0x324] sm:$0xf]  ;;  %311 = vst [vmem:[%s3440_s29 + $0x104] sm:$0xf] %v310_v1 }
  0x42   : > { %313 = vst [vmem:[%s3440_s29 + $0x108] sm:$0xf] %v312_v2  ;;  %315 = vst [vmem:[%s3440_s29 + $0x10c] sm:$0xf] %v314_v3  ;;  %v316_v4 = vld [vmem:[%s3433_s28 + $0x330] sm:$0xf] }
  0x43   : > { %v318_v5 = vld [vmem:[%s3433_s28 + $0x33c] sm:$0xf]  ;;  %v320_v6 = vld [vmem:[%s3433_s28 + $0x348] sm:$0xf]  ;;  %317 = vst [vmem:[%s3440_s29 + $0x110] sm:$0xf] %v316_v4 }
  0x44   : > { %319 = vst [vmem:[%s3440_s29 + $0x114] sm:$0xf] %v318_v5  ;;  %321 = vst [vmem:[%s3440_s29 + $0x118] sm:$0xf] %v320_v6  ;;  %v322_v7 = vld [vmem:[%s3433_s28 + $0x354] sm:$0xf] }
  0x45   : > { %v324_v8 = vld [vmem:[%s3433_s28 + $0x360] sm:$0xf]  ;;  %v326_v9 = vld [vmem:[%s3433_s28 + $0x36c] sm:$0xf]  ;;  %323 = vst [vmem:[%s3440_s29 + $0x11c] sm:$0xf] %v322_v7 }
  0x46   : > { %325 = vst [vmem:[%s3440_s29 + $0x120] sm:$0xf] %v324_v8  ;;  %327 = vst [vmem:[%s3440_s29 + $0x124] sm:$0xf] %v326_v9  ;;  %v328_v10 = vld [vmem:[%s3433_s28 + $0x378] sm:$0xf] }
  0x47   : > { %v330_v11 = vld [vmem:[%s3433_s28 + $0x384] sm:$0xf]  ;;  %v332_v12 = vld [vmem:[%s3433_s28 + $0x390] sm:$0xf]  ;;  %329 = vst [vmem:[%s3440_s29 + $0x128] sm:$0xf] %v328_v10 }
  0x48   : > { %331 = vst [vmem:[%s3440_s29 + $0x12c] sm:$0xf] %v330_v11  ;;  %333 = vst [vmem:[%s3440_s29 + $0x130] sm:$0xf] %v332_v12  ;;  %v334_v13 = vld [vmem:[%s3433_s28 + $0x39c] sm:$0xf] }
  0x49   : > { %v336_v14 = vld [vmem:[%s3433_s28 + $0x3a8] sm:$0xf]  ;;  %v338_v15 = vld [vmem:[%s3433_s28 + $0x3b4] sm:$0xf]  ;;  %335 = vst [vmem:[%s3440_s29 + $0x134] sm:$0xf] %v334_v13 }
  0x4a   : > { %337 = vst [vmem:[%s3440_s29 + $0x138] sm:$0xf] %v336_v14  ;;  %339 = vst [vmem:[%s3440_s29 + $0x13c] sm:$0xf] %v338_v15  ;;  %v340_v16 = vld [vmem:[%s3433_s28 + $0x3c0] sm:$0xf] }
  0x4b   : > { %v342_v17 = vld [vmem:[%s3433_s28 + $0x3cc] sm:$0xf]  ;;  %v344_v18 = vld [vmem:[%s3433_s28 + $0x3d8] sm:$0xf]  ;;  %341 = vst [vmem:[%s3440_s29 + $0x140] sm:$0xf] %v340_v16 }
  0x4c   : > { %343 = vst [vmem:[%s3440_s29 + $0x144] sm:$0xf] %v342_v17  ;;  %345 = vst [vmem:[%s3440_s29 + $0x148] sm:$0xf] %v344_v18  ;;  %v346_v19 = vld [vmem:[%s3433_s28 + $0x3e4] sm:$0xf] }
  0x4d   : > { %v348_v20 = vld [vmem:[%s3433_s28 + $0x3f0] sm:$0xf]  ;;  %v350_v21 = vld [vmem:[%s3433_s28 + $0x3fc] sm:$0xf]  ;;  %347 = vst [vmem:[%s3440_s29 + $0x14c] sm:$0xf] %v346_v19 }
  0x4e   : > { %349 = vst [vmem:[%s3440_s29 + $0x150] sm:$0xf] %v348_v20  ;;  %351 = vst [vmem:[%s3440_s29 + $0x154] sm:$0xf] %v350_v21  ;;  %v352_v22 = vld [vmem:[%s3433_s28 + $0x408] sm:$0xf] }
  0x4f   : > { %v354_v23 = vld [vmem:[%s3433_s28 + $0x414] sm:$0xf]  ;;  %v356_v24 = vld [vmem:[%s3433_s28 + $0x420] sm:$0xf]  ;;  %353 = vst [vmem:[%s3440_s29 + $0x158] sm:$0xf] %v352_v22 }
  0x50   : > { %355 = vst [vmem:[%s3440_s29 + $0x15c] sm:$0xf] %v354_v23  ;;  %357 = vst [vmem:[%s3440_s29 + $0x160] sm:$0xf] %v356_v24  ;;  %v358_v25 = vld [vmem:[%s3433_s28 + $0x42c] sm:$0xf] }
  0x51   : > { %v360_v26 = vld [vmem:[%s3433_s28 + $0x438] sm:$0xf]  ;;  %v362_v27 = vld [vmem:[%s3433_s28 + $0x444] sm:$0xf]  ;;  %359 = vst [vmem:[%s3440_s29 + $0x164] sm:$0xf] %v358_v25 }
  0x52   : > { %361 = vst [vmem:[%s3440_s29 + $0x168] sm:$0xf] %v360_v26  ;;  %363 = vst [vmem:[%s3440_s29 + $0x16c] sm:$0xf] %v362_v27  ;;  %v364_v28 = vld [vmem:[%s3433_s28 + $0x450] sm:$0xf] }
  0x53   : > { %v366_v29 = vld [vmem:[%s3433_s28 + $0x45c] sm:$0xf]  ;;  %v368_v30 = vld [vmem:[%s3433_s28 + $0x468] sm:$0xf]  ;;  %365 = vst [vmem:[%s3440_s29 + $0x170] sm:$0xf] %v364_v28 }
  0x54   : > { %367 = vst [vmem:[%s3440_s29 + $0x174] sm:$0xf] %v366_v29  ;;  %369 = vst [vmem:[%s3440_s29 + $0x178] sm:$0xf] %v368_v30  ;;  %v370_v31 = vld [vmem:[%s3433_s28 + $0x474] sm:$0xf] }
  0x55   : > { %v372_v32 = vld [vmem:[%s3433_s28 + $0x480] sm:$0xf]  ;;  %v374_v33 = vld [vmem:[%s3433_s28 + $0x48c] sm:$0xf]  ;;  %371 = vst [vmem:[%s3440_s29 + $0x17c] sm:$0xf] %v370_v31 }
  0x56   : > { %373 = vst [vmem:[%s3440_s29 + $0x180] sm:$0xf] %v372_v32  ;;  %375 = vst [vmem:[%s3440_s29 + $0x184] sm:$0xf] %v374_v33  ;;  %v376_v34 = vld [vmem:[%s3433_s28 + $0x498] sm:$0xf] }
  0x57   : > { %v378_v35 = vld [vmem:[%s3433_s28 + $0x4a4] sm:$0xf]  ;;  %v380_v36 = vld [vmem:[%s3433_s28 + $0x4b0] sm:$0xf]  ;;  %377 = vst [vmem:[%s3440_s29 + $0x188] sm:$0xf] %v376_v34 }
  0x58   : > { %379 = vst [vmem:[%s3440_s29 + $0x18c] sm:$0xf] %v378_v35  ;;  %381 = vst [vmem:[%s3440_s29 + $0x190] sm:$0xf] %v380_v36  ;;  %v382_v37 = vld [vmem:[%s3433_s28 + $0x4bc] sm:$0xf] }
  0x59   : > { %v384_v38 = vld [vmem:[%s3433_s28 + $0x4c8] sm:$0xf]  ;;  %v386_v39 = vld [vmem:[%s3433_s28 + $0x4d4] sm:$0xf]  ;;  %383 = vst [vmem:[%s3440_s29 + $0x194] sm:$0xf] %v382_v37 }
  0x5a   : > { %385 = vst [vmem:[%s3440_s29 + $0x198] sm:$0xf] %v384_v38  ;;  %387 = vst [vmem:[%s3440_s29 + $0x19c] sm:$0xf] %v386_v39  ;;  %v388_v40 = vld [vmem:[%s3433_s28 + $0x4e0] sm:$0xf] }
  0x5b   : > { %v390_v41 = vld [vmem:[%s3433_s28 + $0x4ec] sm:$0xf]  ;;  %v392_v42 = vld [vmem:[%s3433_s28 + $0x4f8] sm:$0xf]  ;;  %389 = vst [vmem:[%s3440_s29 + $0x1a0] sm:$0xf] %v388_v40 }
  0x5c   : > { %391 = vst [vmem:[%s3440_s29 + $0x1a4] sm:$0xf] %v390_v41  ;;  %393 = vst [vmem:[%s3440_s29 + $0x1a8] sm:$0xf] %v392_v42  ;;  %v394_v43 = vld [vmem:[%s3433_s28 + $0x504] sm:$0xf] }
  0x5d   : > { %v396_v44 = vld [vmem:[%s3433_s28 + $0x510] sm:$0xf]  ;;  %v398_v45 = vld [vmem:[%s3433_s28 + $0x51c] sm:$0xf]  ;;  %395 = vst [vmem:[%s3440_s29 + $0x1ac] sm:$0xf] %v394_v43 }
  0x5e   : > { %397 = vst [vmem:[%s3440_s29 + $0x1b0] sm:$0xf] %v396_v44  ;;  %399 = vst [vmem:[%s3440_s29 + $0x1b4] sm:$0xf] %v398_v45  ;;  %v400_v46 = vld [vmem:[%s3433_s28 + $0x528] sm:$0xf] }
  0x5f   : > { %v402_v47 = vld [vmem:[%s3433_s28 + $0x534] sm:$0xf]  ;;  %v404_v48 = vld [vmem:[%s3433_s28 + $0x540] sm:$0xf]  ;;  %401 = vst [vmem:[%s3440_s29 + $0x1b8] sm:$0xf] %v400_v46 }
  0x60   : > { %403 = vst [vmem:[%s3440_s29 + $0x1bc] sm:$0xf] %v402_v47  ;;  %405 = vst [vmem:[%s3440_s29 + $0x1c0] sm:$0xf] %v404_v48  ;;  %v406_v49 = vld [vmem:[%s3433_s28 + $0x54c] sm:$0xf] }
  0x61   : > { %v408_v50 = vld [vmem:[%s3433_s28 + $0x558] sm:$0xf]  ;;  %v410_v51 = vld [vmem:[%s3433_s28 + $0x564] sm:$0xf]  ;;  %407 = vst [vmem:[%s3440_s29 + $0x1c4] sm:$0xf] %v406_v49 }
  0x62   : > { %409 = vst [vmem:[%s3440_s29 + $0x1c8] sm:$0xf] %v408_v50  ;;  %411 = vst [vmem:[%s3440_s29 + $0x1cc] sm:$0xf] %v410_v51  ;;  %v412_v52 = vld [vmem:[%s3433_s28 + $0x570] sm:$0xf] }
  0x63   : > { %v414_v53 = vld [vmem:[%s3433_s28 + $0x57c] sm:$0xf]  ;;  %v416_v54 = vld [vmem:[%s3433_s28 + $0x588] sm:$0xf]  ;;  %413 = vst [vmem:[%s3440_s29 + $0x1d0] sm:$0xf] %v412_v52 }
  0x64   : > { %415 = vst [vmem:[%s3440_s29 + $0x1d4] sm:$0xf] %v414_v53  ;;  %417 = vst [vmem:[%s3440_s29 + $0x1d8] sm:$0xf] %v416_v54  ;;  %v418_v55 = vld [vmem:[%s3433_s28 + $0x594] sm:$0xf] }
  0x65   : > { %v420_v56 = vld [vmem:[%s3433_s28 + $0x5a0] sm:$0xf]  ;;  %v422_v57 = vld [vmem:[%s3433_s28 + $0x5ac] sm:$0xf]  ;;  %419 = vst [vmem:[%s3440_s29 + $0x1dc] sm:$0xf] %v418_v55 }
  0x66   : > { %421 = vst [vmem:[%s3440_s29 + $0x1e0] sm:$0xf] %v420_v56  ;;  %423 = vst [vmem:[%s3440_s29 + $0x1e4] sm:$0xf] %v422_v57  ;;  %v424_v58 = vld [vmem:[%s3433_s28 + $0x5b8] sm:$0xf] }
  0x67   : > { %v426_v59 = vld [vmem:[%s3433_s28 + $0x5c4] sm:$0xf]  ;;  %v428_v60 = vld [vmem:[%s3433_s28 + $0x5d0] sm:$0xf]  ;;  %425 = vst [vmem:[%s3440_s29 + $0x1e8] sm:$0xf] %v424_v58 }
  0x68   : > { %427 = vst [vmem:[%s3440_s29 + $0x1ec] sm:$0xf] %v426_v59  ;;  %429 = vst [vmem:[%s3440_s29 + $0x1f0] sm:$0xf] %v428_v60  ;;  %v430_v61 = vld [vmem:[%s3433_s28 + $0x5dc] sm:$0xf] }
  0x69   : > { %v432_v62 = vld [vmem:[%s3433_s28 + $0x5e8] sm:$0xf]  ;;  %v434_v63 = vld [vmem:[%s3433_s28 + $0x5f4] sm:$0xf]  ;;  %431 = vst [vmem:[%s3440_s29 + $0x1f4] sm:$0xf] %v430_v61 }
  0x6a   : > { %433 = vst [vmem:[%s3440_s29 + $0x1f8] sm:$0xf] %v432_v62  ;;  %435 = vst [vmem:[%s3440_s29 + $0x1fc] sm:$0xf] %v434_v63  ;;  %v436_v0 = vld [vmem:[%s3433_s28 + $0x600] sm:$0xf] }
  0x6b   : > { %v438_v1 = vld [vmem:[%s3433_s28 + $0x60c] sm:$0xf]  ;;  %v440_v2 = vld [vmem:[%s3433_s28 + $0x618] sm:$0xf]  ;;  %437 = vst [vmem:[%s3440_s29 + $0x200] sm:$0xf] %v436_v0 }
  0x6c   : > { %439 = vst [vmem:[%s3440_s29 + $0x204] sm:$0xf] %v438_v1  ;;  %441 = vst [vmem:[%s3440_s29 + $0x208] sm:$0xf] %v440_v2  ;;  %v442_v3 = vld [vmem:[%s3433_s28 + $0x624] sm:$0xf] }
  0x6d   : > { %v444_v4 = vld [vmem:[%s3433_s28 + $0x630] sm:$0xf]  ;;  %v446_v5 = vld [vmem:[%s3433_s28 + $0x63c] sm:$0xf]  ;;  %443 = vst [vmem:[%s3440_s29 + $0x20c] sm:$0xf] %v442_v3 }
  0x6e   : > { %445 = vst [vmem:[%s3440_s29 + $0x210] sm:$0xf] %v444_v4  ;;  %447 = vst [vmem:[%s3440_s29 + $0x214] sm:$0xf] %v446_v5  ;;  %v448_v6 = vld [vmem:[%s3433_s28 + $0x648] sm:$0xf] }
  0x6f   : > { %v450_v7 = vld [vmem:[%s3433_s28 + $0x654] sm:$0xf]  ;;  %v452_v8 = vld [vmem:[%s3433_s28 + $0x660] sm:$0xf]  ;;  %449 = vst [vmem:[%s3440_s29 + $0x218] sm:$0xf] %v448_v6 }
  0x70   : > { %451 = vst [vmem:[%s3440_s29 + $0x21c] sm:$0xf] %v450_v7  ;;  %453 = vst [vmem:[%s3440_s29 + $0x220] sm:$0xf] %v452_v8  ;;  %v454_v9 = vld [vmem:[%s3433_s28 + $0x66c] sm:$0xf] }
  0x71   : > { %v456_v10 = vld [vmem:[%s3433_s28 + $0x678] sm:$0xf]  ;;  %v458_v11 = vld [vmem:[%s3433_s28 + $0x684] sm:$0xf]  ;;  %455 = vst [vmem:[%s3440_s29 + $0x224] sm:$0xf] %v454_v9 }
  0x72   : > { %457 = vst [vmem:[%s3440_s29 + $0x228] sm:$0xf] %v456_v10  ;;  %459 = vst [vmem:[%s3440_s29 + $0x22c] sm:$0xf] %v458_v11  ;;  %v460_v12 = vld [vmem:[%s3433_s28 + $0x690] sm:$0xf] }
  0x73   : > { %v462_v13 = vld [vmem:[%s3433_s28 + $0x69c] sm:$0xf]  ;;  %v464_v14 = vld [vmem:[%s3433_s28 + $0x6a8] sm:$0xf]  ;;  %461 = vst [vmem:[%s3440_s29 + $0x230] sm:$0xf] %v460_v12 }
  0x74   : > { %463 = vst [vmem:[%s3440_s29 + $0x234] sm:$0xf] %v462_v13  ;;  %465 = vst [vmem:[%s3440_s29 + $0x238] sm:$0xf] %v464_v14  ;;  %v466_v15 = vld [vmem:[%s3433_s28 + $0x6b4] sm:$0xf] }
  0x75   : > { %v468_v16 = vld [vmem:[%s3433_s28 + $0x6c0] sm:$0xf]  ;;  %v470_v17 = vld [vmem:[%s3433_s28 + $0x6cc] sm:$0xf]  ;;  %467 = vst [vmem:[%s3440_s29 + $0x23c] sm:$0xf] %v466_v15 }
  0x76   : > { %469 = vst [vmem:[%s3440_s29 + $0x240] sm:$0xf] %v468_v16  ;;  %471 = vst [vmem:[%s3440_s29 + $0x244] sm:$0xf] %v470_v17  ;;  %v472_v18 = vld [vmem:[%s3433_s28 + $0x6d8] sm:$0xf] }
  0x77   : > { %v474_v19 = vld [vmem:[%s3433_s28 + $0x6e4] sm:$0xf]  ;;  %v476_v20 = vld [vmem:[%s3433_s28 + $0x6f0] sm:$0xf]  ;;  %473 = vst [vmem:[%s3440_s29 + $0x248] sm:$0xf] %v472_v18 }
  0x78   : > { %475 = vst [vmem:[%s3440_s29 + $0x24c] sm:$0xf] %v474_v19  ;;  %477 = vst [vmem:[%s3440_s29 + $0x250] sm:$0xf] %v476_v20  ;;  %v478_v21 = vld [vmem:[%s3433_s28 + $0x6fc] sm:$0xf] }
  0x79   : > { %v480_v22 = vld [vmem:[%s3433_s28 + $0x708] sm:$0xf]  ;;  %v482_v23 = vld [vmem:[%s3433_s28 + $0x714] sm:$0xf]  ;;  %479 = vst [vmem:[%s3440_s29 + $0x254] sm:$0xf] %v478_v21 }
  0x7a   : > { %481 = vst [vmem:[%s3440_s29 + $0x258] sm:$0xf] %v480_v22  ;;  %483 = vst [vmem:[%s3440_s29 + $0x25c] sm:$0xf] %v482_v23  ;;  %v484_v24 = vld [vmem:[%s3433_s28 + $0x720] sm:$0xf] }
  0x7b   : > { %v486_v25 = vld [vmem:[%s3433_s28 + $0x72c] sm:$0xf]  ;;  %v488_v26 = vld [vmem:[%s3433_s28 + $0x738] sm:$0xf]  ;;  %485 = vst [vmem:[%s3440_s29 + $0x260] sm:$0xf] %v484_v24 }
  0x7c   : > { %487 = vst [vmem:[%s3440_s29 + $0x264] sm:$0xf] %v486_v25  ;;  %489 = vst [vmem:[%s3440_s29 + $0x268] sm:$0xf] %v488_v26  ;;  %v490_v27 = vld [vmem:[%s3433_s28 + $0x744] sm:$0xf] }
  0x7d   : > { %v492_v28 = vld [vmem:[%s3433_s28 + $0x750] sm:$0xf]  ;;  %v494_v29 = vld [vmem:[%s3433_s28 + $0x75c] sm:$0xf]  ;;  %491 = vst [vmem:[%s3440_s29 + $0x26c] sm:$0xf] %v490_v27 }
  0x7e   : > { %493 = vst [vmem:[%s3440_s29 + $0x270] sm:$0xf] %v492_v28  ;;  %495 = vst [vmem:[%s3440_s29 + $0x274] sm:$0xf] %v494_v29  ;;  %v496_v30 = vld [vmem:[%s3433_s28 + $0x768] sm:$0xf] }
  0x7f   : > { %v498_v31 = vld [vmem:[%s3433_s28 + $0x774] sm:$0xf]  ;;  %v500_v32 = vld [vmem:[%s3433_s28 + $0x780] sm:$0xf]  ;;  %497 = vst [vmem:[%s3440_s29 + $0x278] sm:$0xf] %v496_v30 }
  0x80   : > { %499 = vst [vmem:[%s3440_s29 + $0x27c] sm:$0xf] %v498_v31  ;;  %501 = vst [vmem:[%s3440_s29 + $0x280] sm:$0xf] %v500_v32  ;;  %v502_v33 = vld [vmem:[%s3433_s28 + $0x78c] sm:$0xf] }
  0x81   : > { %v504_v34 = vld [vmem:[%s3433_s28 + $0x798] sm:$0xf]  ;;  %v506_v35 = vld [vmem:[%s3433_s28 + $0x7a4] sm:$0xf]  ;;  %503 = vst [vmem:[%s3440_s29 + $0x284] sm:$0xf] %v502_v33 }
  0x82   : > { %505 = vst [vmem:[%s3440_s29 + $0x288] sm:$0xf] %v504_v34  ;;  %507 = vst [vmem:[%s3440_s29 + $0x28c] sm:$0xf] %v506_v35  ;;  %v508_v36 = vld [vmem:[%s3433_s28 + $0x7b0] sm:$0xf] }
  0x83   : > { %v510_v37 = vld [vmem:[%s3433_s28 + $0x7bc] sm:$0xf]  ;;  %v512_v38 = vld [vmem:[%s3433_s28 + $0x7c8] sm:$0xf]  ;;  %509 = vst [vmem:[%s3440_s29 + $0x290] sm:$0xf] %v508_v36 }
  0x84   : > { %511 = vst [vmem:[%s3440_s29 + $0x294] sm:$0xf] %v510_v37  ;;  %513 = vst [vmem:[%s3440_s29 + $0x298] sm:$0xf] %v512_v38  ;;  %v514_v39 = vld [vmem:[%s3433_s28 + $0x7d4] sm:$0xf] }
  0x85   : > { %v516_v40 = vld [vmem:[%s3433_s28 + $0x7e0] sm:$0xf]  ;;  %v518_v41 = vld [vmem:[%s3433_s28 + $0x7ec] sm:$0xf]  ;;  %515 = vst [vmem:[%s3440_s29 + $0x29c] sm:$0xf] %v514_v39 }
  0x86   : > { %517 = vst [vmem:[%s3440_s29 + $0x2a0] sm:$0xf] %v516_v40  ;;  %519 = vst [vmem:[%s3440_s29 + $0x2a4] sm:$0xf] %v518_v41  ;;  %v520_v42 = vld [vmem:[%s3433_s28 + $0x7f8] sm:$0xf] }
  0x87   : > { %v522_v43 = vld [vmem:[%s3433_s28 + $0x804] sm:$0xf]  ;;  %v524_v44 = vld [vmem:[%s3433_s28 + $0x810] sm:$0xf]  ;;  %521 = vst [vmem:[%s3440_s29 + $0x2a8] sm:$0xf] %v520_v42 }
  0x88   : > { %523 = vst [vmem:[%s3440_s29 + $0x2ac] sm:$0xf] %v522_v43  ;;  %525 = vst [vmem:[%s3440_s29 + $0x2b0] sm:$0xf] %v524_v44  ;;  %v526_v45 = vld [vmem:[%s3433_s28 + $0x81c] sm:$0xf] }
  0x89   : > { %v528_v46 = vld [vmem:[%s3433_s28 + $0x828] sm:$0xf]  ;;  %v530_v47 = vld [vmem:[%s3433_s28 + $0x834] sm:$0xf]  ;;  %527 = vst [vmem:[%s3440_s29 + $0x2b4] sm:$0xf] %v526_v45 }
  0x8a   : > { %529 = vst [vmem:[%s3440_s29 + $0x2b8] sm:$0xf] %v528_v46  ;;  %531 = vst [vmem:[%s3440_s29 + $0x2bc] sm:$0xf] %v530_v47  ;;  %v532_v48 = vld [vmem:[%s3433_s28 + $0x840] sm:$0xf] }
  0x8b   : > { %v534_v49 = vld [vmem:[%s3433_s28 + $0x84c] sm:$0xf]  ;;  %v536_v50 = vld [vmem:[%s3433_s28 + $0x858] sm:$0xf]  ;;  %533 = vst [vmem:[%s3440_s29 + $0x2c0] sm:$0xf] %v532_v48 }
  0x8c   : > { %535 = vst [vmem:[%s3440_s29 + $0x2c4] sm:$0xf] %v534_v49  ;;  %537 = vst [vmem:[%s3440_s29 + $0x2c8] sm:$0xf] %v536_v50  ;;  %v538_v51 = vld [vmem:[%s3433_s28 + $0x864] sm:$0xf] }
  0x8d   : > { %v540_v52 = vld [vmem:[%s3433_s28 + $0x870] sm:$0xf]  ;;  %v542_v53 = vld [vmem:[%s3433_s28 + $0x87c] sm:$0xf]  ;;  %539 = vst [vmem:[%s3440_s29 + $0x2cc] sm:$0xf] %v538_v51 }
  0x8e   : > { %541 = vst [vmem:[%s3440_s29 + $0x2d0] sm:$0xf] %v540_v52  ;;  %543 = vst [vmem:[%s3440_s29 + $0x2d4] sm:$0xf] %v542_v53  ;;  %v544_v54 = vld [vmem:[%s3433_s28 + $0x888] sm:$0xf] }
  0x8f   : > { %v546_v55 = vld [vmem:[%s3433_s28 + $0x894] sm:$0xf]  ;;  %v548_v56 = vld [vmem:[%s3433_s28 + $0x8a0] sm:$0xf]  ;;  %545 = vst [vmem:[%s3440_s29 + $0x2d8] sm:$0xf] %v544_v54 }
  0x90   : > { %547 = vst [vmem:[%s3440_s29 + $0x2dc] sm:$0xf] %v546_v55  ;;  %549 = vst [vmem:[%s3440_s29 + $0x2e0] sm:$0xf] %v548_v56  ;;  %v550_v57 = vld [vmem:[%s3433_s28 + $0x8ac] sm:$0xf] }
  0x91   : > { %v552_v58 = vld [vmem:[%s3433_s28 + $0x8b8] sm:$0xf]  ;;  %v554_v59 = vld [vmem:[%s3433_s28 + $0x8c4] sm:$0xf]  ;;  %551 = vst [vmem:[%s3440_s29 + $0x2e4] sm:$0xf] %v550_v57 }
  0x92   : > { %553 = vst [vmem:[%s3440_s29 + $0x2e8] sm:$0xf] %v552_v58  ;;  %555 = vst [vmem:[%s3440_s29 + $0x2ec] sm:$0xf] %v554_v59  ;;  %v556_v60 = vld [vmem:[%s3433_s28 + $0x8d0] sm:$0xf] }
  0x93   : > { %v558_v61 = vld [vmem:[%s3433_s28 + $0x8dc] sm:$0xf]  ;;  %v560_v62 = vld [vmem:[%s3433_s28 + $0x8e8] sm:$0xf]  ;;  %557 = vst [vmem:[%s3440_s29 + $0x2f0] sm:$0xf] %v556_v60 }
  0x94   : > { %559 = vst [vmem:[%s3440_s29 + $0x2f4] sm:$0xf] %v558_v61  ;;  %561 = vst [vmem:[%s3440_s29 + $0x2f8] sm:$0xf] %v560_v62  ;;  %v562_v63 = vld [vmem:[%s3433_s28 + $0x8f4] sm:$0xf] }
  0x95   : > { %v564_v0 = vld [vmem:[%s3433_s28 + $0x900] sm:$0xf]  ;;  %v566_v1 = vld [vmem:[%s3433_s28 + $0x90c] sm:$0xf]  ;;  %563 = vst [vmem:[%s3440_s29 + $0x2fc] sm:$0xf] %v562_v63 }
  0x96   : > { %565 = vst [vmem:[%s3440_s29 + $0x300] sm:$0xf] %v564_v0  ;;  %567 = vst [vmem:[%s3440_s29 + $0x304] sm:$0xf] %v566_v1  ;;  %v568_v2 = vld [vmem:[%s3433_s28 + $0x918] sm:$0xf] }
  0x97   : > { %v570_v3 = vld [vmem:[%s3433_s28 + $0x924] sm:$0xf]  ;;  %v572_v4 = vld [vmem:[%s3433_s28 + $0x930] sm:$0xf]  ;;  %569 = vst [vmem:[%s3440_s29 + $0x308] sm:$0xf] %v568_v2 }
  0x98   : > { %571 = vst [vmem:[%s3440_s29 + $0x30c] sm:$0xf] %v570_v3  ;;  %573 = vst [vmem:[%s3440_s29 + $0x310] sm:$0xf] %v572_v4  ;;  %v574_v5 = vld [vmem:[%s3433_s28 + $0x93c] sm:$0xf] }
  0x99   : > { %v576_v6 = vld [vmem:[%s3433_s28 + $0x948] sm:$0xf]  ;;  %v578_v7 = vld [vmem:[%s3433_s28 + $0x954] sm:$0xf]  ;;  %575 = vst [vmem:[%s3440_s29 + $0x314] sm:$0xf] %v574_v5 }
  0x9a   : > { %577 = vst [vmem:[%s3440_s29 + $0x318] sm:$0xf] %v576_v6  ;;  %579 = vst [vmem:[%s3440_s29 + $0x31c] sm:$0xf] %v578_v7  ;;  %v580_v8 = vld [vmem:[%s3433_s28 + $0x960] sm:$0xf] }
  0x9b   : > { %v582_v9 = vld [vmem:[%s3433_s28 + $0x96c] sm:$0xf]  ;;  %v584_v10 = vld [vmem:[%s3433_s28 + $0x978] sm:$0xf]  ;;  %581 = vst [vmem:[%s3440_s29 + $0x320] sm:$0xf] %v580_v8 }
  0x9c   : > { %583 = vst [vmem:[%s3440_s29 + $0x324] sm:$0xf] %v582_v9  ;;  %585 = vst [vmem:[%s3440_s29 + $0x328] sm:$0xf] %v584_v10  ;;  %v586_v11 = vld [vmem:[%s3433_s28 + $0x984] sm:$0xf] }
  0x9d   : > { %v588_v12 = vld [vmem:[%s3433_s28 + $0x990] sm:$0xf]  ;;  %v590_v13 = vld [vmem:[%s3433_s28 + $0x99c] sm:$0xf]  ;;  %587 = vst [vmem:[%s3440_s29 + $0x32c] sm:$0xf] %v586_v11 }
  0x9e   : > { %589 = vst [vmem:[%s3440_s29 + $0x330] sm:$0xf] %v588_v12  ;;  %591 = vst [vmem:[%s3440_s29 + $0x334] sm:$0xf] %v590_v13  ;;  %v592_v14 = vld [vmem:[%s3433_s28 + $0x9a8] sm:$0xf] }
  0x9f   : > { %v594_v15 = vld [vmem:[%s3433_s28 + $0x9b4] sm:$0xf]  ;;  %v596_v16 = vld [vmem:[%s3433_s28 + $0x9c0] sm:$0xf]  ;;  %593 = vst [vmem:[%s3440_s29 + $0x338] sm:$0xf] %v592_v14 }
  0xa0   : > { %595 = vst [vmem:[%s3440_s29 + $0x33c] sm:$0xf] %v594_v15  ;;  %597 = vst [vmem:[%s3440_s29 + $0x340] sm:$0xf] %v596_v16  ;;  %v598_v17 = vld [vmem:[%s3433_s28 + $0x9cc] sm:$0xf] }
  0xa1   : > { %v600_v18 = vld [vmem:[%s3433_s28 + $0x9d8] sm:$0xf]  ;;  %v602_v19 = vld [vmem:[%s3433_s28 + $0x9e4] sm:$0xf]  ;;  %599 = vst [vmem:[%s3440_s29 + $0x344] sm:$0xf] %v598_v17 }
  0xa2   : > { %601 = vst [vmem:[%s3440_s29 + $0x348] sm:$0xf] %v600_v18  ;;  %603 = vst [vmem:[%s3440_s29 + $0x34c] sm:$0xf] %v602_v19  ;;  %v604_v20 = vld [vmem:[%s3433_s28 + $0x9f0] sm:$0xf] }
  0xa3   : > { %v606_v21 = vld [vmem:[%s3433_s28 + $0x9fc] sm:$0xf]  ;;  %v608_v22 = vld [vmem:[%s3433_s28 + $0xa08] sm:$0xf]  ;;  %605 = vst [vmem:[%s3440_s29 + $0x350] sm:$0xf] %v604_v20 }
  0xa4   : > { %607 = vst [vmem:[%s3440_s29 + $0x354] sm:$0xf] %v606_v21  ;;  %609 = vst [vmem:[%s3440_s29 + $0x358] sm:$0xf] %v608_v22  ;;  %v610_v23 = vld [vmem:[%s3433_s28 + $0xa14] sm:$0xf] }
  0xa5   : > { %v612_v24 = vld [vmem:[%s3433_s28 + $0xa20] sm:$0xf]  ;;  %v614_v25 = vld [vmem:[%s3433_s28 + $0xa2c] sm:$0xf]  ;;  %611 = vst [vmem:[%s3440_s29 + $0x35c] sm:$0xf] %v610_v23 }
  0xa6   : > { %613 = vst [vmem:[%s3440_s29 + $0x360] sm:$0xf] %v612_v24  ;;  %615 = vst [vmem:[%s3440_s29 + $0x364] sm:$0xf] %v614_v25  ;;  %v616_v26 = vld [vmem:[%s3433_s28 + $0xa38] sm:$0xf] }
  0xa7   : > { %v618_v27 = vld [vmem:[%s3433_s28 + $0xa44] sm:$0xf]  ;;  %v620_v28 = vld [vmem:[%s3433_s28 + $0xa50] sm:$0xf]  ;;  %617 = vst [vmem:[%s3440_s29 + $0x368] sm:$0xf] %v616_v26 }
  0xa8   : > { %619 = vst [vmem:[%s3440_s29 + $0x36c] sm:$0xf] %v618_v27  ;;  %621 = vst [vmem:[%s3440_s29 + $0x370] sm:$0xf] %v620_v28  ;;  %v622_v29 = vld [vmem:[%s3433_s28 + $0xa5c] sm:$0xf] }
  0xa9   : > { %v624_v30 = vld [vmem:[%s3433_s28 + $0xa68] sm:$0xf]  ;;  %v626_v31 = vld [vmem:[%s3433_s28 + $0xa74] sm:$0xf]  ;;  %623 = vst [vmem:[%s3440_s29 + $0x374] sm:$0xf] %v622_v29 }
  0xaa   : > { %625 = vst [vmem:[%s3440_s29 + $0x378] sm:$0xf] %v624_v30  ;;  %627 = vst [vmem:[%s3440_s29 + $0x37c] sm:$0xf] %v626_v31 }
  0xab PF: > { %p2751_p8 = scmp.ge.s32.totalorder %s3363_s16, 1  ;;  %p1103_p9 = scmp.lt.s32.totalorder %s3363_s16, 4 }
  0xad   : > { %p1104_p10 = pnand %p2751_p8, %p1103_p9 }
  0xae   : > { %s1110_s30 = sand.u32 (!%p1104_p10), 1, %s3347_s12   ;;  %v3205_v32 = vld [vmem:[%s4116_s0 + $0x4] ss:$56 sps:$4 sm:$0xff] (!%p1104_p10)   ;;  %v3203_v0 = vld [vmem:[%s4116_s0] ss:$56 sps:$4 sm:$0xff] (!%p1104_p10)   ;;  %p1148_p11 = scmp.lt.s32.totalorder (!%p1104_p10), %s3355_s14, 2 }
  0xaf   : > { %1107 = sbr.rel (%p1104_p10) target bundleno = 543 (0x21f), region = 69  ;;  %v3208_v33 = vld [vmem:[%s4116_s0 + $0xc] ss:$56 sps:$4 sm:$0xff] (!%p1104_p10)   ;;  %2256 = vmatprep.mubr.bf16.mxu0 (!%p1104_p10), %v3205_v32  ;;  %v3206_v2 = vld [vmem:[%s4116_s0 + $0x8] ss:$56 sps:$4 sm:$0xff] (!%p1104_p10)   ;;  %s2752_s20 = sshll.u32 (!%p1104_p10), %s1110_s30, 4 }
  0xb0   : > { %s3130_s4 = smul.u32 (!%p1104_p10), 896, %s1110_s30  ;;  %2305 = vmatprep.mubr.bf16.mxu1 (!%p1104_p10), %v3208_v33  ;;  %v3229_v4 = vld [vmem:[%s4116_s0 + $0x74] ss:$56 sps:$4 sm:$0xff] (!%p1104_p10)   ;;  %v3231_v11 = vld [vmem:[%s4116_s0 + $0x70] ss:$56 sps:$4 sm:$0xff] (!%p1104_p10)   ;;  %s1140_s23 = scalar_lea.vmem (!%p1104_p10), [#allocation3], %s2752_s20 }
  0xb1   : > { %v3234_v28 = vld [vmem:[%s4116_s0 + $0x7c] ss:$56 sps:$4 sm:$0xff] (!%p1104_p10)   ;;  %v3238_v31 = vld [vmem:[%s4116_s0 + $0x78] ss:$56 sps:$4 sm:$0xff] (!%p1104_p10)  }
  0xb2   : > { %s3896_s9 = scalar_lea.vmem (!%p1104_p10), [#allocation2], %s3130_s4 }
  0xb3   : > { %v3171_v34 = vld [vmem:[%s3896_s9 + $0x40] sm:$0xff] (!%p1104_p10)   ;;  %v3175_v38 = vld [vmem:[%s3896_s9 + $0x48] sm:$0xff] (!%p1104_p10)   ;;  %v3179_v42 = vld [vmem:[%s3896_s9 + $0x50] sm:$0xff] (!%p1104_p10)  }
  0xb4   : > { %v3172_v35 = vld [vmem:[%s3896_s9 + $0xc0] sm:$0xff] (!%p1104_p10)   ;;  %2917 = vmatprep.subr.bf16.mxu0 (!%p1104_p10), %v3171_v34  ;;  %v3176_v39 = vld [vmem:[%s3896_s9 + $0xc8] sm:$0xff] (!%p1104_p10)   ;;  %v3180_v43 = vld [vmem:[%s3896_s9 + $0xd0] sm:$0xff] (!%p1104_p10)  }
  0xb5   : > { %v3173_v36 = vld [vmem:[%s3896_s9] sm:$0xff] (!%p1104_p10)   ;;  %2945 = vmatprep.subr.bf16.mxu1 (!%p1104_p10), %v3172_v35  ;;  %v3177_v40 = vld [vmem:[%s3896_s9 + $0x8] sm:$0xff] (!%p1104_p10)   ;;  %v3181_v44 = vld [vmem:[%s3896_s9 + $0x10] sm:$0xff] (!%p1104_p10)  }
  0xb6   : > { %v3174_v37 = vld [vmem:[%s3896_s9 + $0x80] sm:$0xff]   ;;  %2918 = vmatpush3.bf16.msra.mxu0 %v3173_v36  ;;  %v3178_v41 = vld [vmem:[%s3896_s9 + $0x88] sm:$0xff]   ;;  %v3182_v45 = vld [vmem:[%s3896_s9 + $0x90] sm:$0xff]   ;;  %s1149_s11 = scalar_select %p1148_p11, %s3355_s14, 2 }
  0xb7   : > { %2946 = vmatpush3.bf16.msra.mxu1 %v3174_v37  ;;  %2919 = vmatprep.subr.bf16.mxu0 %v3175_v38  ;;  %v3183_v46 = vld [vmem:[%s3896_s9 + $0x58] sm:$0xff]   ;;  %v3187_v50 = vld [vmem:[%s3896_s9 + $0x60] sm:$0xff]   ;;  %v3191_v54 = vld [vmem:[%s3896_s9 + $0x68] sm:$0xff]   ;;  %s2899_s24 = sshll.u32 (%p3420_p6), %s3355_s14, 2 }
  0xb8   : > { %2947 = vmatprep.subr.bf16.mxu1 %v3176_v39  ;;  %v3184_v47 = vld [vmem:[%s3896_s9 + $0xd8] sm:$0xff]   ;;  %v3188_v51 = vld [vmem:[%s3896_s9 + $0xe0] sm:$0xff]   ;;  %v3192_v55 = vld [vmem:[%s3896_s9 + $0xe8] sm:$0xff]   ;;  %s2602_s25 = scalar_lea.vmem (%p3420_p6), %s4119_s3, %s2899_s24 }
  0xb9   : > { %v3185_v48 = vld [vmem:[%s3896_s9 + $0x18] sm:$0xff]   ;;  %v3189_v52 = vld [vmem:[%s3896_s9 + $0x20] sm:$0xff]   ;;  %v3193_v56 = vld [vmem:[%s3896_s9 + $0x28] sm:$0xff]  }
  0xba   : > { %2920 = vmatpush3.bf16.msra.mxu0 %v3177_v40  ;;  %v3186_v49 = vld [vmem:[%s3896_s9 + $0x98] sm:$0xff]   ;;  %v3190_v53 = vld [vmem:[%s3896_s9 + $0xa0] sm:$0xff]   ;;  %v3194_v57 = vld [vmem:[%s3896_s9 + $0xa8] sm:$0xff]  }
  0xbb   : > { %2948 = vmatpush3.bf16.msra.mxu1 %v3178_v41  ;;  %2921 = vmatprep.subr.bf16.mxu0 %v3179_v42  ;;  %v3195_v58 = vld [vmem:[%s3896_s9 + $0x70] sm:$0xff]   ;;  %v3199_v62 = vld [vmem:[%s3896_s9 + $0x78] sm:$0xff]   ;;  %v3209_v5 = vld [vmem:[%s3896_s9 + $0x140] sm:$0xff]  }
  0xbc   : > { %2949 = vmatprep.subr.bf16.mxu1 %v3180_v43  ;;  %v3196_v59 = vld [vmem:[%s3896_s9 + $0xf0] sm:$0xff]   ;;  %v3200_v63 = vld [vmem:[%s3896_s9 + $0xf8] sm:$0xff]   ;;  %v3210_v6 = vld [vmem:[%s3896_s9 + $0x1c0] sm:$0xff]  }
  0xbd   : > { %v3197_v60 = vld [vmem:[%s3896_s9 + $0x30] sm:$0xff]   ;;  %v3201_v1 = vld [vmem:[%s3896_s9 + $0x38] sm:$0xff]   ;;  %v3211_v7 = vld [vmem:[%s3896_s9 + $0x100] sm:$0xff]  }
  0xbe   : > { %2922 = vmatpush3.bf16.msra.mxu0 %v3181_v44  ;;  %v3198_v61 = vld [vmem:[%s3896_s9 + $0xb0] sm:$0xff]   ;;  %v3202_v3 = vld [vmem:[%s3896_s9 + $0xb8] sm:$0xff]   ;;  %v3212_v8 = vld [vmem:[%s3896_s9 + $0x180] sm:$0xff]  }
  0xbf   : > { %2950 = vmatpush3.bf16.msra.mxu1 %v3182_v45  ;;  %2923 = vmatprep.subr.bf16.mxu0 %v3183_v46  ;;  %v3213_v9 = vld [vmem:[%s3896_s9 + $0x148] sm:$0xff]   ;;  %v3217_v14 = vld [vmem:[%s3896_s9 + $0x150] sm:$0xff]   ;;  %v3221_v18 = vld [vmem:[%s3896_s9 + $0x158] sm:$0xff]  }
  0xc0   : > { %2951 = vmatprep.subr.bf16.mxu1 %v3184_v47  ;;  %v3214_v10 = vld [vmem:[%s3896_s9 + $0x1c8] sm:$0xff]   ;;  %v3218_v15 = vld [vmem:[%s3896_s9 + $0x1d0] sm:$0xff]   ;;  %v3222_v19 = vld [vmem:[%s3896_s9 + $0x1d8] sm:$0xff]  }
  0xc1   : > { %v3215_v12 = vld [vmem:[%s3896_s9 + $0x108] sm:$0xff]   ;;  %v3219_v16 = vld [vmem:[%s3896_s9 + $0x110] sm:$0xff]   ;;  %v3223_v20 = vld [vmem:[%s3896_s9 + $0x118] sm:$0xff]  }
  0xc2   : > { %2924 = vmatpush3.bf16.msra.mxu0 %v3185_v48  ;;  %v3216_v13 = vld [vmem:[%s3896_s9 + $0x188] sm:$0xff]   ;;  %v3220_v17 = vld [vmem:[%s3896_s9 + $0x190] sm:$0xff]   ;;  %v3224_v21 = vld [vmem:[%s3896_s9 + $0x198] sm:$0xff]  }
  0xc3   : > { %2952 = vmatpush3.bf16.msra.mxu1 %v3186_v49  ;;  %2925 = vmatprep.subr.bf16.mxu0 %v3187_v50  ;;  %v3225_v22 = vld [vmem:[%s3896_s9 + $0x160] sm:$0xff]   ;;  %v3232_v26 = vld [vmem:[%s3896_s9 + $0x168] sm:$0xff]   ;;  %v3239_v32 = vld [vmem:[%s3896_s9 + $0x170] sm:$0xff]  }
  0xc4   : > { %2953 = vmatprep.subr.bf16.mxu1 %v3188_v51  ;;  %v3226_v23 = vld [vmem:[%s3896_s9 + $0x1e0] sm:$0xff]   ;;  %v3233_v27 = vld [vmem:[%s3896_s9 + $0x1e8] sm:$0xff]   ;;  %v3240_v33 = vld [vmem:[%s3896_s9 + $0x1f0] sm:$0xff]  }
  0xc5   : > { %v3227_v24 = vld [vmem:[%s3896_s9 + $0x120] sm:$0xff]   ;;  %v3236_v29 = vld [vmem:[%s3896_s9 + $0x128] sm:$0xff]   ;;  %v3241_v34 = vld [vmem:[%s3896_s9 + $0x130] sm:$0xff]  }
  0xc6   : > { %2926 = vmatpush3.bf16.msra.mxu0 %v3189_v52  ;;  %v3228_v25 = vld [vmem:[%s3896_s9 + $0x1a0] sm:$0xff]   ;;  %v3237_v30 = vld [vmem:[%s3896_s9 + $0x1a8] sm:$0xff]   ;;  %v3242_v35 = vld [vmem:[%s3896_s9 + $0x1b0] sm:$0xff]  }
  0xc7   : > { %2954 = vmatpush3.bf16.msra.mxu1 %v3190_v53  ;;  %2927 = vmatprep.subr.bf16.mxu0 %v3191_v54  ;;  %v3243_v36 = vld [vmem:[%s3896_s9 + $0x178] sm:$0xff]   ;;  %v3247_v40 = vld [vmem:[%s4116_s0 + $0x10] ss:$56 sps:$4 sm:$0xff]   ;;  %v3249_v41 = vld [vmem:[%s4116_s0 + $0x14] ss:$56 sps:$4 sm:$0xff]  }
  0xc8   : > { %2955 = vmatprep.subr.bf16.mxu1 %v3192_v55  ;;  %v3244_v37 = vld [vmem:[%s3896_s9 + $0x1f8] sm:$0xff]   ;;  %v3253_v44 = vld [vmem:[%s3896_s9 + $0x240] sm:$0xff]   ;;  %v3257_v48 = vld [vmem:[%s3896_s9 + $0x248] sm:$0xff]  }
  0xc9   : > { %v3245_v38 = vld [vmem:[%s3896_s9 + $0x138] sm:$0xff]   ;;  %v3254_v45 = vld [vmem:[%s3896_s9 + $0x2c0] sm:$0xff]   ;;  %v3258_v49 = vld [vmem:[%s3896_s9 + $0x2c8] sm:$0xff]  }
  0xca   : > { %2928 = vmatpush3.bf16.msra.mxu0 %v3193_v56  ;;  %v3246_v39 = vld [vmem:[%s3896_s9 + $0x1b8] sm:$0xff]   ;;  %v3255_v46 = vld [vmem:[%s3896_s9 + $0x200] sm:$0xff]   ;;  %v3259_v50 = vld [vmem:[%s3896_s9 + $0x208] sm:$0xff]  }
  0xcb   : > { %2956 = vmatpush3.bf16.msra.mxu1 %v3194_v57  ;;  %2929 = vmatprep.subr.bf16.mxu0 %v3195_v58  ;;  %v3250_v42 = vld [vmem:[%s4116_s0 + $0x18] ss:$56 sps:$4 sm:$0xff]   ;;  %v3252_v43 = vld [vmem:[%s4116_s0 + $0x1c] ss:$56 sps:$4 sm:$0xff]   ;;  %v3256_v47 = vld [vmem:[%s3896_s9 + $0x280] sm:$0xff]  }
  0xcc   : > { %2957 = vmatprep.subr.bf16.mxu1 %v3196_v59  ;;  %v3260_v51 = vld [vmem:[%s3896_s9 + $0x288] sm:$0xff]   ;;  %v3261_v52 = vld [vmem:[%s4116_s0 + $0x84] ss:$56 sps:$4 sm:$0xff]   ;;  %v3263_v53 = vld [vmem:[%s4116_s0 + $0x80] ss:$56 sps:$4 sm:$0xff]  }
  0xcd   : > { %v3264_v54 = vld [vmem:[%s3896_s9 + $0x250] sm:$0xff]   ;;  %v3266_v56 = vld [vmem:[%s4116_s0 + $0x8c] ss:$56 sps:$4 sm:$0xff]   ;;  %v3270_v59 = vld [vmem:[%s4116_s0 + $0x88] ss:$56 sps:$4 sm:$0xff]  }
  0xce   : > { %2930 = vmatpush3.bf16.msra.mxu0 %v3197_v60  ;;  %v3265_v55 = vld [vmem:[%s3896_s9 + $0x2d0] sm:$0xff]   ;;  %v3271_v60 = vld [vmem:[%s3896_s9 + $0x258] sm:$0xff]  }
  0xcf   : > { %2958 = vmatpush3.bf16.msra.mxu1 %v3198_v61  ;;  %2931 = vmatprep.subr.bf16.mxu0 %v3199_v62  ;;  %v3268_v57 = vld [vmem:[%s3896_s9 + $0x210] sm:$0xff]   ;;  %v3272_v61 = vld [vmem:[%s3896_s9 + $0x2d8] sm:$0xff]  }
  0xd0   : > { %2959 = vmatprep.subr.bf16.mxu1 %v3200_v63  ;;  %v3269_v58 = vld [vmem:[%s3896_s9 + $0x290] sm:$0xff]   ;;  %v3273_v62 = vld [vmem:[%s3896_s9 + $0x218] sm:$0xff]  }
  0xd1   : > { %v3274_v63 = vld [vmem:[%s3896_s9 + $0x298] sm:$0xff]  }
  0xd2   : > { %2932 = vmatpush3.bf16.msra.mxu0 %v3201_v1  ;;  %v3276_v1 = vld [vmem:[%s3896_s9 + $0x2e0] sm:$0xff]  }
  0xd3   : > { %2960 = vmatpush3.bf16.msra.mxu1 %v3202_v3  ;;  %2973 = vmatprep.subr.bf16.mxu0 %v3209_v5  ;;  %v3278_v3 = vld [vmem:[%s3896_s9 + $0x2a0] sm:$0xff]   ;;  %v3280_v5 = vld [vmem:[%s3896_s9 + $0x2e8] sm:$0xff]  }
  0xd4   : > { %3001 = vmatprep.subr.bf16.mxu1 %v3210_v6  ;;  %v3281_v6 = vld [vmem:[%s3896_s9 + $0x228] sm:$0xff]  }
  0xd5   : > { %2257 = vmatmul.mubr.bf16.vlgmr.msra.gmra.mrb[0].mxu0 %v3203_v0  ;;  %v3275_v0 = vld [vmem:[%s3896_s9 + $0x260] sm:$0xff]  }
  0xd6   : > { %2306 = vmatmul.mubr.bf16.vlgmr.msra.gmra.mrb[0].mxu1 %v3206_v2  ;;  %2974 = vmatpush3.bf16.msra.mxu0 %v3211_v7  ;;  %v3277_v2 = vld [vmem:[%s3896_s9 + $0x220] sm:$0xff]   ;;  %v3282_v7 = vld [vmem:[%s3896_s9 + $0x2a8] sm:$0xff]  }
  0xd7   : > { %3002 = vmatpush3.bf16.msra.mxu1 %v3212_v8  ;;  %2264 = vmatprep.mubr.bf16.mxu0 %v3229_v4  ;;  %v3279_v4 = vld [vmem:[%s3896_s9 + $0x268] sm:$0xff]   ;;  %v3283_v8 = vld [vmem:[%s3896_s9 + $0x270] sm:$0xff]  }
  0xd8   : > { %2975 = vmatprep.subr.bf16.mxu0 %v3213_v9  ;;  %3003 = vmatprep.subr.bf16.mxu1 %v3214_v10  ;;  %v3284_v9 = vld [vmem:[%s3896_s9 + $0x2f0] sm:$0xff]  }
  0xd9   : > { %2313 = vmatprep.mubr.bf16.mxu1 %v3234_v28  ;;  %v3285_v10 = vld [vmem:[%s3896_s9 + $0x230] sm:$0xff]  }
  0xda   : > { %2976 = vmatpush3.bf16.msra.mxu0 %v3215_v12  ;;  %v3287_v12 = vld [vmem:[%s3896_s9 + $0x278] sm:$0xff]   ;;  %v3307_v28 = vld [vmem:[%s3896_s9 + $0x310] sm:$0xff]  }
  0xdb   : > { %3004 = vmatpush3.bf16.msra.mxu1 %v3216_v13  ;;  %2977 = vmatprep.subr.bf16.mxu0 %v3217_v14  ;;  %v3288_v13 = vld [vmem:[%s3896_s9 + $0x2f8] sm:$0xff]  }
  0xdc   : > { %3005 = vmatprep.subr.bf16.mxu1 %v3218_v15  ;;  %v3289_v14 = vld [vmem:[%s3896_s9 + $0x238] sm:$0xff]  }
  0xdd   : > { %2265 = vmatmul.mubr.bf16.gmra.mrb[4].mxu0 %v3231_v11  ;;  %v3286_v11 = vld [vmem:[%s3896_s9 + $0x2b0] sm:$0xff]   ;;  %v3290_v15 = vld [vmem:[%s3896_s9 + $0x2b8] sm:$0xff]  }
  0xde   : > { %2978 = vmatpush3.bf16.msra.mxu0 %v3219_v16  ;;  %2314 = vmatmul.mubr.bf16.gmra.mrb[4].mxu1 %v3238_v31  ;;  %v3291_v16 = vld [vmem:[%s4116_s0 + $0x20] ss:$56 sps:$4 sm:$0xff]  }
  0xdf   : > { %3006 = vmatpush3.bf16.msra.mxu1 %v3220_v17  ;;  %2979 = vmatprep.subr.bf16.mxu0 %v3221_v18  ;;  %v3293_v17 = vld [vmem:[%s4116_s0 + $0x24] ss:$56 sps:$4 sm:$0xff]   ;;  %v3294_v18 = vld [vmem:[%s4116_s0 + $0x28] ss:$56 sps:$4 sm:$0xff]  }
  0xe0   : > { %3007 = vmatprep.subr.bf16.mxu1 %v3222_v19  ;;  %2354 = vmatprep.mubr.bf16.mxu0 %v3249_v41  ;;  %v3296_v19 = vld [vmem:[%s4116_s0 + $0x2c] ss:$56 sps:$4 sm:$0xff]   ;;  %v3310_v31 = vld [vmem:[%s3896_s9 + $0x318] sm:$0xff]  }
  0xe1   : > { %2403 = vmatprep.mubr.bf16.mxu1 %v3252_v43  ;;  %v3318_v41 = vld [vmem:[%s3896_s9 + $0x338] sm:$0xff]  }
  0xe2   : > { %2980 = vmatpush3.bf16.msra.mxu0 %v3223_v20  ;;  %v3297_v20 = vld [vmem:[%s3896_s9 + $0x340] sm:$0xff]  }
  0xe3   : > { %3008 = vmatpush3.bf16.msra.mxu1 %v3224_v21  ;;  %2981 = vmatprep.subr.bf16.mxu0 %v3225_v22  ;;  %v3298_v21 = vld [vmem:[%s3896_s9 + $0x300] sm:$0xff]   ;;  %v3299_v22 = vld [vmem:[%s3896_s9 + $0x348] sm:$0xff]  }
  0xe4   : > { %3009 = vmatprep.subr.bf16.mxu1 %v3226_v23  ;;  %v3300_v23 = vld [vmem:[%s3896_s9 + $0x308] sm:$0xff]   ;;  %v3322_v43 = vld [vmem:[%s4116_s0 + $0xa0] ss:$56 sps:$4 sm:$0xff]  }
  0xe6   : > { %2982 = vmatpush3.bf16.msra.mxu0 %v3227_v24  ;;  %v3301_v24 = vld [vmem:[%s4116_s0 + $0x94] ss:$56 sps:$4 sm:$0xff]  }
  0xe7   : > { %3010 = vmatpush3.bf16.msra.mxu1 %v3228_v25  ;;  %2983 = vmatprep.subr.bf16.mxu0 %v3232_v26  ;;  %v3303_v25 = vld [vmem:[%s4116_s0 + $0x90] ss:$56 sps:$4 sm:$0xff]  }
  0xe8   : > { %3011 = vmatprep.subr.bf16.mxu1 %v3233_v27  ;;  %v3304_v26 = vld [vmem:[%s3896_s9 + $0x350] sm:$0xff]  }
  0xe9   : > { %v3305_v27 = vld [vmem:[%s4116_s0 + $0x9c] ss:$56 sps:$4 sm:$0xff]  }
  0xea   : > { %2984 = vmatpush3.bf16.msra.mxu0 %v3236_v29  ;;  %v3308_v29 = vld [vmem:[%s4116_s0 + $0x98] ss:$56 sps:$4 sm:$0xff]  }
  0xeb   : > { %3012 = vmatpush3.bf16.msra.mxu1 %v3237_v30  ;;  %2985 = vmatprep.subr.bf16.mxu0 %v3239_v32  ;;  %v3309_v30 = vld [vmem:[%s3896_s9 + $0x358] sm:$0xff]   ;;  %v3311_v32 = vld [vmem:[%s3896_s9 + $0x360] sm:$0xff]  }
  0xec   : > { %3013 = vmatprep.subr.bf16.mxu1 %v3240_v33  ;;  %v3312_v33 = vld [vmem:[%s3896_s9 + $0x320] sm:$0xff]  }
  0xee   : > { %2986 = vmatpush3.bf16.msra.mxu0 %v3241_v34  ;;  %v3313_v34 = vld [vmem:[%s3896_s9 + $0x368] sm:$0xff]  }
  0xef   : > { %3014 = vmatpush3.bf16.msra.mxu1 %v3242_v35  ;;  %2987 = vmatprep.subr.bf16.mxu0 %v3243_v36  ;;  %v3314_v35 = vld [vmem:[%s3896_s9 + $0x328] sm:$0xff]  }
  0xf0   : > { %3015 = vmatprep.subr.bf16.mxu1 %v3244_v37  ;;  %v3321_v36 = vld [vmem:[%s4116_s0 + $0x34] ss:$56 sps:$4 sm:$0xff]  }
  0xf1   : > { %v3315_v37 = vld [vmem:[%s3896_s9 + $0x370] sm:$0xff]  }
  0xf2   : > { %2988 = vmatpush3.bf16.msra.mxu0 %v3245_v38  ;;  %v3324_v38 = vld [vmem:[%s4116_s0 + $0xa4] ss:$56 sps:$4 sm:$0xff]  }
  0xf3   : > { %3016 = vmatpush3.bf16.msra.mxu1 %v3246_v39  ;;  %3029 = vmatprep.subr.bf16.mxu0 %v3253_v44  ;;  %v3316_v39 = vld [vmem:[%s3896_s9 + $0x330] sm:$0xff]  }
  0xf4   : > { %3057 = vmatprep.subr.bf16.mxu1 %v3254_v45 }
  0xf5   : > { %2355 = vmatmul.mubr.bf16.vlgmr.msra.gmra.mrb[8].mxu0 %v3247_v40  ;;  %v3317_v40 = vld [vmem:[%s3896_s9 + $0x378] sm:$0xff]   ;;  %s1150_s9 = scalar_lea.vmem %s4118_s2, %s1149_s11 }
  0xf6   : > { %2404 = vmatmul.mubr.bf16.vlgmr.msra.gmra.mrb[8].mxu1 %v3250_v42  ;;  %3030 = vmatpush3.bf16.msra.mxu0 %v3255_v46  ;;  %v3319_v42 = vld [vmem:[%s4116_s0 + $0x30] ss:$56 sps:$4 sm:$0xff]   ;;  %v2753_v46 = vld [vmem:[%s1150_s9] ss:$0 sm:$0xff] }
  0xf7   : > { %3058 = vmatpush3.bf16.msra.mxu1 %v3256_v47  ;;  %3031 = vmatprep.subr.bf16.mxu0 %v3257_v48 }
  0xf8   : > { %3059 = vmatprep.subr.bf16.mxu1 %v3258_v49  ;;  %2362 = vmatprep.mubr.bf16.mxu0 %v3261_v52 }
  0xf9   : > { %2411 = vmatprep.mubr.bf16.mxu1 %v3266_v56 }
  0xfa   : > { %3032 = vmatpush3.bf16.msra.mxu0 %v3259_v50 }
  0xfb   : > { %3060 = vmatpush3.bf16.msra.mxu1 %v3260_v51  ;;  %3033 = vmatprep.subr.bf16.mxu0 %v3264_v54 }
  0xfc   : > { %3061 = vmatprep.subr.bf16.mxu1 %v3265_v55 }
  0xfd   : > { %2363 = vmatmul.mubr.bf16.gmra.mrb[12].mxu0 %v3263_v53 }
  0xfe   : > { %3034 = vmatpush3.bf16.msra.mxu0 %v3268_v57  ;;  %2412 = vmatmul.mubr.bf16.gmra.mrb[12].mxu1 %v3270_v59 }
  0xff   : > { %3062 = vmatpush3.bf16.msra.mxu1 %v3269_v58  ;;  %3035 = vmatprep.subr.bf16.mxu0 %v3271_v60 }
 0x100   : > { %3063 = vmatprep.subr.bf16.mxu1 %v3272_v61  ;;  %2452 = vmatprep.mubr.bf16.mxu0 %v3293_v17 }
 0x101   : > { %2501 = vmatprep.mubr.bf16.mxu1 %v3296_v19 }
 0x102   : > { %3036 = vmatpush3.bf16.msra.mxu0 %v3273_v62 }
 0x103   : > { %3064 = vmatpush3.bf16.msra.mxu1 %v3274_v63  ;;  %3037 = vmatprep.subr.bf16.mxu0 %v3275_v0 }
 0x104   : > { %3065 = vmatprep.subr.bf16.mxu1 %v3276_v1 }
 0x106   : > { %3038 = vmatpush3.bf16.msra.mxu0 %v3277_v2 }
 0x107   : > { %3066 = vmatpush3.bf16.msra.mxu1 %v3278_v3  ;;  %3039 = vmatprep.subr.bf16.mxu0 %v3279_v4 }
 0x108   : > { %3067 = vmatprep.subr.bf16.mxu1 %v3280_v5 }
 0x10a   : > { %3040 = vmatpush3.bf16.msra.mxu0 %v3281_v6 }
 0x10b   : > { %3068 = vmatpush3.bf16.msra.mxu1 %v3282_v7  ;;  %3041 = vmatprep.subr.bf16.mxu0 %v3283_v8 }
 0x10c   : > { %3069 = vmatprep.subr.bf16.mxu1 %v3284_v9 }
 0x10e   : > { %3042 = vmatpush3.bf16.msra.mxu0 %v3285_v10 }
 0x10f   : > { %3070 = vmatpush3.bf16.msra.mxu1 %v3286_v11  ;;  %3043 = vmatprep.subr.bf16.mxu0 %v3287_v12 }
 0x110   : > { %3071 = vmatprep.subr.bf16.mxu1 %v3288_v13 }
 0x112   : > { %3044 = vmatpush3.bf16.msra.mxu0 %v3289_v14 }
 0x113   : > { %3072 = vmatpush3.bf16.msra.mxu1 %v3290_v15  ;;  %3085 = vmatprep.subr.bf16.mxu0 %v3297_v20 }
 0x114   : > { %3113 = vmatprep.subr.bf16.mxu1 %v3297_v20 }
 0x115   : > { %2453 = vmatmul.mubr.bf16.vlgmr.msra.gmra.mrb[16].mxu0 %v3291_v16 }
 0x116   : > { %2502 = vmatmul.mubr.bf16.vlgmr.msra.gmra.mrb[16].mxu1 %v3294_v18  ;;  %3086 = vmatpush3.bf16.msra.mxu0 %v3298_v21 }
 0x117   : > { %3121 = vmatpush3.bf16.msra.mxu1 %v3298_v21  ;;  %3087 = vmatprep.subr.bf16.mxu0 %v3299_v22 }
 0x118   : > { %3114 = vmatprep.subr.bf16.mxu1 %v3299_v22  ;;  %2460 = vmatprep.mubr.bf16.mxu0 %v3301_v24 }
 0x119   : > { %2509 = vmatprep.mubr.bf16.mxu1 %v3305_v27 }
 0x11a   : > { %3088 = vmatpush3.bf16.msra.mxu0 %v3300_v23 }
 0x11b   : > { %3122 = vmatpush3.bf16.msra.mxu1 %v3300_v23  ;;  %3089 = vmatprep.subr.bf16.mxu0 %v3304_v26 }
 0x11c   : > { %3115 = vmatprep.subr.bf16.mxu1 %v3304_v26 }
 0x11d   : > { %2461 = vmatmul.mubr.bf16.gmra.mrb[20].mxu0 %v3303_v25 }
 0x11e   : > { %3090 = vmatpush3.bf16.msra.mxu0 %v3307_v28  ;;  %2510 = vmatmul.mubr.bf16.gmra.mrb[20].mxu1 %v3308_v29 }
 0x11f   : > { %3123 = vmatpush3.bf16.msra.mxu1 %v3307_v28  ;;  %3091 = vmatprep.subr.bf16.mxu0 %v3309_v30 }
 0x120   : > { %3116 = vmatprep.subr.bf16.mxu1 %v3309_v30  ;;  %2550 = vmatprep.mubr.bf16.mxu0 %v3321_v36 }
 0x121   : > { %2558 = vmatprep.mubr.bf16.mxu1 %v3324_v38 }
 0x122   : > { %3092 = vmatpush3.bf16.msra.mxu0 %v3310_v31 }
 0x123   : > { %3124 = vmatpush3.bf16.msra.mxu1 %v3310_v31  ;;  %3093 = vmatprep.subr.bf16.mxu0 %v3311_v32 }
 0x124   : > { %3117 = vmatprep.subr.bf16.mxu1 %v3311_v32 }
 0x126   : > { %3094 = vmatpush3.bf16.msra.mxu0 %v3312_v33 }
 0x127   : > { %3125 = vmatpush3.bf16.msra.mxu1 %v3312_v33  ;;  %3095 = vmatprep.subr.bf16.mxu0 %v3313_v34 }
 0x128   : > { %3118 = vmatprep.subr.bf16.mxu1 %v3313_v34 }
 0x12a   : > { %3096 = vmatpush3.bf16.msra.mxu0 %v3314_v35 }
 0x12b   : > { %3126 = vmatpush3.bf16.msra.mxu1 %v3314_v35  ;;  %3097 = vmatprep.subr.bf16.mxu0 %v3315_v37 }
 0x12c   : > { %3119 = vmatprep.subr.bf16.mxu1 %v3315_v37 }
 0x12e   : > { %3098 = vmatpush3.bf16.msra.mxu0 %v3316_v39 }
 0x12f   : > { %3127 = vmatpush3.bf16.msra.mxu1 %v3316_v39  ;;  %3099 = vmatprep.subr.bf16.mxu0 %v3317_v40 }
 0x130   : > { %3120 = vmatprep.subr.bf16.mxu1 %v3317_v40 }
 0x132   : > { %3100 = vmatpush3.bf16.msra.mxu0 %v3318_v41 }
 0x133   : > { %3128 = vmatpush3.bf16.msra.mxu1 %v3318_v41 }
 0x135   : > { %2551 = vmatmul.mubr.bf16.vlgmr.msra.gmra.mrb[24].mxu0 %v3319_v42 }
 0x136   : > { %2559 = vmatmul.mubr.bf16.vlgmr.msra.gmra.mrb[24].mxu1 %v3322_v43 }
 0x1a8   : > { %v2933_v44 = vpop.f32.mrb[0].mxu0 }
 0x1a9   : > { %v2961_v45 = vpop.f32.mrb[0].mxu1  ;;  %v2934_v47 = vpop.f32.mrb[1].mxu0 }
 0x1aa   : > { %v2935_v48 = vadd.f32 %v2934_v47, %v2933_v44  ;;  %v2962_v49 = vpop.f32.mrb[1].mxu1  ;;  %v2936_v50 = vpop.f32.mrb[2].mxu0 }
 0x1ab   : > { %v2963_v51 = vadd.f32 %v2962_v49, %v2961_v45  ;;  %v2964_v52 = vpop.f32.mrb[2].mxu1  ;;  %v2937_v53 = vpop.f32.mrb[3].mxu0 }
 0x1ac   : > { %v2259_v54 = vadd.f32 %v2935_v48, %v2753_v46  ;;  %v2938_v55 = vadd.f32 %v2937_v53, %v2936_v50  ;;  %v2965_v56 = vpop.f32.mrb[3].mxu1 }
 0x1ad   : > { %v2966_v57 = vadd.f32 %v2965_v56, %v2964_v52 }
 0x1ae   : > { %v2308_v58 = vadd.f32 %v2963_v51, %v2259_v54  ;;  %v2262_v59 = vadd.f32 %v2938_v55, %v2753_v46 }
 0x1b0   : > { %v2311_v60 = vadd.f32 %v2966_v57, %v2262_v59  ;;  %v2939_v61 = vpop.f32.mrb[4].mxu0 }
 0x1b1   : > { %v2940_v62 = vpop.f32.mrb[5].mxu0  ;;  %v2967_v4 = vpop.f32.mrb[4].mxu1 }
 0x1b2   : > { %v2941_v63 = vadd.f32 %v2940_v62, %v2939_v61  ;;  %v2942_v0 = vpop.f32.mrb[6].mxu0  ;;  %v2968_v5 = vpop.f32.mrb[5].mxu1 }
 0x1b3   : > { %v2943_v1 = vpop.f32.mrb[7].mxu0  ;;  %v2969_v7 = vadd.f32 %v2968_v5, %v2967_v4  ;;  %v2970_v8 = vpop.f32.mrb[6].mxu1 }
 0x1b4   : > { %v2944_v2 = vadd.f32 %v2943_v1, %v2942_v0  ;;  %v2267_v3 = vadd.f32 %v2941_v63, %v2753_v46  ;;  %v2971_v9 = vpop.f32.mrb[7].mxu1 }
 0x1b5   : > { %v2972_v11 = vadd.f32 %v2971_v9, %v2970_v8 }
 0x1b6   : > { %v2270_v6 = vadd.f32 %v2944_v2, %v2753_v46  ;;  %v2316_v10 = vadd.f32 %v2969_v7, %v2267_v3 }
 0x1b8   : > { %v2319_v12 = vadd.f32 %v2972_v11, %v2270_v6 }
 0x1c8   : > { %v2989_v13 = vpop.f32.mrb[8].mxu0 }
 0x1c9   : > { %v3017_v14 = vpop.f32.mrb[8].mxu1  ;;  %v2990_v15 = vpop.f32.mrb[9].mxu0 }
 0x1ca   : > { %v2991_v16 = vadd.f32 %v2990_v15, %v2989_v13  ;;  %v3018_v17 = vpop.f32.mrb[9].mxu1  ;;  %v2992_v18 = vpop.f32.mrb[10].mxu0 }
 0x1cb   : > { %v3019_v19 = vadd.f32 %v3018_v17, %v3017_v14  ;;  %v3020_v20 = vpop.f32.mrb[10].mxu1  ;;  %v2993_v21 = vpop.f32.mrb[11].mxu0 }
 0x1cc   : > { %v2357_v22 = vadd.f32 %v2991_v16, %v2308_v58  ;;  %v2994_v23 = vadd.f32 %v2993_v21, %v2992_v18  ;;  %v3021_v24 = vpop.f32.mrb[11].mxu1 }
 0x1cd   : > { %v3022_v25 = vadd.f32 %v3021_v24, %v3020_v20 }
 0x1ce   : > { %v2406_v26 = vadd.f32 %v3019_v19, %v2357_v22  ;;  %v2360_v27 = vadd.f32 %v2994_v23, %v2311_v60 }
 0x1d0   : > { %v2409_v28 = vadd.f32 %v3022_v25, %v2360_v27  ;;  %v2995_v29 = vpop.f32.mrb[12].mxu0 }
 0x1d1   : > { %v2996_v30 = vpop.f32.mrb[13].mxu0  ;;  %v3023_v36 = vpop.f32.mrb[12].mxu1 }
 0x1d2   : > { %v2997_v31 = vadd.f32 %v2996_v30, %v2995_v29  ;;  %v2998_v32 = vpop.f32.mrb[14].mxu0  ;;  %v3024_v38 = vpop.f32.mrb[13].mxu1 }
 0x1d3   : > { %v2999_v33 = vpop.f32.mrb[15].mxu0  ;;  %v3025_v39 = vadd.f32 %v3024_v38, %v3023_v36  ;;  %v3026_v40 = vpop.f32.mrb[14].mxu1 }
 0x1d4   : > { %v2365_v34 = vadd.f32 %v2997_v31, %v2316_v10  ;;  %v3000_v35 = vadd.f32 %v2999_v33, %v2998_v32  ;;  %v3027_v41 = vpop.f32.mrb[15].mxu1 }
 0x1d5   : > { %v3028_v43 = vadd.f32 %v3027_v41, %v3026_v40 }
 0x1d6   : > { %v2368_v37 = vadd.f32 %v3000_v35, %v2319_v12  ;;  %v2414_v42 = vadd.f32 %v3025_v39, %v2365_v34 }
 0x1d8   : > { %v2417_v44 = vadd.f32 %v3028_v43, %v2368_v37 }
 0x1e8   : > { %v3045_v45 = vpop.f32.mrb[16].mxu0 }
 0x1e9   : > { %v3046_v46 = vpop.f32.mrb[17].mxu0  ;;  %v3073_v47 = vpop.f32.mrb[16].mxu1 }
 0x1ea   : > { %v3047_v48 = vadd.f32 %v3046_v46, %v3045_v45  ;;  %v3048_v49 = vpop.f32.mrb[18].mxu0  ;;  %v3074_v50 = vpop.f32.mrb[17].mxu1 }
 0x1eb   : > { %v3049_v51 = vpop.f32.mrb[19].mxu0  ;;  %v3075_v53 = vadd.f32 %v3074_v50, %v3073_v47  ;;  %v3076_v54 = vpop.f32.mrb[18].mxu1 }
 0x1ec   : > { %v2455_v52 = vadd.f32 %v3047_v48, %v2406_v26  ;;  %v3050_v55 = vadd.f32 %v3049_v51, %v3048_v49  ;;  %v3077_v56 = vpop.f32.mrb[19].mxu1 }
 0x1ed   : > { %v3078_v59 = vadd.f32 %v3077_v56, %v3076_v54 }
 0x1ee   : > { %v2504_v57 = vadd.f32 %v3075_v53, %v2455_v52  ;;  %v2458_v58 = vadd.f32 %v3050_v55, %v2409_v28 }
 0x1f0   : > { %v2507_v60 = vadd.f32 %v3078_v59, %v2458_v58  ;;  %v3051_v61 = vpop.f32.mrb[20].mxu0 }
 0x1f1   : > { %v3052_v62 = vpop.f32.mrb[21].mxu0  ;;  %v3079_v1 = vpop.f32.mrb[20].mxu1 }
 0x1f2   : > { %v3053_v63 = vadd.f32 %v3052_v62, %v3051_v61  ;;  %v3054_v0 = vpop.f32.mrb[22].mxu0  ;;  %v3080_v5 = vpop.f32.mrb[21].mxu1 }
 0x1f3   : > { %v3055_v2 = vpop.f32.mrb[23].mxu0  ;;  %v3081_v6 = vadd.f32 %v3080_v5, %v3079_v1  ;;  %v3082_v7 = vpop.f32.mrb[22].mxu1 }
 0x1f4   : > { %v2463_v3 = vadd.f32 %v3053_v63, %v2414_v42  ;;  %v3056_v4 = vadd.f32 %v3055_v2, %v3054_v0  ;;  %v3083_v9 = vpop.f32.mrb[23].mxu1 }
 0x1f5   : > { %v3084_v11 = vadd.f32 %v3083_v9, %v3082_v7 }
 0x1f6   : > { %v2466_v8 = vadd.f32 %v3056_v4, %v2417_v44  ;;  %v2512_v10 = vadd.f32 %v3081_v6, %v2463_v3 }
 0x1f8   : > { %v2515_v12 = vadd.f32 %v3084_v11, %v2466_v8 }
 0x208   : > { %v3101_v13 = vpop.f32.mrb[24].mxu0 }
 0x209   : > { %v3107_v14 = vpop.f32.mrb[24].mxu1  ;;  %v3102_v15 = vpop.f32.mrb[25].mxu0 }
 0x20a   : > { %v3103_v16 = vadd.f32 %v3102_v15, %v3101_v13  ;;  %v3108_v17 = vpop.f32.mrb[25].mxu1  ;;  %v3104_v18 = vpop.f32.mrb[26].mxu0 }
 0x20b   : > { %v3109_v19 = vadd.f32 %v3108_v17, %v3107_v14  ;;  %v3110_v20 = vpop.f32.mrb[26].mxu1  ;;  %v3105_v21 = vpop.f32.mrb[27].mxu0 }
 0x20c   : > { %v2553_v22 = vadd.f32 %v3103_v16, %v2504_v57  ;;  %v3106_v23 = vadd.f32 %v3105_v21, %v3104_v18  ;;  %v3111_v24 = vpop.f32.mrb[27].mxu1 }
 0x20d   : > { %v2561_v25 = vadd.f32 %v3109_v19, %v2512_v10  ;;  %v3112_v26 = vadd.f32 %v3111_v24, %v3110_v20 }
 0x20e   : > { %v2556_v27 = vadd.f32 %v3106_v23, %v2507_v60  ;;  %v2567_v29 = vmax.f32 %v2553_v22, 0.0 }
 0x20f   : > { %v2564_v28 = vadd.f32 %v3112_v26, %v2515_v12  ;;  %v2569_v31 = vmax.f32 %v2561_v25, 0.0  ;;  %2597 = sbr.rel (!%p3420_p6) target bundleno = 543 (0x21f), region = 77 }
 0x210   : > { %v2568_v30 = vmax.f32 %v2556_v27, 0.0 }
 0x211   : > { %v2570_v32 = vmax.f32 %v2564_v28, 0.0 }
 0x212   : > { %v2909_v33 = vpack.c.bf16 %v2568_v30, %v2567_v29 }
 0x213   : > { %v2914_v34 = vpack.c.bf16 %v2570_v32, %v2569_v31 }
 0x214   : > { %2910 = vst [vmem:[%s1140_s23] sm:$0xff] %v2909_v33  }
 0x215   : > { %2916 = vst [vmem:[%s1140_s23 + $0x8] sm:$0xff] %v2914_v34  }
 0x21b   : > { %v2618_v35 = vld [vmem:[%s1140_s23] sm:$0xf]  ;;  %v2620_v36 = vld [vmem:[%s1140_s23 + $0x4] sm:$0xf] }
 0x21c   : > { %v2622_v37 = vld [vmem:[%s1140_s23 + $0x8] sm:$0xf]  ;;  %v2624_v38 = vld [vmem:[%s1140_s23 + $0xc] sm:$0xf]  ;;  %2619 = vst [vmem:[%s2602_s25] sm:$0xf] %v2618_v35 }
 0x21d   : > { %2621 = vst [vmem:[%s2602_s25 + $0xc] sm:$0xf] %v2620_v36  ;;  %2623 = vst [vmem:[%s2602_s25 + $0x18] sm:$0xf] %v2622_v37 }
 0x21e   : > { %2625 = vst [vmem:[%s2602_s25 + $0x24] sm:$0xf] %v2624_v38 }
 0x21f PF: > { %s13_s16 = sadd.s32 1, %s3363_s16   ;;  %s4121_s12 = smov %s3351_s13 }
 0x220   : > { %p10_p12 = scmp.ge.s32.totalorder %s13_s16, 5   ;;  %s4122_s13 = smov %s3425_s22 }
 0x221   : > { %s4123_s14 = smov %s3359_s15  ;;  %s4124_s15 = smov %s4126_s17 }
 0x222   :  { %12 = sbr.rel (!%p10_p12) target bundleno = 3 (0x3), region = 155 }

// kernel: depth_cnn_forward.8
= control target key start
LH: loop header
LB: loop body
LE: loop exit
PB: predicated region body
PF: predicated region fallthrough
CT: control target
= control target key end

     0   :  { %s6006_s12 = smov 0   ;;  %s6008_s13 = smov 0   ;;  %s7335_s0 = inlined_call_operand.vmem [shape: bf16[32,3456], index: 0, kind: input, shape index: {}]   ;;  %s7336_s1 = inlined_call_operand.vmem [shape: bf16[3456,256], index: 1, kind: input, shape index: {}]   ;;  %s7337_s2 = inlined_call_operand.vmem [shape: f32[1,256], index: 2, kind: input, shape index: {}]   ;;  %s7338_s3 = inlined_call_operand.vmem [shape: bf16[32,256], index: 3, kind: output, shape index: {}]  }
   0x1   :  { %s6010_s14 = smov 0   ;;  %s6012_s15 = smov 0  }
   0x2   :  { %s6014_s16 = smov 0  }
   0x3 LB: > { %s25_s17 = sadd.s32 1, %s5980_s15  ;;  %s4912_s18 = sadd.s32 4294967295, %s5984_s16   ;;  %s5984_s16 = sphi %s6014_s16, %s13_s16   ;;  %s5980_s15 = sphi %s6012_s15, %s7343_s15   ;;  %s5976_s14 = sphi %s6010_s14, %s7342_s14   ;;  %s5972_s13 = sphi %s6008_s13, %s7341_s13   ;;  %s5968_s12 = sphi %s6006_s12, %s7340_s12  }
   0x4   : > { %p27_p0 = scmp.ge.s32.totalorder %s25_s17, 2  ;;  %p65_p1 = scmp.ne.s32.totalorder %s5972_s13, %s5968_s12 }
   0x5   : > { %p66_p2 = scmp.eq.s32.totalorder %s5984_s16, 0  ;;  %p123_p4 = scmp.eq.s32.totalorder %s4912_s18, 1 }
   0x6   : > { %s7345_s17 = smov (%p27_p0, %s25_s17), 0  ;;  %s58_s20 = sadd.s32 1, %s5972_s13 }
   0x7   : > { %p67_p3 = por %p66_p2, %p65_p1  ;;  %s55_s19 = ssub.s32 %s5980_s15, %s7345_s17 }
   0x8   : > { %p56_p5 = scmp.eq.s32.totalorder %s55_s19, 0  ;;  %p6041_p6 = por %p123_p4, %p65_p1 }
   0x9   : > { %p4916_p7 = scmp.ge.s32.totalorder %s5984_s16, 2 }
   0xa   : > { %s6046_s22 = scalar_select %p56_p5, %s5972_s13, %s58_s20  }
   0xb   : > { %155 = sbr.rel (%p4916_p7) target bundleno = 310 (0x136), region = 20 }
  0x12   : > { %158 = sbr.rel (!%p67_p3) target bundleno = 310 (0x136), region = 24  ;;  %s160_s23 = sand.u32 (%p67_p3), 1, %s5972_s13  }
  0x13   : > { %s4917_s24 = sshll.u32 (%p67_p3), %s5980_s15, 2  ;;  %s5608_s25 = smul.u32 (%p67_p3), 1728, %s160_s23 }
  0x14   : > { %s6054_s28 = scalar_lea.vmem (%p67_p3), %s7336_s1, %s4917_s24 }
  0x15   : > { %v180_v0 = vld [vmem:[%s6054_s28] sm:$0xf] (%p67_p3)  ;;  %v182_v1 = vld [vmem:[%s6054_s28 + $0x8] sm:$0xf] (%p67_p3)  ;;  %v184_v2 = vld [vmem:[%s6054_s28 + $0x10] sm:$0xf] (%p67_p3) }
  0x16   : > { %v186_v3 = vld [vmem:[%s6054_s28 + $0x18] sm:$0xf] (%p67_p3)  ;;  %v188_v4 = vld [vmem:[%s6054_s28 + $0x20] sm:$0xf] (%p67_p3)  ;;  %s6061_s29 = scalar_lea.vmem (%p67_p3), [#allocation2], %s5608_s25 }
  0x17   : > { %181 = vst [vmem:[%s6061_s29] sm:$0xf] (%p67_p3), %v180_v0  ;;  %183 = vst [vmem:[%s6061_s29 + $0x4] sm:$0xf] (%p67_p3), %v182_v1  ;;  %v190_v5 = vld [vmem:[%s6054_s28 + $0x28] sm:$0xf] (%p67_p3) }
  0x18   : > { %185 = vst [vmem:[%s6061_s29 + $0x8] sm:$0xf] (%p67_p3), %v184_v2  ;;  %187 = vst [vmem:[%s6061_s29 + $0xc] sm:$0xf] (%p67_p3), %v186_v3  ;;  %v192_v6 = vld [vmem:[%s6054_s28 + $0x30] sm:$0xf] (%p67_p3) }
  0x19   : > { %189 = vst [vmem:[%s6061_s29 + $0x10] sm:$0xf] %v188_v4  ;;  %v194_v7 = vld [vmem:[%s6054_s28 + $0x38] sm:$0xf]  ;;  %191 = vst [vmem:[%s6061_s29 + $0x14] sm:$0xf] %v190_v5 }
  0x1a   : > { %193 = vst [vmem:[%s6061_s29 + $0x18] sm:$0xf] %v192_v6  ;;  %195 = vst [vmem:[%s6061_s29 + $0x1c] sm:$0xf] %v194_v7  ;;  %v196_v8 = vld [vmem:[%s6054_s28 + $0x40] sm:$0xf] }
  0x1b   : > { %v198_v9 = vld [vmem:[%s6054_s28 + $0x48] sm:$0xf]  ;;  %v200_v10 = vld [vmem:[%s6054_s28 + $0x50] sm:$0xf]  ;;  %197 = vst [vmem:[%s6061_s29 + $0x20] sm:$0xf] %v196_v8 }
  0x1c   : > { %199 = vst [vmem:[%s6061_s29 + $0x24] sm:$0xf] %v198_v9  ;;  %201 = vst [vmem:[%s6061_s29 + $0x28] sm:$0xf] %v200_v10  ;;  %v202_v11 = vld [vmem:[%s6054_s28 + $0x58] sm:$0xf] }
  0x1d   : > { %v204_v12 = vld [vmem:[%s6054_s28 + $0x60] sm:$0xf]  ;;  %v206_v13 = vld [vmem:[%s6054_s28 + $0x68] sm:$0xf]  ;;  %203 = vst [vmem:[%s6061_s29 + $0x2c] sm:$0xf] %v202_v11 }
  0x1e   : > { %205 = vst [vmem:[%s6061_s29 + $0x30] sm:$0xf] %v204_v12  ;;  %207 = vst [vmem:[%s6061_s29 + $0x34] sm:$0xf] %v206_v13  ;;  %v208_v14 = vld [vmem:[%s6054_s28 + $0x70] sm:$0xf] }
  0x1f   : > { %v210_v15 = vld [vmem:[%s6054_s28 + $0x78] sm:$0xf]  ;;  %v212_v16 = vld [vmem:[%s6054_s28 + $0x80] sm:$0xf]  ;;  %209 = vst [vmem:[%s6061_s29 + $0x38] sm:$0xf] %v208_v14 }
  0x20   : > { %211 = vst [vmem:[%s6061_s29 + $0x3c] sm:$0xf] %v210_v15  ;;  %213 = vst [vmem:[%s6061_s29 + $0x40] sm:$0xf] %v212_v16  ;;  %v214_v17 = vld [vmem:[%s6054_s28 + $0x88] sm:$0xf] }
  0x21   : > { %v216_v18 = vld [vmem:[%s6054_s28 + $0x90] sm:$0xf]  ;;  %v218_v19 = vld [vmem:[%s6054_s28 + $0x98] sm:$0xf]  ;;  %215 = vst [vmem:[%s6061_s29 + $0x44] sm:$0xf] %v214_v17 }
  0x22   : > { %217 = vst [vmem:[%s6061_s29 + $0x48] sm:$0xf] %v216_v18  ;;  %219 = vst [vmem:[%s6061_s29 + $0x4c] sm:$0xf] %v218_v19  ;;  %v220_v20 = vld [vmem:[%s6054_s28 + $0xa0] sm:$0xf] }
  0x23   : > { %v222_v21 = vld [vmem:[%s6054_s28 + $0xa8] sm:$0xf]  ;;  %v224_v22 = vld [vmem:[%s6054_s28 + $0xb0] sm:$0xf]  ;;  %221 = vst [vmem:[%s6061_s29 + $0x50] sm:$0xf] %v220_v20 }
  0x24   : > { %223 = vst [vmem:[%s6061_s29 + $0x54] sm:$0xf] %v222_v21  ;;  %225 = vst [vmem:[%s6061_s29 + $0x58] sm:$0xf] %v224_v22  ;;  %v226_v23 = vld [vmem:[%s6054_s28 + $0xb8] sm:$0xf] }
  0x25   : > { %v228_v24 = vld [vmem:[%s6054_s28 + $0xc0] sm:$0xf]  ;;  %v230_v25 = vld [vmem:[%s6054_s28 + $0xc8] sm:$0xf]  ;;  %227 = vst [vmem:[%s6061_s29 + $0x5c] sm:$0xf] %v226_v23 }
  0x26   : > { %229 = vst [vmem:[%s6061_s29 + $0x60] sm:$0xf] %v228_v24  ;;  %231 = vst [vmem:[%s6061_s29 + $0x64] sm:$0xf] %v230_v25  ;;  %v232_v26 = vld [vmem:[%s6054_s28 + $0xd0] sm:$0xf] }
  0x27   : > { %v234_v27 = vld [vmem:[%s6054_s28 + $0xd8] sm:$0xf]  ;;  %v236_v28 = vld [vmem:[%s6054_s28 + $0xe0] sm:$0xf]  ;;  %233 = vst [vmem:[%s6061_s29 + $0x68] sm:$0xf] %v232_v26 }
  0x28   : > { %235 = vst [vmem:[%s6061_s29 + $0x6c] sm:$0xf] %v234_v27  ;;  %237 = vst [vmem:[%s6061_s29 + $0x70] sm:$0xf] %v236_v28  ;;  %v238_v29 = vld [vmem:[%s6054_s28 + $0xe8] sm:$0xf] }
  0x29   : > { %v240_v30 = vld [vmem:[%s6054_s28 + $0xf0] sm:$0xf]  ;;  %v242_v31 = vld [vmem:[%s6054_s28 + $0xf8] sm:$0xf]  ;;  %239 = vst [vmem:[%s6061_s29 + $0x74] sm:$0xf] %v238_v29 }
  0x2a   : > { %241 = vst [vmem:[%s6061_s29 + $0x78] sm:$0xf] %v240_v30  ;;  %243 = vst [vmem:[%s6061_s29 + $0x7c] sm:$0xf] %v242_v31  ;;  %v244_v32 = vld [vmem:[%s6054_s28 + $0x100] sm:$0xf] }
  0x2b   : > { %v246_v33 = vld [vmem:[%s6054_s28 + $0x108] sm:$0xf]  ;;  %v248_v34 = vld [vmem:[%s6054_s28 + $0x110] sm:$0xf]  ;;  %245 = vst [vmem:[%s6061_s29 + $0x80] sm:$0xf] %v244_v32 }
  0x2c   : > { %247 = vst [vmem:[%s6061_s29 + $0x84] sm:$0xf] %v246_v33  ;;  %249 = vst [vmem:[%s6061_s29 + $0x88] sm:$0xf] %v248_v34  ;;  %v250_v35 = vld [vmem:[%s6054_s28 + $0x118] sm:$0xf] }
  0x2d   : > { %v252_v36 = vld [vmem:[%s6054_s28 + $0x120] sm:$0xf]  ;;  %v254_v37 = vld [vmem:[%s6054_s28 + $0x128] sm:$0xf]  ;;  %251 = vst [vmem:[%s6061_s29 + $0x8c] sm:$0xf] %v250_v35 }
  0x2e   : > { %253 = vst [vmem:[%s6061_s29 + $0x90] sm:$0xf] %v252_v36  ;;  %255 = vst [vmem:[%s6061_s29 + $0x94] sm:$0xf] %v254_v37  ;;  %v256_v38 = vld [vmem:[%s6054_s28 + $0x130] sm:$0xf] }
  0x2f   : > { %v258_v39 = vld [vmem:[%s6054_s28 + $0x138] sm:$0xf]  ;;  %v260_v40 = vld [vmem:[%s6054_s28 + $0x140] sm:$0xf]  ;;  %257 = vst [vmem:[%s6061_s29 + $0x98] sm:$0xf] %v256_v38 }
  0x30   : > { %259 = vst [vmem:[%s6061_s29 + $0x9c] sm:$0xf] %v258_v39  ;;  %261 = vst [vmem:[%s6061_s29 + $0xa0] sm:$0xf] %v260_v40  ;;  %v262_v41 = vld [vmem:[%s6054_s28 + $0x148] sm:$0xf] }
  0x31   : > { %v264_v42 = vld [vmem:[%s6054_s28 + $0x150] sm:$0xf]  ;;  %v266_v43 = vld [vmem:[%s6054_s28 + $0x158] sm:$0xf]  ;;  %263 = vst [vmem:[%s6061_s29 + $0xa4] sm:$0xf] %v262_v41 }
  0x32   : > { %265 = vst [vmem:[%s6061_s29 + $0xa8] sm:$0xf] %v264_v42  ;;  %267 = vst [vmem:[%s6061_s29 + $0xac] sm:$0xf] %v266_v43  ;;  %v268_v44 = vld [vmem:[%s6054_s28 + $0x160] sm:$0xf] }
  0x33   : > { %v270_v45 = vld [vmem:[%s6054_s28 + $0x168] sm:$0xf]  ;;  %v272_v46 = vld [vmem:[%s6054_s28 + $0x170] sm:$0xf]  ;;  %269 = vst [vmem:[%s6061_s29 + $0xb0] sm:$0xf] %v268_v44 }
  0x34   : > { %271 = vst [vmem:[%s6061_s29 + $0xb4] sm:$0xf] %v270_v45  ;;  %273 = vst [vmem:[%s6061_s29 + $0xb8] sm:$0xf] %v272_v46  ;;  %v274_v47 = vld [vmem:[%s6054_s28 + $0x178] sm:$0xf] }
  0x35   : > { %v276_v48 = vld [vmem:[%s6054_s28 + $0x180] sm:$0xf]  ;;  %v278_v49 = vld [vmem:[%s6054_s28 + $0x188] sm:$0xf]  ;;  %275 = vst [vmem:[%s6061_s29 + $0xbc] sm:$0xf] %v274_v47 }
  0x36   : > { %277 = vst [vmem:[%s6061_s29 + $0xc0] sm:$0xf] %v276_v48  ;;  %279 = vst [vmem:[%s6061_s29 + $0xc4] sm:$0xf] %v278_v49  ;;  %v280_v50 = vld [vmem:[%s6054_s28 + $0x190] sm:$0xf] }
  0x37   : > { %v282_v51 = vld [vmem:[%s6054_s28 + $0x198] sm:$0xf]  ;;  %v284_v52 = vld [vmem:[%s6054_s28 + $0x1a0] sm:$0xf]  ;;  %281 = vst [vmem:[%s6061_s29 + $0xc8] sm:$0xf] %v280_v50 }
  0x38   : > { %283 = vst [vmem:[%s6061_s29 + $0xcc] sm:$0xf] %v282_v51  ;;  %285 = vst [vmem:[%s6061_s29 + $0xd0] sm:$0xf] %v284_v52  ;;  %v286_v53 = vld [vmem:[%s6054_s28 + $0x1a8] sm:$0xf] }
  0x39   : > { %v288_v54 = vld [vmem:[%s6054_s28 + $0x1b0] sm:$0xf]  ;;  %v290_v55 = vld [vmem:[%s6054_s28 + $0x1b8] sm:$0xf]  ;;  %287 = vst [vmem:[%s6061_s29 + $0xd4] sm:$0xf] %v286_v53 }
  0x3a   : > { %289 = vst [vmem:[%s6061_s29 + $0xd8] sm:$0xf] %v288_v54  ;;  %291 = vst [vmem:[%s6061_s29 + $0xdc] sm:$0xf] %v290_v55  ;;  %v292_v56 = vld [vmem:[%s6054_s28 + $0x1c0] sm:$0xf] }
  0x3b   : > { %v294_v57 = vld [vmem:[%s6054_s28 + $0x1c8] sm:$0xf]  ;;  %v296_v58 = vld [vmem:[%s6054_s28 + $0x1d0] sm:$0xf]  ;;  %293 = vst [vmem:[%s6061_s29 + $0xe0] sm:$0xf] %v292_v56 }
  0x3c   : > { %295 = vst [vmem:[%s6061_s29 + $0xe4] sm:$0xf] %v294_v57  ;;  %297 = vst [vmem:[%s6061_s29 + $0xe8] sm:$0xf] %v296_v58  ;;  %v298_v59 = vld [vmem:[%s6054_s28 + $0x1d8] sm:$0xf] }
  0x3d   : > { %v300_v60 = vld [vmem:[%s6054_s28 + $0x1e0] sm:$0xf]  ;;  %v302_v61 = vld [vmem:[%s6054_s28 + $0x1e8] sm:$0xf]  ;;  %299 = vst [vmem:[%s6061_s29 + $0xec] sm:$0xf] %v298_v59 }
  0x3e   : > { %301 = vst [vmem:[%s6061_s29 + $0xf0] sm:$0xf] %v300_v60  ;;  %303 = vst [vmem:[%s6061_s29 + $0xf4] sm:$0xf] %v302_v61  ;;  %v304_v62 = vld [vmem:[%s6054_s28 + $0x1f0] sm:$0xf] }
  0x3f   : > { %v306_v63 = vld [vmem:[%s6054_s28 + $0x1f8] sm:$0xf]  ;;  %v308_v0 = vld [vmem:[%s6054_s28 + $0x200] sm:$0xf]  ;;  %305 = vst [vmem:[%s6061_s29 + $0xf8] sm:$0xf] %v304_v62 }
  0x40   : > { %307 = vst [vmem:[%s6061_s29 + $0xfc] sm:$0xf] %v306_v63  ;;  %309 = vst [vmem:[%s6061_s29 + $0x100] sm:$0xf] %v308_v0  ;;  %v310_v1 = vld [vmem:[%s6054_s28 + $0x208] sm:$0xf] }
  0x41   : > { %v312_v2 = vld [vmem:[%s6054_s28 + $0x210] sm:$0xf]  ;;  %v314_v3 = vld [vmem:[%s6054_s28 + $0x218] sm:$0xf]  ;;  %311 = vst [vmem:[%s6061_s29 + $0x104] sm:$0xf] %v310_v1 }
  0x42   : > { %313 = vst [vmem:[%s6061_s29 + $0x108] sm:$0xf] %v312_v2  ;;  %315 = vst [vmem:[%s6061_s29 + $0x10c] sm:$0xf] %v314_v3  ;;  %v316_v4 = vld [vmem:[%s6054_s28 + $0x220] sm:$0xf] }
  0x43   : > { %v318_v5 = vld [vmem:[%s6054_s28 + $0x228] sm:$0xf]  ;;  %v320_v6 = vld [vmem:[%s6054_s28 + $0x230] sm:$0xf]  ;;  %317 = vst [vmem:[%s6061_s29 + $0x110] sm:$0xf] %v316_v4 }
  0x44   : > { %319 = vst [vmem:[%s6061_s29 + $0x114] sm:$0xf] %v318_v5  ;;  %321 = vst [vmem:[%s6061_s29 + $0x118] sm:$0xf] %v320_v6  ;;  %v322_v7 = vld [vmem:[%s6054_s28 + $0x238] sm:$0xf] }
  0x45   : > { %v324_v8 = vld [vmem:[%s6054_s28 + $0x240] sm:$0xf]  ;;  %v326_v9 = vld [vmem:[%s6054_s28 + $0x248] sm:$0xf]  ;;  %323 = vst [vmem:[%s6061_s29 + $0x11c] sm:$0xf] %v322_v7 }
  0x46   : > { %325 = vst [vmem:[%s6061_s29 + $0x120] sm:$0xf] %v324_v8  ;;  %327 = vst [vmem:[%s6061_s29 + $0x124] sm:$0xf] %v326_v9  ;;  %v328_v10 = vld [vmem:[%s6054_s28 + $0x250] sm:$0xf] }
  0x47   : > { %v330_v11 = vld [vmem:[%s6054_s28 + $0x258] sm:$0xf]  ;;  %v332_v12 = vld [vmem:[%s6054_s28 + $0x260] sm:$0xf]  ;;  %329 = vst [vmem:[%s6061_s29 + $0x128] sm:$0xf] %v328_v10 }
  0x48   : > { %331 = vst [vmem:[%s6061_s29 + $0x12c] sm:$0xf] %v330_v11  ;;  %333 = vst [vmem:[%s6061_s29 + $0x130] sm:$0xf] %v332_v12  ;;  %v334_v13 = vld [vmem:[%s6054_s28 + $0x268] sm:$0xf] }
  0x49   : > { %v336_v14 = vld [vmem:[%s6054_s28 + $0x270] sm:$0xf]  ;;  %v338_v15 = vld [vmem:[%s6054_s28 + $0x278] sm:$0xf]  ;;  %335 = vst [vmem:[%s6061_s29 + $0x134] sm:$0xf] %v334_v13 }
  0x4a   : > { %337 = vst [vmem:[%s6061_s29 + $0x138] sm:$0xf] %v336_v14  ;;  %339 = vst [vmem:[%s6061_s29 + $0x13c] sm:$0xf] %v338_v15  ;;  %v340_v16 = vld [vmem:[%s6054_s28 + $0x280] sm:$0xf] }
  0x4b   : > { %v342_v17 = vld [vmem:[%s6054_s28 + $0x288] sm:$0xf]  ;;  %v344_v18 = vld [vmem:[%s6054_s28 + $0x290] sm:$0xf]  ;;  %341 = vst [vmem:[%s6061_s29 + $0x140] sm:$0xf] %v340_v16 }
  0x4c   : > { %343 = vst [vmem:[%s6061_s29 + $0x144] sm:$0xf] %v342_v17  ;;  %345 = vst [vmem:[%s6061_s29 + $0x148] sm:$0xf] %v344_v18  ;;  %v346_v19 = vld [vmem:[%s6054_s28 + $0x298] sm:$0xf] }
  0x4d   : > { %v348_v20 = vld [vmem:[%s6054_s28 + $0x2a0] sm:$0xf]  ;;  %v350_v21 = vld [vmem:[%s6054_s28 + $0x2a8] sm:$0xf]  ;;  %347 = vst [vmem:[%s6061_s29 + $0x14c] sm:$0xf] %v346_v19 }
  0x4e   : > { %349 = vst [vmem:[%s6061_s29 + $0x150] sm:$0xf] %v348_v20  ;;  %351 = vst [vmem:[%s6061_s29 + $0x154] sm:$0xf] %v350_v21  ;;  %v352_v22 = vld [vmem:[%s6054_s28 + $0x2b0] sm:$0xf] }
  0x4f   : > { %v354_v23 = vld [vmem:[%s6054_s28 + $0x2b8] sm:$0xf]  ;;  %v356_v24 = vld [vmem:[%s6054_s28 + $0x2c0] sm:$0xf]  ;;  %353 = vst [vmem:[%s6061_s29 + $0x158] sm:$0xf] %v352_v22 }
  0x50   : > { %355 = vst [vmem:[%s6061_s29 + $0x15c] sm:$0xf] %v354_v23  ;;  %357 = vst [vmem:[%s6061_s29 + $0x160] sm:$0xf] %v356_v24  ;;  %v358_v25 = vld [vmem:[%s6054_s28 + $0x2c8] sm:$0xf] }
  0x51   : > { %v360_v26 = vld [vmem:[%s6054_s28 + $0x2d0] sm:$0xf]  ;;  %v362_v27 = vld [vmem:[%s6054_s28 + $0x2d8] sm:$0xf]  ;;  %359 = vst [vmem:[%s6061_s29 + $0x164] sm:$0xf] %v358_v25 }
  0x52   : > { %361 = vst [vmem:[%s6061_s29 + $0x168] sm:$0xf] %v360_v26  ;;  %363 = vst [vmem:[%s6061_s29 + $0x16c] sm:$0xf] %v362_v27  ;;  %v364_v28 = vld [vmem:[%s6054_s28 + $0x2e0] sm:$0xf] }
  0x53   : > { %v366_v29 = vld [vmem:[%s6054_s28 + $0x2e8] sm:$0xf]  ;;  %v368_v30 = vld [vmem:[%s6054_s28 + $0x2f0] sm:$0xf]  ;;  %365 = vst [vmem:[%s6061_s29 + $0x170] sm:$0xf] %v364_v28 }
  0x54   : > { %367 = vst [vmem:[%s6061_s29 + $0x174] sm:$0xf] %v366_v29  ;;  %369 = vst [vmem:[%s6061_s29 + $0x178] sm:$0xf] %v368_v30  ;;  %v370_v31 = vld [vmem:[%s6054_s28 + $0x2f8] sm:$0xf] }
  0x55   : > { %v372_v32 = vld [vmem:[%s6054_s28 + $0x300] sm:$0xf]  ;;  %v374_v33 = vld [vmem:[%s6054_s28 + $0x308] sm:$0xf]  ;;  %371 = vst [vmem:[%s6061_s29 + $0x17c] sm:$0xf] %v370_v31 }
  0x56   : > { %373 = vst [vmem:[%s6061_s29 + $0x180] sm:$0xf] %v372_v32  ;;  %375 = vst [vmem:[%s6061_s29 + $0x184] sm:$0xf] %v374_v33  ;;  %v376_v34 = vld [vmem:[%s6054_s28 + $0x310] sm:$0xf] }
  0x57   : > { %v378_v35 = vld [vmem:[%s6054_s28 + $0x318] sm:$0xf]  ;;  %v380_v36 = vld [vmem:[%s6054_s28 + $0x320] sm:$0xf]  ;;  %377 = vst [vmem:[%s6061_s29 + $0x188] sm:$0xf] %v376_v34 }
  0x58   : > { %379 = vst [vmem:[%s6061_s29 + $0x18c] sm:$0xf] %v378_v35  ;;  %381 = vst [vmem:[%s6061_s29 + $0x190] sm:$0xf] %v380_v36  ;;  %v382_v37 = vld [vmem:[%s6054_s28 + $0x328] sm:$0xf] }
  0x59   : > { %v384_v38 = vld [vmem:[%s6054_s28 + $0x330] sm:$0xf]  ;;  %v386_v39 = vld [vmem:[%s6054_s28 + $0x338] sm:$0xf]  ;;  %383 = vst [vmem:[%s6061_s29 + $0x194] sm:$0xf] %v382_v37 }
  0x5a   : > { %385 = vst [vmem:[%s6061_s29 + $0x198] sm:$0xf] %v384_v38  ;;  %387 = vst [vmem:[%s6061_s29 + $0x19c] sm:$0xf] %v386_v39  ;;  %v388_v40 = vld [vmem:[%s6054_s28 + $0x340] sm:$0xf] }
  0x5b   : > { %v390_v41 = vld [vmem:[%s6054_s28 + $0x348] sm:$0xf]  ;;  %v392_v42 = vld [vmem:[%s6054_s28 + $0x350] sm:$0xf]  ;;  %389 = vst [vmem:[%s6061_s29 + $0x1a0] sm:$0xf] %v388_v40 }
  0x5c   : > { %391 = vst [vmem:[%s6061_s29 + $0x1a4] sm:$0xf] %v390_v41  ;;  %393 = vst [vmem:[%s6061_s29 + $0x1a8] sm:$0xf] %v392_v42  ;;  %v394_v43 = vld [vmem:[%s6054_s28 + $0x358] sm:$0xf] }
  0x5d   : > { %v396_v44 = vld [vmem:[%s6054_s28 + $0x360] sm:$0xf]  ;;  %v398_v45 = vld [vmem:[%s6054_s28 + $0x368] sm:$0xf]  ;;  %395 = vst [vmem:[%s6061_s29 + $0x1ac] sm:$0xf] %v394_v43 }
  0x5e   : > { %397 = vst [vmem:[%s6061_s29 + $0x1b0] sm:$0xf] %v396_v44  ;;  %399 = vst [vmem:[%s6061_s29 + $0x1b4] sm:$0xf] %v398_v45  ;;  %v400_v46 = vld [vmem:[%s6054_s28 + $0x370] sm:$0xf] }
  0x5f   : > { %v402_v47 = vld [vmem:[%s6054_s28 + $0x378] sm:$0xf]  ;;  %v404_v48 = vld [vmem:[%s6054_s28 + $0x380] sm:$0xf]  ;;  %401 = vst [vmem:[%s6061_s29 + $0x1b8] sm:$0xf] %v400_v46 }
  0x60   : > { %403 = vst [vmem:[%s6061_s29 + $0x1bc] sm:$0xf] %v402_v47  ;;  %405 = vst [vmem:[%s6061_s29 + $0x1c0] sm:$0xf] %v404_v48  ;;  %v406_v49 = vld [vmem:[%s6054_s28 + $0x388] sm:$0xf] }
  0x61   : > { %v408_v50 = vld [vmem:[%s6054_s28 + $0x390] sm:$0xf]  ;;  %v410_v51 = vld [vmem:[%s6054_s28 + $0x398] sm:$0xf]  ;;  %407 = vst [vmem:[%s6061_s29 + $0x1c4] sm:$0xf] %v406_v49 }
  0x62   : > { %409 = vst [vmem:[%s6061_s29 + $0x1c8] sm:$0xf] %v408_v50  ;;  %411 = vst [vmem:[%s6061_s29 + $0x1cc] sm:$0xf] %v410_v51  ;;  %v412_v52 = vld [vmem:[%s6054_s28 + $0x3a0] sm:$0xf] }
  0x63   : > { %v414_v53 = vld [vmem:[%s6054_s28 + $0x3a8] sm:$0xf]  ;;  %v416_v54 = vld [vmem:[%s6054_s28 + $0x3b0] sm:$0xf]  ;;  %413 = vst [vmem:[%s6061_s29 + $0x1d0] sm:$0xf] %v412_v52 }
  0x64   : > { %415 = vst [vmem:[%s6061_s29 + $0x1d4] sm:$0xf] %v414_v53  ;;  %417 = vst [vmem:[%s6061_s29 + $0x1d8] sm:$0xf] %v416_v54  ;;  %v418_v55 = vld [vmem:[%s6054_s28 + $0x3b8] sm:$0xf] }
  0x65   : > { %v420_v56 = vld [vmem:[%s6054_s28 + $0x3c0] sm:$0xf]  ;;  %v422_v57 = vld [vmem:[%s6054_s28 + $0x3c8] sm:$0xf]  ;;  %419 = vst [vmem:[%s6061_s29 + $0x1dc] sm:$0xf] %v418_v55 }
  0x66   : > { %421 = vst [vmem:[%s6061_s29 + $0x1e0] sm:$0xf] %v420_v56  ;;  %423 = vst [vmem:[%s6061_s29 + $0x1e4] sm:$0xf] %v422_v57  ;;  %v424_v58 = vld [vmem:[%s6054_s28 + $0x3d0] sm:$0xf] }
  0x67   : > { %v426_v59 = vld [vmem:[%s6054_s28 + $0x3d8] sm:$0xf]  ;;  %v428_v60 = vld [vmem:[%s6054_s28 + $0x3e0] sm:$0xf]  ;;  %425 = vst [vmem:[%s6061_s29 + $0x1e8] sm:$0xf] %v424_v58 }
  0x68   : > { %427 = vst [vmem:[%s6061_s29 + $0x1ec] sm:$0xf] %v426_v59  ;;  %429 = vst [vmem:[%s6061_s29 + $0x1f0] sm:$0xf] %v428_v60  ;;  %v430_v61 = vld [vmem:[%s6054_s28 + $0x3e8] sm:$0xf] }
  0x69   : > { %v432_v62 = vld [vmem:[%s6054_s28 + $0x3f0] sm:$0xf]  ;;  %v434_v63 = vld [vmem:[%s6054_s28 + $0x3f8] sm:$0xf]  ;;  %431 = vst [vmem:[%s6061_s29 + $0x1f4] sm:$0xf] %v430_v61 }
  0x6a   : > { %433 = vst [vmem:[%s6061_s29 + $0x1f8] sm:$0xf] %v432_v62  ;;  %435 = vst [vmem:[%s6061_s29 + $0x1fc] sm:$0xf] %v434_v63  ;;  %v436_v0 = vld [vmem:[%s6054_s28 + $0x400] sm:$0xf] }
  0x6b   : > { %v438_v1 = vld [vmem:[%s6054_s28 + $0x408] sm:$0xf]  ;;  %v440_v2 = vld [vmem:[%s6054_s28 + $0x410] sm:$0xf]  ;;  %437 = vst [vmem:[%s6061_s29 + $0x200] sm:$0xf] %v436_v0 }
  0x6c   : > { %439 = vst [vmem:[%s6061_s29 + $0x204] sm:$0xf] %v438_v1  ;;  %441 = vst [vmem:[%s6061_s29 + $0x208] sm:$0xf] %v440_v2  ;;  %v442_v3 = vld [vmem:[%s6054_s28 + $0x418] sm:$0xf] }
  0x6d   : > { %v444_v4 = vld [vmem:[%s6054_s28 + $0x420] sm:$0xf]  ;;  %v446_v5 = vld [vmem:[%s6054_s28 + $0x428] sm:$0xf]  ;;  %443 = vst [vmem:[%s6061_s29 + $0x20c] sm:$0xf] %v442_v3 }
  0x6e   : > { %445 = vst [vmem:[%s6061_s29 + $0x210] sm:$0xf] %v444_v4  ;;  %447 = vst [vmem:[%s6061_s29 + $0x214] sm:$0xf] %v446_v5  ;;  %v448_v6 = vld [vmem:[%s6054_s28 + $0x430] sm:$0xf] }
  0x6f   : > { %v450_v7 = vld [vmem:[%s6054_s28 + $0x438] sm:$0xf]  ;;  %v452_v8 = vld [vmem:[%s6054_s28 + $0x440] sm:$0xf]  ;;  %449 = vst [vmem:[%s6061_s29 + $0x218] sm:$0xf] %v448_v6 }
  0x70   : > { %451 = vst [vmem:[%s6061_s29 + $0x21c] sm:$0xf] %v450_v7  ;;  %453 = vst [vmem:[%s6061_s29 + $0x220] sm:$0xf] %v452_v8  ;;  %v454_v9 = vld [vmem:[%s6054_s28 + $0x448] sm:$0xf] }
  0x71   : > { %v456_v10 = vld [vmem:[%s6054_s28 + $0x450] sm:$0xf]  ;;  %v458_v11 = vld [vmem:[%s6054_s28 + $0x458] sm:$0xf]  ;;  %455 = vst [vmem:[%s6061_s29 + $0x224] sm:$0xf] %v454_v9 }
  0x72   : > { %457 = vst [vmem:[%s6061_s29 + $0x228] sm:$0xf] %v456_v10  ;;  %459 = vst [vmem:[%s6061_s29 + $0x22c] sm:$0xf] %v458_v11  ;;  %v460_v12 = vld [vmem:[%s6054_s28 + $0x460] sm:$0xf] }
  0x73   : > { %v462_v13 = vld [vmem:[%s6054_s28 + $0x468] sm:$0xf]  ;;  %v464_v14 = vld [vmem:[%s6054_s28 + $0x470] sm:$0xf]  ;;  %461 = vst [vmem:[%s6061_s29 + $0x230] sm:$0xf] %v460_v12 }
  0x74   : > { %463 = vst [vmem:[%s6061_s29 + $0x234] sm:$0xf] %v462_v13  ;;  %465 = vst [vmem:[%s6061_s29 + $0x238] sm:$0xf] %v464_v14  ;;  %v466_v15 = vld [vmem:[%s6054_s28 + $0x478] sm:$0xf] }
  0x75   : > { %v468_v16 = vld [vmem:[%s6054_s28 + $0x480] sm:$0xf]  ;;  %v470_v17 = vld [vmem:[%s6054_s28 + $0x488] sm:$0xf]  ;;  %467 = vst [vmem:[%s6061_s29 + $0x23c] sm:$0xf] %v466_v15 }
  0x76   : > { %469 = vst [vmem:[%s6061_s29 + $0x240] sm:$0xf] %v468_v16  ;;  %471 = vst [vmem:[%s6061_s29 + $0x244] sm:$0xf] %v470_v17  ;;  %v472_v18 = vld [vmem:[%s6054_s28 + $0x490] sm:$0xf] }
  0x77   : > { %v474_v19 = vld [vmem:[%s6054_s28 + $0x498] sm:$0xf]  ;;  %v476_v20 = vld [vmem:[%s6054_s28 + $0x4a0] sm:$0xf]  ;;  %473 = vst [vmem:[%s6061_s29 + $0x248] sm:$0xf] %v472_v18 }
  0x78   : > { %475 = vst [vmem:[%s6061_s29 + $0x24c] sm:$0xf] %v474_v19  ;;  %477 = vst [vmem:[%s6061_s29 + $0x250] sm:$0xf] %v476_v20  ;;  %v478_v21 = vld [vmem:[%s6054_s28 + $0x4a8] sm:$0xf] }
  0x79   : > { %v480_v22 = vld [vmem:[%s6054_s28 + $0x4b0] sm:$0xf]  ;;  %v482_v23 = vld [vmem:[%s6054_s28 + $0x4b8] sm:$0xf]  ;;  %479 = vst [vmem:[%s6061_s29 + $0x254] sm:$0xf] %v478_v21 }
  0x7a   : > { %481 = vst [vmem:[%s6061_s29 + $0x258] sm:$0xf] %v480_v22  ;;  %483 = vst [vmem:[%s6061_s29 + $0x25c] sm:$0xf] %v482_v23  ;;  %v484_v24 = vld [vmem:[%s6054_s28 + $0x4c0] sm:$0xf] }
  0x7b   : > { %v486_v25 = vld [vmem:[%s6054_s28 + $0x4c8] sm:$0xf]  ;;  %v488_v26 = vld [vmem:[%s6054_s28 + $0x4d0] sm:$0xf]  ;;  %485 = vst [vmem:[%s6061_s29 + $0x260] sm:$0xf] %v484_v24 }
  0x7c   : > { %487 = vst [vmem:[%s6061_s29 + $0x264] sm:$0xf] %v486_v25  ;;  %489 = vst [vmem:[%s6061_s29 + $0x268] sm:$0xf] %v488_v26  ;;  %v490_v27 = vld [vmem:[%s6054_s28 + $0x4d8] sm:$0xf] }
  0x7d   : > { %v492_v28 = vld [vmem:[%s6054_s28 + $0x4e0] sm:$0xf]  ;;  %v494_v29 = vld [vmem:[%s6054_s28 + $0x4e8] sm:$0xf]  ;;  %491 = vst [vmem:[%s6061_s29 + $0x26c] sm:$0xf] %v490_v27 }
  0x7e   : > { %493 = vst [vmem:[%s6061_s29 + $0x270] sm:$0xf] %v492_v28  ;;  %495 = vst [vmem:[%s6061_s29 + $0x274] sm:$0xf] %v494_v29  ;;  %v496_v30 = vld [vmem:[%s6054_s28 + $0x4f0] sm:$0xf] }
  0x7f   : > { %v498_v31 = vld [vmem:[%s6054_s28 + $0x4f8] sm:$0xf]  ;;  %v500_v32 = vld [vmem:[%s6054_s28 + $0x500] sm:$0xf]  ;;  %497 = vst [vmem:[%s6061_s29 + $0x278] sm:$0xf] %v496_v30 }
  0x80   : > { %499 = vst [vmem:[%s6061_s29 + $0x27c] sm:$0xf] %v498_v31  ;;  %501 = vst [vmem:[%s6061_s29 + $0x280] sm:$0xf] %v500_v32  ;;  %v502_v33 = vld [vmem:[%s6054_s28 + $0x508] sm:$0xf] }
  0x81   : > { %v504_v34 = vld [vmem:[%s6054_s28 + $0x510] sm:$0xf]  ;;  %v506_v35 = vld [vmem:[%s6054_s28 + $0x518] sm:$0xf]  ;;  %503 = vst [vmem:[%s6061_s29 + $0x284] sm:$0xf] %v502_v33 }
  0x82   : > { %505 = vst [vmem:[%s6061_s29 + $0x288] sm:$0xf] %v504_v34  ;;  %507 = vst [vmem:[%s6061_s29 + $0x28c] sm:$0xf] %v506_v35  ;;  %v508_v36 = vld [vmem:[%s6054_s28 + $0x520] sm:$0xf] }
  0x83   : > { %v510_v37 = vld [vmem:[%s6054_s28 + $0x528] sm:$0xf]  ;;  %v512_v38 = vld [vmem:[%s6054_s28 + $0x530] sm:$0xf]  ;;  %509 = vst [vmem:[%s6061_s29 + $0x290] sm:$0xf] %v508_v36 }
  0x84   : > { %511 = vst [vmem:[%s6061_s29 + $0x294] sm:$0xf] %v510_v37  ;;  %513 = vst [vmem:[%s6061_s29 + $0x298] sm:$0xf] %v512_v38  ;;  %v514_v39 = vld [vmem:[%s6054_s28 + $0x538] sm:$0xf] }
  0x85   : > { %v516_v40 = vld [vmem:[%s6054_s28 + $0x540] sm:$0xf]  ;;  %v518_v41 = vld [vmem:[%s6054_s28 + $0x548] sm:$0xf]  ;;  %515 = vst [vmem:[%s6061_s29 + $0x29c] sm:$0xf] %v514_v39 }
  0x86   : > { %517 = vst [vmem:[%s6061_s29 + $0x2a0] sm:$0xf] %v516_v40  ;;  %519 = vst [vmem:[%s6061_s29 + $0x2a4] sm:$0xf] %v518_v41  ;;  %v520_v42 = vld [vmem:[%s6054_s28 + $0x550] sm:$0xf] }
  0x87   : > { %v522_v43 = vld [vmem:[%s6054_s28 + $0x558] sm:$0xf]  ;;  %v524_v44 = vld [vmem:[%s6054_s28 + $0x560] sm:$0xf]  ;;  %521 = vst [vmem:[%s6061_s29 + $0x2a8] sm:$0xf] %v520_v42 }
  0x88   : > { %523 = vst [vmem:[%s6061_s29 + $0x2ac] sm:$0xf] %v522_v43  ;;  %525 = vst [vmem:[%s6061_s29 + $0x2b0] sm:$0xf] %v524_v44  ;;  %v526_v45 = vld [vmem:[%s6054_s28 + $0x568] sm:$0xf] }
  0x89   : > { %v528_v46 = vld [vmem:[%s6054_s28 + $0x570] sm:$0xf]  ;;  %v530_v47 = vld [vmem:[%s6054_s28 + $0x578] sm:$0xf]  ;;  %527 = vst [vmem:[%s6061_s29 + $0x2b4] sm:$0xf] %v526_v45 }
  0x8a   : > { %529 = vst [vmem:[%s6061_s29 + $0x2b8] sm:$0xf] %v528_v46  ;;  %531 = vst [vmem:[%s6061_s29 + $0x2bc] sm:$0xf] %v530_v47  ;;  %v532_v48 = vld [vmem:[%s6054_s28 + $0x580] sm:$0xf] }
  0x8b   : > { %v534_v49 = vld [vmem:[%s6054_s28 + $0x588] sm:$0xf]  ;;  %v536_v50 = vld [vmem:[%s6054_s28 + $0x590] sm:$0xf]  ;;  %533 = vst [vmem:[%s6061_s29 + $0x2c0] sm:$0xf] %v532_v48 }
  0x8c   : > { %535 = vst [vmem:[%s6061_s29 + $0x2c4] sm:$0xf] %v534_v49  ;;  %537 = vst [vmem:[%s6061_s29 + $0x2c8] sm:$0xf] %v536_v50  ;;  %v538_v51 = vld [vmem:[%s6054_s28 + $0x598] sm:$0xf] }
  0x8d   : > { %v540_v52 = vld [vmem:[%s6054_s28 + $0x5a0] sm:$0xf]  ;;  %v542_v53 = vld [vmem:[%s6054_s28 + $0x5a8] sm:$0xf]  ;;  %539 = vst [vmem:[%s6061_s29 + $0x2cc] sm:$0xf] %v538_v51 }
  0x8e   : > { %541 = vst [vmem:[%s6061_s29 + $0x2d0] sm:$0xf] %v540_v52  ;;  %543 = vst [vmem:[%s6061_s29 + $0x2d4] sm:$0xf] %v542_v53  ;;  %v544_v54 = vld [vmem:[%s6054_s28 + $0x5b0] sm:$0xf] }
  0x8f   : > { %v546_v55 = vld [vmem:[%s6054_s28 + $0x5b8] sm:$0xf]  ;;  %v548_v56 = vld [vmem:[%s6054_s28 + $0x5c0] sm:$0xf]  ;;  %545 = vst [vmem:[%s6061_s29 + $0x2d8] sm:$0xf] %v544_v54 }
  0x90   : > { %547 = vst [vmem:[%s6061_s29 + $0x2dc] sm:$0xf] %v546_v55  ;;  %549 = vst [vmem:[%s6061_s29 + $0x2e0] sm:$0xf] %v548_v56  ;;  %v550_v57 = vld [vmem:[%s6054_s28 + $0x5c8] sm:$0xf] }
  0x91   : > { %v552_v58 = vld [vmem:[%s6054_s28 + $0x5d0] sm:$0xf]  ;;  %v554_v59 = vld [vmem:[%s6054_s28 + $0x5d8] sm:$0xf]  ;;  %551 = vst [vmem:[%s6061_s29 + $0x2e4] sm:$0xf] %v550_v57 }
  0x92   : > { %553 = vst [vmem:[%s6061_s29 + $0x2e8] sm:$0xf] %v552_v58  ;;  %555 = vst [vmem:[%s6061_s29 + $0x2ec] sm:$0xf] %v554_v59  ;;  %v556_v60 = vld [vmem:[%s6054_s28 + $0x5e0] sm:$0xf] }
  0x93   : > { %v558_v61 = vld [vmem:[%s6054_s28 + $0x5e8] sm:$0xf]  ;;  %v560_v62 = vld [vmem:[%s6054_s28 + $0x5f0] sm:$0xf]  ;;  %557 = vst [vmem:[%s6061_s29 + $0x2f0] sm:$0xf] %v556_v60 }
  0x94   : > { %559 = vst [vmem:[%s6061_s29 + $0x2f4] sm:$0xf] %v558_v61  ;;  %561 = vst [vmem:[%s6061_s29 + $0x2f8] sm:$0xf] %v560_v62  ;;  %v562_v63 = vld [vmem:[%s6054_s28 + $0x5f8] sm:$0xf] }
  0x95   : > { %v564_v0 = vld [vmem:[%s6054_s28 + $0x600] sm:$0xf]  ;;  %v566_v1 = vld [vmem:[%s6054_s28 + $0x608] sm:$0xf]  ;;  %563 = vst [vmem:[%s6061_s29 + $0x2fc] sm:$0xf] %v562_v63 }
  0x96   : > { %565 = vst [vmem:[%s6061_s29 + $0x300] sm:$0xf] %v564_v0  ;;  %567 = vst [vmem:[%s6061_s29 + $0x304] sm:$0xf] %v566_v1  ;;  %v568_v2 = vld [vmem:[%s6054_s28 + $0x610] sm:$0xf] }
  0x97   : > { %v570_v3 = vld [vmem:[%s6054_s28 + $0x618] sm:$0xf]  ;;  %v572_v4 = vld [vmem:[%s6054_s28 + $0x620] sm:$0xf]  ;;  %569 = vst [vmem:[%s6061_s29 + $0x308] sm:$0xf] %v568_v2 }
  0x98   : > { %571 = vst [vmem:[%s6061_s29 + $0x30c] sm:$0xf] %v570_v3  ;;  %573 = vst [vmem:[%s6061_s29 + $0x310] sm:$0xf] %v572_v4  ;;  %v574_v5 = vld [vmem:[%s6054_s28 + $0x628] sm:$0xf] }
  0x99   : > { %v576_v6 = vld [vmem:[%s6054_s28 + $0x630] sm:$0xf]  ;;  %v578_v7 = vld [vmem:[%s6054_s28 + $0x638] sm:$0xf]  ;;  %575 = vst [vmem:[%s6061_s29 + $0x314] sm:$0xf] %v574_v5 }
  0x9a   : > { %577 = vst [vmem:[%s6061_s29 + $0x318] sm:$0xf] %v576_v6  ;;  %579 = vst [vmem:[%s6061_s29 + $0x31c] sm:$0xf] %v578_v7  ;;  %v580_v8 = vld [vmem:[%s6054_s28 + $0x640] sm:$0xf] }
  0x9b   : > { %v582_v9 = vld [vmem:[%s6054_s28 + $0x648] sm:$0xf]  ;;  %v584_v10 = vld [vmem:[%s6054_s28 + $0x650] sm:$0xf]  ;;  %581 = vst [vmem:[%s6061_s29 + $0x320] sm:$0xf] %v580_v8 }
  0x9c   : > { %583 = vst [vmem:[%s6061_s29 + $0x324] sm:$0xf] %v582_v9  ;;  %585 = vst [vmem:[%s6061_s29 + $0x328] sm:$0xf] %v584_v10  ;;  %v586_v11 = vld [vmem:[%s6054_s28 + $0x658] sm:$0xf] }
  0x9d   : > { %v588_v12 = vld [vmem:[%s6054_s28 + $0x660] sm:$0xf]  ;;  %v590_v13 = vld [vmem:[%s6054_s28 + $0x668] sm:$0xf]  ;;  %587 = vst [vmem:[%s6061_s29 + $0x32c] sm:$0xf] %v586_v11 }
  0x9e   : > { %589 = vst [vmem:[%s6061_s29 + $0x330] sm:$0xf] %v588_v12  ;;  %591 = vst [vmem:[%s6061_s29 + $0x334] sm:$0xf] %v590_v13  ;;  %v592_v14 = vld [vmem:[%s6054_s28 + $0x670] sm:$0xf] }
  0x9f   : > { %v594_v15 = vld [vmem:[%s6054_s28 + $0x678] sm:$0xf]  ;;  %v596_v16 = vld [vmem:[%s6054_s28 + $0x680] sm:$0xf]  ;;  %593 = vst [vmem:[%s6061_s29 + $0x338] sm:$0xf] %v592_v14 }
  0xa0   : > { %595 = vst [vmem:[%s6061_s29 + $0x33c] sm:$0xf] %v594_v15  ;;  %597 = vst [vmem:[%s6061_s29 + $0x340] sm:$0xf] %v596_v16  ;;  %v598_v17 = vld [vmem:[%s6054_s28 + $0x688] sm:$0xf] }
  0xa1   : > { %v600_v18 = vld [vmem:[%s6054_s28 + $0x690] sm:$0xf]  ;;  %v602_v19 = vld [vmem:[%s6054_s28 + $0x698] sm:$0xf]  ;;  %599 = vst [vmem:[%s6061_s29 + $0x344] sm:$0xf] %v598_v17 }
  0xa2   : > { %601 = vst [vmem:[%s6061_s29 + $0x348] sm:$0xf] %v600_v18  ;;  %603 = vst [vmem:[%s6061_s29 + $0x34c] sm:$0xf] %v602_v19  ;;  %v604_v20 = vld [vmem:[%s6054_s28 + $0x6a0] sm:$0xf] }
  0xa3   : > { %v606_v21 = vld [vmem:[%s6054_s28 + $0x6a8] sm:$0xf]  ;;  %v608_v22 = vld [vmem:[%s6054_s28 + $0x6b0] sm:$0xf]  ;;  %605 = vst [vmem:[%s6061_s29 + $0x350] sm:$0xf] %v604_v20 }
  0xa4   : > { %607 = vst [vmem:[%s6061_s29 + $0x354] sm:$0xf] %v606_v21  ;;  %609 = vst [vmem:[%s6061_s29 + $0x358] sm:$0xf] %v608_v22  ;;  %v610_v23 = vld [vmem:[%s6054_s28 + $0x6b8] sm:$0xf] }
  0xa5   : > { %v612_v24 = vld [vmem:[%s6054_s28 + $0x6c0] sm:$0xf]  ;;  %v614_v25 = vld [vmem:[%s6054_s28 + $0x6c8] sm:$0xf]  ;;  %611 = vst [vmem:[%s6061_s29 + $0x35c] sm:$0xf] %v610_v23 }
  0xa6   : > { %613 = vst [vmem:[%s6061_s29 + $0x360] sm:$0xf] %v612_v24  ;;  %615 = vst [vmem:[%s6061_s29 + $0x364] sm:$0xf] %v614_v25  ;;  %v616_v26 = vld [vmem:[%s6054_s28 + $0x6d0] sm:$0xf] }
  0xa7   : > { %v618_v27 = vld [vmem:[%s6054_s28 + $0x6d8] sm:$0xf]  ;;  %v620_v28 = vld [vmem:[%s6054_s28 + $0x6e0] sm:$0xf]  ;;  %617 = vst [vmem:[%s6061_s29 + $0x368] sm:$0xf] %v616_v26 }
  0xa8   : > { %619 = vst [vmem:[%s6061_s29 + $0x36c] sm:$0xf] %v618_v27  ;;  %621 = vst [vmem:[%s6061_s29 + $0x370] sm:$0xf] %v620_v28  ;;  %v622_v29 = vld [vmem:[%s6054_s28 + $0x6e8] sm:$0xf] }
  0xa9   : > { %v624_v30 = vld [vmem:[%s6054_s28 + $0x6f0] sm:$0xf]  ;;  %v626_v31 = vld [vmem:[%s6054_s28 + $0x6f8] sm:$0xf]  ;;  %623 = vst [vmem:[%s6061_s29 + $0x374] sm:$0xf] %v622_v29 }
  0xaa   : > { %625 = vst [vmem:[%s6061_s29 + $0x378] sm:$0xf] %v624_v30  ;;  %627 = vst [vmem:[%s6061_s29 + $0x37c] sm:$0xf] %v626_v31  ;;  %v628_v32 = vld [vmem:[%s6054_s28 + $0x700] sm:$0xf] }
  0xab   : > { %v630_v33 = vld [vmem:[%s6054_s28 + $0x708] sm:$0xf]  ;;  %v632_v34 = vld [vmem:[%s6054_s28 + $0x710] sm:$0xf]  ;;  %629 = vst [vmem:[%s6061_s29 + $0x380] sm:$0xf] %v628_v32 }
  0xac   : > { %631 = vst [vmem:[%s6061_s29 + $0x384] sm:$0xf] %v630_v33  ;;  %633 = vst [vmem:[%s6061_s29 + $0x388] sm:$0xf] %v632_v34  ;;  %v634_v35 = vld [vmem:[%s6054_s28 + $0x718] sm:$0xf] }
  0xad   : > { %v636_v36 = vld [vmem:[%s6054_s28 + $0x720] sm:$0xf]  ;;  %v638_v37 = vld [vmem:[%s6054_s28 + $0x728] sm:$0xf]  ;;  %635 = vst [vmem:[%s6061_s29 + $0x38c] sm:$0xf] %v634_v35 }
  0xae   : > { %637 = vst [vmem:[%s6061_s29 + $0x390] sm:$0xf] %v636_v36  ;;  %639 = vst [vmem:[%s6061_s29 + $0x394] sm:$0xf] %v638_v37  ;;  %v640_v38 = vld [vmem:[%s6054_s28 + $0x730] sm:$0xf] }
  0xaf   : > { %v642_v39 = vld [vmem:[%s6054_s28 + $0x738] sm:$0xf]  ;;  %v644_v40 = vld [vmem:[%s6054_s28 + $0x740] sm:$0xf]  ;;  %641 = vst [vmem:[%s6061_s29 + $0x398] sm:$0xf] %v640_v38 }
  0xb0   : > { %643 = vst [vmem:[%s6061_s29 + $0x39c] sm:$0xf] %v642_v39  ;;  %645 = vst [vmem:[%s6061_s29 + $0x3a0] sm:$0xf] %v644_v40  ;;  %v646_v41 = vld [vmem:[%s6054_s28 + $0x748] sm:$0xf] }
  0xb1   : > { %v648_v42 = vld [vmem:[%s6054_s28 + $0x750] sm:$0xf]  ;;  %v650_v43 = vld [vmem:[%s6054_s28 + $0x758] sm:$0xf]  ;;  %647 = vst [vmem:[%s6061_s29 + $0x3a4] sm:$0xf] %v646_v41 }
  0xb2   : > { %649 = vst [vmem:[%s6061_s29 + $0x3a8] sm:$0xf] %v648_v42  ;;  %651 = vst [vmem:[%s6061_s29 + $0x3ac] sm:$0xf] %v650_v43  ;;  %v652_v44 = vld [vmem:[%s6054_s28 + $0x760] sm:$0xf] }
  0xb3   : > { %v654_v45 = vld [vmem:[%s6054_s28 + $0x768] sm:$0xf]  ;;  %v656_v46 = vld [vmem:[%s6054_s28 + $0x770] sm:$0xf]  ;;  %653 = vst [vmem:[%s6061_s29 + $0x3b0] sm:$0xf] %v652_v44 }
  0xb4   : > { %655 = vst [vmem:[%s6061_s29 + $0x3b4] sm:$0xf] %v654_v45  ;;  %657 = vst [vmem:[%s6061_s29 + $0x3b8] sm:$0xf] %v656_v46  ;;  %v658_v47 = vld [vmem:[%s6054_s28 + $0x778] sm:$0xf] }
  0xb5   : > { %v660_v48 = vld [vmem:[%s6054_s28 + $0x780] sm:$0xf]  ;;  %v662_v49 = vld [vmem:[%s6054_s28 + $0x788] sm:$0xf]  ;;  %659 = vst [vmem:[%s6061_s29 + $0x3bc] sm:$0xf] %v658_v47 }
  0xb6   : > { %661 = vst [vmem:[%s6061_s29 + $0x3c0] sm:$0xf] %v660_v48  ;;  %663 = vst [vmem:[%s6061_s29 + $0x3c4] sm:$0xf] %v662_v49  ;;  %v664_v50 = vld [vmem:[%s6054_s28 + $0x790] sm:$0xf] }
  0xb7   : > { %v666_v51 = vld [vmem:[%s6054_s28 + $0x798] sm:$0xf]  ;;  %v668_v52 = vld [vmem:[%s6054_s28 + $0x7a0] sm:$0xf]  ;;  %665 = vst [vmem:[%s6061_s29 + $0x3c8] sm:$0xf] %v664_v50 }
  0xb8   : > { %667 = vst [vmem:[%s6061_s29 + $0x3cc] sm:$0xf] %v666_v51  ;;  %669 = vst [vmem:[%s6061_s29 + $0x3d0] sm:$0xf] %v668_v52  ;;  %v670_v53 = vld [vmem:[%s6054_s28 + $0x7a8] sm:$0xf] }
  0xb9   : > { %v672_v54 = vld [vmem:[%s6054_s28 + $0x7b0] sm:$0xf]  ;;  %v674_v55 = vld [vmem:[%s6054_s28 + $0x7b8] sm:$0xf]  ;;  %671 = vst [vmem:[%s6061_s29 + $0x3d4] sm:$0xf] %v670_v53 }
  0xba   : > { %673 = vst [vmem:[%s6061_s29 + $0x3d8] sm:$0xf] %v672_v54  ;;  %675 = vst [vmem:[%s6061_s29 + $0x3dc] sm:$0xf] %v674_v55  ;;  %v676_v56 = vld [vmem:[%s6054_s28 + $0x7c0] sm:$0xf] }
  0xbb   : > { %v678_v57 = vld [vmem:[%s6054_s28 + $0x7c8] sm:$0xf]  ;;  %v680_v58 = vld [vmem:[%s6054_s28 + $0x7d0] sm:$0xf]  ;;  %677 = vst [vmem:[%s6061_s29 + $0x3e0] sm:$0xf] %v676_v56 }
  0xbc   : > { %679 = vst [vmem:[%s6061_s29 + $0x3e4] sm:$0xf] %v678_v57  ;;  %681 = vst [vmem:[%s6061_s29 + $0x3e8] sm:$0xf] %v680_v58  ;;  %v682_v59 = vld [vmem:[%s6054_s28 + $0x7d8] sm:$0xf] }
  0xbd   : > { %v684_v60 = vld [vmem:[%s6054_s28 + $0x7e0] sm:$0xf]  ;;  %v686_v61 = vld [vmem:[%s6054_s28 + $0x7e8] sm:$0xf]  ;;  %683 = vst [vmem:[%s6061_s29 + $0x3ec] sm:$0xf] %v682_v59 }
  0xbe   : > { %685 = vst [vmem:[%s6061_s29 + $0x3f0] sm:$0xf] %v684_v60  ;;  %687 = vst [vmem:[%s6061_s29 + $0x3f4] sm:$0xf] %v686_v61  ;;  %v688_v62 = vld [vmem:[%s6054_s28 + $0x7f0] sm:$0xf] }
  0xbf   : > { %v690_v63 = vld [vmem:[%s6054_s28 + $0x7f8] sm:$0xf]  ;;  %v692_v0 = vld [vmem:[%s6054_s28 + $0x800] sm:$0xf]  ;;  %689 = vst [vmem:[%s6061_s29 + $0x3f8] sm:$0xf] %v688_v62 }
  0xc0   : > { %691 = vst [vmem:[%s6061_s29 + $0x3fc] sm:$0xf] %v690_v63  ;;  %693 = vst [vmem:[%s6061_s29 + $0x400] sm:$0xf] %v692_v0  ;;  %v694_v1 = vld [vmem:[%s6054_s28 + $0x808] sm:$0xf] }
  0xc1   : > { %v696_v2 = vld [vmem:[%s6054_s28 + $0x810] sm:$0xf]  ;;  %v698_v3 = vld [vmem:[%s6054_s28 + $0x818] sm:$0xf]  ;;  %695 = vst [vmem:[%s6061_s29 + $0x404] sm:$0xf] %v694_v1 }
  0xc2   : > { %697 = vst [vmem:[%s6061_s29 + $0x408] sm:$0xf] %v696_v2  ;;  %699 = vst [vmem:[%s6061_s29 + $0x40c] sm:$0xf] %v698_v3  ;;  %v700_v4 = vld [vmem:[%s6054_s28 + $0x820] sm:$0xf] }
  0xc3   : > { %v702_v5 = vld [vmem:[%s6054_s28 + $0x828] sm:$0xf]  ;;  %v704_v6 = vld [vmem:[%s6054_s28 + $0x830] sm:$0xf]  ;;  %701 = vst [vmem:[%s6061_s29 + $0x410] sm:$0xf] %v700_v4 }
  0xc4   : > { %703 = vst [vmem:[%s6061_s29 + $0x414] sm:$0xf] %v702_v5  ;;  %705 = vst [vmem:[%s6061_s29 + $0x418] sm:$0xf] %v704_v6  ;;  %v706_v7 = vld [vmem:[%s6054_s28 + $0x838] sm:$0xf] }
  0xc5   : > { %v708_v8 = vld [vmem:[%s6054_s28 + $0x840] sm:$0xf]  ;;  %v710_v9 = vld [vmem:[%s6054_s28 + $0x848] sm:$0xf]  ;;  %707 = vst [vmem:[%s6061_s29 + $0x41c] sm:$0xf] %v706_v7 }
  0xc6   : > { %709 = vst [vmem:[%s6061_s29 + $0x420] sm:$0xf] %v708_v8  ;;  %711 = vst [vmem:[%s6061_s29 + $0x424] sm:$0xf] %v710_v9  ;;  %v712_v10 = vld [vmem:[%s6054_s28 + $0x850] sm:$0xf] }
  0xc7   : > { %v714_v11 = vld [vmem:[%s6054_s28 + $0x858] sm:$0xf]  ;;  %v716_v12 = vld [vmem:[%s6054_s28 + $0x860] sm:$0xf]  ;;  %713 = vst [vmem:[%s6061_s29 + $0x428] sm:$0xf] %v712_v10 }
  0xc8   : > { %715 = vst [vmem:[%s6061_s29 + $0x42c] sm:$0xf] %v714_v11  ;;  %717 = vst [vmem:[%s6061_s29 + $0x430] sm:$0xf] %v716_v12  ;;  %v718_v13 = vld [vmem:[%s6054_s28 + $0x868] sm:$0xf] }
  0xc9   : > { %v720_v14 = vld [vmem:[%s6054_s28 + $0x870] sm:$0xf]  ;;  %v722_v15 = vld [vmem:[%s6054_s28 + $0x878] sm:$0xf]  ;;  %719 = vst [vmem:[%s6061_s29 + $0x434] sm:$0xf] %v718_v13 }
  0xca   : > { %721 = vst [vmem:[%s6061_s29 + $0x438] sm:$0xf] %v720_v14  ;;  %723 = vst [vmem:[%s6061_s29 + $0x43c] sm:$0xf] %v722_v15  ;;  %v724_v16 = vld [vmem:[%s6054_s28 + $0x880] sm:$0xf] }
  0xcb   : > { %v726_v17 = vld [vmem:[%s6054_s28 + $0x888] sm:$0xf]  ;;  %v728_v18 = vld [vmem:[%s6054_s28 + $0x890] sm:$0xf]  ;;  %725 = vst [vmem:[%s6061_s29 + $0x440] sm:$0xf] %v724_v16 }
  0xcc   : > { %727 = vst [vmem:[%s6061_s29 + $0x444] sm:$0xf] %v726_v17  ;;  %729 = vst [vmem:[%s6061_s29 + $0x448] sm:$0xf] %v728_v18  ;;  %v730_v19 = vld [vmem:[%s6054_s28 + $0x898] sm:$0xf] }
  0xcd   : > { %v732_v20 = vld [vmem:[%s6054_s28 + $0x8a0] sm:$0xf]  ;;  %v734_v21 = vld [vmem:[%s6054_s28 + $0x8a8] sm:$0xf]  ;;  %731 = vst [vmem:[%s6061_s29 + $0x44c] sm:$0xf] %v730_v19 }
  0xce   : > { %733 = vst [vmem:[%s6061_s29 + $0x450] sm:$0xf] %v732_v20  ;;  %735 = vst [vmem:[%s6061_s29 + $0x454] sm:$0xf] %v734_v21  ;;  %v736_v22 = vld [vmem:[%s6054_s28 + $0x8b0] sm:$0xf] }
  0xcf   : > { %v738_v23 = vld [vmem:[%s6054_s28 + $0x8b8] sm:$0xf]  ;;  %v740_v24 = vld [vmem:[%s6054_s28 + $0x8c0] sm:$0xf]  ;;  %737 = vst [vmem:[%s6061_s29 + $0x458] sm:$0xf] %v736_v22 }
  0xd0   : > { %739 = vst [vmem:[%s6061_s29 + $0x45c] sm:$0xf] %v738_v23  ;;  %741 = vst [vmem:[%s6061_s29 + $0x460] sm:$0xf] %v740_v24  ;;  %v742_v25 = vld [vmem:[%s6054_s28 + $0x8c8] sm:$0xf] }
  0xd1   : > { %v744_v26 = vld [vmem:[%s6054_s28 + $0x8d0] sm:$0xf]  ;;  %v746_v27 = vld [vmem:[%s6054_s28 + $0x8d8] sm:$0xf]  ;;  %743 = vst [vmem:[%s6061_s29 + $0x464] sm:$0xf] %v742_v25 }
  0xd2   : > { %745 = vst [vmem:[%s6061_s29 + $0x468] sm:$0xf] %v744_v26  ;;  %747 = vst [vmem:[%s6061_s29 + $0x46c] sm:$0xf] %v746_v27  ;;  %v748_v28 = vld [vmem:[%s6054_s28 + $0x8e0] sm:$0xf] }
  0xd3   : > { %v750_v29 = vld [vmem:[%s6054_s28 + $0x8e8] sm:$0xf]  ;;  %v752_v30 = vld [vmem:[%s6054_s28 + $0x8f0] sm:$0xf]  ;;  %749 = vst [vmem:[%s6061_s29 + $0x470] sm:$0xf] %v748_v28 }
  0xd4   : > { %751 = vst [vmem:[%s6061_s29 + $0x474] sm:$0xf] %v750_v29  ;;  %753 = vst [vmem:[%s6061_s29 + $0x478] sm:$0xf] %v752_v30  ;;  %v754_v31 = vld [vmem:[%s6054_s28 + $0x8f8] sm:$0xf] }
  0xd5   : > { %v756_v32 = vld [vmem:[%s6054_s28 + $0x900] sm:$0xf]  ;;  %v758_v33 = vld [vmem:[%s6054_s28 + $0x908] sm:$0xf]  ;;  %755 = vst [vmem:[%s6061_s29 + $0x47c] sm:$0xf] %v754_v31 }
  0xd6   : > { %757 = vst [vmem:[%s6061_s29 + $0x480] sm:$0xf] %v756_v32  ;;  %759 = vst [vmem:[%s6061_s29 + $0x484] sm:$0xf] %v758_v33  ;;  %v760_v34 = vld [vmem:[%s6054_s28 + $0x910] sm:$0xf] }
  0xd7   : > { %v762_v35 = vld [vmem:[%s6054_s28 + $0x918] sm:$0xf]  ;;  %v764_v36 = vld [vmem:[%s6054_s28 + $0x920] sm:$0xf]  ;;  %761 = vst [vmem:[%s6061_s29 + $0x488] sm:$0xf] %v760_v34 }
  0xd8   : > { %763 = vst [vmem:[%s6061_s29 + $0x48c] sm:$0xf] %v762_v35  ;;  %765 = vst [vmem:[%s6061_s29 + $0x490] sm:$0xf] %v764_v36  ;;  %v766_v37 = vld [vmem:[%s6054_s28 + $0x928] sm:$0xf] }
  0xd9   : > { %v768_v38 = vld [vmem:[%s6054_s28 + $0x930] sm:$0xf]  ;;  %v770_v39 = vld [vmem:[%s6054_s28 + $0x938] sm:$0xf]  ;;  %767 = vst [vmem:[%s6061_s29 + $0x494] sm:$0xf] %v766_v37 }
  0xda   : > { %769 = vst [vmem:[%s6061_s29 + $0x498] sm:$0xf] %v768_v38  ;;  %771 = vst [vmem:[%s6061_s29 + $0x49c] sm:$0xf] %v770_v39  ;;  %v772_v40 = vld [vmem:[%s6054_s28 + $0x940] sm:$0xf] }
  0xdb   : > { %v774_v41 = vld [vmem:[%s6054_s28 + $0x948] sm:$0xf]  ;;  %v776_v42 = vld [vmem:[%s6054_s28 + $0x950] sm:$0xf]  ;;  %773 = vst [vmem:[%s6061_s29 + $0x4a0] sm:$0xf] %v772_v40 }
  0xdc   : > { %775 = vst [vmem:[%s6061_s29 + $0x4a4] sm:$0xf] %v774_v41  ;;  %777 = vst [vmem:[%s6061_s29 + $0x4a8] sm:$0xf] %v776_v42  ;;  %v778_v43 = vld [vmem:[%s6054_s28 + $0x958] sm:$0xf] }
  0xdd   : > { %v780_v44 = vld [vmem:[%s6054_s28 + $0x960] sm:$0xf]  ;;  %v782_v45 = vld [vmem:[%s6054_s28 + $0x968] sm:$0xf]  ;;  %779 = vst [vmem:[%s6061_s29 + $0x4ac] sm:$0xf] %v778_v43 }
  0xde   : > { %781 = vst [vmem:[%s6061_s29 + $0x4b0] sm:$0xf] %v780_v44  ;;  %783 = vst [vmem:[%s6061_s29 + $0x4b4] sm:$0xf] %v782_v45  ;;  %v784_v46 = vld [vmem:[%s6054_s28 + $0x970] sm:$0xf] }
  0xdf   : > { %v786_v47 = vld [vmem:[%s6054_s28 + $0x978] sm:$0xf]  ;;  %v788_v48 = vld [vmem:[%s6054_s28 + $0x980] sm:$0xf]  ;;  %785 = vst [vmem:[%s6061_s29 + $0x4b8] sm:$0xf] %v784_v46 }
  0xe0   : > { %787 = vst [vmem:[%s6061_s29 + $0x4bc] sm:$0xf] %v786_v47  ;;  %789 = vst [vmem:[%s6061_s29 + $0x4c0] sm:$0xf] %v788_v48  ;;  %v790_v49 = vld [vmem:[%s6054_s28 + $0x988] sm:$0xf] }
  0xe1   : > { %v792_v50 = vld [vmem:[%s6054_s28 + $0x990] sm:$0xf]  ;;  %v794_v51 = vld [vmem:[%s6054_s28 + $0x998] sm:$0xf]  ;;  %791 = vst [vmem:[%s6061_s29 + $0x4c4] sm:$0xf] %v790_v49 }
  0xe2   : > { %793 = vst [vmem:[%s6061_s29 + $0x4c8] sm:$0xf] %v792_v50  ;;  %795 = vst [vmem:[%s6061_s29 + $0x4cc] sm:$0xf] %v794_v51  ;;  %v796_v52 = vld [vmem:[%s6054_s28 + $0x9a0] sm:$0xf] }
  0xe3   : > { %v798_v53 = vld [vmem:[%s6054_s28 + $0x9a8] sm:$0xf]  ;;  %v800_v54 = vld [vmem:[%s6054_s28 + $0x9b0] sm:$0xf]  ;;  %797 = vst [vmem:[%s6061_s29 + $0x4d0] sm:$0xf] %v796_v52 }
  0xe4   : > { %799 = vst [vmem:[%s6061_s29 + $0x4d4] sm:$0xf] %v798_v53  ;;  %801 = vst [vmem:[%s6061_s29 + $0x4d8] sm:$0xf] %v800_v54  ;;  %v802_v55 = vld [vmem:[%s6054_s28 + $0x9b8] sm:$0xf] }
  0xe5   : > { %v804_v56 = vld [vmem:[%s6054_s28 + $0x9c0] sm:$0xf]  ;;  %v806_v57 = vld [vmem:[%s6054_s28 + $0x9c8] sm:$0xf]  ;;  %803 = vst [vmem:[%s6061_s29 + $0x4dc] sm:$0xf] %v802_v55 }
  0xe6   : > { %805 = vst [vmem:[%s6061_s29 + $0x4e0] sm:$0xf] %v804_v56  ;;  %807 = vst [vmem:[%s6061_s29 + $0x4e4] sm:$0xf] %v806_v57  ;;  %v808_v58 = vld [vmem:[%s6054_s28 + $0x9d0] sm:$0xf] }
  0xe7   : > { %v810_v59 = vld [vmem:[%s6054_s28 + $0x9d8] sm:$0xf]  ;;  %v812_v60 = vld [vmem:[%s6054_s28 + $0x9e0] sm:$0xf]  ;;  %809 = vst [vmem:[%s6061_s29 + $0x4e8] sm:$0xf] %v808_v58 }
  0xe8   : > { %811 = vst [vmem:[%s6061_s29 + $0x4ec] sm:$0xf] %v810_v59  ;;  %813 = vst [vmem:[%s6061_s29 + $0x4f0] sm:$0xf] %v812_v60  ;;  %v814_v61 = vld [vmem:[%s6054_s28 + $0x9e8] sm:$0xf] }
  0xe9   : > { %v816_v62 = vld [vmem:[%s6054_s28 + $0x9f0] sm:$0xf]  ;;  %v818_v63 = vld [vmem:[%s6054_s28 + $0x9f8] sm:$0xf]  ;;  %815 = vst [vmem:[%s6061_s29 + $0x4f4] sm:$0xf] %v814_v61 }
  0xea   : > { %817 = vst [vmem:[%s6061_s29 + $0x4f8] sm:$0xf] %v816_v62  ;;  %819 = vst [vmem:[%s6061_s29 + $0x4fc] sm:$0xf] %v818_v63  ;;  %v820_v0 = vld [vmem:[%s6054_s28 + $0xa00] sm:$0xf] }
  0xeb   : > { %v822_v1 = vld [vmem:[%s6054_s28 + $0xa08] sm:$0xf]  ;;  %v824_v2 = vld [vmem:[%s6054_s28 + $0xa10] sm:$0xf]  ;;  %821 = vst [vmem:[%s6061_s29 + $0x500] sm:$0xf] %v820_v0 }
  0xec   : > { %823 = vst [vmem:[%s6061_s29 + $0x504] sm:$0xf] %v822_v1  ;;  %825 = vst [vmem:[%s6061_s29 + $0x508] sm:$0xf] %v824_v2  ;;  %v826_v3 = vld [vmem:[%s6054_s28 + $0xa18] sm:$0xf] }
  0xed   : > { %v828_v4 = vld [vmem:[%s6054_s28 + $0xa20] sm:$0xf]  ;;  %v830_v5 = vld [vmem:[%s6054_s28 + $0xa28] sm:$0xf]  ;;  %827 = vst [vmem:[%s6061_s29 + $0x50c] sm:$0xf] %v826_v3 }
  0xee   : > { %829 = vst [vmem:[%s6061_s29 + $0x510] sm:$0xf] %v828_v4  ;;  %831 = vst [vmem:[%s6061_s29 + $0x514] sm:$0xf] %v830_v5  ;;  %v832_v6 = vld [vmem:[%s6054_s28 + $0xa30] sm:$0xf] }
  0xef   : > { %v834_v7 = vld [vmem:[%s6054_s28 + $0xa38] sm:$0xf]  ;;  %v836_v8 = vld [vmem:[%s6054_s28 + $0xa40] sm:$0xf]  ;;  %833 = vst [vmem:[%s6061_s29 + $0x518] sm:$0xf] %v832_v6 }
  0xf0   : > { %835 = vst [vmem:[%s6061_s29 + $0x51c] sm:$0xf] %v834_v7  ;;  %837 = vst [vmem:[%s6061_s29 + $0x520] sm:$0xf] %v836_v8  ;;  %v838_v9 = vld [vmem:[%s6054_s28 + $0xa48] sm:$0xf] }
  0xf1   : > { %v840_v10 = vld [vmem:[%s6054_s28 + $0xa50] sm:$0xf]  ;;  %v842_v11 = vld [vmem:[%s6054_s28 + $0xa58] sm:$0xf]  ;;  %839 = vst [vmem:[%s6061_s29 + $0x524] sm:$0xf] %v838_v9 }
  0xf2   : > { %841 = vst [vmem:[%s6061_s29 + $0x528] sm:$0xf] %v840_v10  ;;  %843 = vst [vmem:[%s6061_s29 + $0x52c] sm:$0xf] %v842_v11  ;;  %v844_v12 = vld [vmem:[%s6054_s28 + $0xa60] sm:$0xf] }
  0xf3   : > { %v846_v13 = vld [vmem:[%s6054_s28 + $0xa68] sm:$0xf]  ;;  %v848_v14 = vld [vmem:[%s6054_s28 + $0xa70] sm:$0xf]  ;;  %845 = vst [vmem:[%s6061_s29 + $0x530] sm:$0xf] %v844_v12 }
  0xf4   : > { %847 = vst [vmem:[%s6061_s29 + $0x534] sm:$0xf] %v846_v13  ;;  %849 = vst [vmem:[%s6061_s29 + $0x538] sm:$0xf] %v848_v14  ;;  %v850_v15 = vld [vmem:[%s6054_s28 + $0xa78] sm:$0xf] }
  0xf5   : > { %v852_v16 = vld [vmem:[%s6054_s28 + $0xa80] sm:$0xf]  ;;  %v854_v17 = vld [vmem:[%s6054_s28 + $0xa88] sm:$0xf]  ;;  %851 = vst [vmem:[%s6061_s29 + $0x53c] sm:$0xf] %v850_v15 }
  0xf6   : > { %853 = vst [vmem:[%s6061_s29 + $0x540] sm:$0xf] %v852_v16  ;;  %855 = vst [vmem:[%s6061_s29 + $0x544] sm:$0xf] %v854_v17  ;;  %v856_v18 = vld [vmem:[%s6054_s28 + $0xa90] sm:$0xf] }
  0xf7   : > { %v858_v19 = vld [vmem:[%s6054_s28 + $0xa98] sm:$0xf]  ;;  %v860_v20 = vld [vmem:[%s6054_s28 + $0xaa0] sm:$0xf]  ;;  %857 = vst [vmem:[%s6061_s29 + $0x548] sm:$0xf] %v856_v18 }
  0xf8   : > { %859 = vst [vmem:[%s6061_s29 + $0x54c] sm:$0xf] %v858_v19  ;;  %861 = vst [vmem:[%s6061_s29 + $0x550] sm:$0xf] %v860_v20  ;;  %v862_v21 = vld [vmem:[%s6054_s28 + $0xaa8] sm:$0xf] }
  0xf9   : > { %v864_v22 = vld [vmem:[%s6054_s28 + $0xab0] sm:$0xf]  ;;  %v866_v23 = vld [vmem:[%s6054_s28 + $0xab8] sm:$0xf]  ;;  %863 = vst [vmem:[%s6061_s29 + $0x554] sm:$0xf] %v862_v21 }
  0xfa   : > { %865 = vst [vmem:[%s6061_s29 + $0x558] sm:$0xf] %v864_v22  ;;  %867 = vst [vmem:[%s6061_s29 + $0x55c] sm:$0xf] %v866_v23  ;;  %v868_v24 = vld [vmem:[%s6054_s28 + $0xac0] sm:$0xf] }
  0xfb   : > { %v870_v25 = vld [vmem:[%s6054_s28 + $0xac8] sm:$0xf]  ;;  %v872_v26 = vld [vmem:[%s6054_s28 + $0xad0] sm:$0xf]  ;;  %869 = vst [vmem:[%s6061_s29 + $0x560] sm:$0xf] %v868_v24 }
  0xfc   : > { %871 = vst [vmem:[%s6061_s29 + $0x564] sm:$0xf] %v870_v25  ;;  %873 = vst [vmem:[%s6061_s29 + $0x568] sm:$0xf] %v872_v26  ;;  %v874_v27 = vld [vmem:[%s6054_s28 + $0xad8] sm:$0xf] }
  0xfd   : > { %v876_v28 = vld [vmem:[%s6054_s28 + $0xae0] sm:$0xf]  ;;  %v878_v29 = vld [vmem:[%s6054_s28 + $0xae8] sm:$0xf]  ;;  %875 = vst [vmem:[%s6061_s29 + $0x56c] sm:$0xf] %v874_v27 }
  0xfe   : > { %877 = vst [vmem:[%s6061_s29 + $0x570] sm:$0xf] %v876_v28  ;;  %879 = vst [vmem:[%s6061_s29 + $0x574] sm:$0xf] %v878_v29  ;;  %v880_v30 = vld [vmem:[%s6054_s28 + $0xaf0] sm:$0xf] }
  0xff   : > { %v882_v31 = vld [vmem:[%s6054_s28 + $0xaf8] sm:$0xf]  ;;  %v884_v32 = vld [vmem:[%s6054_s28 + $0xb00] sm:$0xf]  ;;  %881 = vst [vmem:[%s6061_s29 + $0x578] sm:$0xf] %v880_v30 }
 0x100   : > { %883 = vst [vmem:[%s6061_s29 + $0x57c] sm:$0xf] %v882_v31  ;;  %885 = vst [vmem:[%s6061_s29 + $0x580] sm:$0xf] %v884_v32  ;;  %v886_v33 = vld [vmem:[%s6054_s28 + $0xb08] sm:$0xf] }
 0x101   : > { %v888_v34 = vld [vmem:[%s6054_s28 + $0xb10] sm:$0xf]  ;;  %v890_v35 = vld [vmem:[%s6054_s28 + $0xb18] sm:$0xf]  ;;  %887 = vst [vmem:[%s6061_s29 + $0x584] sm:$0xf] %v886_v33 }
 0x102   : > { %889 = vst [vmem:[%s6061_s29 + $0x588] sm:$0xf] %v888_v34  ;;  %891 = vst [vmem:[%s6061_s29 + $0x58c] sm:$0xf] %v890_v35  ;;  %v892_v36 = vld [vmem:[%s6054_s28 + $0xb20] sm:$0xf] }
 0x103   : > { %v894_v37 = vld [vmem:[%s6054_s28 + $0xb28] sm:$0xf]  ;;  %v896_v38 = vld [vmem:[%s6054_s28 + $0xb30] sm:$0xf]  ;;  %893 = vst [vmem:[%s6061_s29 + $0x590] sm:$0xf] %v892_v36 }
 0x104   : > { %895 = vst [vmem:[%s6061_s29 + $0x594] sm:$0xf] %v894_v37  ;;  %897 = vst [vmem:[%s6061_s29 + $0x598] sm:$0xf] %v896_v38  ;;  %v898_v39 = vld [vmem:[%s6054_s28 + $0xb38] sm:$0xf] }
 0x105   : > { %v900_v40 = vld [vmem:[%s6054_s28 + $0xb40] sm:$0xf]  ;;  %v902_v41 = vld [vmem:[%s6054_s28 + $0xb48] sm:$0xf]  ;;  %899 = vst [vmem:[%s6061_s29 + $0x59c] sm:$0xf] %v898_v39 }
 0x106   : > { %901 = vst [vmem:[%s6061_s29 + $0x5a0] sm:$0xf] %v900_v40  ;;  %903 = vst [vmem:[%s6061_s29 + $0x5a4] sm:$0xf] %v902_v41  ;;  %v904_v42 = vld [vmem:[%s6054_s28 + $0xb50] sm:$0xf] }
 0x107   : > { %v906_v43 = vld [vmem:[%s6054_s28 + $0xb58] sm:$0xf]  ;;  %v908_v44 = vld [vmem:[%s6054_s28 + $0xb60] sm:$0xf]  ;;  %905 = vst [vmem:[%s6061_s29 + $0x5a8] sm:$0xf] %v904_v42 }
 0x108   : > { %907 = vst [vmem:[%s6061_s29 + $0x5ac] sm:$0xf] %v906_v43  ;;  %909 = vst [vmem:[%s6061_s29 + $0x5b0] sm:$0xf] %v908_v44  ;;  %v910_v45 = vld [vmem:[%s6054_s28 + $0xb68] sm:$0xf] }
 0x109   : > { %v912_v46 = vld [vmem:[%s6054_s28 + $0xb70] sm:$0xf]  ;;  %v914_v47 = vld [vmem:[%s6054_s28 + $0xb78] sm:$0xf]  ;;  %911 = vst [vmem:[%s6061_s29 + $0x5b4] sm:$0xf] %v910_v45 }
 0x10a   : > { %913 = vst [vmem:[%s6061_s29 + $0x5b8] sm:$0xf] %v912_v46  ;;  %915 = vst [vmem:[%s6061_s29 + $0x5bc] sm:$0xf] %v914_v47  ;;  %v916_v48 = vld [vmem:[%s6054_s28 + $0xb80] sm:$0xf] }
 0x10b   : > { %v918_v49 = vld [vmem:[%s6054_s28 + $0xb88] sm:$0xf]  ;;  %v920_v50 = vld [vmem:[%s6054_s28 + $0xb90] sm:$0xf]  ;;  %917 = vst [vmem:[%s6061_s29 + $0x5c0] sm:$0xf] %v916_v48 }
 0x10c   : > { %919 = vst [vmem:[%s6061_s29 + $0x5c4] sm:$0xf] %v918_v49  ;;  %921 = vst [vmem:[%s6061_s29 + $0x5c8] sm:$0xf] %v920_v50  ;;  %v922_v51 = vld [vmem:[%s6054_s28 + $0xb98] sm:$0xf] }
 0x10d   : > { %v924_v52 = vld [vmem:[%s6054_s28 + $0xba0] sm:$0xf]  ;;  %v926_v53 = vld [vmem:[%s6054_s28 + $0xba8] sm:$0xf]  ;;  %923 = vst [vmem:[%s6061_s29 + $0x5cc] sm:$0xf] %v922_v51 }
 0x10e   : > { %925 = vst [vmem:[%s6061_s29 + $0x5d0] sm:$0xf] %v924_v52  ;;  %927 = vst [vmem:[%s6061_s29 + $0x5d4] sm:$0xf] %v926_v53  ;;  %v928_v54 = vld [vmem:[%s6054_s28 + $0xbb0] sm:$0xf] }
 0x10f   : > { %v930_v55 = vld [vmem:[%s6054_s28 + $0xbb8] sm:$0xf]  ;;  %v932_v56 = vld [vmem:[%s6054_s28 + $0xbc0] sm:$0xf]  ;;  %929 = vst [vmem:[%s6061_s29 + $0x5d8] sm:$0xf] %v928_v54 }
 0x110   : > { %931 = vst [vmem:[%s6061_s29 + $0x5dc] sm:$0xf] %v930_v55  ;;  %933 = vst [vmem:[%s6061_s29 + $0x5e0] sm:$0xf] %v932_v56  ;;  %v934_v57 = vld [vmem:[%s6054_s28 + $0xbc8] sm:$0xf] }
 0x111   : > { %v936_v58 = vld [vmem:[%s6054_s28 + $0xbd0] sm:$0xf]  ;;  %v938_v59 = vld [vmem:[%s6054_s28 + $0xbd8] sm:$0xf]  ;;  %935 = vst [vmem:[%s6061_s29 + $0x5e4] sm:$0xf] %v934_v57 }
 0x112   : > { %937 = vst [vmem:[%s6061_s29 + $0x5e8] sm:$0xf] %v936_v58  ;;  %939 = vst [vmem:[%s6061_s29 + $0x5ec] sm:$0xf] %v938_v59  ;;  %v940_v60 = vld [vmem:[%s6054_s28 + $0xbe0] sm:$0xf] }
 0x113   : > { %v942_v61 = vld [vmem:[%s6054_s28 + $0xbe8] sm:$0xf]  ;;  %v944_v62 = vld [vmem:[%s6054_s28 + $0xbf0] sm:$0xf]  ;;  %941 = vst [vmem:[%s6061_s29 + $0x5f0] sm:$0xf] %v940_v60 }
 0x114   : > { %943 = vst [vmem:[%s6061_s29 + $0x5f4] sm:$0xf] %v942_v61  ;;  %945 = vst [vmem:[%s6061_s29 + $0x5f8] sm:$0xf] %v944_v62  ;;  %v946_v63 = vld [vmem:[%s6054_s28 + $0xbf8] sm:$0xf] }
 0x115   : > { %v948_v0 = vld [vmem:[%s6054_s28 + $0xc00] sm:$0xf]  ;;  %v950_v1 = vld [vmem:[%s6054_s28 + $0xc08] sm:$0xf]  ;;  %947 = vst [vmem:[%s6061_s29 + $0x5fc] sm:$0xf] %v946_v63 }
 0x116   : > { %949 = vst [vmem:[%s6061_s29 + $0x600] sm:$0xf] %v948_v0  ;;  %951 = vst [vmem:[%s6061_s29 + $0x604] sm:$0xf] %v950_v1  ;;  %v952_v2 = vld [vmem:[%s6054_s28 + $0xc10] sm:$0xf] }
 0x117   : > { %v954_v3 = vld [vmem:[%s6054_s28 + $0xc18] sm:$0xf]  ;;  %v956_v4 = vld [vmem:[%s6054_s28 + $0xc20] sm:$0xf]  ;;  %953 = vst [vmem:[%s6061_s29 + $0x608] sm:$0xf] %v952_v2 }
 0x118   : > { %955 = vst [vmem:[%s6061_s29 + $0x60c] sm:$0xf] %v954_v3  ;;  %957 = vst [vmem:[%s6061_s29 + $0x610] sm:$0xf] %v956_v4  ;;  %v958_v5 = vld [vmem:[%s6054_s28 + $0xc28] sm:$0xf] }
 0x119   : > { %v960_v6 = vld [vmem:[%s6054_s28 + $0xc30] sm:$0xf]  ;;  %v962_v7 = vld [vmem:[%s6054_s28 + $0xc38] sm:$0xf]  ;;  %959 = vst [vmem:[%s6061_s29 + $0x614] sm:$0xf] %v958_v5 }
 0x11a   : > { %961 = vst [vmem:[%s6061_s29 + $0x618] sm:$0xf] %v960_v6  ;;  %963 = vst [vmem:[%s6061_s29 + $0x61c] sm:$0xf] %v962_v7  ;;  %v964_v8 = vld [vmem:[%s6054_s28 + $0xc40] sm:$0xf] }
 0x11b   : > { %v966_v9 = vld [vmem:[%s6054_s28 + $0xc48] sm:$0xf]  ;;  %v968_v10 = vld [vmem:[%s6054_s28 + $0xc50] sm:$0xf]  ;;  %965 = vst [vmem:[%s6061_s29 + $0x620] sm:$0xf] %v964_v8 }
 0x11c   : > { %967 = vst [vmem:[%s6061_s29 + $0x624] sm:$0xf] %v966_v9  ;;  %969 = vst [vmem:[%s6061_s29 + $0x628] sm:$0xf] %v968_v10  ;;  %v970_v11 = vld [vmem:[%s6054_s28 + $0xc58] sm:$0xf] }
 0x11d   : > { %v972_v12 = vld [vmem:[%s6054_s28 + $0xc60] sm:$0xf]  ;;  %v974_v13 = vld [vmem:[%s6054_s28 + $0xc68] sm:$0xf]  ;;  %971 = vst [vmem:[%s6061_s29 + $0x62c] sm:$0xf] %v970_v11 }
 0x11e   : > { %973 = vst [vmem:[%s6061_s29 + $0x630] sm:$0xf] %v972_v12  ;;  %975 = vst [vmem:[%s6061_s29 + $0x634] sm:$0xf] %v974_v13  ;;  %v976_v14 = vld [vmem:[%s6054_s28 + $0xc70] sm:$0xf] }
 0x11f   : > { %v978_v15 = vld [vmem:[%s6054_s28 + $0xc78] sm:$0xf]  ;;  %v980_v16 = vld [vmem:[%s6054_s28 + $0xc80] sm:$0xf]  ;;  %977 = vst [vmem:[%s6061_s29 + $0x638] sm:$0xf] %v976_v14 }
 0x120   : > { %979 = vst [vmem:[%s6061_s29 + $0x63c] sm:$0xf] %v978_v15  ;;  %981 = vst [vmem:[%s6061_s29 + $0x640] sm:$0xf] %v980_v16  ;;  %v982_v17 = vld [vmem:[%s6054_s28 + $0xc88] sm:$0xf] }
 0x121   : > { %v984_v18 = vld [vmem:[%s6054_s28 + $0xc90] sm:$0xf]  ;;  %v986_v19 = vld [vmem:[%s6054_s28 + $0xc98] sm:$0xf]  ;;  %983 = vst [vmem:[%s6061_s29 + $0x644] sm:$0xf] %v982_v17 }
 0x122   : > { %985 = vst [vmem:[%s6061_s29 + $0x648] sm:$0xf] %v984_v18  ;;  %987 = vst [vmem:[%s6061_s29 + $0x64c] sm:$0xf] %v986_v19  ;;  %v988_v20 = vld [vmem:[%s6054_s28 + $0xca0] sm:$0xf] }
 0x123   : > { %v990_v21 = vld [vmem:[%s6054_s28 + $0xca8] sm:$0xf]  ;;  %v992_v22 = vld [vmem:[%s6054_s28 + $0xcb0] sm:$0xf]  ;;  %989 = vst [vmem:[%s6061_s29 + $0x650] sm:$0xf] %v988_v20 }
 0x124   : > { %991 = vst [vmem:[%s6061_s29 + $0x654] sm:$0xf] %v990_v21  ;;  %993 = vst [vmem:[%s6061_s29 + $0x658] sm:$0xf] %v992_v22  ;;  %v994_v23 = vld [vmem:[%s6054_s28 + $0xcb8] sm:$0xf] }
 0x125   : > { %v996_v24 = vld [vmem:[%s6054_s28 + $0xcc0] sm:$0xf]  ;;  %v998_v25 = vld [vmem:[%s6054_s28 + $0xcc8] sm:$0xf]  ;;  %995 = vst [vmem:[%s6061_s29 + $0x65c] sm:$0xf] %v994_v23 }
 0x126   : > { %997 = vst [vmem:[%s6061_s29 + $0x660] sm:$0xf] %v996_v24  ;;  %999 = vst [vmem:[%s6061_s29 + $0x664] sm:$0xf] %v998_v25  ;;  %v1000_v26 = vld [vmem:[%s6054_s28 + $0xcd0] sm:$0xf] }
 0x127   : > { %v1002_v27 = vld [vmem:[%s6054_s28 + $0xcd8] sm:$0xf]  ;;  %v1004_v28 = vld [vmem:[%s6054_s28 + $0xce0] sm:$0xf]  ;;  %1001 = vst [vmem:[%s6061_s29 + $0x668] sm:$0xf] %v1000_v26 }
 0x128   : > { %1003 = vst [vmem:[%s6061_s29 + $0x66c] sm:$0xf] %v1002_v27  ;;  %1005 = vst [vmem:[%s6061_s29 + $0x670] sm:$0xf] %v1004_v28  ;;  %v1006_v29 = vld [vmem:[%s6054_s28 + $0xce8] sm:$0xf] }
 0x129   : > { %v1008_v30 = vld [vmem:[%s6054_s28 + $0xcf0] sm:$0xf]  ;;  %v1010_v31 = vld [vmem:[%s6054_s28 + $0xcf8] sm:$0xf]  ;;  %1007 = vst [vmem:[%s6061_s29 + $0x674] sm:$0xf] %v1006_v29 }
 0x12a   : > { %1009 = vst [vmem:[%s6061_s29 + $0x678] sm:$0xf] %v1008_v30  ;;  %1011 = vst [vmem:[%s6061_s29 + $0x67c] sm:$0xf] %v1010_v31  ;;  %v1012_v32 = vld [vmem:[%s6054_s28 + $0xd00] sm:$0xf] }
 0x12b   : > { %v1014_v33 = vld [vmem:[%s6054_s28 + $0xd08] sm:$0xf]  ;;  %v1016_v34 = vld [vmem:[%s6054_s28 + $0xd10] sm:$0xf]  ;;  %1013 = vst [vmem:[%s6061_s29 + $0x680] sm:$0xf] %v1012_v32 }
 0x12c   : > { %1015 = vst [vmem:[%s6061_s29 + $0x684] sm:$0xf] %v1014_v33  ;;  %1017 = vst [vmem:[%s6061_s29 + $0x688] sm:$0xf] %v1016_v34  ;;  %v1018_v35 = vld [vmem:[%s6054_s28 + $0xd18] sm:$0xf] }
 0x12d   : > { %v1020_v36 = vld [vmem:[%s6054_s28 + $0xd20] sm:$0xf]  ;;  %v1022_v37 = vld [vmem:[%s6054_s28 + $0xd28] sm:$0xf]  ;;  %1019 = vst [vmem:[%s6061_s29 + $0x68c] sm:$0xf] %v1018_v35 }
 0x12e   : > { %1021 = vst [vmem:[%s6061_s29 + $0x690] sm:$0xf] %v1020_v36  ;;  %1023 = vst [vmem:[%s6061_s29 + $0x694] sm:$0xf] %v1022_v37  ;;  %v1024_v38 = vld [vmem:[%s6054_s28 + $0xd30] sm:$0xf] }
 0x12f   : > { %v1026_v39 = vld [vmem:[%s6054_s28 + $0xd38] sm:$0xf]  ;;  %v1028_v40 = vld [vmem:[%s6054_s28 + $0xd40] sm:$0xf]  ;;  %1025 = vst [vmem:[%s6061_s29 + $0x698] sm:$0xf] %v1024_v38 }
 0x130   : > { %1027 = vst [vmem:[%s6061_s29 + $0x69c] sm:$0xf] %v1026_v39  ;;  %1029 = vst [vmem:[%s6061_s29 + $0x6a0] sm:$0xf] %v1028_v40  ;;  %v1030_v41 = vld [vmem:[%s6054_s28 + $0xd48] sm:$0xf] }
 0x131   : > { %v1032_v42 = vld [vmem:[%s6054_s28 + $0xd50] sm:$0xf]  ;;  %v1034_v43 = vld [vmem:[%s6054_s28 + $0xd58] sm:$0xf]  ;;  %1031 = vst [vmem:[%s6061_s29 + $0x6a4] sm:$0xf] %v1030_v41 }
 0x132   : > { %1033 = vst [vmem:[%s6061_s29 + $0x6a8] sm:$0xf] %v1032_v42  ;;  %1035 = vst [vmem:[%s6061_s29 + $0x6ac] sm:$0xf] %v1034_v43  ;;  %v1036_v44 = vld [vmem:[%s6054_s28 + $0xd60] sm:$0xf] }
 0x133   : > { %v1038_v45 = vld [vmem:[%s6054_s28 + $0xd68] sm:$0xf]  ;;  %v1040_v46 = vld [vmem:[%s6054_s28 + $0xd70] sm:$0xf]  ;;  %1037 = vst [vmem:[%s6061_s29 + $0x6b0] sm:$0xf] %v1036_v44 }
 0x134   : > { %1039 = vst [vmem:[%s6061_s29 + $0x6b4] sm:$0xf] %v1038_v45  ;;  %1041 = vst [vmem:[%s6061_s29 + $0x6b8] sm:$0xf] %v1040_v46  ;;  %v1042_v47 = vld [vmem:[%s6054_s28 + $0xd78] sm:$0xf] }
 0x135   : > { %1043 = vst [vmem:[%s6061_s29 + $0x6bc] sm:$0xf] %v1042_v47 }
 0x136 PF: > { %p4918_p8 = scmp.ge.s32.totalorder %s5984_s16, 1  ;;  %p1935_p9 = scmp.lt.s32.totalorder %s5984_s16, 3 }
 0x138   : > { %p1936_p10 = pnand %p4918_p8, %p1935_p9 }
 0x139   : > { %s1942_s30 = sand.u32 (!%p1936_p10), 1, %s5968_s12   ;;  %v5683_v48 = vld [vmem:[%s7335_s0 + $0x4] ss:$108 sps:$4 sm:$0xff] (!%p1936_p10)   ;;  %v5688_v49 = vld [vmem:[%s7335_s0 + $0xc] ss:$108 sps:$4 sm:$0xff] (!%p1936_p10)   ;;  %p1980_p11 = scmp.lt.s32.totalorder (!%p1936_p10), %s5976_s14, 1 }
 0x13a   : > { %1939 = sbr.rel (%p1936_p10) target bundleno = 785 (0x311), region = 69  ;;  %4080 = vmatprep.mubr.bf16.mxu0 (!%p1936_p10), %v5683_v48  ;;  %4129 = vmatprep.mubr.bf16.mxu1 (!%p1936_p10), %v5688_v49  ;;  %v5681_v15 = vld [vmem:[%s7335_s0] ss:$108 sps:$4 sm:$0xff] (!%p1936_p10)   ;;  %v5709_v17 = vld [vmem:[%s7335_s0 + $0xdc] ss:$108 sps:$4 sm:$0xff] (!%p1936_p10)   ;;  %s4919_s23 = sshll.u32 (!%p1936_p10), %s1942_s30, 4 }
 0x13b   : > { %s5609_s4 = smul.u32 (!%p1936_p10), 1728, %s1942_s30  ;;  %v5686_v19 = vld [vmem:[%s7335_s0 + $0x8] ss:$108 sps:$4 sm:$0xff] (!%p1936_p10)   ;;  %v5712_v26 = vld [vmem:[%s7335_s0 + $0xd8] ss:$108 sps:$4 sm:$0xff] (!%p1936_p10)   ;;  %s1972_s24 = scalar_lea.vmem (!%p1936_p10), [#allocation3], %s4919_s23 }
 0x13c   : > { %v5714_v45 = vld [vmem:[%s7335_s0 + $0xe4] ss:$108 sps:$4 sm:$0xff] (!%p1936_p10)   ;;  %v5717_v47 = vld [vmem:[%s7335_s0 + $0xe0] ss:$108 sps:$4 sm:$0xff] (!%p1936_p10)  }
 0x13d   : > { %s6933_s9 = scalar_lea.vmem (!%p1936_p10), [#allocation2], %s5609_s4 }
 0x13e   : > { %v5650_v50 = vld [vmem:[%s6933_s9 + $0x40] sm:$0xff] (!%p1936_p10)   ;;  %v5654_v54 = vld [vmem:[%s6933_s9 + $0x48] sm:$0xff] (!%p1936_p10)   ;;  %v5658_v58 = vld [vmem:[%s6933_s9 + $0x50] sm:$0xff] (!%p1936_p10)  }
 0x13f   : > { %v5651_v51 = vld [vmem:[%s6933_s9] sm:$0xff] (!%p1936_p10)   ;;  %5214 = vmatprep.subr.bf16.mxu0 (!%p1936_p10), %v5650_v50  ;;  %v5655_v55 = vld [vmem:[%s6933_s9 + $0x8] sm:$0xff] (!%p1936_p10)   ;;  %v5659_v59 = vld [vmem:[%s6933_s9 + $0x10] sm:$0xff] (!%p1936_p10)  }
 0x140   : > { %v5652_v52 = vld [vmem:[%s6933_s9 + $0xc0] sm:$0xff] (!%p1936_p10)   ;;  %5215 = vmatpush3.bf16.msra.mxu0 (!%p1936_p10), %v5651_v51  ;;  %v5656_v56 = vld [vmem:[%s6933_s9 + $0xc8] sm:$0xff] (!%p1936_p10)   ;;  %v5660_v60 = vld [vmem:[%s6933_s9 + $0xd0] sm:$0xff] (!%p1936_p10)  }
 0x141   : > { %v5653_v53 = vld [vmem:[%s6933_s9 + $0x80] sm:$0xff]   ;;  %5242 = vmatprep.subr.bf16.mxu1 %v5652_v52  ;;  %5216 = vmatprep.subr.bf16.mxu0 %v5654_v54  ;;  %v5657_v57 = vld [vmem:[%s6933_s9 + $0x88] sm:$0xff]   ;;  %v5661_v61 = vld [vmem:[%s6933_s9 + $0x90] sm:$0xff]   ;;  %s1981_s25 = scalar_select %p1980_p11, %s5976_s14, 1 }
 0x142   : > { %5243 = vmatpush3.bf16.msra.mxu1 %v5653_v53  ;;  %v5662_v62 = vld [vmem:[%s6933_s9 + $0x58] sm:$0xff]   ;;  %v5666_v2 = vld [vmem:[%s6933_s9 + $0x60] sm:$0xff]   ;;  %v5670_v6 = vld [vmem:[%s6933_s9 + $0x68] sm:$0xff]   ;;  %s5196_s12 = sshll.u32 (%p6041_p6), %s5976_s14, 2 }
 0x143   : > { %5244 = vmatprep.subr.bf16.mxu1 %v5656_v56  ;;  %v5663_v63 = vld [vmem:[%s6933_s9 + $0x18] sm:$0xff]   ;;  %v5667_v3 = vld [vmem:[%s6933_s9 + $0x20] sm:$0xff]   ;;  %v5671_v7 = vld [vmem:[%s6933_s9 + $0x28] sm:$0xff]   ;;  %s1982_s4 = scalar_lea.vmem %s7337_s2, %s1981_s25  ;;  %s4769_s26 = scalar_lea.vmem (%p6041_p6), %s7338_s3, %s5196_s12 }
 0x144   : > { %5217 = vmatpush3.bf16.msra.mxu0 %v5655_v55  ;;  %v5664_v0 = vld [vmem:[%s6933_s9 + $0xd8] sm:$0xff]   ;;  %v5668_v4 = vld [vmem:[%s6933_s9 + $0xe0] sm:$0xff]   ;;  %v5672_v8 = vld [vmem:[%s6933_s9 + $0xe8] sm:$0xff]  }
 0x145   : > { %5218 = vmatprep.subr.bf16.mxu0 %v5658_v58  ;;  %v5665_v1 = vld [vmem:[%s6933_s9 + $0x98] sm:$0xff]   ;;  %v5669_v5 = vld [vmem:[%s6933_s9 + $0xa0] sm:$0xff]   ;;  %v5673_v9 = vld [vmem:[%s6933_s9 + $0xa8] sm:$0xff]  }
 0x146   : > { %5245 = vmatpush3.bf16.msra.mxu1 %v5657_v57  ;;  %v5674_v10 = vld [vmem:[%s6933_s9 + $0x70] sm:$0xff]   ;;  %v5678_v14 = vld [vmem:[%s6933_s9 + $0x78] sm:$0xff]   ;;  %v5685_v21 = vld [vmem:[%s6933_s9 + $0x140] sm:$0xff]  }
 0x147   : > { %5246 = vmatprep.subr.bf16.mxu1 %v5660_v60  ;;  %v5675_v11 = vld [vmem:[%s6933_s9 + $0x30] sm:$0xff]   ;;  %v5679_v16 = vld [vmem:[%s6933_s9 + $0x38] sm:$0xff]   ;;  %v5689_v22 = vld [vmem:[%s6933_s9 + $0x100] sm:$0xff]  }
 0x148   : > { %5219 = vmatpush3.bf16.msra.mxu0 %v5659_v59  ;;  %v5676_v12 = vld [vmem:[%s6933_s9 + $0xf0] sm:$0xff]   ;;  %v5680_v18 = vld [vmem:[%s6933_s9 + $0xf8] sm:$0xff]   ;;  %v5690_v23 = vld [vmem:[%s6933_s9 + $0x1c0] sm:$0xff]  }
 0x149   : > { %5220 = vmatprep.subr.bf16.mxu0 %v5662_v62  ;;  %v5677_v13 = vld [vmem:[%s6933_s9 + $0xb0] sm:$0xff]   ;;  %v5684_v20 = vld [vmem:[%s6933_s9 + $0xb8] sm:$0xff]   ;;  %v5691_v24 = vld [vmem:[%s6933_s9 + $0x180] sm:$0xff]  }
 0x14a   : > { %5247 = vmatpush3.bf16.msra.mxu1 %v5661_v61  ;;  %v5692_v25 = vld [vmem:[%s6933_s9 + $0x148] sm:$0xff]   ;;  %v5696_v30 = vld [vmem:[%s6933_s9 + $0x150] sm:$0xff]   ;;  %v5700_v34 = vld [vmem:[%s6933_s9 + $0x158] sm:$0xff]  }
 0x14b   : > { %5248 = vmatprep.subr.bf16.mxu1 %v5664_v0  ;;  %v5693_v27 = vld [vmem:[%s6933_s9 + $0x108] sm:$0xff]   ;;  %v5697_v31 = vld [vmem:[%s6933_s9 + $0x110] sm:$0xff]   ;;  %v5701_v35 = vld [vmem:[%s6933_s9 + $0x118] sm:$0xff]  }
 0x14c   : > { %5221 = vmatpush3.bf16.msra.mxu0 %v5663_v63  ;;  %v5694_v28 = vld [vmem:[%s6933_s9 + $0x1c8] sm:$0xff]   ;;  %v5698_v32 = vld [vmem:[%s6933_s9 + $0x1d0] sm:$0xff]   ;;  %v5702_v36 = vld [vmem:[%s6933_s9 + $0x1d8] sm:$0xff]  }
 0x14d   : > { %5222 = vmatprep.subr.bf16.mxu0 %v5666_v2  ;;  %v5695_v29 = vld [vmem:[%s6933_s9 + $0x188] sm:$0xff]   ;;  %v5699_v33 = vld [vmem:[%s6933_s9 + $0x190] sm:$0xff]   ;;  %v5703_v37 = vld [vmem:[%s6933_s9 + $0x198] sm:$0xff]  }
 0x14e   : > { %5249 = vmatpush3.bf16.msra.mxu1 %v5665_v1  ;;  %v5704_v38 = vld [vmem:[%s6933_s9 + $0x160] sm:$0xff]   ;;  %v5708_v42 = vld [vmem:[%s6933_s9 + $0x168] sm:$0xff]   ;;  %v5718_v48 = vld [vmem:[%s6933_s9 + $0x170] sm:$0xff]  }
 0x14f   : > { %5250 = vmatprep.subr.bf16.mxu1 %v5668_v4  ;;  %v5705_v39 = vld [vmem:[%s6933_s9 + $0x120] sm:$0xff]   ;;  %v5711_v43 = vld [vmem:[%s6933_s9 + $0x128] sm:$0xff]   ;;  %v5719_v49 = vld [vmem:[%s6933_s9 + $0x130] sm:$0xff]  }
 0x150   : > { %5223 = vmatpush3.bf16.msra.mxu0 %v5667_v3  ;;  %v5706_v40 = vld [vmem:[%s6933_s9 + $0x1e0] sm:$0xff]   ;;  %v5713_v44 = vld [vmem:[%s6933_s9 + $0x1e8] sm:$0xff]   ;;  %v5720_v50 = vld [vmem:[%s6933_s9 + $0x1f0] sm:$0xff]  }
 0x151   : > { %5224 = vmatprep.subr.bf16.mxu0 %v5670_v6  ;;  %v5707_v41 = vld [vmem:[%s6933_s9 + $0x1a0] sm:$0xff]   ;;  %v5716_v46 = vld [vmem:[%s6933_s9 + $0x1a8] sm:$0xff]   ;;  %v5721_v51 = vld [vmem:[%s6933_s9 + $0x1b0] sm:$0xff]  }
 0x152   : > { %5251 = vmatpush3.bf16.msra.mxu1 %v5669_v5  ;;  %v5722_v52 = vld [vmem:[%s6933_s9 + $0x178] sm:$0xff]   ;;  %v5727_v56 = vld [vmem:[%s7335_s0 + $0x14] ss:$108 sps:$4 sm:$0xff]   ;;  %v5736_v0 = vld [vmem:[%s6933_s9 + $0x248] sm:$0xff]  }
 0x153   : > { %5252 = vmatprep.subr.bf16.mxu1 %v5672_v8  ;;  %v5723_v53 = vld [vmem:[%s6933_s9 + $0x138] sm:$0xff]   ;;  %v5729_v58 = vld [vmem:[%s6933_s9 + $0x240] sm:$0xff]   ;;  %v5737_v1 = vld [vmem:[%s6933_s9 + $0x208] sm:$0xff]  }
 0x154   : > { %5225 = vmatpush3.bf16.msra.mxu0 %v5671_v7  ;;  %v5724_v54 = vld [vmem:[%s6933_s9 + $0x1f8] sm:$0xff]   ;;  %v5733_v61 = vld [vmem:[%s6933_s9 + $0x200] sm:$0xff]   ;;  %v5738_v2 = vld [vmem:[%s6933_s9 + $0x2c8] sm:$0xff]  }
 0x155   : > { %5226 = vmatprep.subr.bf16.mxu0 %v5674_v10  ;;  %v5725_v55 = vld [vmem:[%s7335_s0 + $0x10] ss:$108 sps:$4 sm:$0xff]   ;;  %v5730_v59 = vld [vmem:[%s7335_s0 + $0x18] ss:$108 sps:$4 sm:$0xff]   ;;  %v5741_v4 = vld [vmem:[%s6933_s9 + $0x288] sm:$0xff]  }
 0x156   : > { %5253 = vmatpush3.bf16.msra.mxu1 %v5673_v9  ;;  %v5728_v57 = vld [vmem:[%s6933_s9 + $0x1b8] sm:$0xff]   ;;  %v5734_v62 = vld [vmem:[%s6933_s9 + $0x2c0] sm:$0xff]   ;;  %v5742_v5 = vld [vmem:[%s7335_s0 + $0xe8] ss:$108 sps:$4 sm:$0xff]  }
 0x157   : > { %5254 = vmatprep.subr.bf16.mxu1 %v5676_v12  ;;  %v5732_v60 = vld [vmem:[%s7335_s0 + $0x1c] ss:$108 sps:$4 sm:$0xff]   ;;  %v5735_v63 = vld [vmem:[%s6933_s9 + $0x280] sm:$0xff]   ;;  %v5739_v3 = vld [vmem:[%s7335_s0 + $0xec] ss:$108 sps:$4 sm:$0xff]  }
 0x158   : > { %5227 = vmatpush3.bf16.msra.mxu0 %v5675_v11  ;;  %v5743_v6 = vld [vmem:[%s6933_s9 + $0x250] sm:$0xff]   ;;  %v5750_v12 = vld [vmem:[%s6933_s9 + $0x258] sm:$0xff]  }
 0x159   : > { %5228 = vmatprep.subr.bf16.mxu0 %v5678_v14  ;;  %v5744_v7 = vld [vmem:[%s7335_s0 + $0xf4] ss:$108 sps:$4 sm:$0xff]   ;;  %v5747_v9 = vld [vmem:[%s7335_s0 + $0xf0] ss:$108 sps:$4 sm:$0xff]  }
 0x15a   : > { %5255 = vmatpush3.bf16.msra.mxu1 %v5677_v13  ;;  %v5746_v8 = vld [vmem:[%s6933_s9 + $0x210] sm:$0xff]   ;;  %v5751_v13 = vld [vmem:[%s6933_s9 + $0x218] sm:$0xff]  }
 0x15b   : > { %5256 = vmatprep.subr.bf16.mxu1 %v5680_v18  ;;  %v5748_v10 = vld [vmem:[%s6933_s9 + $0x2d0] sm:$0xff]   ;;  %v5752_v14 = vld [vmem:[%s6933_s9 + $0x2d8] sm:$0xff]   ;;  %v5756_v18 = vld [vmem:[%s6933_s9 + $0x2e0] sm:$0xff]  }
 0x15c   : > { %5229 = vmatpush3.bf16.msra.mxu0 %v5679_v16  ;;  %v5749_v11 = vld [vmem:[%s6933_s9 + $0x290] sm:$0xff]   ;;  %v5754_v16 = vld [vmem:[%s6933_s9 + $0x260] sm:$0xff]  }
 0x15d   : > { %5270 = vmatprep.subr.bf16.mxu0 %v5685_v21  ;;  %v5759_v21 = vld [vmem:[%s6933_s9 + $0x228] sm:$0xff]  }
 0x15e   : > { %5257 = vmatpush3.bf16.msra.mxu1 %v5684_v20  ;;  %v5758_v20 = vld [vmem:[%s6933_s9 + $0x268] sm:$0xff]  }
 0x15f   : > { %4081 = vmatmul.mubr.bf16.vlgmr.msra.gmra.mrb[0].mxu0 %v5681_v15  ;;  %5298 = vmatprep.subr.bf16.mxu1 %v5690_v23  ;;  %v5753_v15 = vld [vmem:[%s6933_s9 + $0x298] sm:$0xff]   ;;  %v5761_v23 = vld [vmem:[%s6933_s9 + $0x2a8] sm:$0xff]  }
 0x160   : > { %5271 = vmatpush3.bf16.msra.mxu0 %v5689_v22  ;;  %4088 = vmatprep.mubr.bf16.mxu0 %v5709_v17  ;;  %v5755_v17 = vld [vmem:[%s6933_s9 + $0x220] sm:$0xff]   ;;  %v5760_v22 = vld [vmem:[%s6933_s9 + $0x2e8] sm:$0xff]  }
 0x161   : > { %4130 = vmatmul.mubr.bf16.vlgmr.msra.gmra.mrb[0].mxu1 %v5686_v19  ;;  %5272 = vmatprep.subr.bf16.mxu0 %v5692_v25  ;;  %v5757_v19 = vld [vmem:[%s6933_s9 + $0x2a0] sm:$0xff]   ;;  %v5763_v25 = vld [vmem:[%s6933_s9 + $0x230] sm:$0xff]  }
 0x162   : > { %5299 = vmatpush3.bf16.msra.mxu1 %v5691_v24  ;;  %4137 = vmatprep.mubr.bf16.mxu1 %v5714_v45  ;;  %v5762_v24 = vld [vmem:[%s6933_s9 + $0x270] sm:$0xff]   ;;  %v5786_v45 = vld [vmem:[%s7335_s0 + $0xf8] ss:$108 sps:$4 sm:$0xff]  }
 0x163   : > { %5300 = vmatprep.subr.bf16.mxu1 %v5694_v28  ;;  %v5766_v28 = vld [vmem:[%s6933_s9 + $0x278] sm:$0xff]  }
 0x164   : > { %5273 = vmatpush3.bf16.msra.mxu0 %v5693_v27  ;;  %v5765_v27 = vld [vmem:[%s6933_s9 + $0x2b0] sm:$0xff]  }
 0x165   : > { %5274 = vmatprep.subr.bf16.mxu0 %v5696_v30  ;;  %v5768_v30 = vld [vmem:[%s6933_s9 + $0x2f8] sm:$0xff]  }
 0x166   : > { %5301 = vmatpush3.bf16.msra.mxu1 %v5695_v29  ;;  %v5767_v29 = vld [vmem:[%s6933_s9 + $0x238] sm:$0xff]  }
 0x167   : > { %4089 = vmatmul.mubr.bf16.gmra.mrb[4].mxu0 %v5712_v26  ;;  %5302 = vmatprep.subr.bf16.mxu1 %v5698_v32  ;;  %v5764_v26 = vld [vmem:[%s6933_s9 + $0x2f0] sm:$0xff]  }
 0x168   : > { %5275 = vmatpush3.bf16.msra.mxu0 %v5697_v31  ;;  %4178 = vmatprep.mubr.bf16.mxu0 %v5727_v56  ;;  %v5769_v31 = vld [vmem:[%s7335_s0 + $0x20] ss:$108 sps:$4 sm:$0xff]   ;;  %v5771_v32 = vld [vmem:[%s7335_s0 + $0x24] ss:$108 sps:$4 sm:$0xff]  }
 0x169   : > { %5276 = vmatprep.subr.bf16.mxu0 %v5700_v34  ;;  %4138 = vmatmul.mubr.bf16.gmra.mrb[4].mxu1 %v5717_v47  ;;  %v5773_v34 = vld [vmem:[%s6933_s9 + $0x340] sm:$0xff]  }
 0x16a   : > { %5303 = vmatpush3.bf16.msra.mxu1 %v5699_v33  ;;  %4227 = vmatprep.mubr.bf16.mxu1 %v5732_v60  ;;  %v5772_v33 = vld [vmem:[%s6933_s9 + $0x2b8] sm:$0xff]   ;;  %v5788_v47 = vld [vmem:[%s7335_s0 + $0x104] ss:$108 sps:$4 sm:$0xff]   ;;  %v5802_v60 = vld [vmem:[%s6933_s9 + $0x368] sm:$0xff]  }
 0x16b   : > { %5304 = vmatprep.subr.bf16.mxu1 %v5702_v36  ;;  %v5776_v36 = vld [vmem:[%s7335_s0 + $0x2c] ss:$108 sps:$4 sm:$0xff]   ;;  %v5798_v56 = vld [vmem:[%s6933_s9 + $0x360] sm:$0xff]  }
 0x16c   : > { %5277 = vmatpush3.bf16.msra.mxu0 %v5701_v35  ;;  %v5774_v35 = vld [vmem:[%s7335_s0 + $0x28] ss:$108 sps:$4 sm:$0xff]  }
 0x16d   : > { %5278 = vmatprep.subr.bf16.mxu0 %v5704_v38  ;;  %v5778_v38 = vld [vmem:[%s6933_s9 + $0x3c0] sm:$0xff]  }
 0x16e   : > { %5305 = vmatpush3.bf16.msra.mxu1 %v5703_v37  ;;  %v5777_v37 = vld [vmem:[%s6933_s9 + $0x300] sm:$0xff]  }
 0x16f   : > { %5306 = vmatprep.subr.bf16.mxu1 %v5706_v40  ;;  %v5780_v40 = vld [vmem:[%s6933_s9 + $0x348] sm:$0xff]  }
 0x170   : > { %5279 = vmatpush3.bf16.msra.mxu0 %v5705_v39  ;;  %v5779_v39 = vld [vmem:[%s6933_s9 + $0x380] sm:$0xff]  }
 0x171   : > { %5280 = vmatprep.subr.bf16.mxu0 %v5708_v42  ;;  %v5782_v42 = vld [vmem:[%s6933_s9 + $0x3c8] sm:$0xff]  }
 0x172   : > { %5307 = vmatpush3.bf16.msra.mxu1 %v5707_v41  ;;  %v5781_v41 = vld [vmem:[%s6933_s9 + $0x308] sm:$0xff]  }
 0x173   : > { %5308 = vmatprep.subr.bf16.mxu1 %v5713_v44  ;;  %v5785_v44 = vld [vmem:[%s6933_s9 + $0x388] sm:$0xff]  }
 0x174   : > { %5281 = vmatpush3.bf16.msra.mxu0 %v5711_v43  ;;  %v5783_v43 = vld [vmem:[%s7335_s0 + $0xfc] ss:$108 sps:$4 sm:$0xff]  }
 0x175   : > { %5282 = vmatprep.subr.bf16.mxu0 %v5718_v48  ;;  %v5790_v48 = vld [vmem:[%s6933_s9 + $0x310] sm:$0xff]  }
 0x176   : > { %5309 = vmatpush3.bf16.msra.mxu1 %v5716_v46  ;;  %v5787_v46 = vld [vmem:[%s6933_s9 + $0x350] sm:$0xff]  }
 0x177   : > { %5310 = vmatprep.subr.bf16.mxu1 %v5720_v50  ;;  %v5792_v50 = vld [vmem:[%s6933_s9 + $0x3d0] sm:$0xff]  }
 0x178   : > { %5283 = vmatpush3.bf16.msra.mxu0 %v5719_v49  ;;  %v5791_v49 = vld [vmem:[%s7335_s0 + $0x100] ss:$108 sps:$4 sm:$0xff]  }
 0x179   : > { %5284 = vmatprep.subr.bf16.mxu0 %v5722_v52  ;;  %v5794_v52 = vld [vmem:[%s6933_s9 + $0x358] sm:$0xff]  }
 0x17a   : > { %5311 = vmatpush3.bf16.msra.mxu1 %v5721_v51  ;;  %v5793_v51 = vld [vmem:[%s6933_s9 + $0x390] sm:$0xff]  }
 0x17b   : > { %5312 = vmatprep.subr.bf16.mxu1 %v5724_v54  ;;  %v5796_v54 = vld [vmem:[%s6933_s9 + $0x3d8] sm:$0xff]  }
 0x17c   : > { %5285 = vmatpush3.bf16.msra.mxu0 %v5723_v53  ;;  %v5795_v53 = vld [vmem:[%s6933_s9 + $0x318] sm:$0xff]  }
 0x17d   : > { %5326 = vmatprep.subr.bf16.mxu0 %v5729_v58  ;;  %v5800_v58 = vld [vmem:[%s6933_s9 + $0x3e0] sm:$0xff]  }
 0x17e   : > { %5313 = vmatpush3.bf16.msra.mxu1 %v5728_v57  ;;  %v5799_v57 = vld [vmem:[%s6933_s9 + $0x320] sm:$0xff]  }
 0x17f   : > { %4179 = vmatmul.mubr.bf16.vlgmr.msra.gmra.mrb[8].mxu0 %v5725_v55  ;;  %5354 = vmatprep.subr.bf16.mxu1 %v5734_v62  ;;  %v5797_v55 = vld [vmem:[%s6933_s9 + $0x398] sm:$0xff]   ;;  %v5804_v62 = vld [vmem:[%s6933_s9 + $0x3e8] sm:$0xff]  }
 0x180   : > { %5327 = vmatpush3.bf16.msra.mxu0 %v5733_v61  ;;  %4186 = vmatprep.mubr.bf16.mxu0 %v5739_v3  ;;  %v5803_v61 = vld [vmem:[%s6933_s9 + $0x328] sm:$0xff]   ;;  %v5809_v3 = vld [vmem:[%s6933_s9 + $0x3b0] sm:$0xff]  }
 0x181   : > { %4228 = vmatmul.mubr.bf16.vlgmr.msra.gmra.mrb[8].mxu1 %v5730_v59  ;;  %5328 = vmatprep.subr.bf16.mxu0 %v5736_v0  ;;  %v5801_v59 = vld [vmem:[%s6933_s9 + $0x3a0] sm:$0xff]   ;;  %v5806_v0 = vld [vmem:[%s6933_s9 + $0x370] sm:$0xff]  }
 0x182   : > { %5355 = vmatpush3.bf16.msra.mxu1 %v5735_v63  ;;  %4235 = vmatprep.mubr.bf16.mxu1 %v5744_v7  ;;  %v5805_v63 = vld [vmem:[%s6933_s9 + $0x3a8] sm:$0xff]   ;;  %v5813_v7 = vld [vmem:[%s7335_s0 + $0x30] ss:$108 sps:$4 sm:$0xff]  }
 0x183   : > { %5356 = vmatprep.subr.bf16.mxu1 %v5738_v2  ;;  %v5808_v2 = vld [vmem:[%s6933_s9 + $0x3f0] sm:$0xff]  }
 0x184   : > { %5329 = vmatpush3.bf16.msra.mxu0 %v5737_v1  ;;  %v5807_v1 = vld [vmem:[%s6933_s9 + $0x330] sm:$0xff]  }
 0x185   : > { %5330 = vmatprep.subr.bf16.mxu0 %v5743_v6  ;;  %v5812_v6 = vld [vmem:[%s6933_s9 + $0x3f8] sm:$0xff]  }
 0x186   : > { %5357 = vmatpush3.bf16.msra.mxu1 %v5741_v4  ;;  %v5810_v4 = vld [vmem:[%s6933_s9 + $0x378] sm:$0xff]  }
 0x187   : > { %4187 = vmatmul.mubr.bf16.gmra.mrb[12].mxu0 %v5742_v5  ;;  %5358 = vmatprep.subr.bf16.mxu1 %v5748_v10  ;;  %v5811_v5 = vld [vmem:[%s6933_s9 + $0x338] sm:$0xff]   ;;  %v5817_v10 = vld [vmem:[%s6933_s9 + $0x440] sm:$0xff]  }
 0x188   : > { %5331 = vmatpush3.bf16.msra.mxu0 %v5746_v8  ;;  %4276 = vmatprep.mubr.bf16.mxu0 %v5771_v32  ;;  %v5815_v8 = vld [vmem:[%s7335_s0 + $0x34] ss:$108 sps:$4 sm:$0xff]  }
 0x189   : > { %4236 = vmatmul.mubr.bf16.gmra.mrb[12].mxu1 %v5747_v9  ;;  %5332 = vmatprep.subr.bf16.mxu0 %v5750_v12  ;;  %v5816_v9 = vld [vmem:[%s6933_s9 + $0x3b8] sm:$0xff]   ;;  %v5842_v32 = vld [vmem:[%s6933_s9 + $0x460] sm:$0xff]  }
 0x18a   : > { %5359 = vmatpush3.bf16.msra.mxu1 %v5749_v11  ;;  %4325 = vmatprep.mubr.bf16.mxu1 %v5776_v36  ;;  %v5818_v11 = vld [vmem:[%s7335_s0 + $0x38] ss:$108 sps:$4 sm:$0xff]   ;;  %v5820_v12 = vld [vmem:[%s7335_s0 + $0x3c] ss:$108 sps:$4 sm:$0xff]  }
 0x18b   : > { %5360 = vmatprep.subr.bf16.mxu1 %v5752_v14  ;;  %v5822_v14 = vld [vmem:[%s6933_s9 + $0x4c0] sm:$0xff]   ;;  %v5846_v36 = vld [vmem:[%s6933_s9 + $0x468] sm:$0xff]  }
 0x18c   : > { %5333 = vmatpush3.bf16.msra.mxu0 %v5751_v13  ;;  %v5821_v13 = vld [vmem:[%s6933_s9 + $0x400] sm:$0xff]  }
 0x18d   : > { %5334 = vmatprep.subr.bf16.mxu0 %v5754_v16  ;;  %v5824_v16 = vld [vmem:[%s6933_s9 + $0x448] sm:$0xff]  }
 0x18e   : > { %5361 = vmatpush3.bf16.msra.mxu1 %v5753_v15  ;;  %v5823_v15 = vld [vmem:[%s6933_s9 + $0x480] sm:$0xff]  }
 0x18f   : > { %5362 = vmatprep.subr.bf16.mxu1 %v5756_v18  ;;  %v5826_v18 = vld [vmem:[%s6933_s9 + $0x4c8] sm:$0xff]  }
 0x190   : > { %5335 = vmatpush3.bf16.msra.mxu0 %v5755_v17  ;;  %v5825_v17 = vld [vmem:[%s6933_s9 + $0x408] sm:$0xff]  }
 0x191   : > { %5336 = vmatprep.subr.bf16.mxu0 %v5758_v20  ;;  %v5829_v20 = vld [vmem:[%s6933_s9 + $0x488] sm:$0xff]  }
 0x192   : > { %5363 = vmatpush3.bf16.msra.mxu1 %v5757_v19  ;;  %v5827_v19 = vld [vmem:[%s7335_s0 + $0x10c] ss:$108 sps:$4 sm:$0xff]  }
 0x193   : > { %5364 = vmatprep.subr.bf16.mxu1 %v5760_v22  ;;  %v5831_v22 = vld [vmem:[%s6933_s9 + $0x450] sm:$0xff]  }
 0x194   : > { %5337 = vmatpush3.bf16.msra.mxu0 %v5759_v21  ;;  %v5830_v21 = vld [vmem:[%s7335_s0 + $0x108] ss:$108 sps:$4 sm:$0xff]  }
 0x195   : > { %5338 = vmatprep.subr.bf16.mxu0 %v5762_v24  ;;  %v5834_v24 = vld [vmem:[%s6933_s9 + $0x410] sm:$0xff]  }
 0x196   : > { %5365 = vmatpush3.bf16.msra.mxu1 %v5761_v23  ;;  %v5832_v23 = vld [vmem:[%s7335_s0 + $0x114] ss:$108 sps:$4 sm:$0xff]  }
 0x197   : > { %5366 = vmatprep.subr.bf16.mxu1 %v5764_v26  ;;  %v5836_v26 = vld [vmem:[%s6933_s9 + $0x4d0] sm:$0xff]  }
 0x198   : > { %5339 = vmatpush3.bf16.msra.mxu0 %v5763_v25  ;;  %v5835_v25 = vld [vmem:[%s7335_s0 + $0x110] ss:$108 sps:$4 sm:$0xff]  }
 0x199   : > { %5340 = vmatprep.subr.bf16.mxu0 %v5766_v28  ;;  %v5838_v28 = vld [vmem:[%s6933_s9 + $0x458] sm:$0xff]  }
 0x19a   : > { %5367 = vmatpush3.bf16.msra.mxu1 %v5765_v27  ;;  %v5837_v27 = vld [vmem:[%s6933_s9 + $0x490] sm:$0xff]  }
 0x19b   : > { %5368 = vmatprep.subr.bf16.mxu1 %v5768_v30  ;;  %v5840_v30 = vld [vmem:[%s6933_s9 + $0x4d8] sm:$0xff]  }
 0x19c   : > { %5341 = vmatpush3.bf16.msra.mxu0 %v5767_v29  ;;  %v5839_v29 = vld [vmem:[%s6933_s9 + $0x418] sm:$0xff]  }
 0x19d   : > { %5382 = vmatprep.subr.bf16.mxu0 %v5773_v34  ;;  %v5844_v34 = vld [vmem:[%s6933_s9 + $0x4e0] sm:$0xff]  }
 0x19e   : > { %5369 = vmatpush3.bf16.msra.mxu1 %v5772_v33  ;;  %v5843_v33 = vld [vmem:[%s6933_s9 + $0x420] sm:$0xff]  }
 0x19f   : > { %4277 = vmatmul.mubr.bf16.vlgmr.msra.gmra.mrb[16].mxu0 %v5769_v31  ;;  %5410 = vmatprep.subr.bf16.mxu1 %v5778_v38  ;;  %v5841_v31 = vld [vmem:[%s6933_s9 + $0x498] sm:$0xff]   ;;  %v5848_v38 = vld [vmem:[%s6933_s9 + $0x4e8] sm:$0xff]  }
 0x1a0   : > { %5383 = vmatpush3.bf16.msra.mxu0 %v5777_v37  ;;  %4284 = vmatprep.mubr.bf16.mxu0 %v5783_v43  ;;  %v5847_v37 = vld [vmem:[%s6933_s9 + $0x428] sm:$0xff]   ;;  %v5853_v43 = vld [vmem:[%s6933_s9 + $0x4b0] sm:$0xff]  }
 0x1a1   : > { %4326 = vmatmul.mubr.bf16.vlgmr.msra.gmra.mrb[16].mxu1 %v5774_v35  ;;  %5384 = vmatprep.subr.bf16.mxu0 %v5780_v40  ;;  %v5845_v35 = vld [vmem:[%s6933_s9 + $0x4a0] sm:$0xff]   ;;  %v5850_v40 = vld [vmem:[%s6933_s9 + $0x470] sm:$0xff]  }
 0x1a2   : > { %5411 = vmatpush3.bf16.msra.mxu1 %v5779_v39  ;;  %4333 = vmatprep.mubr.bf16.mxu1 %v5788_v47  ;;  %v5849_v39 = vld [vmem:[%s6933_s9 + $0x4a8] sm:$0xff]  }
 0x1a3   : > { %5412 = vmatprep.subr.bf16.mxu1 %v5782_v42  ;;  %v5852_v42 = vld [vmem:[%s6933_s9 + $0x4f0] sm:$0xff]   ;;  %v5857_v47 = vld [vmem:[%s7335_s0 + $0x40] ss:$108 sps:$4 sm:$0xff]  }
 0x1a4   : > { %5385 = vmatpush3.bf16.msra.mxu0 %v5781_v41  ;;  %v5851_v41 = vld [vmem:[%s6933_s9 + $0x430] sm:$0xff]  }
 0x1a5   : > { %5386 = vmatprep.subr.bf16.mxu0 %v5787_v46  ;;  %v5856_v46 = vld [vmem:[%s6933_s9 + $0x4f8] sm:$0xff]  }
 0x1a6   : > { %5413 = vmatpush3.bf16.msra.mxu1 %v5785_v44  ;;  %v5854_v44 = vld [vmem:[%s6933_s9 + $0x478] sm:$0xff]  }
 0x1a7   : > { %4285 = vmatmul.mubr.bf16.gmra.mrb[20].mxu0 %v5786_v45  ;;  %5414 = vmatprep.subr.bf16.mxu1 %v5792_v50  ;;  %v5855_v45 = vld [vmem:[%s6933_s9 + $0x438] sm:$0xff]   ;;  %v5861_v50 = vld [vmem:[%s6933_s9 + $0x540] sm:$0xff]  }
 0x1a8   : > { %5387 = vmatpush3.bf16.msra.mxu0 %v5790_v48  ;;  %4374 = vmatprep.mubr.bf16.mxu0 %v5815_v8  ;;  %v5859_v48 = vld [vmem:[%s7335_s0 + $0x44] ss:$108 sps:$4 sm:$0xff]  }
 0x1a9   : > { %4334 = vmatmul.mubr.bf16.gmra.mrb[20].mxu1 %v5791_v49  ;;  %5388 = vmatprep.subr.bf16.mxu0 %v5794_v52  ;;  %v5860_v49 = vld [vmem:[%s6933_s9 + $0x4b8] sm:$0xff]   ;;  %v5886_v8 = vld [vmem:[%s6933_s9 + $0x560] sm:$0xff]  }
 0x1aa   : > { %5415 = vmatpush3.bf16.msra.mxu1 %v5793_v51  ;;  %4423 = vmatprep.mubr.bf16.mxu1 %v5820_v12  ;;  %v5862_v51 = vld [vmem:[%s7335_s0 + $0x48] ss:$108 sps:$4 sm:$0xff]   ;;  %v5864_v52 = vld [vmem:[%s7335_s0 + $0x4c] ss:$108 sps:$4 sm:$0xff]  }
 0x1ab   : > { %5416 = vmatprep.subr.bf16.mxu1 %v5796_v54  ;;  %v5866_v54 = vld [vmem:[%s6933_s9 + $0x5c0] sm:$0xff]   ;;  %v5890_v12 = vld [vmem:[%s6933_s9 + $0x568] sm:$0xff]  }
 0x1ac   : > { %5389 = vmatpush3.bf16.msra.mxu0 %v5795_v53  ;;  %v5865_v53 = vld [vmem:[%s6933_s9 + $0x500] sm:$0xff]  }
 0x1ad   : > { %5390 = vmatprep.subr.bf16.mxu0 %v5798_v56  ;;  %v5868_v56 = vld [vmem:[%s6933_s9 + $0x548] sm:$0xff]  }
 0x1ae   : > { %5417 = vmatpush3.bf16.msra.mxu1 %v5797_v55  ;;  %v5867_v55 = vld [vmem:[%s6933_s9 + $0x580] sm:$0xff]  }
 0x1af   : > { %5418 = vmatprep.subr.bf16.mxu1 %v5800_v58  ;;  %v5870_v58 = vld [vmem:[%s6933_s9 + $0x5c8] sm:$0xff]  }
 0x1b0   : > { %5391 = vmatpush3.bf16.msra.mxu0 %v5799_v57  ;;  %v5869_v57 = vld [vmem:[%s6933_s9 + $0x508] sm:$0xff]  }
 0x1b1   : > { %5392 = vmatprep.subr.bf16.mxu0 %v5802_v60  ;;  %v5873_v60 = vld [vmem:[%s6933_s9 + $0x588] sm:$0xff]  }
 0x1b2   : > { %5419 = vmatpush3.bf16.msra.mxu1 %v5801_v59  ;;  %v5871_v59 = vld [vmem:[%s7335_s0 + $0x11c] ss:$108 sps:$4 sm:$0xff]  }
 0x1b3   : > { %5420 = vmatprep.subr.bf16.mxu1 %v5804_v62  ;;  %v5875_v62 = vld [vmem:[%s6933_s9 + $0x550] sm:$0xff]  }
 0x1b4   : > { %5393 = vmatpush3.bf16.msra.mxu0 %v5803_v61  ;;  %v5874_v61 = vld [vmem:[%s7335_s0 + $0x118] ss:$108 sps:$4 sm:$0xff]  }
 0x1b5   : > { %5394 = vmatprep.subr.bf16.mxu0 %v5806_v0  ;;  %v5878_v0 = vld [vmem:[%s6933_s9 + $0x510] sm:$0xff]  }
 0x1b6   : > { %5421 = vmatpush3.bf16.msra.mxu1 %v5805_v63  ;;  %v5876_v63 = vld [vmem:[%s7335_s0 + $0x124] ss:$108 sps:$4 sm:$0xff]  }
 0x1b7   : > { %5422 = vmatprep.subr.bf16.mxu1 %v5808_v2  ;;  %v5880_v2 = vld [vmem:[%s6933_s9 + $0x5d0] sm:$0xff]  }
 0x1b8   : > { %5395 = vmatpush3.bf16.msra.mxu0 %v5807_v1  ;;  %v5879_v1 = vld [vmem:[%s7335_s0 + $0x120] ss:$108 sps:$4 sm:$0xff]  }
 0x1b9   : > { %5396 = vmatprep.subr.bf16.mxu0 %v5810_v4  ;;  %v5882_v4 = vld [vmem:[%s6933_s9 + $0x558] sm:$0xff]  }
 0x1ba   : > { %5423 = vmatpush3.bf16.msra.mxu1 %v5809_v3  ;;  %v5881_v3 = vld [vmem:[%s6933_s9 + $0x590] sm:$0xff]  }
 0x1bb   : > { %5424 = vmatprep.subr.bf16.mxu1 %v5812_v6  ;;  %v5884_v6 = vld [vmem:[%s6933_s9 + $0x5d8] sm:$0xff]  }
 0x1bc   : > { %5397 = vmatpush3.bf16.msra.mxu0 %v5811_v5  ;;  %v5883_v5 = vld [vmem:[%s6933_s9 + $0x518] sm:$0xff]  }
 0x1bd   : > { %5438 = vmatprep.subr.bf16.mxu0 %v5817_v10  ;;  %v5888_v10 = vld [vmem:[%s6933_s9 + $0x5e0] sm:$0xff]  }
 0x1be   : > { %5425 = vmatpush3.bf16.msra.mxu1 %v5816_v9  ;;  %v5887_v9 = vld [vmem:[%s6933_s9 + $0x520] sm:$0xff]  }
 0x1bf   : > { %4375 = vmatmul.mubr.bf16.vlgmr.msra.gmra.mrb[24].mxu0 %v5813_v7  ;;  %5466 = vmatprep.subr.bf16.mxu1 %v5822_v14  ;;  %v5885_v7 = vld [vmem:[%s6933_s9 + $0x598] sm:$0xff]   ;;  %v5892_v14 = vld [vmem:[%s6933_s9 + $0x5e8] sm:$0xff]  }
 0x1c0   : > { %5439 = vmatpush3.bf16.msra.mxu0 %v5821_v13  ;;  %4382 = vmatprep.mubr.bf16.mxu0 %v5827_v19  ;;  %v5891_v13 = vld [vmem:[%s6933_s9 + $0x528] sm:$0xff]   ;;  %v5897_v19 = vld [vmem:[%s6933_s9 + $0x5b0] sm:$0xff]  }
 0x1c1   : > { %4424 = vmatmul.mubr.bf16.vlgmr.msra.gmra.mrb[24].mxu1 %v5818_v11  ;;  %5440 = vmatprep.subr.bf16.mxu0 %v5824_v16  ;;  %v5889_v11 = vld [vmem:[%s6933_s9 + $0x5a0] sm:$0xff]   ;;  %v5894_v16 = vld [vmem:[%s6933_s9 + $0x570] sm:$0xff]  }
 0x1c2   : > { %5467 = vmatpush3.bf16.msra.mxu1 %v5823_v15  ;;  %4431 = vmatprep.mubr.bf16.mxu1 %v5832_v23  ;;  %v5893_v15 = vld [vmem:[%s6933_s9 + $0x5a8] sm:$0xff]   ;;  %v5901_v23 = vld [vmem:[%s7335_s0 + $0x50] ss:$108 sps:$4 sm:$0xff]  }
 0x1c3   : > { %5468 = vmatprep.subr.bf16.mxu1 %v5826_v18  ;;  %v5896_v18 = vld [vmem:[%s6933_s9 + $0x5f0] sm:$0xff]  }
 0x1c4   : > { %5441 = vmatpush3.bf16.msra.mxu0 %v5825_v17  ;;  %v5895_v17 = vld [vmem:[%s6933_s9 + $0x530] sm:$0xff]  }
 0x1c5   : > { %5442 = vmatprep.subr.bf16.mxu0 %v5831_v22  ;;  %v5900_v22 = vld [vmem:[%s6933_s9 + $0x5f8] sm:$0xff]  }
 0x1c6   : > { %5469 = vmatpush3.bf16.msra.mxu1 %v5829_v20  ;;  %v5898_v20 = vld [vmem:[%s6933_s9 + $0x578] sm:$0xff]  }
 0x1c7   : > { %4383 = vmatmul.mubr.bf16.gmra.mrb[28].mxu0 %v5830_v21  ;;  %5470 = vmatprep.subr.bf16.mxu1 %v5836_v26  ;;  %v5899_v21 = vld [vmem:[%s6933_s9 + $0x538] sm:$0xff]   ;;  %v5905_v26 = vld [vmem:[%s6933_s9 + $0x640] sm:$0xff]  }
 0x1c8   : > { %5443 = vmatpush3.bf16.msra.mxu0 %v5834_v24  ;;  %4472 = vmatprep.mubr.bf16.mxu0 %v5859_v48  ;;  %v5903_v24 = vld [vmem:[%s7335_s0 + $0x54] ss:$108 sps:$4 sm:$0xff]   ;;  %v5930_v48 = vld [vmem:[%s6933_s9 + $0x628] sm:$0xff]  }
 0x1c9   : > { %4432 = vmatmul.mubr.bf16.gmra.mrb[28].mxu1 %v5835_v25  ;;  %5444 = vmatprep.subr.bf16.mxu0 %v5838_v28  ;;  %v5904_v25 = vld [vmem:[%s6933_s9 + $0x5b8] sm:$0xff]  }
 0x1ca   : > { %5471 = vmatpush3.bf16.msra.mxu1 %v5837_v27  ;;  %4521 = vmatprep.mubr.bf16.mxu1 %v5864_v52  ;;  %v5906_v27 = vld [vmem:[%s7335_s0 + $0x58] ss:$108 sps:$4 sm:$0xff]   ;;  %v5908_v28 = vld [vmem:[%s7335_s0 + $0x5c] ss:$108 sps:$4 sm:$0xff]   ;;  %v5935_v52 = vld [vmem:[%s6933_s9 + $0x6b0] sm:$0xff]  }
 0x1cb   : > { %5472 = vmatprep.subr.bf16.mxu1 %v5840_v30  ;;  %v5910_v30 = vld [vmem:[%s6933_s9 + $0x648] sm:$0xff]  }
 0x1cc   : > { %5445 = vmatpush3.bf16.msra.mxu0 %v5839_v29  ;;  %v5909_v29 = vld [vmem:[%s6933_s9 + $0x600] sm:$0xff]  }
 0x1cd   : > { %5446 = vmatprep.subr.bf16.mxu0 %v5842_v32  ;;  %v5912_v32 = vld [vmem:[%s6933_s9 + $0x608] sm:$0xff]  }
 0x1ce   : > { %5473 = vmatpush3.bf16.msra.mxu1 %v5841_v31  ;;  %v5911_v31 = vld [vmem:[%s6933_s9 + $0x680] sm:$0xff]  }
 0x1cf   : > { %5474 = vmatprep.subr.bf16.mxu1 %v5844_v34  ;;  %v5915_v34 = vld [vmem:[%s7335_s0 + $0x128] ss:$108 sps:$4 sm:$0xff]  }
 0x1d0   : > { %5447 = vmatpush3.bf16.msra.mxu0 %v5843_v33  ;;  %v5913_v33 = vld [vmem:[%s7335_s0 + $0x12c] ss:$108 sps:$4 sm:$0xff]  }
 0x1d1   : > { %5448 = vmatprep.subr.bf16.mxu0 %v5846_v36  ;;  %v5917_v36 = vld [vmem:[%s6933_s9 + $0x688] sm:$0xff]  }
 0x1d2   : > { %5475 = vmatpush3.bf16.msra.mxu1 %v5845_v35  ;;  %v5916_v35 = vld [vmem:[%s6933_s9 + $0x650] sm:$0xff]  }
 0x1d3   : > { %5476 = vmatprep.subr.bf16.mxu1 %v5848_v38  ;;  %v5920_v38 = vld [vmem:[%s6933_s9 + $0x610] sm:$0xff]  }
 0x1d4   : > { %5449 = vmatpush3.bf16.msra.mxu0 %v5847_v37  ;;  %v5918_v37 = vld [vmem:[%s7335_s0 + $0x134] ss:$108 sps:$4 sm:$0xff]  }
 0x1d5   : > { %5450 = vmatprep.subr.bf16.mxu0 %v5850_v40  ;;  %v5922_v40 = vld [vmem:[%s6933_s9 + $0x658] sm:$0xff]  }
 0x1d6   : > { %5477 = vmatpush3.bf16.msra.mxu1 %v5849_v39  ;;  %v5921_v39 = vld [vmem:[%s7335_s0 + $0x130] ss:$108 sps:$4 sm:$0xff]  }
 0x1d7   : > { %5478 = vmatprep.subr.bf16.mxu1 %v5852_v42  ;;  %v5924_v42 = vld [vmem:[%s6933_s9 + $0x618] sm:$0xff]  }
 0x1d8   : > { %5451 = vmatpush3.bf16.msra.mxu0 %v5851_v41  ;;  %v5923_v41 = vld [vmem:[%s6933_s9 + $0x690] sm:$0xff]  }
 0x1d9   : > { %5452 = vmatprep.subr.bf16.mxu0 %v5854_v44  ;;  %v5926_v44 = vld [vmem:[%s6933_s9 + $0x698] sm:$0xff]  }
 0x1da   : > { %5479 = vmatpush3.bf16.msra.mxu1 %v5853_v43  ;;  %v5925_v43 = vld [vmem:[%s6933_s9 + $0x660] sm:$0xff]  }
 0x1db   : > { %5480 = vmatprep.subr.bf16.mxu1 %v5856_v46  ;;  %v5928_v46 = vld [vmem:[%s6933_s9 + $0x668] sm:$0xff]  }
 0x1dc   : > { %5453 = vmatpush3.bf16.msra.mxu0 %v5855_v45  ;;  %v5927_v45 = vld [vmem:[%s6933_s9 + $0x620] sm:$0xff]  }
 0x1dd   : > { %5494 = vmatprep.subr.bf16.mxu0 %v5861_v50  ;;  %v5932_v50 = vld [vmem:[%s6933_s9 + $0x6a8] sm:$0xff]  }
 0x1de   : > { %5481 = vmatpush3.bf16.msra.mxu1 %v5860_v49  ;;  %v5931_v49 = vld [vmem:[%s6933_s9 + $0x670] sm:$0xff]  }
 0x1df   : > { %4473 = vmatmul.mubr.bf16.vlgmr.msra.gmra.mrb[32].mxu0 %v5857_v47  ;;  %5522 = vmatprep.subr.bf16.mxu1 %v5866_v54  ;;  %v5929_v47 = vld [vmem:[%s6933_s9 + $0x6a0] sm:$0xff]   ;;  %v5936_v54 = vld [vmem:[%s6933_s9 + $0x638] sm:$0xff]  }
 0x1e0   : > { %5495 = vmatpush3.bf16.msra.mxu0 %v5865_v53  ;;  %4480 = vmatprep.mubr.bf16.mxu0 %v5871_v59  ;;  %v5934_v53 = vld [vmem:[%s6933_s9 + $0x678] sm:$0xff]  }
 0x1e1   : > { %4522 = vmatmul.mubr.bf16.vlgmr.msra.gmra.mrb[32].mxu1 %v5862_v51  ;;  %5496 = vmatprep.subr.bf16.mxu0 %v5868_v56  ;;  %v5933_v51 = vld [vmem:[%s6933_s9 + $0x630] sm:$0xff]   ;;  %v5940_v56 = vld [vmem:[%s6933_s9 + $0x6b8] sm:$0xff]  }
 0x1e2   : > { %5523 = vmatpush3.bf16.msra.mxu1 %v5867_v55  ;;  %4529 = vmatprep.mubr.bf16.mxu1 %v5876_v63  ;;  %v5939_v55 = vld [vmem:[%s7335_s0 + $0x64] ss:$108 sps:$4 sm:$0xff]  }
 0x1e3   : > { %5524 = vmatprep.subr.bf16.mxu1 %v5870_v58  ;;  %v5941_v58 = vld [vmem:[%s7335_s0 + $0x68] ss:$108 sps:$4 sm:$0xff]  }
 0x1e4   : > { %5497 = vmatpush3.bf16.msra.mxu0 %v5869_v57 }
 0x1e5   : > { %5498 = vmatprep.subr.bf16.mxu0 %v5875_v62  ;;  %v4920_v62 = vld [vmem:[%s1982_s4] ss:$0 sm:$0xff] }
 0x1e6   : > { %5525 = vmatpush3.bf16.msra.mxu1 %v5873_v60 }
 0x1e7   : > { %4481 = vmatmul.mubr.bf16.gmra.mrb[36].mxu0 %v5874_v61  ;;  %5526 = vmatprep.subr.bf16.mxu1 %v5880_v2  ;;  %v5937_v61 = vld [vmem:[%s7335_s0 + $0x60] ss:$108 sps:$4 sm:$0xff]  }
 0x1e8   : > { %5499 = vmatpush3.bf16.msra.mxu0 %v5878_v0  ;;  %4570 = vmatprep.mubr.bf16.mxu0 %v5903_v24  ;;  %v5943_v0 = vld [vmem:[%s7335_s0 + $0x13c] ss:$108 sps:$4 sm:$0xff]  }
 0x1e9   : > { %4530 = vmatmul.mubr.bf16.gmra.mrb[36].mxu1 %v5879_v1  ;;  %5500 = vmatprep.subr.bf16.mxu0 %v5882_v4 }
 0x1ea   : > { %5527 = vmatpush3.bf16.msra.mxu1 %v5881_v3  ;;  %4619 = vmatprep.mubr.bf16.mxu1 %v5908_v28 }
 0x1eb   : > { %5528 = vmatprep.subr.bf16.mxu1 %v5884_v6 }
 0x1ec   : > { %5501 = vmatpush3.bf16.msra.mxu0 %v5883_v5 }
 0x1ed   : > { %5502 = vmatprep.subr.bf16.mxu0 %v5886_v8 }
 0x1ee   : > { %5529 = vmatpush3.bf16.msra.mxu1 %v5885_v7  ;;  %v5942_v7 = vld [vmem:[%s7335_s0 + $0x140] ss:$108 sps:$4 sm:$0xff]  }
 0x1ef   : > { %5530 = vmatprep.subr.bf16.mxu1 %v5888_v10 }
 0x1f0   : > { %5503 = vmatpush3.bf16.msra.mxu0 %v5887_v9 }
 0x1f1   : > { %5504 = vmatprep.subr.bf16.mxu0 %v5890_v12 }
 0x1f2   : > { %5531 = vmatpush3.bf16.msra.mxu1 %v5889_v11 }
 0x1f3   : > { %5532 = vmatprep.subr.bf16.mxu1 %v5892_v14 }
 0x1f4   : > { %5505 = vmatpush3.bf16.msra.mxu0 %v5891_v13 }
 0x1f5   : > { %5506 = vmatprep.subr.bf16.mxu0 %v5894_v16 }
 0x1f6   : > { %5533 = vmatpush3.bf16.msra.mxu1 %v5893_v15 }
 0x1f7   : > { %5534 = vmatprep.subr.bf16.mxu1 %v5896_v18  ;;  %v5945_v18 = vld [vmem:[%s7335_s0 + $0x138] ss:$108 sps:$4 sm:$0xff]  }
 0x1f8   : > { %5507 = vmatpush3.bf16.msra.mxu0 %v5895_v17 }
 0x1f9   : > { %5508 = vmatprep.subr.bf16.mxu0 %v5898_v20 }
 0x1fa   : > { %5535 = vmatpush3.bf16.msra.mxu1 %v5897_v19 }
 0x1fb   : > { %5536 = vmatprep.subr.bf16.mxu1 %v5900_v22 }
 0x1fc   : > { %5509 = vmatpush3.bf16.msra.mxu0 %v5899_v21 }
 0x1fd   : > { %5550 = vmatprep.subr.bf16.mxu0 %v5905_v26 }
 0x1fe   : > { %5537 = vmatpush3.bf16.msra.mxu1 %v5904_v25 }
 0x1ff   : > { %4571 = vmatmul.mubr.bf16.vlgmr.msra.gmra.mrb[40].mxu0 %v5901_v23  ;;  %5588 = vmatprep.subr.bf16.mxu1 %v5911_v31 }
 0x200   : > { %5551 = vmatpush3.bf16.msra.mxu0 %v5909_v29  ;;  %4578 = vmatprep.mubr.bf16.mxu0 %v5913_v33 }
 0x201   : > { %4620 = vmatmul.mubr.bf16.vlgmr.msra.gmra.mrb[40].mxu1 %v5906_v27  ;;  %5552 = vmatprep.subr.bf16.mxu0 %v5910_v30 }
 0x202   : > { %5589 = vmatpush3.bf16.msra.mxu1 %v5911_v31  ;;  %4627 = vmatprep.mubr.bf16.mxu1 %v5918_v37 }
 0x203   : > { %5590 = vmatprep.subr.bf16.mxu1 %v5917_v36 }
 0x204   : > { %5553 = vmatpush3.bf16.msra.mxu0 %v5912_v32 }
 0x205   : > { %5554 = vmatprep.subr.bf16.mxu0 %v5916_v35 }
 0x206   : > { %5591 = vmatpush3.bf16.msra.mxu1 %v5917_v36 }
 0x207   : > { %4579 = vmatmul.mubr.bf16.gmra.mrb[44].mxu0 %v5915_v34  ;;  %5592 = vmatprep.subr.bf16.mxu1 %v5923_v41 }
 0x208   : > { %5555 = vmatpush3.bf16.msra.mxu0 %v5920_v38  ;;  %4668 = vmatprep.mubr.bf16.mxu0 %v5939_v55 }
 0x209   : > { %4628 = vmatmul.mubr.bf16.gmra.mrb[44].mxu1 %v5921_v39  ;;  %5556 = vmatprep.subr.bf16.mxu0 %v5922_v40 }
 0x20a   : > { %5593 = vmatpush3.bf16.msra.mxu1 %v5923_v41  ;;  %5604 = vmatprep.mubr.bf16.mxu1 %v5941_v58 }
 0x20b   : > { %5594 = vmatprep.subr.bf16.mxu1 %v5926_v44 }
 0x20c   : > { %5557 = vmatpush3.bf16.msra.mxu0 %v5924_v42 }
 0x20d   : > { %5558 = vmatprep.subr.bf16.mxu0 %v5925_v43 }
 0x20e   : > { %5595 = vmatpush3.bf16.msra.mxu1 %v5926_v44 }
 0x20f   : > { %5596 = vmatprep.subr.bf16.mxu1 %v5929_v47 }
 0x210   : > { %5559 = vmatpush3.bf16.msra.mxu0 %v5927_v45 }
 0x211   : > { %5560 = vmatprep.subr.bf16.mxu0 %v5928_v46 }
 0x212   : > { %5597 = vmatpush3.bf16.msra.mxu1 %v5929_v47 }
 0x213   : > { %5598 = vmatprep.subr.bf16.mxu1 %v5932_v50 }
 0x214   : > { %5561 = vmatpush3.bf16.msra.mxu0 %v5930_v48 }
 0x215   : > { %5562 = vmatprep.subr.bf16.mxu0 %v5931_v49 }
 0x216   : > { %5599 = vmatpush3.bf16.msra.mxu1 %v5932_v50 }
 0x217   : > { %5600 = vmatprep.subr.bf16.mxu1 %v5935_v52 }
 0x218   : > { %5563 = vmatpush3.bf16.msra.mxu0 %v5933_v51 }
 0x219   : > { %5564 = vmatprep.subr.bf16.mxu0 %v5934_v53 }
 0x21a   : > { %5601 = vmatpush3.bf16.msra.mxu1 %v5935_v52 }
 0x21b   : > { %5602 = vmatprep.subr.bf16.mxu1 %v5940_v56 }
 0x21c   : > { %5565 = vmatpush3.bf16.msra.mxu0 %v5936_v54 }
 0x21e   : > { %5603 = vmatpush3.bf16.msra.mxu1 %v5940_v56 }
 0x21f   : > { %4669 = vmatmul.mubr.bf16.vlgmr.msra.gmra.mrb[48].mxu0 %v5937_v61 }
 0x220   : > { %4676 = vmatprep.mubr.bf16.mxu0 %v5943_v0 }
 0x221   : > { %5605 = vmatmul.mubr.bf16.vlgmr.msra.gmra.mrb[48].mxu1 %v5942_v7 }
 0x227   : > { %4677 = vmatmul.mubr.bf16.gmra.mrb[52].mxu0 %v5945_v18 }
 0x232   : > { %v5230_v57 = vpop.f32.mrb[0].mxu0 }
 0x233   : > { %v5231_v59 = vpop.f32.mrb[1].mxu0 }
 0x234   : > { %v5258_v60 = vpop.f32.mrb[0].mxu1  ;;  %v5232_v63 = vadd.f32 %v5231_v59, %v5230_v57  ;;  %v5233_v1 = vpop.f32.mrb[2].mxu0 }
 0x235   : > { %v5259_v2 = vpop.f32.mrb[1].mxu1  ;;  %v5234_v4 = vpop.f32.mrb[3].mxu0 }
 0x236   : > { %v4083_v3 = vadd.f32 %v5232_v63, %v4920_v62  ;;  %v5260_v5 = vadd.f32 %v5259_v2, %v5258_v60  ;;  %v5261_v6 = vpop.f32.mrb[2].mxu1  ;;  %v5235_v8 = vadd.f32 %v5234_v4, %v5233_v1 }
 0x237   : > { %v5262_v9 = vpop.f32.mrb[3].mxu1 }
 0x238   : > { %v4132_v10 = vadd.f32 %v5260_v5, %v4083_v3  ;;  %v5263_v11 = vadd.f32 %v5262_v9, %v5261_v6  ;;  %v4086_v12 = vadd.f32 %v5235_v8, %v4920_v62 }
 0x23a   : > { %v5236_v13 = vpop.f32.mrb[4].mxu0  ;;  %v4135_v15 = vadd.f32 %v5263_v11, %v4086_v12 }
 0x23b   : > { %v5237_v14 = vpop.f32.mrb[5].mxu0 }
 0x23c   : > { %v5238_v16 = vadd.f32 %v5237_v14, %v5236_v13  ;;  %v5239_v17 = vpop.f32.mrb[6].mxu0  ;;  %v5264_v22 = vpop.f32.mrb[4].mxu1 }
 0x23d   : > { %v5240_v19 = vpop.f32.mrb[7].mxu0  ;;  %v5265_v23 = vpop.f32.mrb[5].mxu1 }
 0x23e   : > { %v5241_v20 = vadd.f32 %v5240_v19, %v5239_v17  ;;  %v4091_v21 = vadd.f32 %v5238_v16, %v4920_v62  ;;  %v5266_v25 = vadd.f32 %v5265_v23, %v5264_v22  ;;  %v5267_v26 = vpop.f32.mrb[6].mxu1 }
 0x23f   : > { %v5268_v27 = vpop.f32.mrb[7].mxu1 }
 0x240   : > { %v4094_v24 = vadd.f32 %v5241_v20, %v4920_v62  ;;  %v4140_v28 = vadd.f32 %v5266_v25, %v4091_v21  ;;  %v5269_v29 = vadd.f32 %v5268_v27, %v5267_v26 }
 0x242   : > { %v4143_v30 = vadd.f32 %v5269_v29, %v4094_v24 }
 0x252   : > { %v5286_v31 = vpop.f32.mrb[8].mxu0 }
 0x253   : > { %v5287_v32 = vpop.f32.mrb[9].mxu0 }
 0x254   : > { %v5288_v33 = vadd.f32 %v5287_v32, %v5286_v31  ;;  %v5289_v34 = vpop.f32.mrb[10].mxu0  ;;  %v5314_v35 = vpop.f32.mrb[8].mxu1 }
 0x255   : > { %v5290_v36 = vpop.f32.mrb[11].mxu0  ;;  %v5315_v39 = vpop.f32.mrb[9].mxu1 }
 0x256   : > { %v4181_v37 = vadd.f32 %v5288_v33, %v4132_v10  ;;  %v5291_v38 = vadd.f32 %v5290_v36, %v5289_v34  ;;  %v5316_v40 = vadd.f32 %v5315_v39, %v5314_v35  ;;  %v5317_v41 = vpop.f32.mrb[10].mxu1 }
 0x257   : > { %v5318_v43 = vpop.f32.mrb[11].mxu1 }
 0x258   : > { %v4184_v42 = vadd.f32 %v5291_v38, %v4135_v15  ;;  %v4230_v44 = vadd.f32 %v5316_v40, %v4181_v37  ;;  %v5319_v45 = vadd.f32 %v5318_v43, %v5317_v41 }
 0x25a   : > { %v4233_v46 = vadd.f32 %v5319_v45, %v4184_v42  ;;  %v5292_v47 = vpop.f32.mrb[12].mxu0 }
 0x25b   : > { %v5293_v48 = vpop.f32.mrb[13].mxu0 }
 0x25c   : > { %v5294_v49 = vadd.f32 %v5293_v48, %v5292_v47  ;;  %v5295_v50 = vpop.f32.mrb[14].mxu0  ;;  %v5320_v51 = vpop.f32.mrb[12].mxu1 }
 0x25d   : > { %v5296_v52 = vpop.f32.mrb[15].mxu0  ;;  %v5321_v55 = vpop.f32.mrb[13].mxu1 }
 0x25e   : > { %v4189_v53 = vadd.f32 %v5294_v49, %v4140_v28  ;;  %v5297_v54 = vadd.f32 %v5296_v52, %v5295_v50  ;;  %v5322_v56 = vadd.f32 %v5321_v55, %v5320_v51  ;;  %v5323_v57 = vpop.f32.mrb[14].mxu1 }
 0x25f   : > { %v5324_v59 = vpop.f32.mrb[15].mxu1 }
 0x260   : > { %v4192_v58 = vadd.f32 %v5297_v54, %v4143_v30  ;;  %v4238_v60 = vadd.f32 %v5322_v56, %v4189_v53  ;;  %v5325_v61 = vadd.f32 %v5324_v59, %v5323_v57 }
 0x262   : > { %v4241_v62 = vadd.f32 %v5325_v61, %v4192_v58 }
 0x272   : > { %v5342_v63 = vpop.f32.mrb[16].mxu0 }
 0x273   : > { %v5343_v0 = vpop.f32.mrb[17].mxu0 }
 0x274   : > { %v5344_v1 = vadd.f32 %v5343_v0, %v5342_v63  ;;  %v5345_v2 = vpop.f32.mrb[18].mxu0  ;;  %v5370_v5 = vpop.f32.mrb[16].mxu1 }
 0x275   : > { %v5346_v3 = vpop.f32.mrb[19].mxu0  ;;  %v5371_v7 = vpop.f32.mrb[17].mxu1 }
 0x276   : > { %v4279_v4 = vadd.f32 %v5344_v1, %v4230_v44  ;;  %v5347_v6 = vadd.f32 %v5346_v3, %v5345_v2  ;;  %v5372_v9 = vadd.f32 %v5371_v7, %v5370_v5  ;;  %v5373_v10 = vpop.f32.mrb[18].mxu1 }
 0x277   : > { %v5374_v11 = vpop.f32.mrb[19].mxu1 }
 0x278   : > { %v4282_v8 = vadd.f32 %v5347_v6, %v4233_v46  ;;  %v4328_v12 = vadd.f32 %v5372_v9, %v4279_v4  ;;  %v5375_v13 = vadd.f32 %v5374_v11, %v5373_v10 }
 0x27a   : > { %v4331_v14 = vadd.f32 %v5375_v13, %v4282_v8  ;;  %v5348_v15 = vpop.f32.mrb[20].mxu0 }
 0x27b   : > { %v5349_v16 = vpop.f32.mrb[21].mxu0 }
 0x27c   : > { %v5350_v17 = vadd.f32 %v5349_v16, %v5348_v15  ;;  %v5351_v18 = vpop.f32.mrb[22].mxu0  ;;  %v5376_v19 = vpop.f32.mrb[20].mxu1 }
 0x27d   : > { %v5352_v20 = vpop.f32.mrb[23].mxu0  ;;  %v5377_v23 = vpop.f32.mrb[21].mxu1 }
 0x27e   : > { %v4287_v21 = vadd.f32 %v5350_v17, %v4238_v60  ;;  %v5353_v22 = vadd.f32 %v5352_v20, %v5351_v18  ;;  %v5378_v24 = vadd.f32 %v5377_v23, %v5376_v19  ;;  %v5379_v25 = vpop.f32.mrb[22].mxu1 }
 0x27f   : > { %v5380_v27 = vpop.f32.mrb[23].mxu1 }
 0x280   : > { %v4290_v26 = vadd.f32 %v5353_v22, %v4241_v62  ;;  %v4336_v28 = vadd.f32 %v5378_v24, %v4287_v21  ;;  %v5381_v29 = vadd.f32 %v5380_v27, %v5379_v25 }
 0x282   : > { %v4339_v30 = vadd.f32 %v5381_v29, %v4290_v26 }
 0x292   : > { %v5398_v31 = vpop.f32.mrb[24].mxu0 }
 0x293   : > { %v5399_v32 = vpop.f32.mrb[25].mxu0 }
 0x294   : > { %v5400_v33 = vadd.f32 %v5399_v32, %v5398_v31  ;;  %v5401_v34 = vpop.f32.mrb[26].mxu0  ;;  %v5426_v35 = vpop.f32.mrb[24].mxu1 }
 0x295   : > { %v5402_v36 = vpop.f32.mrb[27].mxu0  ;;  %v5427_v39 = vpop.f32.mrb[25].mxu1 }
 0x296   : > { %v4377_v37 = vadd.f32 %v5400_v33, %v4328_v12  ;;  %v5403_v38 = vadd.f32 %v5402_v36, %v5401_v34  ;;  %v5428_v40 = vadd.f32 %v5427_v39, %v5426_v35  ;;  %v5429_v41 = vpop.f32.mrb[26].mxu1 }
 0x297   : > { %v5430_v43 = vpop.f32.mrb[27].mxu1 }
 0x298   : > { %v4380_v42 = vadd.f32 %v5403_v38, %v4331_v14  ;;  %v4426_v44 = vadd.f32 %v5428_v40, %v4377_v37  ;;  %v5431_v45 = vadd.f32 %v5430_v43, %v5429_v41 }
 0x29a   : > { %v4429_v46 = vadd.f32 %v5431_v45, %v4380_v42  ;;  %v5404_v47 = vpop.f32.mrb[28].mxu0 }
 0x29b   : > { %v5405_v48 = vpop.f32.mrb[29].mxu0 }
 0x29c   : > { %v5406_v49 = vadd.f32 %v5405_v48, %v5404_v47  ;;  %v5407_v50 = vpop.f32.mrb[30].mxu0  ;;  %v5432_v53 = vpop.f32.mrb[28].mxu1 }
 0x29d   : > { %v5408_v51 = vpop.f32.mrb[31].mxu0  ;;  %v5433_v55 = vpop.f32.mrb[29].mxu1 }
 0x29e   : > { %v4385_v52 = vadd.f32 %v5406_v49, %v4336_v28  ;;  %v5409_v54 = vadd.f32 %v5408_v51, %v5407_v50  ;;  %v5434_v57 = vadd.f32 %v5433_v55, %v5432_v53  ;;  %v5435_v58 = vpop.f32.mrb[30].mxu1 }
 0x29f   : > { %v5436_v59 = vpop.f32.mrb[31].mxu1 }
 0x2a0   : > { %v4388_v56 = vadd.f32 %v5409_v54, %v4339_v30  ;;  %v4434_v60 = vadd.f32 %v5434_v57, %v4385_v52  ;;  %v5437_v61 = vadd.f32 %v5436_v59, %v5435_v58 }
 0x2a2   : > { %v4437_v62 = vadd.f32 %v5437_v61, %v4388_v56 }
 0x2b2   : > { %v5454_v63 = vpop.f32.mrb[32].mxu0 }
 0x2b3   : > { %v5455_v0 = vpop.f32.mrb[33].mxu0 }
 0x2b4   : > { %v5456_v1 = vadd.f32 %v5455_v0, %v5454_v63  ;;  %v5457_v2 = vpop.f32.mrb[34].mxu0  ;;  %v5482_v3 = vpop.f32.mrb[32].mxu1 }
 0x2b5   : > { %v5458_v4 = vpop.f32.mrb[35].mxu0  ;;  %v5483_v7 = vpop.f32.mrb[33].mxu1 }
 0x2b6   : > { %v4475_v5 = vadd.f32 %v5456_v1, %v4426_v44  ;;  %v5459_v6 = vadd.f32 %v5458_v4, %v5457_v2  ;;  %v5484_v8 = vadd.f32 %v5483_v7, %v5482_v3  ;;  %v5485_v9 = vpop.f32.mrb[34].mxu1 }
 0x2b7   : > { %v5486_v11 = vpop.f32.mrb[35].mxu1 }
 0x2b8   : > { %v4478_v10 = vadd.f32 %v5459_v6, %v4429_v46  ;;  %v4524_v12 = vadd.f32 %v5484_v8, %v4475_v5  ;;  %v5487_v13 = vadd.f32 %v5486_v11, %v5485_v9 }
 0x2ba   : > { %v4527_v14 = vadd.f32 %v5487_v13, %v4478_v10  ;;  %v5460_v15 = vpop.f32.mrb[36].mxu0 }
 0x2bb   : > { %v5461_v16 = vpop.f32.mrb[37].mxu0 }
 0x2bc   : > { %v5462_v17 = vadd.f32 %v5461_v16, %v5460_v15  ;;  %v5463_v18 = vpop.f32.mrb[38].mxu0  ;;  %v5488_v19 = vpop.f32.mrb[36].mxu1 }
 0x2bd   : > { %v5464_v20 = vpop.f32.mrb[39].mxu0  ;;  %v5489_v23 = vpop.f32.mrb[37].mxu1 }
 0x2be   : > { %v4483_v21 = vadd.f32 %v5462_v17, %v4434_v60  ;;  %v5465_v22 = vadd.f32 %v5464_v20, %v5463_v18  ;;  %v5490_v24 = vadd.f32 %v5489_v23, %v5488_v19  ;;  %v5491_v25 = vpop.f32.mrb[38].mxu1 }
 0x2bf   : > { %v5492_v27 = vpop.f32.mrb[39].mxu1 }
 0x2c0   : > { %v4486_v26 = vadd.f32 %v5465_v22, %v4437_v62  ;;  %v4532_v28 = vadd.f32 %v5490_v24, %v4483_v21  ;;  %v5493_v29 = vadd.f32 %v5492_v27, %v5491_v25 }
 0x2c2   : > { %v4535_v30 = vadd.f32 %v5493_v29, %v4486_v26 }
 0x2d2   : > { %v5510_v31 = vpop.f32.mrb[40].mxu0 }
 0x2d3   : > { %v5511_v32 = vpop.f32.mrb[41].mxu0 }
 0x2d4   : > { %v5512_v33 = vadd.f32 %v5511_v32, %v5510_v31  ;;  %v5513_v34 = vpop.f32.mrb[42].mxu0  ;;  %v5538_v37 = vpop.f32.mrb[40].mxu1 }
 0x2d5   : > { %v5514_v35 = vpop.f32.mrb[43].mxu0  ;;  %v5539_v39 = vpop.f32.mrb[41].mxu1 }
 0x2d6   : > { %v4573_v36 = vadd.f32 %v5512_v33, %v4524_v12  ;;  %v5515_v38 = vadd.f32 %v5514_v35, %v5513_v34  ;;  %v5540_v41 = vadd.f32 %v5539_v39, %v5538_v37  ;;  %v5541_v42 = vpop.f32.mrb[42].mxu1 }
 0x2d7   : > { %v5542_v43 = vpop.f32.mrb[43].mxu1 }
 0x2d8   : > { %v4576_v40 = vadd.f32 %v5515_v38, %v4527_v14  ;;  %v4622_v44 = vadd.f32 %v5540_v41, %v4573_v36  ;;  %v5543_v45 = vadd.f32 %v5542_v43, %v5541_v42 }
 0x2da   : > { %v5516_v46 = vpop.f32.mrb[44].mxu0  ;;  %v4625_v47 = vadd.f32 %v5543_v45, %v4576_v40 }
 0x2db   : > { %v5517_v48 = vpop.f32.mrb[45].mxu0 }
 0x2dc   : > { %v5518_v49 = vadd.f32 %v5517_v48, %v5516_v46  ;;  %v5519_v50 = vpop.f32.mrb[46].mxu0  ;;  %v5544_v51 = vpop.f32.mrb[44].mxu1 }
 0x2dd   : > { %v5520_v52 = vpop.f32.mrb[47].mxu0  ;;  %v5545_v55 = vpop.f32.mrb[45].mxu1 }
 0x2de   : > { %v4581_v53 = vadd.f32 %v5518_v49, %v4532_v28  ;;  %v5521_v54 = vadd.f32 %v5520_v52, %v5519_v50  ;;  %v5546_v56 = vadd.f32 %v5545_v55, %v5544_v51  ;;  %v5547_v57 = vpop.f32.mrb[46].mxu1 }
 0x2df   : > { %v5548_v59 = vpop.f32.mrb[47].mxu1 }
 0x2e0   : > { %v4584_v58 = vadd.f32 %v5521_v54, %v4535_v30  ;;  %v4630_v60 = vadd.f32 %v5546_v56, %v4581_v53  ;;  %v5549_v61 = vadd.f32 %v5548_v59, %v5547_v57 }
 0x2e2   : > { %v4633_v62 = vadd.f32 %v5549_v61, %v4584_v58 }
 0x2f2   : > { %v5566_v63 = vpop.f32.mrb[48].mxu0 }
 0x2f3   : > { %v5567_v0 = vpop.f32.mrb[49].mxu0 }
 0x2f4   : > { %v5568_v1 = vadd.f32 %v5567_v0, %v5566_v63  ;;  %v5569_v2 = vpop.f32.mrb[50].mxu0  ;;  %v5606_v4 = vpop.f32.mrb[48].mxu1 }
 0x2f5   : > { %v5570_v3 = vpop.f32.mrb[51].mxu0  ;;  %v4719_v7 = vpop.f32.mrb[49].mxu1 }
 0x2f6   : > { %v5571_v5 = vadd.f32 %v5570_v3, %v5569_v2  ;;  %v4671_v6 = vadd.f32 %v5568_v1, %v4622_v44  ;;  %v5607_v8 = vpop.f32.mrb[50].mxu1 }
 0x2f7   : > { %v4722_v11 = vpop.f32.mrb[51].mxu1 }
 0x2f8   : > { %v4720_v9 = vadd.f32 %v4719_v7, %v4671_v6  ;;  %v4674_v10 = vadd.f32 %v5571_v5, %v4625_v47 }
 0x2fa   : > { %v4723_v12 = vadd.f32 %v4722_v11, %v4674_v10  ;;  %v5572_v13 = vpop.f32.mrb[52].mxu0  ;;  %v4734_v15 = vmax.f32 %v4720_v9, 0.0 }
 0x2fb   : > { %v5573_v14 = vpop.f32.mrb[53].mxu0 }
 0x2fc   : > { %v4735_v16 = vmax.f32 %v4723_v12, 0.0  ;;  %v5574_v17 = vadd.f32 %v5573_v14, %v5572_v13  ;;  %v5575_v18 = vpop.f32.mrb[54].mxu0 }
 0x2fd   : > { %v5576_v19 = vpop.f32.mrb[55].mxu0 }
 0x2fe   : > { %v5206_v20 = vpack.c.bf16 %v4735_v16, %v4734_v15  ;;  %v4679_v21 = vadd.f32 %v5574_v17, %v4630_v60  ;;  %v5577_v22 = vadd.f32 %v5576_v19, %v5575_v18 }
 0x300   : > { %5207 = vst [vmem:[%s1972_s24] sm:$0xff] %v5206_v20   ;;  %v4728_v23 = vadd.f32 %v5606_v4, %v4679_v21  ;;  %v4682_v24 = vadd.f32 %v5577_v22, %v4633_v62 }
 0x302   : > { %v4731_v25 = vadd.f32 %v5607_v8, %v4682_v24  ;;  %v4736_v26 = vmax.f32 %v4728_v23, 0.0  ;;  %4764 = sbr.rel (!%p6041_p6) target bundleno = 785 (0x311), region = 77 }
 0x304   : > { %v4737_v27 = vmax.f32 %v4731_v25, 0.0 }
 0x306   : > { %v5211_v28 = vpack.c.bf16 %v4737_v27, %v4736_v26 }
 0x307   : > { %v4785_v29 = vld [vmem:[%s1972_s24] sm:$0xf] (%p6041_p6)  ;;  %v4787_v30 = vld [vmem:[%s1972_s24 + $0x4] sm:$0xf] (%p6041_p6) }
 0x308   : > { %5213 = vst [vmem:[%s1972_s24 + $0x8] sm:$0xff] %v5211_v28   ;;  %4786 = vst [vmem:[%s4769_s26] sm:$0xf] (%p6041_p6), %v4785_v29 }
 0x309   : > { %4788 = vst [vmem:[%s4769_s26 + $0x8] sm:$0xf] %v4787_v30 }
 0x30f   : > { %v4789_v31 = vld [vmem:[%s1972_s24 + $0x8] sm:$0xf]  ;;  %v4791_v32 = vld [vmem:[%s1972_s24 + $0xc] sm:$0xf] }
 0x310   : > { %4790 = vst [vmem:[%s4769_s26 + $0x10] sm:$0xf] %v4789_v31  ;;  %4792 = vst [vmem:[%s4769_s26 + $0x18] sm:$0xf] %v4791_v32 }
 0x311 PF: > { %s13_s16 = sadd.s32 1, %s5984_s16   ;;  %s7340_s12 = smov %s5972_s13 }
 0x312   : > { %p10_p12 = scmp.ge.s32.totalorder %s13_s16, 4   ;;  %s7341_s13 = smov %s6046_s22 }
 0x313   : > { %s7342_s14 = smov %s5980_s15  ;;  %s7343_s15 = smov %s7345_s17 }
 0x314   :  { %12 = sbr.rel (!%p10_p12) target bundleno = 3 (0x3), region = 155 }

// kernel: depth_cnn_forward.9
= control target key start
LH: loop header
LB: loop body
LE: loop exit
PB: predicated region body
PF: predicated region fallthrough
CT: control target
= control target key end

     0   :  { %s4183_s12 = smov 0   ;;  %s4185_s13 = smov 0   ;;  %s5098_s0 = inlined_call_operand.vmem [shape: bf16[32,2304], index: 0, kind: input, shape index: {}]   ;;  %s5099_s1 = inlined_call_operand.vmem [shape: bf16[2304,256], index: 1, kind: input, shape index: {}]   ;;  %s5100_s2 = inlined_call_operand.vmem [shape: f32[1,256], index: 2, kind: input, shape index: {}]   ;;  %s5101_s3 = inlined_call_operand.vmem [shape: bf16[32,256], index: 3, kind: output, shape index: {}]  }
   0x1   :  { %s4187_s14 = smov 0   ;;  %s4189_s15 = smov 0  }
   0x2   :  { %s4191_s16 = smov 0  }
   0x3 LB: > { %s25_s17 = sadd.s32 1, %s4157_s15  ;;  %s3403_s18 = sadd.s32 4294967295, %s4161_s16   ;;  %s4161_s16 = sphi %s4191_s16, %s13_s16   ;;  %s4157_s15 = sphi %s4189_s15, %s5106_s15   ;;  %s4153_s14 = sphi %s4187_s14, %s5105_s14   ;;  %s4149_s13 = sphi %s4185_s13, %s5104_s13   ;;  %s4145_s12 = sphi %s4183_s12, %s5103_s12  }
   0x4   : > { %p27_p0 = scmp.ge.s32.totalorder %s25_s17, 2  ;;  %p65_p1 = scmp.ne.s32.totalorder %s4149_s13, %s4145_s12 }
   0x5   : > { %p66_p2 = scmp.eq.s32.totalorder %s4161_s16, 0  ;;  %p123_p4 = scmp.eq.s32.totalorder %s3403_s18, 1 }
   0x6   : > { %s5108_s17 = smov (%p27_p0, %s25_s17), 0  ;;  %s58_s20 = sadd.s32 1, %s4149_s13 }
   0x7   : > { %p67_p3 = por %p66_p2, %p65_p1  ;;  %s55_s19 = ssub.s32 %s4157_s15, %s5108_s17 }
   0x8   : > { %p56_p5 = scmp.eq.s32.totalorder %s55_s19, 0  ;;  %p4218_p6 = por %p123_p4, %p65_p1 }
   0x9   : > { %p3407_p7 = scmp.ge.s32.totalorder %s4161_s16, 2 }
   0xa   : > { %s4223_s22 = scalar_select %p56_p5, %s4149_s13, %s58_s20  }
   0xb   : > { %155 = sbr.rel (%p3407_p7) target bundleno = 214 (0xd6), region = 20 }
  0x12   : > { %158 = sbr.rel (!%p67_p3) target bundleno = 214 (0xd6), region = 24  ;;  %s160_s23 = sand.u32 (%p67_p3), 1, %s4149_s13  }
  0x13   : > { %s3408_s24 = sshll.u32 (%p67_p3), %s4157_s15, 2  ;;  %s3883_s25 = smul.u32 (%p67_p3), 1152, %s160_s23 }
  0x14   : > { %s4231_s28 = scalar_lea.vmem (%p67_p3), %s5099_s1, %s3408_s24 }
  0x15   : > { %v180_v0 = vld [vmem:[%s4231_s28] sm:$0xf] (%p67_p3)  ;;  %v182_v1 = vld [vmem:[%s4231_s28 + $0x8] sm:$0xf] (%p67_p3)  ;;  %v184_v2 = vld [vmem:[%s4231_s28 + $0x10] sm:$0xf] (%p67_p3) }
  0x16   : > { %v186_v3 = vld [vmem:[%s4231_s28 + $0x18] sm:$0xf] (%p67_p3)  ;;  %v188_v4 = vld [vmem:[%s4231_s28 + $0x20] sm:$0xf] (%p67_p3)  ;;  %s4238_s29 = scalar_lea.vmem (%p67_p3), [#allocation2], %s3883_s25 }
  0x17   : > { %181 = vst [vmem:[%s4238_s29] sm:$0xf] (%p67_p3), %v180_v0  ;;  %183 = vst [vmem:[%s4238_s29 + $0x4] sm:$0xf] (%p67_p3), %v182_v1  ;;  %v190_v5 = vld [vmem:[%s4231_s28 + $0x28] sm:$0xf] (%p67_p3) }
  0x18   : > { %185 = vst [vmem:[%s4238_s29 + $0x8] sm:$0xf] (%p67_p3), %v184_v2  ;;  %187 = vst [vmem:[%s4238_s29 + $0xc] sm:$0xf] (%p67_p3), %v186_v3  ;;  %v192_v6 = vld [vmem:[%s4231_s28 + $0x30] sm:$0xf] (%p67_p3) }
  0x19   : > { %189 = vst [vmem:[%s4238_s29 + $0x10] sm:$0xf] %v188_v4  ;;  %v194_v7 = vld [vmem:[%s4231_s28 + $0x38] sm:$0xf]  ;;  %191 = vst [vmem:[%s4238_s29 + $0x14] sm:$0xf] %v190_v5 }
  0x1a   : > { %193 = vst [vmem:[%s4238_s29 + $0x18] sm:$0xf] %v192_v6  ;;  %195 = vst [vmem:[%s4238_s29 + $0x1c] sm:$0xf] %v194_v7  ;;  %v196_v8 = vld [vmem:[%s4231_s28 + $0x40] sm:$0xf] }
  0x1b   : > { %v198_v9 = vld [vmem:[%s4231_s28 + $0x48] sm:$0xf]  ;;  %v200_v10 = vld [vmem:[%s4231_s28 + $0x50] sm:$0xf]  ;;  %197 = vst [vmem:[%s4238_s29 + $0x20] sm:$0xf] %v196_v8 }
  0x1c   : > { %199 = vst [vmem:[%s4238_s29 + $0x24] sm:$0xf] %v198_v9  ;;  %201 = vst [vmem:[%s4238_s29 + $0x28] sm:$0xf] %v200_v10  ;;  %v202_v11 = vld [vmem:[%s4231_s28 + $0x58] sm:$0xf] }
  0x1d   : > { %v204_v12 = vld [vmem:[%s4231_s28 + $0x60] sm:$0xf]  ;;  %v206_v13 = vld [vmem:[%s4231_s28 + $0x68] sm:$0xf]  ;;  %203 = vst [vmem:[%s4238_s29 + $0x2c] sm:$0xf] %v202_v11 }
  0x1e   : > { %205 = vst [vmem:[%s4238_s29 + $0x30] sm:$0xf] %v204_v12  ;;  %207 = vst [vmem:[%s4238_s29 + $0x34] sm:$0xf] %v206_v13  ;;  %v208_v14 = vld [vmem:[%s4231_s28 + $0x70] sm:$0xf] }
  0x1f   : > { %v210_v15 = vld [vmem:[%s4231_s28 + $0x78] sm:$0xf]  ;;  %v212_v16 = vld [vmem:[%s4231_s28 + $0x80] sm:$0xf]  ;;  %209 = vst [vmem:[%s4238_s29 + $0x38] sm:$0xf] %v208_v14 }
  0x20   : > { %211 = vst [vmem:[%s4238_s29 + $0x3c] sm:$0xf] %v210_v15  ;;  %213 = vst [vmem:[%s4238_s29 + $0x40] sm:$0xf] %v212_v16  ;;  %v214_v17 = vld [vmem:[%s4231_s28 + $0x88] sm:$0xf] }
  0x21   : > { %v216_v18 = vld [vmem:[%s4231_s28 + $0x90] sm:$0xf]  ;;  %v218_v19 = vld [vmem:[%s4231_s28 + $0x98] sm:$0xf]  ;;  %215 = vst [vmem:[%s4238_s29 + $0x44] sm:$0xf] %v214_v17 }
  0x22   : > { %217 = vst [vmem:[%s4238_s29 + $0x48] sm:$0xf] %v216_v18  ;;  %219 = vst [vmem:[%s4238_s29 + $0x4c] sm:$0xf] %v218_v19  ;;  %v220_v20 = vld [vmem:[%s4231_s28 + $0xa0] sm:$0xf] }
  0x23   : > { %v222_v21 = vld [vmem:[%s4231_s28 + $0xa8] sm:$0xf]  ;;  %v224_v22 = vld [vmem:[%s4231_s28 + $0xb0] sm:$0xf]  ;;  %221 = vst [vmem:[%s4238_s29 + $0x50] sm:$0xf] %v220_v20 }
  0x24   : > { %223 = vst [vmem:[%s4238_s29 + $0x54] sm:$0xf] %v222_v21  ;;  %225 = vst [vmem:[%s4238_s29 + $0x58] sm:$0xf] %v224_v22  ;;  %v226_v23 = vld [vmem:[%s4231_s28 + $0xb8] sm:$0xf] }
  0x25   : > { %v228_v24 = vld [vmem:[%s4231_s28 + $0xc0] sm:$0xf]  ;;  %v230_v25 = vld [vmem:[%s4231_s28 + $0xc8] sm:$0xf]  ;;  %227 = vst [vmem:[%s4238_s29 + $0x5c] sm:$0xf] %v226_v23 }
  0x26   : > { %229 = vst [vmem:[%s4238_s29 + $0x60] sm:$0xf] %v228_v24  ;;  %231 = vst [vmem:[%s4238_s29 + $0x64] sm:$0xf] %v230_v25  ;;  %v232_v26 = vld [vmem:[%s4231_s28 + $0xd0] sm:$0xf] }
  0x27   : > { %v234_v27 = vld [vmem:[%s4231_s28 + $0xd8] sm:$0xf]  ;;  %v236_v28 = vld [vmem:[%s4231_s28 + $0xe0] sm:$0xf]  ;;  %233 = vst [vmem:[%s4238_s29 + $0x68] sm:$0xf] %v232_v26 }
  0x28   : > { %235 = vst [vmem:[%s4238_s29 + $0x6c] sm:$0xf] %v234_v27  ;;  %237 = vst [vmem:[%s4238_s29 + $0x70] sm:$0xf] %v236_v28  ;;  %v238_v29 = vld [vmem:[%s4231_s28 + $0xe8] sm:$0xf] }
  0x29   : > { %v240_v30 = vld [vmem:[%s4231_s28 + $0xf0] sm:$0xf]  ;;  %v242_v31 = vld [vmem:[%s4231_s28 + $0xf8] sm:$0xf]  ;;  %239 = vst [vmem:[%s4238_s29 + $0x74] sm:$0xf] %v238_v29 }
  0x2a   : > { %241 = vst [vmem:[%s4238_s29 + $0x78] sm:$0xf] %v240_v30  ;;  %243 = vst [vmem:[%s4238_s29 + $0x7c] sm:$0xf] %v242_v31  ;;  %v244_v32 = vld [vmem:[%s4231_s28 + $0x100] sm:$0xf] }
  0x2b   : > { %v246_v33 = vld [vmem:[%s4231_s28 + $0x108] sm:$0xf]  ;;  %v248_v34 = vld [vmem:[%s4231_s28 + $0x110] sm:$0xf]  ;;  %245 = vst [vmem:[%s4238_s29 + $0x80] sm:$0xf] %v244_v32 }
  0x2c   : > { %247 = vst [vmem:[%s4238_s29 + $0x84] sm:$0xf] %v246_v33  ;;  %249 = vst [vmem:[%s4238_s29 + $0x88] sm:$0xf] %v248_v34  ;;  %v250_v35 = vld [vmem:[%s4231_s28 + $0x118] sm:$0xf] }
  0x2d   : > { %v252_v36 = vld [vmem:[%s4231_s28 + $0x120] sm:$0xf]  ;;  %v254_v37 = vld [vmem:[%s4231_s28 + $0x128] sm:$0xf]  ;;  %251 = vst [vmem:[%s4238_s29 + $0x8c] sm:$0xf] %v250_v35 }
  0x2e   : > { %253 = vst [vmem:[%s4238_s29 + $0x90] sm:$0xf] %v252_v36  ;;  %255 = vst [vmem:[%s4238_s29 + $0x94] sm:$0xf] %v254_v37  ;;  %v256_v38 = vld [vmem:[%s4231_s28 + $0x130] sm:$0xf] }
  0x2f   : > { %v258_v39 = vld [vmem:[%s4231_s28 + $0x138] sm:$0xf]  ;;  %v260_v40 = vld [vmem:[%s4231_s28 + $0x140] sm:$0xf]  ;;  %257 = vst [vmem:[%s4238_s29 + $0x98] sm:$0xf] %v256_v38 }
  0x30   : > { %259 = vst [vmem:[%s4238_s29 + $0x9c] sm:$0xf] %v258_v39  ;;  %261 = vst [vmem:[%s4238_s29 + $0xa0] sm:$0xf] %v260_v40  ;;  %v262_v41 = vld [vmem:[%s4231_s28 + $0x148] sm:$0xf] }
  0x31   : > { %v264_v42 = vld [vmem:[%s4231_s28 + $0x150] sm:$0xf]  ;;  %v266_v43 = vld [vmem:[%s4231_s28 + $0x158] sm:$0xf]  ;;  %263 = vst [vmem:[%s4238_s29 + $0xa4] sm:$0xf] %v262_v41 }
  0x32   : > { %265 = vst [vmem:[%s4238_s29 + $0xa8] sm:$0xf] %v264_v42  ;;  %267 = vst [vmem:[%s4238_s29 + $0xac] sm:$0xf] %v266_v43  ;;  %v268_v44 = vld [vmem:[%s4231_s28 + $0x160] sm:$0xf] }
  0x33   : > { %v270_v45 = vld [vmem:[%s4231_s28 + $0x168] sm:$0xf]  ;;  %v272_v46 = vld [vmem:[%s4231_s28 + $0x170] sm:$0xf]  ;;  %269 = vst [vmem:[%s4238_s29 + $0xb0] sm:$0xf] %v268_v44 }
  0x34   : > { %271 = vst [vmem:[%s4238_s29 + $0xb4] sm:$0xf] %v270_v45  ;;  %273 = vst [vmem:[%s4238_s29 + $0xb8] sm:$0xf] %v272_v46  ;;  %v274_v47 = vld [vmem:[%s4231_s28 + $0x178] sm:$0xf] }
  0x35   : > { %v276_v48 = vld [vmem:[%s4231_s28 + $0x180] sm:$0xf]  ;;  %v278_v49 = vld [vmem:[%s4231_s28 + $0x188] sm:$0xf]  ;;  %275 = vst [vmem:[%s4238_s29 + $0xbc] sm:$0xf] %v274_v47 }
  0x36   : > { %277 = vst [vmem:[%s4238_s29 + $0xc0] sm:$0xf] %v276_v48  ;;  %279 = vst [vmem:[%s4238_s29 + $0xc4] sm:$0xf] %v278_v49  ;;  %v280_v50 = vld [vmem:[%s4231_s28 + $0x190] sm:$0xf] }
  0x37   : > { %v282_v51 = vld [vmem:[%s4231_s28 + $0x198] sm:$0xf]  ;;  %v284_v52 = vld [vmem:[%s4231_s28 + $0x1a0] sm:$0xf]  ;;  %281 = vst [vmem:[%s4238_s29 + $0xc8] sm:$0xf] %v280_v50 }
  0x38   : > { %283 = vst [vmem:[%s4238_s29 + $0xcc] sm:$0xf] %v282_v51  ;;  %285 = vst [vmem:[%s4238_s29 + $0xd0] sm:$0xf] %v284_v52  ;;  %v286_v53 = vld [vmem:[%s4231_s28 + $0x1a8] sm:$0xf] }
  0x39   : > { %v288_v54 = vld [vmem:[%s4231_s28 + $0x1b0] sm:$0xf]  ;;  %v290_v55 = vld [vmem:[%s4231_s28 + $0x1b8] sm:$0xf]  ;;  %287 = vst [vmem:[%s4238_s29 + $0xd4] sm:$0xf] %v286_v53 }
  0x3a   : > { %289 = vst [vmem:[%s4238_s29 + $0xd8] sm:$0xf] %v288_v54  ;;  %291 = vst [vmem:[%s4238_s29 + $0xdc] sm:$0xf] %v290_v55  ;;  %v292_v56 = vld [vmem:[%s4231_s28 + $0x1c0] sm:$0xf] }
  0x3b   : > { %v294_v57 = vld [vmem:[%s4231_s28 + $0x1c8] sm:$0xf]  ;;  %v296_v58 = vld [vmem:[%s4231_s28 + $0x1d0] sm:$0xf]  ;;  %293 = vst [vmem:[%s4238_s29 + $0xe0] sm:$0xf] %v292_v56 }
  0x3c   : > { %295 = vst [vmem:[%s4238_s29 + $0xe4] sm:$0xf] %v294_v57  ;;  %297 = vst [vmem:[%s4238_s29 + $0xe8] sm:$0xf] %v296_v58  ;;  %v298_v59 = vld [vmem:[%s4231_s28 + $0x1d8] sm:$0xf] }
  0x3d   : > { %v300_v60 = vld [vmem:[%s4231_s28 + $0x1e0] sm:$0xf]  ;;  %v302_v61 = vld [vmem:[%s4231_s28 + $0x1e8] sm:$0xf]  ;;  %299 = vst [vmem:[%s4238_s29 + $0xec] sm:$0xf] %v298_v59 }
  0x3e   : > { %301 = vst [vmem:[%s4238_s29 + $0xf0] sm:$0xf] %v300_v60  ;;  %303 = vst [vmem:[%s4238_s29 + $0xf4] sm:$0xf] %v302_v61  ;;  %v304_v62 = vld [vmem:[%s4231_s28 + $0x1f0] sm:$0xf] }
  0x3f   : > { %v306_v63 = vld [vmem:[%s4231_s28 + $0x1f8] sm:$0xf]  ;;  %v308_v0 = vld [vmem:[%s4231_s28 + $0x200] sm:$0xf]  ;;  %305 = vst [vmem:[%s4238_s29 + $0xf8] sm:$0xf] %v304_v62 }
  0x40   : > { %307 = vst [vmem:[%s4238_s29 + $0xfc] sm:$0xf] %v306_v63  ;;  %309 = vst [vmem:[%s4238_s29 + $0x100] sm:$0xf] %v308_v0  ;;  %v310_v1 = vld [vmem:[%s4231_s28 + $0x208] sm:$0xf] }
  0x41   : > { %v312_v2 = vld [vmem:[%s4231_s28 + $0x210] sm:$0xf]  ;;  %v314_v3 = vld [vmem:[%s4231_s28 + $0x218] sm:$0xf]  ;;  %311 = vst [vmem:[%s4238_s29 + $0x104] sm:$0xf] %v310_v1 }
  0x42   : > { %313 = vst [vmem:[%s4238_s29 + $0x108] sm:$0xf] %v312_v2  ;;  %315 = vst [vmem:[%s4238_s29 + $0x10c] sm:$0xf] %v314_v3  ;;  %v316_v4 = vld [vmem:[%s4231_s28 + $0x220] sm:$0xf] }
  0x43   : > { %v318_v5 = vld [vmem:[%s4231_s28 + $0x228] sm:$0xf]  ;;  %v320_v6 = vld [vmem:[%s4231_s28 + $0x230] sm:$0xf]  ;;  %317 = vst [vmem:[%s4238_s29 + $0x110] sm:$0xf] %v316_v4 }
  0x44   : > { %319 = vst [vmem:[%s4238_s29 + $0x114] sm:$0xf] %v318_v5  ;;  %321 = vst [vmem:[%s4238_s29 + $0x118] sm:$0xf] %v320_v6  ;;  %v322_v7 = vld [vmem:[%s4231_s28 + $0x238] sm:$0xf] }
  0x45   : > { %v324_v8 = vld [vmem:[%s4231_s28 + $0x240] sm:$0xf]  ;;  %v326_v9 = vld [vmem:[%s4231_s28 + $0x248] sm:$0xf]  ;;  %323 = vst [vmem:[%s4238_s29 + $0x11c] sm:$0xf] %v322_v7 }
  0x46   : > { %325 = vst [vmem:[%s4238_s29 + $0x120] sm:$0xf] %v324_v8  ;;  %327 = vst [vmem:[%s4238_s29 + $0x124] sm:$0xf] %v326_v9  ;;  %v328_v10 = vld [vmem:[%s4231_s28 + $0x250] sm:$0xf] }
  0x47   : > { %v330_v11 = vld [vmem:[%s4231_s28 + $0x258] sm:$0xf]  ;;  %v332_v12 = vld [vmem:[%s4231_s28 + $0x260] sm:$0xf]  ;;  %329 = vst [vmem:[%s4238_s29 + $0x128] sm:$0xf] %v328_v10 }
  0x48   : > { %331 = vst [vmem:[%s4238_s29 + $0x12c] sm:$0xf] %v330_v11  ;;  %333 = vst [vmem:[%s4238_s29 + $0x130] sm:$0xf] %v332_v12  ;;  %v334_v13 = vld [vmem:[%s4231_s28 + $0x268] sm:$0xf] }
  0x49   : > { %v336_v14 = vld [vmem:[%s4231_s28 + $0x270] sm:$0xf]  ;;  %v338_v15 = vld [vmem:[%s4231_s28 + $0x278] sm:$0xf]  ;;  %335 = vst [vmem:[%s4238_s29 + $0x134] sm:$0xf] %v334_v13 }
  0x4a   : > { %337 = vst [vmem:[%s4238_s29 + $0x138] sm:$0xf] %v336_v14  ;;  %339 = vst [vmem:[%s4238_s29 + $0x13c] sm:$0xf] %v338_v15  ;;  %v340_v16 = vld [vmem:[%s4231_s28 + $0x280] sm:$0xf] }
  0x4b   : > { %v342_v17 = vld [vmem:[%s4231_s28 + $0x288] sm:$0xf]  ;;  %v344_v18 = vld [vmem:[%s4231_s28 + $0x290] sm:$0xf]  ;;  %341 = vst [vmem:[%s4238_s29 + $0x140] sm:$0xf] %v340_v16 }
  0x4c   : > { %343 = vst [vmem:[%s4238_s29 + $0x144] sm:$0xf] %v342_v17  ;;  %345 = vst [vmem:[%s4238_s29 + $0x148] sm:$0xf] %v344_v18  ;;  %v346_v19 = vld [vmem:[%s4231_s28 + $0x298] sm:$0xf] }
  0x4d   : > { %v348_v20 = vld [vmem:[%s4231_s28 + $0x2a0] sm:$0xf]  ;;  %v350_v21 = vld [vmem:[%s4231_s28 + $0x2a8] sm:$0xf]  ;;  %347 = vst [vmem:[%s4238_s29 + $0x14c] sm:$0xf] %v346_v19 }
  0x4e   : > { %349 = vst [vmem:[%s4238_s29 + $0x150] sm:$0xf] %v348_v20  ;;  %351 = vst [vmem:[%s4238_s29 + $0x154] sm:$0xf] %v350_v21  ;;  %v352_v22 = vld [vmem:[%s4231_s28 + $0x2b0] sm:$0xf] }
  0x4f   : > { %v354_v23 = vld [vmem:[%s4231_s28 + $0x2b8] sm:$0xf]  ;;  %v356_v24 = vld [vmem:[%s4231_s28 + $0x2c0] sm:$0xf]  ;;  %353 = vst [vmem:[%s4238_s29 + $0x158] sm:$0xf] %v352_v22 }
  0x50   : > { %355 = vst [vmem:[%s4238_s29 + $0x15c] sm:$0xf] %v354_v23  ;;  %357 = vst [vmem:[%s4238_s29 + $0x160] sm:$0xf] %v356_v24  ;;  %v358_v25 = vld [vmem:[%s4231_s28 + $0x2c8] sm:$0xf] }
  0x51   : > { %v360_v26 = vld [vmem:[%s4231_s28 + $0x2d0] sm:$0xf]  ;;  %v362_v27 = vld [vmem:[%s4231_s28 + $0x2d8] sm:$0xf]  ;;  %359 = vst [vmem:[%s4238_s29 + $0x164] sm:$0xf] %v358_v25 }
  0x52   : > { %361 = vst [vmem:[%s4238_s29 + $0x168] sm:$0xf] %v360_v26  ;;  %363 = vst [vmem:[%s4238_s29 + $0x16c] sm:$0xf] %v362_v27  ;;  %v364_v28 = vld [vmem:[%s4231_s28 + $0x2e0] sm:$0xf] }
  0x53   : > { %v366_v29 = vld [vmem:[%s4231_s28 + $0x2e8] sm:$0xf]  ;;  %v368_v30 = vld [vmem:[%s4231_s28 + $0x2f0] sm:$0xf]  ;;  %365 = vst [vmem:[%s4238_s29 + $0x170] sm:$0xf] %v364_v28 }
  0x54   : > { %367 = vst [vmem:[%s4238_s29 + $0x174] sm:$0xf] %v366_v29  ;;  %369 = vst [vmem:[%s4238_s29 + $0x178] sm:$0xf] %v368_v30  ;;  %v370_v31 = vld [vmem:[%s4231_s28 + $0x2f8] sm:$0xf] }
  0x55   : > { %v372_v32 = vld [vmem:[%s4231_s28 + $0x300] sm:$0xf]  ;;  %v374_v33 = vld [vmem:[%s4231_s28 + $0x308] sm:$0xf]  ;;  %371 = vst [vmem:[%s4238_s29 + $0x17c] sm:$0xf] %v370_v31 }
  0x56   : > { %373 = vst [vmem:[%s4238_s29 + $0x180] sm:$0xf] %v372_v32  ;;  %375 = vst [vmem:[%s4238_s29 + $0x184] sm:$0xf] %v374_v33  ;;  %v376_v34 = vld [vmem:[%s4231_s28 + $0x310] sm:$0xf] }
  0x57   : > { %v378_v35 = vld [vmem:[%s4231_s28 + $0x318] sm:$0xf]  ;;  %v380_v36 = vld [vmem:[%s4231_s28 + $0x320] sm:$0xf]  ;;  %377 = vst [vmem:[%s4238_s29 + $0x188] sm:$0xf] %v376_v34 }
  0x58   : > { %379 = vst [vmem:[%s4238_s29 + $0x18c] sm:$0xf] %v378_v35  ;;  %381 = vst [vmem:[%s4238_s29 + $0x190] sm:$0xf] %v380_v36  ;;  %v382_v37 = vld [vmem:[%s4231_s28 + $0x328] sm:$0xf] }
  0x59   : > { %v384_v38 = vld [vmem:[%s4231_s28 + $0x330] sm:$0xf]  ;;  %v386_v39 = vld [vmem:[%s4231_s28 + $0x338] sm:$0xf]  ;;  %383 = vst [vmem:[%s4238_s29 + $0x194] sm:$0xf] %v382_v37 }
  0x5a   : > { %385 = vst [vmem:[%s4238_s29 + $0x198] sm:$0xf] %v384_v38  ;;  %387 = vst [vmem:[%s4238_s29 + $0x19c] sm:$0xf] %v386_v39  ;;  %v388_v40 = vld [vmem:[%s4231_s28 + $0x340] sm:$0xf] }
  0x5b   : > { %v390_v41 = vld [vmem:[%s4231_s28 + $0x348] sm:$0xf]  ;;  %v392_v42 = vld [vmem:[%s4231_s28 + $0x350] sm:$0xf]  ;;  %389 = vst [vmem:[%s4238_s29 + $0x1a0] sm:$0xf] %v388_v40 }
  0x5c   : > { %391 = vst [vmem:[%s4238_s29 + $0x1a4] sm:$0xf] %v390_v41  ;;  %393 = vst [vmem:[%s4238_s29 + $0x1a8] sm:$0xf] %v392_v42  ;;  %v394_v43 = vld [vmem:[%s4231_s28 + $0x358] sm:$0xf] }
  0x5d   : > { %v396_v44 = vld [vmem:[%s4231_s28 + $0x360] sm:$0xf]  ;;  %v398_v45 = vld [vmem:[%s4231_s28 + $0x368] sm:$0xf]  ;;  %395 = vst [vmem:[%s4238_s29 + $0x1ac] sm:$0xf] %v394_v43 }
  0x5e   : > { %397 = vst [vmem:[%s4238_s29 + $0x1b0] sm:$0xf] %v396_v44  ;;  %399 = vst [vmem:[%s4238_s29 + $0x1b4] sm:$0xf] %v398_v45  ;;  %v400_v46 = vld [vmem:[%s4231_s28 + $0x370] sm:$0xf] }
  0x5f   : > { %v402_v47 = vld [vmem:[%s4231_s28 + $0x378] sm:$0xf]  ;;  %v404_v48 = vld [vmem:[%s4231_s28 + $0x380] sm:$0xf]  ;;  %401 = vst [vmem:[%s4238_s29 + $0x1b8] sm:$0xf] %v400_v46 }
  0x60   : > { %403 = vst [vmem:[%s4238_s29 + $0x1bc] sm:$0xf] %v402_v47  ;;  %405 = vst [vmem:[%s4238_s29 + $0x1c0] sm:$0xf] %v404_v48  ;;  %v406_v49 = vld [vmem:[%s4231_s28 + $0x388] sm:$0xf] }
  0x61   : > { %v408_v50 = vld [vmem:[%s4231_s28 + $0x390] sm:$0xf]  ;;  %v410_v51 = vld [vmem:[%s4231_s28 + $0x398] sm:$0xf]  ;;  %407 = vst [vmem:[%s4238_s29 + $0x1c4] sm:$0xf] %v406_v49 }
  0x62   : > { %409 = vst [vmem:[%s4238_s29 + $0x1c8] sm:$0xf] %v408_v50  ;;  %411 = vst [vmem:[%s4238_s29 + $0x1cc] sm:$0xf] %v410_v51  ;;  %v412_v52 = vld [vmem:[%s4231_s28 + $0x3a0] sm:$0xf] }
  0x63   : > { %v414_v53 = vld [vmem:[%s4231_s28 + $0x3a8] sm:$0xf]  ;;  %v416_v54 = vld [vmem:[%s4231_s28 + $0x3b0] sm:$0xf]  ;;  %413 = vst [vmem:[%s4238_s29 + $0x1d0] sm:$0xf] %v412_v52 }
  0x64   : > { %415 = vst [vmem:[%s4238_s29 + $0x1d4] sm:$0xf] %v414_v53  ;;  %417 = vst [vmem:[%s4238_s29 + $0x1d8] sm:$0xf] %v416_v54  ;;  %v418_v55 = vld [vmem:[%s4231_s28 + $0x3b8] sm:$0xf] }
  0x65   : > { %v420_v56 = vld [vmem:[%s4231_s28 + $0x3c0] sm:$0xf]  ;;  %v422_v57 = vld [vmem:[%s4231_s28 + $0x3c8] sm:$0xf]  ;;  %419 = vst [vmem:[%s4238_s29 + $0x1dc] sm:$0xf] %v418_v55 }
  0x66   : > { %421 = vst [vmem:[%s4238_s29 + $0x1e0] sm:$0xf] %v420_v56  ;;  %423 = vst [vmem:[%s4238_s29 + $0x1e4] sm:$0xf] %v422_v57  ;;  %v424_v58 = vld [vmem:[%s4231_s28 + $0x3d0] sm:$0xf] }
  0x67   : > { %v426_v59 = vld [vmem:[%s4231_s28 + $0x3d8] sm:$0xf]  ;;  %v428_v60 = vld [vmem:[%s4231_s28 + $0x3e0] sm:$0xf]  ;;  %425 = vst [vmem:[%s4238_s29 + $0x1e8] sm:$0xf] %v424_v58 }
  0x68   : > { %427 = vst [vmem:[%s4238_s29 + $0x1ec] sm:$0xf] %v426_v59  ;;  %429 = vst [vmem:[%s4238_s29 + $0x1f0] sm:$0xf] %v428_v60  ;;  %v430_v61 = vld [vmem:[%s4231_s28 + $0x3e8] sm:$0xf] }
  0x69   : > { %v432_v62 = vld [vmem:[%s4231_s28 + $0x3f0] sm:$0xf]  ;;  %v434_v63 = vld [vmem:[%s4231_s28 + $0x3f8] sm:$0xf]  ;;  %431 = vst [vmem:[%s4238_s29 + $0x1f4] sm:$0xf] %v430_v61 }
  0x6a   : > { %433 = vst [vmem:[%s4238_s29 + $0x1f8] sm:$0xf] %v432_v62  ;;  %435 = vst [vmem:[%s4238_s29 + $0x1fc] sm:$0xf] %v434_v63  ;;  %v436_v0 = vld [vmem:[%s4231_s28 + $0x400] sm:$0xf] }
  0x6b   : > { %v438_v1 = vld [vmem:[%s4231_s28 + $0x408] sm:$0xf]  ;;  %v440_v2 = vld [vmem:[%s4231_s28 + $0x410] sm:$0xf]  ;;  %437 = vst [vmem:[%s4238_s29 + $0x200] sm:$0xf] %v436_v0 }
  0x6c   : > { %439 = vst [vmem:[%s4238_s29 + $0x204] sm:$0xf] %v438_v1  ;;  %441 = vst [vmem:[%s4238_s29 + $0x208] sm:$0xf] %v440_v2  ;;  %v442_v3 = vld [vmem:[%s4231_s28 + $0x418] sm:$0xf] }
  0x6d   : > { %v444_v4 = vld [vmem:[%s4231_s28 + $0x420] sm:$0xf]  ;;  %v446_v5 = vld [vmem:[%s4231_s28 + $0x428] sm:$0xf]  ;;  %443 = vst [vmem:[%s4238_s29 + $0x20c] sm:$0xf] %v442_v3 }
  0x6e   : > { %445 = vst [vmem:[%s4238_s29 + $0x210] sm:$0xf] %v444_v4  ;;  %447 = vst [vmem:[%s4238_s29 + $0x214] sm:$0xf] %v446_v5  ;;  %v448_v6 = vld [vmem:[%s4231_s28 + $0x430] sm:$0xf] }
  0x6f   : > { %v450_v7 = vld [vmem:[%s4231_s28 + $0x438] sm:$0xf]  ;;  %v452_v8 = vld [vmem:[%s4231_s28 + $0x440] sm:$0xf]  ;;  %449 = vst [vmem:[%s4238_s29 + $0x218] sm:$0xf] %v448_v6 }
  0x70   : > { %451 = vst [vmem:[%s4238_s29 + $0x21c] sm:$0xf] %v450_v7  ;;  %453 = vst [vmem:[%s4238_s29 + $0x220] sm:$0xf] %v452_v8  ;;  %v454_v9 = vld [vmem:[%s4231_s28 + $0x448] sm:$0xf] }
  0x71   : > { %v456_v10 = vld [vmem:[%s4231_s28 + $0x450] sm:$0xf]  ;;  %v458_v11 = vld [vmem:[%s4231_s28 + $0x458] sm:$0xf]  ;;  %455 = vst [vmem:[%s4238_s29 + $0x224] sm:$0xf] %v454_v9 }
  0x72   : > { %457 = vst [vmem:[%s4238_s29 + $0x228] sm:$0xf] %v456_v10  ;;  %459 = vst [vmem:[%s4238_s29 + $0x22c] sm:$0xf] %v458_v11  ;;  %v460_v12 = vld [vmem:[%s4231_s28 + $0x460] sm:$0xf] }
  0x73   : > { %v462_v13 = vld [vmem:[%s4231_s28 + $0x468] sm:$0xf]  ;;  %v464_v14 = vld [vmem:[%s4231_s28 + $0x470] sm:$0xf]  ;;  %461 = vst [vmem:[%s4238_s29 + $0x230] sm:$0xf] %v460_v12 }
  0x74   : > { %463 = vst [vmem:[%s4238_s29 + $0x234] sm:$0xf] %v462_v13  ;;  %465 = vst [vmem:[%s4238_s29 + $0x238] sm:$0xf] %v464_v14  ;;  %v466_v15 = vld [vmem:[%s4231_s28 + $0x478] sm:$0xf] }
  0x75   : > { %v468_v16 = vld [vmem:[%s4231_s28 + $0x480] sm:$0xf]  ;;  %v470_v17 = vld [vmem:[%s4231_s28 + $0x488] sm:$0xf]  ;;  %467 = vst [vmem:[%s4238_s29 + $0x23c] sm:$0xf] %v466_v15 }
  0x76   : > { %469 = vst [vmem:[%s4238_s29 + $0x240] sm:$0xf] %v468_v16  ;;  %471 = vst [vmem:[%s4238_s29 + $0x244] sm:$0xf] %v470_v17  ;;  %v472_v18 = vld [vmem:[%s4231_s28 + $0x490] sm:$0xf] }
  0x77   : > { %v474_v19 = vld [vmem:[%s4231_s28 + $0x498] sm:$0xf]  ;;  %v476_v20 = vld [vmem:[%s4231_s28 + $0x4a0] sm:$0xf]  ;;  %473 = vst [vmem:[%s4238_s29 + $0x248] sm:$0xf] %v472_v18 }
  0x78   : > { %475 = vst [vmem:[%s4238_s29 + $0x24c] sm:$0xf] %v474_v19  ;;  %477 = vst [vmem:[%s4238_s29 + $0x250] sm:$0xf] %v476_v20  ;;  %v478_v21 = vld [vmem:[%s4231_s28 + $0x4a8] sm:$0xf] }
  0x79   : > { %v480_v22 = vld [vmem:[%s4231_s28 + $0x4b0] sm:$0xf]  ;;  %v482_v23 = vld [vmem:[%s4231_s28 + $0x4b8] sm:$0xf]  ;;  %479 = vst [vmem:[%s4238_s29 + $0x254] sm:$0xf] %v478_v21 }
  0x7a   : > { %481 = vst [vmem:[%s4238_s29 + $0x258] sm:$0xf] %v480_v22  ;;  %483 = vst [vmem:[%s4238_s29 + $0x25c] sm:$0xf] %v482_v23  ;;  %v484_v24 = vld [vmem:[%s4231_s28 + $0x4c0] sm:$0xf] }
  0x7b   : > { %v486_v25 = vld [vmem:[%s4231_s28 + $0x4c8] sm:$0xf]  ;;  %v488_v26 = vld [vmem:[%s4231_s28 + $0x4d0] sm:$0xf]  ;;  %485 = vst [vmem:[%s4238_s29 + $0x260] sm:$0xf] %v484_v24 }
  0x7c   : > { %487 = vst [vmem:[%s4238_s29 + $0x264] sm:$0xf] %v486_v25  ;;  %489 = vst [vmem:[%s4238_s29 + $0x268] sm:$0xf] %v488_v26  ;;  %v490_v27 = vld [vmem:[%s4231_s28 + $0x4d8] sm:$0xf] }
  0x7d   : > { %v492_v28 = vld [vmem:[%s4231_s28 + $0x4e0] sm:$0xf]  ;;  %v494_v29 = vld [vmem:[%s4231_s28 + $0x4e8] sm:$0xf]  ;;  %491 = vst [vmem:[%s4238_s29 + $0x26c] sm:$0xf] %v490_v27 }
  0x7e   : > { %493 = vst [vmem:[%s4238_s29 + $0x270] sm:$0xf] %v492_v28  ;;  %495 = vst [vmem:[%s4238_s29 + $0x274] sm:$0xf] %v494_v29  ;;  %v496_v30 = vld [vmem:[%s4231_s28 + $0x4f0] sm:$0xf] }
  0x7f   : > { %v498_v31 = vld [vmem:[%s4231_s28 + $0x4f8] sm:$0xf]  ;;  %v500_v32 = vld [vmem:[%s4231_s28 + $0x500] sm:$0xf]  ;;  %497 = vst [vmem:[%s4238_s29 + $0x278] sm:$0xf] %v496_v30 }
  0x80   : > { %499 = vst [vmem:[%s4238_s29 + $0x27c] sm:$0xf] %v498_v31  ;;  %501 = vst [vmem:[%s4238_s29 + $0x280] sm:$0xf] %v500_v32  ;;  %v502_v33 = vld [vmem:[%s4231_s28 + $0x508] sm:$0xf] }
  0x81   : > { %v504_v34 = vld [vmem:[%s4231_s28 + $0x510] sm:$0xf]  ;;  %v506_v35 = vld [vmem:[%s4231_s28 + $0x518] sm:$0xf]  ;;  %503 = vst [vmem:[%s4238_s29 + $0x284] sm:$0xf] %v502_v33 }
  0x82   : > { %505 = vst [vmem:[%s4238_s29 + $0x288] sm:$0xf] %v504_v34  ;;  %507 = vst [vmem:[%s4238_s29 + $0x28c] sm:$0xf] %v506_v35  ;;  %v508_v36 = vld [vmem:[%s4231_s28 + $0x520] sm:$0xf] }
  0x83   : > { %v510_v37 = vld [vmem:[%s4231_s28 + $0x528] sm:$0xf]  ;;  %v512_v38 = vld [vmem:[%s4231_s28 + $0x530] sm:$0xf]  ;;  %509 = vst [vmem:[%s4238_s29 + $0x290] sm:$0xf] %v508_v36 }
  0x84   : > { %511 = vst [vmem:[%s4238_s29 + $0x294] sm:$0xf] %v510_v37  ;;  %513 = vst [vmem:[%s4238_s29 + $0x298] sm:$0xf] %v512_v38  ;;  %v514_v39 = vld [vmem:[%s4231_s28 + $0x538] sm:$0xf] }
  0x85   : > { %v516_v40 = vld [vmem:[%s4231_s28 + $0x540] sm:$0xf]  ;;  %v518_v41 = vld [vmem:[%s4231_s28 + $0x548] sm:$0xf]  ;;  %515 = vst [vmem:[%s4238_s29 + $0x29c] sm:$0xf] %v514_v39 }
  0x86   : > { %517 = vst [vmem:[%s4238_s29 + $0x2a0] sm:$0xf] %v516_v40  ;;  %519 = vst [vmem:[%s4238_s29 + $0x2a4] sm:$0xf] %v518_v41  ;;  %v520_v42 = vld [vmem:[%s4231_s28 + $0x550] sm:$0xf] }
  0x87   : > { %v522_v43 = vld [vmem:[%s4231_s28 + $0x558] sm:$0xf]  ;;  %v524_v44 = vld [vmem:[%s4231_s28 + $0x560] sm:$0xf]  ;;  %521 = vst [vmem:[%s4238_s29 + $0x2a8] sm:$0xf] %v520_v42 }
  0x88   : > { %523 = vst [vmem:[%s4238_s29 + $0x2ac] sm:$0xf] %v522_v43  ;;  %525 = vst [vmem:[%s4238_s29 + $0x2b0] sm:$0xf] %v524_v44  ;;  %v526_v45 = vld [vmem:[%s4231_s28 + $0x568] sm:$0xf] }
  0x89   : > { %v528_v46 = vld [vmem:[%s4231_s28 + $0x570] sm:$0xf]  ;;  %v530_v47 = vld [vmem:[%s4231_s28 + $0x578] sm:$0xf]  ;;  %527 = vst [vmem:[%s4238_s29 + $0x2b4] sm:$0xf] %v526_v45 }
  0x8a   : > { %529 = vst [vmem:[%s4238_s29 + $0x2b8] sm:$0xf] %v528_v46  ;;  %531 = vst [vmem:[%s4238_s29 + $0x2bc] sm:$0xf] %v530_v47  ;;  %v532_v48 = vld [vmem:[%s4231_s28 + $0x580] sm:$0xf] }
  0x8b   : > { %v534_v49 = vld [vmem:[%s4231_s28 + $0x588] sm:$0xf]  ;;  %v536_v50 = vld [vmem:[%s4231_s28 + $0x590] sm:$0xf]  ;;  %533 = vst [vmem:[%s4238_s29 + $0x2c0] sm:$0xf] %v532_v48 }
  0x8c   : > { %535 = vst [vmem:[%s4238_s29 + $0x2c4] sm:$0xf] %v534_v49  ;;  %537 = vst [vmem:[%s4238_s29 + $0x2c8] sm:$0xf] %v536_v50  ;;  %v538_v51 = vld [vmem:[%s4231_s28 + $0x598] sm:$0xf] }
  0x8d   : > { %v540_v52 = vld [vmem:[%s4231_s28 + $0x5a0] sm:$0xf]  ;;  %v542_v53 = vld [vmem:[%s4231_s28 + $0x5a8] sm:$0xf]  ;;  %539 = vst [vmem:[%s4238_s29 + $0x2cc] sm:$0xf] %v538_v51 }
  0x8e   : > { %541 = vst [vmem:[%s4238_s29 + $0x2d0] sm:$0xf] %v540_v52  ;;  %543 = vst [vmem:[%s4238_s29 + $0x2d4] sm:$0xf] %v542_v53  ;;  %v544_v54 = vld [vmem:[%s4231_s28 + $0x5b0] sm:$0xf] }
  0x8f   : > { %v546_v55 = vld [vmem:[%s4231_s28 + $0x5b8] sm:$0xf]  ;;  %v548_v56 = vld [vmem:[%s4231_s28 + $0x5c0] sm:$0xf]  ;;  %545 = vst [vmem:[%s4238_s29 + $0x2d8] sm:$0xf] %v544_v54 }
  0x90   : > { %547 = vst [vmem:[%s4238_s29 + $0x2dc] sm:$0xf] %v546_v55  ;;  %549 = vst [vmem:[%s4238_s29 + $0x2e0] sm:$0xf] %v548_v56  ;;  %v550_v57 = vld [vmem:[%s4231_s28 + $0x5c8] sm:$0xf] }
  0x91   : > { %v552_v58 = vld [vmem:[%s4231_s28 + $0x5d0] sm:$0xf]  ;;  %v554_v59 = vld [vmem:[%s4231_s28 + $0x5d8] sm:$0xf]  ;;  %551 = vst [vmem:[%s4238_s29 + $0x2e4] sm:$0xf] %v550_v57 }
  0x92   : > { %553 = vst [vmem:[%s4238_s29 + $0x2e8] sm:$0xf] %v552_v58  ;;  %555 = vst [vmem:[%s4238_s29 + $0x2ec] sm:$0xf] %v554_v59  ;;  %v556_v60 = vld [vmem:[%s4231_s28 + $0x5e0] sm:$0xf] }
  0x93   : > { %v558_v61 = vld [vmem:[%s4231_s28 + $0x5e8] sm:$0xf]  ;;  %v560_v62 = vld [vmem:[%s4231_s28 + $0x5f0] sm:$0xf]  ;;  %557 = vst [vmem:[%s4238_s29 + $0x2f0] sm:$0xf] %v556_v60 }
  0x94   : > { %559 = vst [vmem:[%s4238_s29 + $0x2f4] sm:$0xf] %v558_v61  ;;  %561 = vst [vmem:[%s4238_s29 + $0x2f8] sm:$0xf] %v560_v62  ;;  %v562_v63 = vld [vmem:[%s4231_s28 + $0x5f8] sm:$0xf] }
  0x95   : > { %v564_v0 = vld [vmem:[%s4231_s28 + $0x600] sm:$0xf]  ;;  %v566_v1 = vld [vmem:[%s4231_s28 + $0x608] sm:$0xf]  ;;  %563 = vst [vmem:[%s4238_s29 + $0x2fc] sm:$0xf] %v562_v63 }
  0x96   : > { %565 = vst [vmem:[%s4238_s29 + $0x300] sm:$0xf] %v564_v0  ;;  %567 = vst [vmem:[%s4238_s29 + $0x304] sm:$0xf] %v566_v1  ;;  %v568_v2 = vld [vmem:[%s4231_s28 + $0x610] sm:$0xf] }
  0x97   : > { %v570_v3 = vld [vmem:[%s4231_s28 + $0x618] sm:$0xf]  ;;  %v572_v4 = vld [vmem:[%s4231_s28 + $0x620] sm:$0xf]  ;;  %569 = vst [vmem:[%s4238_s29 + $0x308] sm:$0xf] %v568_v2 }
  0x98   : > { %571 = vst [vmem:[%s4238_s29 + $0x30c] sm:$0xf] %v570_v3  ;;  %573 = vst [vmem:[%s4238_s29 + $0x310] sm:$0xf] %v572_v4  ;;  %v574_v5 = vld [vmem:[%s4231_s28 + $0x628] sm:$0xf] }
  0x99   : > { %v576_v6 = vld [vmem:[%s4231_s28 + $0x630] sm:$0xf]  ;;  %v578_v7 = vld [vmem:[%s4231_s28 + $0x638] sm:$0xf]  ;;  %575 = vst [vmem:[%s4238_s29 + $0x314] sm:$0xf] %v574_v5 }
  0x9a   : > { %577 = vst [vmem:[%s4238_s29 + $0x318] sm:$0xf] %v576_v6  ;;  %579 = vst [vmem:[%s4238_s29 + $0x31c] sm:$0xf] %v578_v7  ;;  %v580_v8 = vld [vmem:[%s4231_s28 + $0x640] sm:$0xf] }
  0x9b   : > { %v582_v9 = vld [vmem:[%s4231_s28 + $0x648] sm:$0xf]  ;;  %v584_v10 = vld [vmem:[%s4231_s28 + $0x650] sm:$0xf]  ;;  %581 = vst [vmem:[%s4238_s29 + $0x320] sm:$0xf] %v580_v8 }
  0x9c   : > { %583 = vst [vmem:[%s4238_s29 + $0x324] sm:$0xf] %v582_v9  ;;  %585 = vst [vmem:[%s4238_s29 + $0x328] sm:$0xf] %v584_v10  ;;  %v586_v11 = vld [vmem:[%s4231_s28 + $0x658] sm:$0xf] }
  0x9d   : > { %v588_v12 = vld [vmem:[%s4231_s28 + $0x660] sm:$0xf]  ;;  %v590_v13 = vld [vmem:[%s4231_s28 + $0x668] sm:$0xf]  ;;  %587 = vst [vmem:[%s4238_s29 + $0x32c] sm:$0xf] %v586_v11 }
  0x9e   : > { %589 = vst [vmem:[%s4238_s29 + $0x330] sm:$0xf] %v588_v12  ;;  %591 = vst [vmem:[%s4238_s29 + $0x334] sm:$0xf] %v590_v13  ;;  %v592_v14 = vld [vmem:[%s4231_s28 + $0x670] sm:$0xf] }
  0x9f   : > { %v594_v15 = vld [vmem:[%s4231_s28 + $0x678] sm:$0xf]  ;;  %v596_v16 = vld [vmem:[%s4231_s28 + $0x680] sm:$0xf]  ;;  %593 = vst [vmem:[%s4238_s29 + $0x338] sm:$0xf] %v592_v14 }
  0xa0   : > { %595 = vst [vmem:[%s4238_s29 + $0x33c] sm:$0xf] %v594_v15  ;;  %597 = vst [vmem:[%s4238_s29 + $0x340] sm:$0xf] %v596_v16  ;;  %v598_v17 = vld [vmem:[%s4231_s28 + $0x688] sm:$0xf] }
  0xa1   : > { %v600_v18 = vld [vmem:[%s4231_s28 + $0x690] sm:$0xf]  ;;  %v602_v19 = vld [vmem:[%s4231_s28 + $0x698] sm:$0xf]  ;;  %599 = vst [vmem:[%s4238_s29 + $0x344] sm:$0xf] %v598_v17 }
  0xa2   : > { %601 = vst [vmem:[%s4238_s29 + $0x348] sm:$0xf] %v600_v18  ;;  %603 = vst [vmem:[%s4238_s29 + $0x34c] sm:$0xf] %v602_v19  ;;  %v604_v20 = vld [vmem:[%s4231_s28 + $0x6a0] sm:$0xf] }
  0xa3   : > { %v606_v21 = vld [vmem:[%s4231_s28 + $0x6a8] sm:$0xf]  ;;  %v608_v22 = vld [vmem:[%s4231_s28 + $0x6b0] sm:$0xf]  ;;  %605 = vst [vmem:[%s4238_s29 + $0x350] sm:$0xf] %v604_v20 }
  0xa4   : > { %607 = vst [vmem:[%s4238_s29 + $0x354] sm:$0xf] %v606_v21  ;;  %609 = vst [vmem:[%s4238_s29 + $0x358] sm:$0xf] %v608_v22  ;;  %v610_v23 = vld [vmem:[%s4231_s28 + $0x6b8] sm:$0xf] }
  0xa5   : > { %v612_v24 = vld [vmem:[%s4231_s28 + $0x6c0] sm:$0xf]  ;;  %v614_v25 = vld [vmem:[%s4231_s28 + $0x6c8] sm:$0xf]  ;;  %611 = vst [vmem:[%s4238_s29 + $0x35c] sm:$0xf] %v610_v23 }
  0xa6   : > { %613 = vst [vmem:[%s4238_s29 + $0x360] sm:$0xf] %v612_v24  ;;  %615 = vst [vmem:[%s4238_s29 + $0x364] sm:$0xf] %v614_v25  ;;  %v616_v26 = vld [vmem:[%s4231_s28 + $0x6d0] sm:$0xf] }
  0xa7   : > { %v618_v27 = vld [vmem:[%s4231_s28 + $0x6d8] sm:$0xf]  ;;  %v620_v28 = vld [vmem:[%s4231_s28 + $0x6e0] sm:$0xf]  ;;  %617 = vst [vmem:[%s4238_s29 + $0x368] sm:$0xf] %v616_v26 }
  0xa8   : > { %619 = vst [vmem:[%s4238_s29 + $0x36c] sm:$0xf] %v618_v27  ;;  %621 = vst [vmem:[%s4238_s29 + $0x370] sm:$0xf] %v620_v28  ;;  %v622_v29 = vld [vmem:[%s4231_s28 + $0x6e8] sm:$0xf] }
  0xa9   : > { %v624_v30 = vld [vmem:[%s4231_s28 + $0x6f0] sm:$0xf]  ;;  %v626_v31 = vld [vmem:[%s4231_s28 + $0x6f8] sm:$0xf]  ;;  %623 = vst [vmem:[%s4238_s29 + $0x374] sm:$0xf] %v622_v29 }
  0xaa   : > { %625 = vst [vmem:[%s4238_s29 + $0x378] sm:$0xf] %v624_v30  ;;  %627 = vst [vmem:[%s4238_s29 + $0x37c] sm:$0xf] %v626_v31  ;;  %v628_v32 = vld [vmem:[%s4231_s28 + $0x700] sm:$0xf] }
  0xab   : > { %v630_v33 = vld [vmem:[%s4231_s28 + $0x708] sm:$0xf]  ;;  %v632_v34 = vld [vmem:[%s4231_s28 + $0x710] sm:$0xf]  ;;  %629 = vst [vmem:[%s4238_s29 + $0x380] sm:$0xf] %v628_v32 }
  0xac   : > { %631 = vst [vmem:[%s4238_s29 + $0x384] sm:$0xf] %v630_v33  ;;  %633 = vst [vmem:[%s4238_s29 + $0x388] sm:$0xf] %v632_v34  ;;  %v634_v35 = vld [vmem:[%s4231_s28 + $0x718] sm:$0xf] }
  0xad   : > { %v636_v36 = vld [vmem:[%s4231_s28 + $0x720] sm:$0xf]  ;;  %v638_v37 = vld [vmem:[%s4231_s28 + $0x728] sm:$0xf]  ;;  %635 = vst [vmem:[%s4238_s29 + $0x38c] sm:$0xf] %v634_v35 }
  0xae   : > { %637 = vst [vmem:[%s4238_s29 + $0x390] sm:$0xf] %v636_v36  ;;  %639 = vst [vmem:[%s4238_s29 + $0x394] sm:$0xf] %v638_v37  ;;  %v640_v38 = vld [vmem:[%s4231_s28 + $0x730] sm:$0xf] }
  0xaf   : > { %v642_v39 = vld [vmem:[%s4231_s28 + $0x738] sm:$0xf]  ;;  %v644_v40 = vld [vmem:[%s4231_s28 + $0x740] sm:$0xf]  ;;  %641 = vst [vmem:[%s4238_s29 + $0x398] sm:$0xf] %v640_v38 }
  0xb0   : > { %643 = vst [vmem:[%s4238_s29 + $0x39c] sm:$0xf] %v642_v39  ;;  %645 = vst [vmem:[%s4238_s29 + $0x3a0] sm:$0xf] %v644_v40  ;;  %v646_v41 = vld [vmem:[%s4231_s28 + $0x748] sm:$0xf] }
  0xb1   : > { %v648_v42 = vld [vmem:[%s4231_s28 + $0x750] sm:$0xf]  ;;  %v650_v43 = vld [vmem:[%s4231_s28 + $0x758] sm:$0xf]  ;;  %647 = vst [vmem:[%s4238_s29 + $0x3a4] sm:$0xf] %v646_v41 }
  0xb2   : > { %649 = vst [vmem:[%s4238_s29 + $0x3a8] sm:$0xf] %v648_v42  ;;  %651 = vst [vmem:[%s4238_s29 + $0x3ac] sm:$0xf] %v650_v43  ;;  %v652_v44 = vld [vmem:[%s4231_s28 + $0x760] sm:$0xf] }
  0xb3   : > { %v654_v45 = vld [vmem:[%s4231_s28 + $0x768] sm:$0xf]  ;;  %v656_v46 = vld [vmem:[%s4231_s28 + $0x770] sm:$0xf]  ;;  %653 = vst [vmem:[%s4238_s29 + $0x3b0] sm:$0xf] %v652_v44 }
  0xb4   : > { %655 = vst [vmem:[%s4238_s29 + $0x3b4] sm:$0xf] %v654_v45  ;;  %657 = vst [vmem:[%s4238_s29 + $0x3b8] sm:$0xf] %v656_v46  ;;  %v658_v47 = vld [vmem:[%s4231_s28 + $0x778] sm:$0xf] }
  0xb5   : > { %v660_v48 = vld [vmem:[%s4231_s28 + $0x780] sm:$0xf]  ;;  %v662_v49 = vld [vmem:[%s4231_s28 + $0x788] sm:$0xf]  ;;  %659 = vst [vmem:[%s4238_s29 + $0x3bc] sm:$0xf] %v658_v47 }
  0xb6   : > { %661 = vst [vmem:[%s4238_s29 + $0x3c0] sm:$0xf] %v660_v48  ;;  %663 = vst [vmem:[%s4238_s29 + $0x3c4] sm:$0xf] %v662_v49  ;;  %v664_v50 = vld [vmem:[%s4231_s28 + $0x790] sm:$0xf] }
  0xb7   : > { %v666_v51 = vld [vmem:[%s4231_s28 + $0x798] sm:$0xf]  ;;  %v668_v52 = vld [vmem:[%s4231_s28 + $0x7a0] sm:$0xf]  ;;  %665 = vst [vmem:[%s4238_s29 + $0x3c8] sm:$0xf] %v664_v50 }
  0xb8   : > { %667 = vst [vmem:[%s4238_s29 + $0x3cc] sm:$0xf] %v666_v51  ;;  %669 = vst [vmem:[%s4238_s29 + $0x3d0] sm:$0xf] %v668_v52  ;;  %v670_v53 = vld [vmem:[%s4231_s28 + $0x7a8] sm:$0xf] }
  0xb9   : > { %v672_v54 = vld [vmem:[%s4231_s28 + $0x7b0] sm:$0xf]  ;;  %v674_v55 = vld [vmem:[%s4231_s28 + $0x7b8] sm:$0xf]  ;;  %671 = vst [vmem:[%s4238_s29 + $0x3d4] sm:$0xf] %v670_v53 }
  0xba   : > { %673 = vst [vmem:[%s4238_s29 + $0x3d8] sm:$0xf] %v672_v54  ;;  %675 = vst [vmem:[%s4238_s29 + $0x3dc] sm:$0xf] %v674_v55  ;;  %v676_v56 = vld [vmem:[%s4231_s28 + $0x7c0] sm:$0xf] }
  0xbb   : > { %v678_v57 = vld [vmem:[%s4231_s28 + $0x7c8] sm:$0xf]  ;;  %v680_v58 = vld [vmem:[%s4231_s28 + $0x7d0] sm:$0xf]  ;;  %677 = vst [vmem:[%s4238_s29 + $0x3e0] sm:$0xf] %v676_v56 }
  0xbc   : > { %679 = vst [vmem:[%s4238_s29 + $0x3e4] sm:$0xf] %v678_v57  ;;  %681 = vst [vmem:[%s4238_s29 + $0x3e8] sm:$0xf] %v680_v58  ;;  %v682_v59 = vld [vmem:[%s4231_s28 + $0x7d8] sm:$0xf] }
  0xbd   : > { %v684_v60 = vld [vmem:[%s4231_s28 + $0x7e0] sm:$0xf]  ;;  %v686_v61 = vld [vmem:[%s4231_s28 + $0x7e8] sm:$0xf]  ;;  %683 = vst [vmem:[%s4238_s29 + $0x3ec] sm:$0xf] %v682_v59 }
  0xbe   : > { %685 = vst [vmem:[%s4238_s29 + $0x3f0] sm:$0xf] %v684_v60  ;;  %687 = vst [vmem:[%s4238_s29 + $0x3f4] sm:$0xf] %v686_v61  ;;  %v688_v62 = vld [vmem:[%s4231_s28 + $0x7f0] sm:$0xf] }
  0xbf   : > { %v690_v63 = vld [vmem:[%s4231_s28 + $0x7f8] sm:$0xf]  ;;  %v692_v0 = vld [vmem:[%s4231_s28 + $0x800] sm:$0xf]  ;;  %689 = vst [vmem:[%s4238_s29 + $0x3f8] sm:$0xf] %v688_v62 }
  0xc0   : > { %691 = vst [vmem:[%s4238_s29 + $0x3fc] sm:$0xf] %v690_v63  ;;  %693 = vst [vmem:[%s4238_s29 + $0x400] sm:$0xf] %v692_v0  ;;  %v694_v1 = vld [vmem:[%s4231_s28 + $0x808] sm:$0xf] }
  0xc1   : > { %v696_v2 = vld [vmem:[%s4231_s28 + $0x810] sm:$0xf]  ;;  %v698_v3 = vld [vmem:[%s4231_s28 + $0x818] sm:$0xf]  ;;  %695 = vst [vmem:[%s4238_s29 + $0x404] sm:$0xf] %v694_v1 }
  0xc2   : > { %697 = vst [vmem:[%s4238_s29 + $0x408] sm:$0xf] %v696_v2  ;;  %699 = vst [vmem:[%s4238_s29 + $0x40c] sm:$0xf] %v698_v3  ;;  %v700_v4 = vld [vmem:[%s4231_s28 + $0x820] sm:$0xf] }
  0xc3   : > { %v702_v5 = vld [vmem:[%s4231_s28 + $0x828] sm:$0xf]  ;;  %v704_v6 = vld [vmem:[%s4231_s28 + $0x830] sm:$0xf]  ;;  %701 = vst [vmem:[%s4238_s29 + $0x410] sm:$0xf] %v700_v4 }
  0xc4   : > { %703 = vst [vmem:[%s4238_s29 + $0x414] sm:$0xf] %v702_v5  ;;  %705 = vst [vmem:[%s4238_s29 + $0x418] sm:$0xf] %v704_v6  ;;  %v706_v7 = vld [vmem:[%s4231_s28 + $0x838] sm:$0xf] }
  0xc5   : > { %v708_v8 = vld [vmem:[%s4231_s28 + $0x840] sm:$0xf]  ;;  %v710_v9 = vld [vmem:[%s4231_s28 + $0x848] sm:$0xf]  ;;  %707 = vst [vmem:[%s4238_s29 + $0x41c] sm:$0xf] %v706_v7 }
  0xc6   : > { %709 = vst [vmem:[%s4238_s29 + $0x420] sm:$0xf] %v708_v8  ;;  %711 = vst [vmem:[%s4238_s29 + $0x424] sm:$0xf] %v710_v9  ;;  %v712_v10 = vld [vmem:[%s4231_s28 + $0x850] sm:$0xf] }
  0xc7   : > { %v714_v11 = vld [vmem:[%s4231_s28 + $0x858] sm:$0xf]  ;;  %v716_v12 = vld [vmem:[%s4231_s28 + $0x860] sm:$0xf]  ;;  %713 = vst [vmem:[%s4238_s29 + $0x428] sm:$0xf] %v712_v10 }
  0xc8   : > { %715 = vst [vmem:[%s4238_s29 + $0x42c] sm:$0xf] %v714_v11  ;;  %717 = vst [vmem:[%s4238_s29 + $0x430] sm:$0xf] %v716_v12  ;;  %v718_v13 = vld [vmem:[%s4231_s28 + $0x868] sm:$0xf] }
  0xc9   : > { %v720_v14 = vld [vmem:[%s4231_s28 + $0x870] sm:$0xf]  ;;  %v722_v15 = vld [vmem:[%s4231_s28 + $0x878] sm:$0xf]  ;;  %719 = vst [vmem:[%s4238_s29 + $0x434] sm:$0xf] %v718_v13 }
  0xca   : > { %721 = vst [vmem:[%s4238_s29 + $0x438] sm:$0xf] %v720_v14  ;;  %723 = vst [vmem:[%s4238_s29 + $0x43c] sm:$0xf] %v722_v15  ;;  %v724_v16 = vld [vmem:[%s4231_s28 + $0x880] sm:$0xf] }
  0xcb   : > { %v726_v17 = vld [vmem:[%s4231_s28 + $0x888] sm:$0xf]  ;;  %v728_v18 = vld [vmem:[%s4231_s28 + $0x890] sm:$0xf]  ;;  %725 = vst [vmem:[%s4238_s29 + $0x440] sm:$0xf] %v724_v16 }
  0xcc   : > { %727 = vst [vmem:[%s4238_s29 + $0x444] sm:$0xf] %v726_v17  ;;  %729 = vst [vmem:[%s4238_s29 + $0x448] sm:$0xf] %v728_v18  ;;  %v730_v19 = vld [vmem:[%s4231_s28 + $0x898] sm:$0xf] }
  0xcd   : > { %v732_v20 = vld [vmem:[%s4231_s28 + $0x8a0] sm:$0xf]  ;;  %v734_v21 = vld [vmem:[%s4231_s28 + $0x8a8] sm:$0xf]  ;;  %731 = vst [vmem:[%s4238_s29 + $0x44c] sm:$0xf] %v730_v19 }
  0xce   : > { %733 = vst [vmem:[%s4238_s29 + $0x450] sm:$0xf] %v732_v20  ;;  %735 = vst [vmem:[%s4238_s29 + $0x454] sm:$0xf] %v734_v21  ;;  %v736_v22 = vld [vmem:[%s4231_s28 + $0x8b0] sm:$0xf] }
  0xcf   : > { %v738_v23 = vld [vmem:[%s4231_s28 + $0x8b8] sm:$0xf]  ;;  %v740_v24 = vld [vmem:[%s4231_s28 + $0x8c0] sm:$0xf]  ;;  %737 = vst [vmem:[%s4238_s29 + $0x458] sm:$0xf] %v736_v22 }
  0xd0   : > { %739 = vst [vmem:[%s4238_s29 + $0x45c] sm:$0xf] %v738_v23  ;;  %741 = vst [vmem:[%s4238_s29 + $0x460] sm:$0xf] %v740_v24  ;;  %v742_v25 = vld [vmem:[%s4231_s28 + $0x8c8] sm:$0xf] }
  0xd1   : > { %v744_v26 = vld [vmem:[%s4231_s28 + $0x8d0] sm:$0xf]  ;;  %v746_v27 = vld [vmem:[%s4231_s28 + $0x8d8] sm:$0xf]  ;;  %743 = vst [vmem:[%s4238_s29 + $0x464] sm:$0xf] %v742_v25 }
  0xd2   : > { %745 = vst [vmem:[%s4238_s29 + $0x468] sm:$0xf] %v744_v26  ;;  %747 = vst [vmem:[%s4238_s29 + $0x46c] sm:$0xf] %v746_v27  ;;  %v748_v28 = vld [vmem:[%s4231_s28 + $0x8e0] sm:$0xf] }
  0xd3   : > { %v750_v29 = vld [vmem:[%s4231_s28 + $0x8e8] sm:$0xf]  ;;  %v752_v30 = vld [vmem:[%s4231_s28 + $0x8f0] sm:$0xf]  ;;  %749 = vst [vmem:[%s4238_s29 + $0x470] sm:$0xf] %v748_v28 }
  0xd4   : > { %751 = vst [vmem:[%s4238_s29 + $0x474] sm:$0xf] %v750_v29  ;;  %753 = vst [vmem:[%s4238_s29 + $0x478] sm:$0xf] %v752_v30  ;;  %v754_v31 = vld [vmem:[%s4231_s28 + $0x8f8] sm:$0xf] }
  0xd5   : > { %755 = vst [vmem:[%s4238_s29 + $0x47c] sm:$0xf] %v754_v31 }
  0xd6 PF: > { %p3409_p8 = scmp.ge.s32.totalorder %s4161_s16, 1  ;;  %p1359_p9 = scmp.lt.s32.totalorder %s4161_s16, 3 }
  0xd8   : > { %p1360_p10 = pnand %p3409_p8, %p1359_p9 }
  0xd9   : > { %s1366_s30 = sand.u32 (!%p1360_p10), 1, %s4145_s12   ;;  %v3959_v32 = vld [vmem:[%s5098_s0 + $0x4] ss:$72 sps:$4 sm:$0xff] (!%p1360_p10)   ;;  %v3957_v0 = vld [vmem:[%s5098_s0] ss:$72 sps:$4 sm:$0xff] (!%p1360_p10)   ;;  %p1404_p11 = scmp.lt.s32.totalorder (!%p1360_p10), %s4153_s14, 1 }
  0xda   : > { %1363 = sbr.rel (%p1360_p10) target bundleno = 618 (0x26a), region = 69  ;;  %v3962_v33 = vld [vmem:[%s5098_s0 + $0xc] ss:$72 sps:$4 sm:$0xff] (!%p1360_p10)   ;;  %2816 = vmatprep.mubr.bf16.mxu0 (!%p1360_p10), %v3959_v32  ;;  %v3960_v2 = vld [vmem:[%s5098_s0 + $0x8] ss:$72 sps:$4 sm:$0xff] (!%p1360_p10)   ;;  %s3410_s19 = sshll.u32 (!%p1360_p10), %s1366_s30, 4 }
  0xdb   : > { %s3884_s4 = smul.u32 (!%p1360_p10), 1152, %s1366_s30  ;;  %2865 = vmatprep.mubr.bf16.mxu1 (!%p1360_p10), %v3962_v33  ;;  %v3983_v4 = vld [vmem:[%s5098_s0 + $0x94] ss:$72 sps:$4 sm:$0xff] (!%p1360_p10)   ;;  %v3985_v11 = vld [vmem:[%s5098_s0 + $0x90] ss:$72 sps:$4 sm:$0xff] (!%p1360_p10)   ;;  %s1396_s20 = scalar_lea.vmem (!%p1360_p10), [#allocation3], %s3410_s19 }
  0xdc   : > { %v3988_v28 = vld [vmem:[%s5098_s0 + $0x9c] ss:$72 sps:$4 sm:$0xff] (!%p1360_p10)   ;;  %v3992_v31 = vld [vmem:[%s5098_s0 + $0x98] ss:$72 sps:$4 sm:$0xff] (!%p1360_p10)  }
  0xdd   : > { %s4822_s9 = scalar_lea.vmem (!%p1360_p10), [#allocation2], %s3884_s4 }
  0xde   : > { %v3925_v34 = vld [vmem:[%s4822_s9 + $0x40] sm:$0xff] (!%p1360_p10)   ;;  %v3929_v38 = vld [vmem:[%s4822_s9 + $0x48] sm:$0xff] (!%p1360_p10)   ;;  %v3933_v42 = vld [vmem:[%s4822_s9 + $0x50] sm:$0xff] (!%p1360_p10)  }
  0xdf   : > { %v3926_v35 = vld [vmem:[%s4822_s9 + $0xc0] sm:$0xff] (!%p1360_p10)   ;;  %3615 = vmatprep.subr.bf16.mxu0 (!%p1360_p10), %v3925_v34  ;;  %v3930_v39 = vld [vmem:[%s4822_s9 + $0xc8] sm:$0xff] (!%p1360_p10)   ;;  %v3934_v43 = vld [vmem:[%s4822_s9 + $0xd0] sm:$0xff] (!%p1360_p10)  }
  0xe0   : > { %v3927_v36 = vld [vmem:[%s4822_s9] sm:$0xff] (!%p1360_p10)   ;;  %3643 = vmatprep.subr.bf16.mxu1 (!%p1360_p10), %v3926_v35  ;;  %v3931_v40 = vld [vmem:[%s4822_s9 + $0x8] sm:$0xff] (!%p1360_p10)   ;;  %v3935_v44 = vld [vmem:[%s4822_s9 + $0x10] sm:$0xff] (!%p1360_p10)  }
  0xe1   : > { %v3928_v37 = vld [vmem:[%s4822_s9 + $0x80] sm:$0xff]   ;;  %3616 = vmatpush3.bf16.msra.mxu0 %v3927_v36  ;;  %v3932_v41 = vld [vmem:[%s4822_s9 + $0x88] sm:$0xff]   ;;  %v3936_v45 = vld [vmem:[%s4822_s9 + $0x90] sm:$0xff]   ;;  %s1405_s10 = scalar_select %p1404_p11, %s4153_s14, 1 }
  0xe2   : > { %3644 = vmatpush3.bf16.msra.mxu1 %v3928_v37  ;;  %3617 = vmatprep.subr.bf16.mxu0 %v3929_v38  ;;  %v3937_v46 = vld [vmem:[%s4822_s9 + $0x58] sm:$0xff]   ;;  %v3941_v50 = vld [vmem:[%s4822_s9 + $0x60] sm:$0xff]   ;;  %v3945_v54 = vld [vmem:[%s4822_s9 + $0x68] sm:$0xff]   ;;  %s3597_s23 = sshll.u32 (%p4218_p6), %s4153_s14, 2 }
  0xe3   : > { %3645 = vmatprep.subr.bf16.mxu1 %v3930_v39  ;;  %v3938_v47 = vld [vmem:[%s4822_s9 + $0xd8] sm:$0xff]   ;;  %v3942_v51 = vld [vmem:[%s4822_s9 + $0xe0] sm:$0xff]   ;;  %v3946_v55 = vld [vmem:[%s4822_s9 + $0xe8] sm:$0xff]   ;;  %s3260_s24 = scalar_lea.vmem (%p4218_p6), %s5101_s3, %s3597_s23 }
  0xe4   : > { %v3939_v48 = vld [vmem:[%s4822_s9 + $0x18] sm:$0xff]   ;;  %v3943_v52 = vld [vmem:[%s4822_s9 + $0x20] sm:$0xff]   ;;  %v3947_v56 = vld [vmem:[%s4822_s9 + $0x28] sm:$0xff]  }
  0xe5   : > { %3618 = vmatpush3.bf16.msra.mxu0 %v3931_v40  ;;  %v3940_v49 = vld [vmem:[%s4822_s9 + $0x98] sm:$0xff]   ;;  %v3944_v53 = vld [vmem:[%s4822_s9 + $0xa0] sm:$0xff]   ;;  %v3948_v57 = vld [vmem:[%s4822_s9 + $0xa8] sm:$0xff]  }
  0xe6   : > { %3646 = vmatpush3.bf16.msra.mxu1 %v3932_v41  ;;  %3619 = vmatprep.subr.bf16.mxu0 %v3933_v42  ;;  %v3949_v58 = vld [vmem:[%s4822_s9 + $0x70] sm:$0xff]   ;;  %v3953_v62 = vld [vmem:[%s4822_s9 + $0x78] sm:$0xff]   ;;  %v3963_v5 = vld [vmem:[%s4822_s9 + $0x140] sm:$0xff]  }
  0xe7   : > { %3647 = vmatprep.subr.bf16.mxu1 %v3934_v43  ;;  %v3950_v59 = vld [vmem:[%s4822_s9 + $0xf0] sm:$0xff]   ;;  %v3954_v63 = vld [vmem:[%s4822_s9 + $0xf8] sm:$0xff]   ;;  %v3964_v6 = vld [vmem:[%s4822_s9 + $0x1c0] sm:$0xff]  }
  0xe8   : > { %v3951_v60 = vld [vmem:[%s4822_s9 + $0x30] sm:$0xff]   ;;  %v3955_v1 = vld [vmem:[%s4822_s9 + $0x38] sm:$0xff]   ;;  %v3965_v7 = vld [vmem:[%s4822_s9 + $0x100] sm:$0xff]  }
  0xe9   : > { %3620 = vmatpush3.bf16.msra.mxu0 %v3935_v44  ;;  %v3952_v61 = vld [vmem:[%s4822_s9 + $0xb0] sm:$0xff]   ;;  %v3956_v3 = vld [vmem:[%s4822_s9 + $0xb8] sm:$0xff]   ;;  %v3966_v8 = vld [vmem:[%s4822_s9 + $0x180] sm:$0xff]  }
  0xea   : > { %3648 = vmatpush3.bf16.msra.mxu1 %v3936_v45  ;;  %3621 = vmatprep.subr.bf16.mxu0 %v3937_v46  ;;  %v3967_v9 = vld [vmem:[%s4822_s9 + $0x148] sm:$0xff]   ;;  %v3971_v14 = vld [vmem:[%s4822_s9 + $0x150] sm:$0xff]   ;;  %v3975_v18 = vld [vmem:[%s4822_s9 + $0x158] sm:$0xff]  }
  0xeb   : > { %3649 = vmatprep.subr.bf16.mxu1 %v3938_v47  ;;  %v3968_v10 = vld [vmem:[%s4822_s9 + $0x1c8] sm:$0xff]   ;;  %v3972_v15 = vld [vmem:[%s4822_s9 + $0x1d0] sm:$0xff]   ;;  %v3976_v19 = vld [vmem:[%s4822_s9 + $0x1d8] sm:$0xff]  }
  0xec   : > { %v3969_v12 = vld [vmem:[%s4822_s9 + $0x108] sm:$0xff]   ;;  %v3973_v16 = vld [vmem:[%s4822_s9 + $0x110] sm:$0xff]   ;;  %v3977_v20 = vld [vmem:[%s4822_s9 + $0x118] sm:$0xff]  }
  0xed   : > { %3622 = vmatpush3.bf16.msra.mxu0 %v3939_v48  ;;  %v3970_v13 = vld [vmem:[%s4822_s9 + $0x188] sm:$0xff]   ;;  %v3974_v17 = vld [vmem:[%s4822_s9 + $0x190] sm:$0xff]   ;;  %v3978_v21 = vld [vmem:[%s4822_s9 + $0x198] sm:$0xff]  }
  0xee   : > { %3650 = vmatpush3.bf16.msra.mxu1 %v3940_v49  ;;  %3623 = vmatprep.subr.bf16.mxu0 %v3941_v50  ;;  %v3979_v22 = vld [vmem:[%s4822_s9 + $0x160] sm:$0xff]   ;;  %v3986_v26 = vld [vmem:[%s4822_s9 + $0x168] sm:$0xff]   ;;  %v3993_v32 = vld [vmem:[%s4822_s9 + $0x170] sm:$0xff]  }
  0xef   : > { %3651 = vmatprep.subr.bf16.mxu1 %v3942_v51  ;;  %v3980_v23 = vld [vmem:[%s4822_s9 + $0x1e0] sm:$0xff]   ;;  %v3987_v27 = vld [vmem:[%s4822_s9 + $0x1e8] sm:$0xff]   ;;  %v3994_v33 = vld [vmem:[%s4822_s9 + $0x1f0] sm:$0xff]  }
  0xf0   : > { %v3981_v24 = vld [vmem:[%s4822_s9 + $0x120] sm:$0xff]   ;;  %v3990_v29 = vld [vmem:[%s4822_s9 + $0x128] sm:$0xff]   ;;  %v3995_v34 = vld [vmem:[%s4822_s9 + $0x130] sm:$0xff]  }
  0xf1   : > { %3624 = vmatpush3.bf16.msra.mxu0 %v3943_v52  ;;  %v3982_v25 = vld [vmem:[%s4822_s9 + $0x1a0] sm:$0xff]   ;;  %v3991_v30 = vld [vmem:[%s4822_s9 + $0x1a8] sm:$0xff]   ;;  %v3996_v35 = vld [vmem:[%s4822_s9 + $0x1b0] sm:$0xff]  }
  0xf2   : > { %3652 = vmatpush3.bf16.msra.mxu1 %v3944_v53  ;;  %3625 = vmatprep.subr.bf16.mxu0 %v3945_v54  ;;  %v3997_v36 = vld [vmem:[%s4822_s9 + $0x178] sm:$0xff]   ;;  %v4007_v44 = vld [vmem:[%s4822_s9 + $0x240] sm:$0xff]   ;;  %v4011_v48 = vld [vmem:[%s4822_s9 + $0x248] sm:$0xff]  }
  0xf3   : > { %3653 = vmatprep.subr.bf16.mxu1 %v3946_v55  ;;  %v3998_v37 = vld [vmem:[%s4822_s9 + $0x1f8] sm:$0xff]   ;;  %v4008_v45 = vld [vmem:[%s4822_s9 + $0x2c0] sm:$0xff]   ;;  %v4012_v49 = vld [vmem:[%s4822_s9 + $0x2c8] sm:$0xff]  }
  0xf4   : > { %v3999_v38 = vld [vmem:[%s4822_s9 + $0x138] sm:$0xff]   ;;  %v4009_v46 = vld [vmem:[%s4822_s9 + $0x200] sm:$0xff]   ;;  %v4013_v50 = vld [vmem:[%s4822_s9 + $0x208] sm:$0xff]  }
  0xf5   : > { %3626 = vmatpush3.bf16.msra.mxu0 %v3947_v56  ;;  %v4000_v39 = vld [vmem:[%s4822_s9 + $0x1b8] sm:$0xff]   ;;  %v4010_v47 = vld [vmem:[%s4822_s9 + $0x280] sm:$0xff]   ;;  %v4014_v51 = vld [vmem:[%s4822_s9 + $0x288] sm:$0xff]  }
  0xf6   : > { %3654 = vmatpush3.bf16.msra.mxu1 %v3948_v57  ;;  %3627 = vmatprep.subr.bf16.mxu0 %v3949_v58  ;;  %v4001_v40 = vld [vmem:[%s5098_s0 + $0x10] ss:$72 sps:$4 sm:$0xff]   ;;  %v4003_v41 = vld [vmem:[%s5098_s0 + $0x14] ss:$72 sps:$4 sm:$0xff]   ;;  %v4015_v52 = vld [vmem:[%s5098_s0 + $0xa4] ss:$72 sps:$4 sm:$0xff]  }
  0xf7   : > { %3655 = vmatprep.subr.bf16.mxu1 %v3950_v59  ;;  %v4004_v42 = vld [vmem:[%s5098_s0 + $0x18] ss:$72 sps:$4 sm:$0xff]   ;;  %v4006_v43 = vld [vmem:[%s5098_s0 + $0x1c] ss:$72 sps:$4 sm:$0xff]   ;;  %v4018_v54 = vld [vmem:[%s4822_s9 + $0x250] sm:$0xff]  }
  0xf8   : > { %v4017_v53 = vld [vmem:[%s5098_s0 + $0xa0] ss:$72 sps:$4 sm:$0xff]   ;;  %v4019_v55 = vld [vmem:[%s4822_s9 + $0x2d0] sm:$0xff]  }
  0xf9   : > { %3628 = vmatpush3.bf16.msra.mxu0 %v3951_v60  ;;  %v4020_v56 = vld [vmem:[%s5098_s0 + $0xac] ss:$72 sps:$4 sm:$0xff]   ;;  %v4024_v59 = vld [vmem:[%s5098_s0 + $0xa8] ss:$72 sps:$4 sm:$0xff]   ;;  %v4025_v60 = vld [vmem:[%s4822_s9 + $0x258] sm:$0xff]  }
  0xfa   : > { %3656 = vmatpush3.bf16.msra.mxu1 %v3952_v61  ;;  %3629 = vmatprep.subr.bf16.mxu0 %v3953_v62  ;;  %v4022_v57 = vld [vmem:[%s4822_s9 + $0x210] sm:$0xff]   ;;  %v4026_v61 = vld [vmem:[%s4822_s9 + $0x2d8] sm:$0xff]  }
  0xfb   : > { %3657 = vmatprep.subr.bf16.mxu1 %v3954_v63  ;;  %v4023_v58 = vld [vmem:[%s4822_s9 + $0x290] sm:$0xff]   ;;  %v4027_v62 = vld [vmem:[%s4822_s9 + $0x218] sm:$0xff]  }
  0xfc   : > { %v4028_v63 = vld [vmem:[%s4822_s9 + $0x298] sm:$0xff]  }
  0xfd   : > { %3630 = vmatpush3.bf16.msra.mxu0 %v3955_v1  ;;  %v4030_v1 = vld [vmem:[%s4822_s9 + $0x2e0] sm:$0xff]  }
  0xfe   : > { %3658 = vmatpush3.bf16.msra.mxu1 %v3956_v3  ;;  %3671 = vmatprep.subr.bf16.mxu0 %v3963_v5  ;;  %v4032_v3 = vld [vmem:[%s4822_s9 + $0x2a0] sm:$0xff]   ;;  %v4034_v5 = vld [vmem:[%s4822_s9 + $0x2e8] sm:$0xff]  }
  0xff   : > { %3699 = vmatprep.subr.bf16.mxu1 %v3964_v6  ;;  %v4035_v6 = vld [vmem:[%s4822_s9 + $0x228] sm:$0xff]  }
 0x100   : > { %2817 = vmatmul.mubr.bf16.vlgmr.msra.gmra.mrb[0].mxu0 %v3957_v0  ;;  %v4029_v0 = vld [vmem:[%s4822_s9 + $0x260] sm:$0xff]  }
 0x101   : > { %2866 = vmatmul.mubr.bf16.vlgmr.msra.gmra.mrb[0].mxu1 %v3960_v2  ;;  %3672 = vmatpush3.bf16.msra.mxu0 %v3965_v7  ;;  %v4031_v2 = vld [vmem:[%s4822_s9 + $0x220] sm:$0xff]   ;;  %v4036_v7 = vld [vmem:[%s4822_s9 + $0x2a8] sm:$0xff]  }
 0x102   : > { %3700 = vmatpush3.bf16.msra.mxu1 %v3966_v8  ;;  %2824 = vmatprep.mubr.bf16.mxu0 %v3983_v4  ;;  %v4033_v4 = vld [vmem:[%s4822_s9 + $0x268] sm:$0xff]   ;;  %v4037_v8 = vld [vmem:[%s4822_s9 + $0x270] sm:$0xff]  }
 0x103   : > { %3673 = vmatprep.subr.bf16.mxu0 %v3967_v9  ;;  %3701 = vmatprep.subr.bf16.mxu1 %v3968_v10  ;;  %v4038_v9 = vld [vmem:[%s4822_s9 + $0x2f0] sm:$0xff]  }
 0x104   : > { %2873 = vmatprep.mubr.bf16.mxu1 %v3988_v28  ;;  %v4039_v10 = vld [vmem:[%s4822_s9 + $0x230] sm:$0xff]  }
 0x105   : > { %3674 = vmatpush3.bf16.msra.mxu0 %v3969_v12  ;;  %v4041_v12 = vld [vmem:[%s4822_s9 + $0x278] sm:$0xff]  }
 0x106   : > { %3702 = vmatpush3.bf16.msra.mxu1 %v3970_v13  ;;  %3675 = vmatprep.subr.bf16.mxu0 %v3971_v14  ;;  %v4042_v13 = vld [vmem:[%s4822_s9 + $0x2f8] sm:$0xff]  }
 0x107   : > { %3703 = vmatprep.subr.bf16.mxu1 %v3972_v15  ;;  %v4043_v14 = vld [vmem:[%s4822_s9 + $0x238] sm:$0xff]  }
 0x108   : > { %2825 = vmatmul.mubr.bf16.gmra.mrb[4].mxu0 %v3985_v11  ;;  %v4040_v11 = vld [vmem:[%s4822_s9 + $0x2b0] sm:$0xff]   ;;  %v4044_v15 = vld [vmem:[%s4822_s9 + $0x2b8] sm:$0xff]  }
 0x109   : > { %3676 = vmatpush3.bf16.msra.mxu0 %v3973_v16  ;;  %2874 = vmatmul.mubr.bf16.gmra.mrb[4].mxu1 %v3992_v31  ;;  %v4045_v16 = vld [vmem:[%s5098_s0 + $0x20] ss:$72 sps:$4 sm:$0xff]   ;;  %v4059_v28 = vld [vmem:[%s5098_s0 + $0xb4] ss:$72 sps:$4 sm:$0xff]  }
 0x10a   : > { %3704 = vmatpush3.bf16.msra.mxu1 %v3974_v17  ;;  %3677 = vmatprep.subr.bf16.mxu0 %v3975_v18  ;;  %v4047_v17 = vld [vmem:[%s5098_s0 + $0x24] ss:$72 sps:$4 sm:$0xff]   ;;  %v4048_v18 = vld [vmem:[%s5098_s0 + $0x28] ss:$72 sps:$4 sm:$0xff]  }
 0x10b   : > { %3705 = vmatprep.subr.bf16.mxu1 %v3976_v19  ;;  %2914 = vmatprep.mubr.bf16.mxu0 %v4003_v41  ;;  %v4050_v19 = vld [vmem:[%s5098_s0 + $0x2c] ss:$72 sps:$4 sm:$0xff]   ;;  %v4074_v41 = vld [vmem:[%s4822_s9 + $0x3e0] sm:$0xff]  }
 0x10c   : > { %2963 = vmatprep.mubr.bf16.mxu1 %v4006_v43  ;;  %v4063_v31 = vld [vmem:[%s4822_s9 + $0x3d0] sm:$0xff]   ;;  %v4076_v43 = vld [vmem:[%s4822_s9 + $0x3a0] sm:$0xff]  }
 0x10d   : > { %3678 = vmatpush3.bf16.msra.mxu0 %v3977_v20  ;;  %v4051_v20 = vld [vmem:[%s4822_s9 + $0x340] sm:$0xff]  }
 0x10e   : > { %3706 = vmatpush3.bf16.msra.mxu1 %v3978_v21  ;;  %3679 = vmatprep.subr.bf16.mxu0 %v3979_v22  ;;  %v4052_v21 = vld [vmem:[%s4822_s9 + $0x3c0] sm:$0xff]  }
 0x10f   : > { %3707 = vmatprep.subr.bf16.mxu1 %v3980_v23  ;;  %v4053_v22 = vld [vmem:[%s4822_s9 + $0x300] sm:$0xff]  }
 0x110   : > { %v4054_v23 = vld [vmem:[%s4822_s9 + $0x380] sm:$0xff]  }
 0x111   : > { %3680 = vmatpush3.bf16.msra.mxu0 %v3981_v24  ;;  %v4055_v24 = vld [vmem:[%s4822_s9 + $0x348] sm:$0xff]  }
 0x112   : > { %3708 = vmatpush3.bf16.msra.mxu1 %v3982_v25  ;;  %3681 = vmatprep.subr.bf16.mxu0 %v3986_v26  ;;  %v4056_v25 = vld [vmem:[%s4822_s9 + $0x3c8] sm:$0xff]  }
 0x113   : > { %3709 = vmatprep.subr.bf16.mxu1 %v3987_v27  ;;  %v4057_v26 = vld [vmem:[%s4822_s9 + $0x308] sm:$0xff]  }
 0x114   : > { %v4058_v27 = vld [vmem:[%s4822_s9 + $0x388] sm:$0xff]  }
 0x115   : > { %3682 = vmatpush3.bf16.msra.mxu0 %v3990_v29  ;;  %v4061_v29 = vld [vmem:[%s5098_s0 + $0xb0] ss:$72 sps:$4 sm:$0xff]  }
 0x116   : > { %3710 = vmatpush3.bf16.msra.mxu1 %v3991_v30  ;;  %3683 = vmatprep.subr.bf16.mxu0 %v3993_v32  ;;  %v4062_v30 = vld [vmem:[%s4822_s9 + $0x350] sm:$0xff]   ;;  %v4064_v32 = vld [vmem:[%s5098_s0 + $0xbc] ss:$72 sps:$4 sm:$0xff]  }
 0x117   : > { %3711 = vmatprep.subr.bf16.mxu1 %v3994_v33  ;;  %v4066_v33 = vld [vmem:[%s4822_s9 + $0x310] sm:$0xff]  }
 0x119   : > { %3684 = vmatpush3.bf16.msra.mxu0 %v3995_v34  ;;  %v4067_v34 = vld [vmem:[%s4822_s9 + $0x390] sm:$0xff]  }
 0x11a   : > { %3712 = vmatpush3.bf16.msra.mxu1 %v3996_v35  ;;  %3685 = vmatprep.subr.bf16.mxu0 %v3997_v36  ;;  %v4068_v35 = vld [vmem:[%s5098_s0 + $0xb8] ss:$72 sps:$4 sm:$0xff]  }
 0x11b   : > { %3713 = vmatprep.subr.bf16.mxu1 %v3998_v37  ;;  %v4069_v36 = vld [vmem:[%s4822_s9 + $0x358] sm:$0xff]  }
 0x11c   : > { %v4070_v37 = vld [vmem:[%s4822_s9 + $0x3d8] sm:$0xff]  }
 0x11d   : > { %3686 = vmatpush3.bf16.msra.mxu0 %v3999_v38  ;;  %v4071_v38 = vld [vmem:[%s4822_s9 + $0x318] sm:$0xff]  }
 0x11e   : > { %3714 = vmatpush3.bf16.msra.mxu1 %v4000_v39  ;;  %3727 = vmatprep.subr.bf16.mxu0 %v4007_v44  ;;  %v4072_v39 = vld [vmem:[%s4822_s9 + $0x398] sm:$0xff]   ;;  %v4077_v44 = vld [vmem:[%s4822_s9 + $0x368] sm:$0xff]  }
 0x11f   : > { %3755 = vmatprep.subr.bf16.mxu1 %v4008_v45  ;;  %v4078_v45 = vld [vmem:[%s4822_s9 + $0x3e8] sm:$0xff]  }
 0x120   : > { %2915 = vmatmul.mubr.bf16.vlgmr.msra.gmra.mrb[8].mxu0 %v4001_v40  ;;  %v4073_v40 = vld [vmem:[%s4822_s9 + $0x360] sm:$0xff]  }
 0x121   : > { %2964 = vmatmul.mubr.bf16.vlgmr.msra.gmra.mrb[8].mxu1 %v4004_v42  ;;  %3728 = vmatpush3.bf16.msra.mxu0 %v4009_v46  ;;  %v4075_v42 = vld [vmem:[%s4822_s9 + $0x320] sm:$0xff]   ;;  %v4079_v46 = vld [vmem:[%s4822_s9 + $0x328] sm:$0xff]  }
 0x122   : > { %3756 = vmatpush3.bf16.msra.mxu1 %v4010_v47  ;;  %3729 = vmatprep.subr.bf16.mxu0 %v4011_v48  ;;  %v4080_v47 = vld [vmem:[%s4822_s9 + $0x3a8] sm:$0xff]   ;;  %v4081_v48 = vld [vmem:[%s4822_s9 + $0x370] sm:$0xff]  }
 0x123   : > { %3757 = vmatprep.subr.bf16.mxu1 %v4012_v49  ;;  %2922 = vmatprep.mubr.bf16.mxu0 %v4015_v52  ;;  %v4082_v49 = vld [vmem:[%s4822_s9 + $0x3f0] sm:$0xff]   ;;  %v4085_v52 = vld [vmem:[%s4822_s9 + $0x378] sm:$0xff]  }
 0x124   : > { %2971 = vmatprep.mubr.bf16.mxu1 %v4020_v56  ;;  %v4089_v56 = vld [vmem:[%s5098_s0 + $0x30] ss:$72 sps:$4 sm:$0xff]  }
 0x125   : > { %3730 = vmatpush3.bf16.msra.mxu0 %v4013_v50  ;;  %v4083_v50 = vld [vmem:[%s4822_s9 + $0x330] sm:$0xff]  }
 0x126   : > { %3758 = vmatpush3.bf16.msra.mxu1 %v4014_v51  ;;  %3731 = vmatprep.subr.bf16.mxu0 %v4018_v54  ;;  %v4084_v51 = vld [vmem:[%s4822_s9 + $0x3b0] sm:$0xff]   ;;  %v4087_v54 = vld [vmem:[%s4822_s9 + $0x338] sm:$0xff]  }
 0x127   : > { %3759 = vmatprep.subr.bf16.mxu1 %v4019_v55  ;;  %v4088_v55 = vld [vmem:[%s4822_s9 + $0x3b8] sm:$0xff]  }
 0x128   : > { %2923 = vmatmul.mubr.bf16.gmra.mrb[12].mxu0 %v4017_v53  ;;  %v4086_v53 = vld [vmem:[%s4822_s9 + $0x3f8] sm:$0xff]  }
 0x129   : > { %3732 = vmatpush3.bf16.msra.mxu0 %v4022_v57  ;;  %2972 = vmatmul.mubr.bf16.gmra.mrb[12].mxu1 %v4024_v59  ;;  %v4091_v57 = vld [vmem:[%s5098_s0 + $0x34] ss:$72 sps:$4 sm:$0xff]  }
 0x12a   : > { %3760 = vmatpush3.bf16.msra.mxu1 %v4023_v58  ;;  %3733 = vmatprep.subr.bf16.mxu0 %v4025_v60  ;;  %v4092_v58 = vld [vmem:[%s5098_s0 + $0x38] ss:$72 sps:$4 sm:$0xff]   ;;  %v4094_v59 = vld [vmem:[%s5098_s0 + $0x3c] ss:$72 sps:$4 sm:$0xff]  }
 0x12b   : > { %3761 = vmatprep.subr.bf16.mxu1 %v4026_v61  ;;  %3012 = vmatprep.mubr.bf16.mxu0 %v4047_v17  ;;  %v4095_v60 = vld [vmem:[%s4822_s9 + $0x440] sm:$0xff]   ;;  %v4116_v17 = vld [vmem:[%s4822_s9 + $0x438] sm:$0xff]  }
 0x12c   : > { %3061 = vmatprep.mubr.bf16.mxu1 %v4050_v19  ;;  %v4096_v61 = vld [vmem:[%s4822_s9 + $0x400] sm:$0xff]   ;;  %v4120_v19 = vld [vmem:[%s5098_s0 + $0xd0] ss:$72 sps:$4 sm:$0xff]  }
 0x12d   : > { %3734 = vmatpush3.bf16.msra.mxu0 %v4027_v62  ;;  %v4097_v62 = vld [vmem:[%s4822_s9 + $0x448] sm:$0xff]  }
 0x12e   : > { %3762 = vmatpush3.bf16.msra.mxu1 %v4028_v63  ;;  %3735 = vmatprep.subr.bf16.mxu0 %v4029_v0  ;;  %v4098_v63 = vld [vmem:[%s4822_s9 + $0x408] sm:$0xff]  }
 0x12f   : > { %3763 = vmatprep.subr.bf16.mxu1 %v4030_v1  ;;  %v4099_v0 = vld [vmem:[%s5098_s0 + $0xc4] ss:$72 sps:$4 sm:$0xff]   ;;  %v4101_v1 = vld [vmem:[%s5098_s0 + $0xc0] ss:$72 sps:$4 sm:$0xff]  }
 0x131   : > { %3736 = vmatpush3.bf16.msra.mxu0 %v4031_v2  ;;  %v4102_v2 = vld [vmem:[%s4822_s9 + $0x450] sm:$0xff]  }
 0x132   : > { %3764 = vmatpush3.bf16.msra.mxu1 %v4032_v3  ;;  %3737 = vmatprep.subr.bf16.mxu0 %v4033_v4  ;;  %v4103_v3 = vld [vmem:[%s5098_s0 + $0xcc] ss:$72 sps:$4 sm:$0xff]  }
 0x133   : > { %3765 = vmatprep.subr.bf16.mxu1 %v4034_v5  ;;  %v4105_v4 = vld [vmem:[%s4822_s9 + $0x410] sm:$0xff]  }
 0x134   : > { %v4106_v5 = vld [vmem:[%s5098_s0 + $0xc8] ss:$72 sps:$4 sm:$0xff]  }
 0x135   : > { %3738 = vmatpush3.bf16.msra.mxu0 %v4035_v6  ;;  %v4107_v6 = vld [vmem:[%s4822_s9 + $0x458] sm:$0xff]  }
 0x136   : > { %3766 = vmatpush3.bf16.msra.mxu1 %v4036_v7  ;;  %3739 = vmatprep.subr.bf16.mxu0 %v4037_v8  ;;  %v4108_v7 = vld [vmem:[%s4822_s9 + $0x418] sm:$0xff]   ;;  %v4109_v8 = vld [vmem:[%s4822_s9 + $0x460] sm:$0xff]  }
 0x137   : > { %3767 = vmatprep.subr.bf16.mxu1 %v4038_v9  ;;  %v4110_v9 = vld [vmem:[%s4822_s9 + $0x420] sm:$0xff]  }
 0x139   : > { %3740 = vmatpush3.bf16.msra.mxu0 %v4039_v10  ;;  %v4111_v10 = vld [vmem:[%s4822_s9 + $0x468] sm:$0xff]  }
 0x13a   : > { %3768 = vmatpush3.bf16.msra.mxu1 %v4040_v11  ;;  %3741 = vmatprep.subr.bf16.mxu0 %v4041_v12  ;;  %v4112_v11 = vld [vmem:[%s4822_s9 + $0x428] sm:$0xff]  }
 0x13b   : > { %3769 = vmatprep.subr.bf16.mxu1 %v4042_v13  ;;  %v4119_v12 = vld [vmem:[%s5098_s0 + $0x44] ss:$72 sps:$4 sm:$0xff]   ;;  %v4113_v13 = vld [vmem:[%s4822_s9 + $0x470] sm:$0xff]  }
 0x13d   : > { %3742 = vmatpush3.bf16.msra.mxu0 %v4043_v14  ;;  %v4122_v14 = vld [vmem:[%s5098_s0 + $0xd4] ss:$72 sps:$4 sm:$0xff]  }
 0x13e   : > { %3770 = vmatpush3.bf16.msra.mxu1 %v4044_v15  ;;  %3783 = vmatprep.subr.bf16.mxu0 %v4051_v20  ;;  %v4114_v15 = vld [vmem:[%s4822_s9 + $0x430] sm:$0xff]  }
 0x13f   : > { %3811 = vmatprep.subr.bf16.mxu1 %v4052_v21 }
 0x140   : > { %3013 = vmatmul.mubr.bf16.vlgmr.msra.gmra.mrb[16].mxu0 %v4045_v16  ;;  %v4115_v16 = vld [vmem:[%s4822_s9 + $0x478] sm:$0xff]   ;;  %s1406_s9 = scalar_lea.vmem %s5100_s2, %s1405_s10 }
 0x141   : > { %3062 = vmatmul.mubr.bf16.vlgmr.msra.gmra.mrb[16].mxu1 %v4048_v18  ;;  %3784 = vmatpush3.bf16.msra.mxu0 %v4053_v22  ;;  %v4117_v18 = vld [vmem:[%s5098_s0 + $0x40] ss:$72 sps:$4 sm:$0xff]  }
 0x142   : > { %3812 = vmatpush3.bf16.msra.mxu1 %v4054_v23  ;;  %3785 = vmatprep.subr.bf16.mxu0 %v4055_v24  ;;  %v3411_v22 = vld [vmem:[%s1406_s9] ss:$0 sm:$0xff] }
 0x143   : > { %3813 = vmatprep.subr.bf16.mxu1 %v4056_v25  ;;  %3020 = vmatprep.mubr.bf16.mxu0 %v4059_v28 }
 0x144   : > { %3069 = vmatprep.mubr.bf16.mxu1 %v4064_v32 }
 0x145   : > { %3786 = vmatpush3.bf16.msra.mxu0 %v4057_v26 }
 0x146   : > { %3814 = vmatpush3.bf16.msra.mxu1 %v4058_v27  ;;  %3787 = vmatprep.subr.bf16.mxu0 %v4062_v30 }
 0x147   : > { %3815 = vmatprep.subr.bf16.mxu1 %v4063_v31 }
 0x148   : > { %3021 = vmatmul.mubr.bf16.gmra.mrb[20].mxu0 %v4061_v29 }
 0x149   : > { %3788 = vmatpush3.bf16.msra.mxu0 %v4066_v33  ;;  %3070 = vmatmul.mubr.bf16.gmra.mrb[20].mxu1 %v4068_v35 }
 0x14a   : > { %3816 = vmatpush3.bf16.msra.mxu1 %v4067_v34  ;;  %3789 = vmatprep.subr.bf16.mxu0 %v4069_v36 }
 0x14b   : > { %3817 = vmatprep.subr.bf16.mxu1 %v4070_v37  ;;  %3110 = vmatprep.mubr.bf16.mxu0 %v4091_v57 }
 0x14c   : > { %3159 = vmatprep.mubr.bf16.mxu1 %v4094_v59 }
 0x14d   : > { %3790 = vmatpush3.bf16.msra.mxu0 %v4071_v38 }
 0x14e   : > { %3818 = vmatpush3.bf16.msra.mxu1 %v4072_v39  ;;  %3791 = vmatprep.subr.bf16.mxu0 %v4073_v40 }
 0x14f   : > { %3819 = vmatprep.subr.bf16.mxu1 %v4074_v41 }
 0x151   : > { %3792 = vmatpush3.bf16.msra.mxu0 %v4075_v42 }
 0x152   : > { %3820 = vmatpush3.bf16.msra.mxu1 %v4076_v43  ;;  %3793 = vmatprep.subr.bf16.mxu0 %v4077_v44 }
 0x153   : > { %3821 = vmatprep.subr.bf16.mxu1 %v4078_v45 }
 0x155   : > { %3794 = vmatpush3.bf16.msra.mxu0 %v4079_v46 }
 0x156   : > { %3822 = vmatpush3.bf16.msra.mxu1 %v4080_v47  ;;  %3795 = vmatprep.subr.bf16.mxu0 %v4081_v48 }
 0x157   : > { %3823 = vmatprep.subr.bf16.mxu1 %v4082_v49 }
 0x159   : > { %3796 = vmatpush3.bf16.msra.mxu0 %v4083_v50 }
 0x15a   : > { %3824 = vmatpush3.bf16.msra.mxu1 %v4084_v51  ;;  %3797 = vmatprep.subr.bf16.mxu0 %v4085_v52 }
 0x15b   : > { %3825 = vmatprep.subr.bf16.mxu1 %v4086_v53 }
 0x15d   : > { %3798 = vmatpush3.bf16.msra.mxu0 %v4087_v54 }
 0x15e   : > { %3826 = vmatpush3.bf16.msra.mxu1 %v4088_v55  ;;  %3839 = vmatprep.subr.bf16.mxu0 %v4095_v60 }
 0x15f   : > { %3867 = vmatprep.subr.bf16.mxu1 %v4095_v60 }
 0x160   : > { %3111 = vmatmul.mubr.bf16.vlgmr.msra.gmra.mrb[24].mxu0 %v4089_v56 }
 0x161   : > { %3160 = vmatmul.mubr.bf16.vlgmr.msra.gmra.mrb[24].mxu1 %v4092_v58  ;;  %3840 = vmatpush3.bf16.msra.mxu0 %v4096_v61 }
 0x162   : > { %3875 = vmatpush3.bf16.msra.mxu1 %v4096_v61  ;;  %3841 = vmatprep.subr.bf16.mxu0 %v4097_v62 }
 0x163   : > { %3868 = vmatprep.subr.bf16.mxu1 %v4097_v62  ;;  %3118 = vmatprep.mubr.bf16.mxu0 %v4099_v0 }
 0x164   : > { %3167 = vmatprep.mubr.bf16.mxu1 %v4103_v3 }
 0x165   : > { %3842 = vmatpush3.bf16.msra.mxu0 %v4098_v63 }
 0x166   : > { %3876 = vmatpush3.bf16.msra.mxu1 %v4098_v63  ;;  %3843 = vmatprep.subr.bf16.mxu0 %v4102_v2 }
 0x167   : > { %3869 = vmatprep.subr.bf16.mxu1 %v4102_v2 }
 0x168   : > { %3119 = vmatmul.mubr.bf16.gmra.mrb[28].mxu0 %v4101_v1 }
 0x169   : > { %3844 = vmatpush3.bf16.msra.mxu0 %v4105_v4  ;;  %3168 = vmatmul.mubr.bf16.gmra.mrb[28].mxu1 %v4106_v5 }
 0x16a   : > { %3877 = vmatpush3.bf16.msra.mxu1 %v4105_v4  ;;  %3845 = vmatprep.subr.bf16.mxu0 %v4107_v6 }
 0x16b   : > { %3870 = vmatprep.subr.bf16.mxu1 %v4107_v6  ;;  %3208 = vmatprep.mubr.bf16.mxu0 %v4119_v12 }
 0x16c   : > { %3216 = vmatprep.mubr.bf16.mxu1 %v4122_v14 }
 0x16d   : > { %3846 = vmatpush3.bf16.msra.mxu0 %v4108_v7 }
 0x16e   : > { %3878 = vmatpush3.bf16.msra.mxu1 %v4108_v7  ;;  %3847 = vmatprep.subr.bf16.mxu0 %v4109_v8 }
 0x16f   : > { %3871 = vmatprep.subr.bf16.mxu1 %v4109_v8 }
 0x171   : > { %3848 = vmatpush3.bf16.msra.mxu0 %v4110_v9 }
 0x172   : > { %3879 = vmatpush3.bf16.msra.mxu1 %v4110_v9  ;;  %3849 = vmatprep.subr.bf16.mxu0 %v4111_v10 }
 0x173   : > { %3872 = vmatprep.subr.bf16.mxu1 %v4111_v10 }
 0x175   : > { %3850 = vmatpush3.bf16.msra.mxu0 %v4112_v11 }
 0x176   : > { %3880 = vmatpush3.bf16.msra.mxu1 %v4112_v11  ;;  %3851 = vmatprep.subr.bf16.mxu0 %v4113_v13 }
 0x177   : > { %3873 = vmatprep.subr.bf16.mxu1 %v4113_v13 }
 0x179   : > { %3852 = vmatpush3.bf16.msra.mxu0 %v4114_v15 }
 0x17a   : > { %3881 = vmatpush3.bf16.msra.mxu1 %v4114_v15  ;;  %3853 = vmatprep.subr.bf16.mxu0 %v4115_v16 }
 0x17b   : > { %3874 = vmatprep.subr.bf16.mxu1 %v4115_v16 }
 0x17d   : > { %3854 = vmatpush3.bf16.msra.mxu0 %v4116_v17 }
 0x17e   : > { %3882 = vmatpush3.bf16.msra.mxu1 %v4116_v17 }
 0x180   : > { %3209 = vmatmul.mubr.bf16.vlgmr.msra.gmra.mrb[32].mxu0 %v4117_v18 }
 0x181   : > { %3217 = vmatmul.mubr.bf16.vlgmr.msra.gmra.mrb[32].mxu1 %v4120_v19 }
 0x1d3   : > { %v3631_v20 = vpop.f32.mrb[0].mxu0 }
 0x1d4   : > { %v3659_v21 = vpop.f32.mrb[0].mxu1  ;;  %v3632_v23 = vpop.f32.mrb[1].mxu0 }
 0x1d5   : > { %v3633_v24 = vadd.f32 %v3632_v23, %v3631_v20  ;;  %v3660_v25 = vpop.f32.mrb[1].mxu1  ;;  %v3634_v26 = vpop.f32.mrb[2].mxu0 }
 0x1d6   : > { %v3661_v27 = vadd.f32 %v3660_v25, %v3659_v21  ;;  %v3662_v28 = vpop.f32.mrb[2].mxu1  ;;  %v3635_v29 = vpop.f32.mrb[3].mxu0 }
 0x1d7   : > { %v2819_v30 = vadd.f32 %v3633_v24, %v3411_v22  ;;  %v3636_v31 = vadd.f32 %v3635_v29, %v3634_v26  ;;  %v3663_v32 = vpop.f32.mrb[3].mxu1 }
 0x1d8   : > { %v3664_v33 = vadd.f32 %v3663_v32, %v3662_v28 }
 0x1d9   : > { %v2868_v34 = vadd.f32 %v3661_v27, %v2819_v30  ;;  %v2822_v35 = vadd.f32 %v3636_v31, %v3411_v22 }
 0x1db   : > { %v2871_v36 = vadd.f32 %v3664_v33, %v2822_v35  ;;  %v3637_v37 = vpop.f32.mrb[4].mxu0 }
 0x1dc   : > { %v3638_v38 = vpop.f32.mrb[5].mxu0  ;;  %v3665_v44 = vpop.f32.mrb[4].mxu1 }
 0x1dd   : > { %v3639_v39 = vadd.f32 %v3638_v38, %v3637_v37  ;;  %v3640_v40 = vpop.f32.mrb[6].mxu0  ;;  %v3666_v45 = vpop.f32.mrb[5].mxu1 }
 0x1de   : > { %v3641_v41 = vpop.f32.mrb[7].mxu0  ;;  %v3667_v47 = vadd.f32 %v3666_v45, %v3665_v44  ;;  %v3668_v48 = vpop.f32.mrb[6].mxu1 }
 0x1df   : > { %v3642_v42 = vadd.f32 %v3641_v41, %v3640_v40  ;;  %v2827_v43 = vadd.f32 %v3639_v39, %v3411_v22  ;;  %v3669_v49 = vpop.f32.mrb[7].mxu1 }
 0x1e0   : > { %v3670_v51 = vadd.f32 %v3669_v49, %v3668_v48 }
 0x1e1   : > { %v2830_v46 = vadd.f32 %v3642_v42, %v3411_v22  ;;  %v2876_v50 = vadd.f32 %v3667_v47, %v2827_v43 }
 0x1e3   : > { %v2879_v52 = vadd.f32 %v3670_v51, %v2830_v46 }
 0x1f3   : > { %v3687_v53 = vpop.f32.mrb[8].mxu0 }
 0x1f4   : > { %v3715_v54 = vpop.f32.mrb[8].mxu1  ;;  %v3688_v55 = vpop.f32.mrb[9].mxu0 }
 0x1f5   : > { %v3689_v56 = vadd.f32 %v3688_v55, %v3687_v53  ;;  %v3716_v57 = vpop.f32.mrb[9].mxu1  ;;  %v3690_v58 = vpop.f32.mrb[10].mxu0 }
 0x1f6   : > { %v3717_v59 = vadd.f32 %v3716_v57, %v3715_v54  ;;  %v3718_v60 = vpop.f32.mrb[10].mxu1  ;;  %v3691_v61 = vpop.f32.mrb[11].mxu0 }
 0x1f7   : > { %v2917_v62 = vadd.f32 %v3689_v56, %v2868_v34  ;;  %v3692_v63 = vadd.f32 %v3691_v61, %v3690_v58  ;;  %v3719_v0 = vpop.f32.mrb[11].mxu1 }
 0x1f8   : > { %v3720_v1 = vadd.f32 %v3719_v0, %v3718_v60 }
 0x1f9   : > { %v2966_v2 = vadd.f32 %v3717_v59, %v2917_v62  ;;  %v2920_v3 = vadd.f32 %v3692_v63, %v2871_v36 }
 0x1fb   : > { %v2969_v4 = vadd.f32 %v3720_v1, %v2920_v3  ;;  %v3693_v5 = vpop.f32.mrb[12].mxu0 }
 0x1fc   : > { %v3694_v6 = vpop.f32.mrb[13].mxu0  ;;  %v3721_v12 = vpop.f32.mrb[12].mxu1 }
 0x1fd   : > { %v3695_v7 = vadd.f32 %v3694_v6, %v3693_v5  ;;  %v3696_v8 = vpop.f32.mrb[14].mxu0  ;;  %v3722_v14 = vpop.f32.mrb[13].mxu1 }
 0x1fe   : > { %v3697_v9 = vpop.f32.mrb[15].mxu0  ;;  %v3723_v15 = vadd.f32 %v3722_v14, %v3721_v12  ;;  %v3724_v16 = vpop.f32.mrb[14].mxu1 }
 0x1ff   : > { %v2925_v10 = vadd.f32 %v3695_v7, %v2876_v50  ;;  %v3698_v11 = vadd.f32 %v3697_v9, %v3696_v8  ;;  %v3725_v17 = vpop.f32.mrb[15].mxu1 }
 0x200   : > { %v3726_v19 = vadd.f32 %v3725_v17, %v3724_v16 }
 0x201   : > { %v2928_v13 = vadd.f32 %v3698_v11, %v2879_v52  ;;  %v2974_v18 = vadd.f32 %v3723_v15, %v2925_v10 }
 0x203   : > { %v2977_v20 = vadd.f32 %v3726_v19, %v2928_v13 }
 0x213   : > { %v3743_v21 = vpop.f32.mrb[16].mxu0 }
 0x214   : > { %v3744_v22 = vpop.f32.mrb[17].mxu0  ;;  %v3771_v23 = vpop.f32.mrb[16].mxu1 }
 0x215   : > { %v3745_v24 = vadd.f32 %v3744_v22, %v3743_v21  ;;  %v3746_v25 = vpop.f32.mrb[18].mxu0  ;;  %v3772_v26 = vpop.f32.mrb[17].mxu1 }
 0x216   : > { %v3747_v27 = vpop.f32.mrb[19].mxu0  ;;  %v3773_v29 = vadd.f32 %v3772_v26, %v3771_v23  ;;  %v3774_v30 = vpop.f32.mrb[18].mxu1 }
 0x217   : > { %v3015_v28 = vadd.f32 %v3745_v24, %v2966_v2  ;;  %v3748_v31 = vadd.f32 %v3747_v27, %v3746_v25  ;;  %v3775_v32 = vpop.f32.mrb[19].mxu1 }
 0x218   : > { %v3776_v35 = vadd.f32 %v3775_v32, %v3774_v30 }
 0x219   : > { %v3064_v33 = vadd.f32 %v3773_v29, %v3015_v28  ;;  %v3018_v34 = vadd.f32 %v3748_v31, %v2969_v4 }
 0x21b   : > { %v3067_v36 = vadd.f32 %v3776_v35, %v3018_v34  ;;  %v3749_v37 = vpop.f32.mrb[20].mxu0 }
 0x21c   : > { %v3750_v38 = vpop.f32.mrb[21].mxu0  ;;  %v3777_v44 = vpop.f32.mrb[20].mxu1 }
 0x21d   : > { %v3751_v39 = vadd.f32 %v3750_v38, %v3749_v37  ;;  %v3752_v40 = vpop.f32.mrb[22].mxu0  ;;  %v3778_v46 = vpop.f32.mrb[21].mxu1 }
 0x21e   : > { %v3753_v41 = vpop.f32.mrb[23].mxu0  ;;  %v3779_v47 = vadd.f32 %v3778_v46, %v3777_v44  ;;  %v3780_v48 = vpop.f32.mrb[22].mxu1 }
 0x21f   : > { %v3023_v42 = vadd.f32 %v3751_v39, %v2974_v18  ;;  %v3754_v43 = vadd.f32 %v3753_v41, %v3752_v40  ;;  %v3781_v49 = vpop.f32.mrb[23].mxu1 }
 0x220   : > { %v3782_v51 = vadd.f32 %v3781_v49, %v3780_v48 }
 0x221   : > { %v3026_v45 = vadd.f32 %v3754_v43, %v2977_v20  ;;  %v3072_v50 = vadd.f32 %v3779_v47, %v3023_v42 }
 0x223   : > { %v3075_v52 = vadd.f32 %v3782_v51, %v3026_v45 }
 0x233   : > { %v3799_v53 = vpop.f32.mrb[24].mxu0 }
 0x234   : > { %v3827_v54 = vpop.f32.mrb[24].mxu1  ;;  %v3800_v55 = vpop.f32.mrb[25].mxu0 }
 0x235   : > { %v3801_v56 = vadd.f32 %v3800_v55, %v3799_v53  ;;  %v3828_v57 = vpop.f32.mrb[25].mxu1  ;;  %v3802_v58 = vpop.f32.mrb[26].mxu0 }
 0x236   : > { %v3829_v59 = vadd.f32 %v3828_v57, %v3827_v54  ;;  %v3830_v60 = vpop.f32.mrb[26].mxu1  ;;  %v3803_v61 = vpop.f32.mrb[27].mxu0 }
 0x237   : > { %v3113_v62 = vadd.f32 %v3801_v56, %v3064_v33  ;;  %v3804_v63 = vadd.f32 %v3803_v61, %v3802_v58  ;;  %v3831_v0 = vpop.f32.mrb[27].mxu1 }
 0x238   : > { %v3832_v1 = vadd.f32 %v3831_v0, %v3830_v60 }
 0x239   : > { %v3162_v2 = vadd.f32 %v3829_v59, %v3113_v62  ;;  %v3116_v3 = vadd.f32 %v3804_v63, %v3067_v36 }
 0x23b   : > { %v3165_v4 = vadd.f32 %v3832_v1, %v3116_v3  ;;  %v3805_v5 = vpop.f32.mrb[28].mxu0 }
 0x23c   : > { %v3806_v6 = vpop.f32.mrb[29].mxu0  ;;  %v3833_v9 = vpop.f32.mrb[28].mxu1 }
 0x23d   : > { %v3807_v7 = vadd.f32 %v3806_v6, %v3805_v5  ;;  %v3808_v8 = vpop.f32.mrb[30].mxu0  ;;  %v3834_v11 = vpop.f32.mrb[29].mxu1 }
 0x23e   : > { %v3809_v10 = vpop.f32.mrb[31].mxu0  ;;  %v3835_v14 = vadd.f32 %v3834_v11, %v3833_v9  ;;  %v3836_v15 = vpop.f32.mrb[30].mxu1 }
 0x23f   : > { %v3121_v12 = vadd.f32 %v3807_v7, %v3072_v50  ;;  %v3810_v13 = vadd.f32 %v3809_v10, %v3808_v8  ;;  %v3837_v16 = vpop.f32.mrb[31].mxu1 }
 0x240   : > { %v3838_v19 = vadd.f32 %v3837_v16, %v3836_v15 }
 0x241   : > { %v3124_v17 = vadd.f32 %v3810_v13, %v3075_v52  ;;  %v3170_v18 = vadd.f32 %v3835_v14, %v3121_v12 }
 0x243   : > { %v3173_v20 = vadd.f32 %v3838_v19, %v3124_v17 }
 0x253   : > { %v3855_v21 = vpop.f32.mrb[32].mxu0 }
 0x254   : > { %v3861_v22 = vpop.f32.mrb[32].mxu1  ;;  %v3856_v23 = vpop.f32.mrb[33].mxu0 }
 0x255   : > { %v3857_v24 = vadd.f32 %v3856_v23, %v3855_v21  ;;  %v3862_v25 = vpop.f32.mrb[33].mxu1  ;;  %v3858_v26 = vpop.f32.mrb[34].mxu0 }
 0x256   : > { %v3863_v27 = vadd.f32 %v3862_v25, %v3861_v22  ;;  %v3864_v28 = vpop.f32.mrb[34].mxu1  ;;  %v3859_v29 = vpop.f32.mrb[35].mxu0 }
 0x257   : > { %v3211_v30 = vadd.f32 %v3857_v24, %v3162_v2  ;;  %v3860_v31 = vadd.f32 %v3859_v29, %v3858_v26  ;;  %v3865_v32 = vpop.f32.mrb[35].mxu1 }
 0x258   : > { %v3219_v33 = vadd.f32 %v3863_v27, %v3170_v18  ;;  %v3866_v34 = vadd.f32 %v3865_v32, %v3864_v28 }
 0x259   : > { %v3214_v35 = vadd.f32 %v3860_v31, %v3165_v4  ;;  %v3225_v37 = vmax.f32 %v3211_v30, 0.0 }
 0x25a   : > { %v3222_v36 = vadd.f32 %v3866_v34, %v3173_v20  ;;  %v3227_v39 = vmax.f32 %v3219_v33, 0.0  ;;  %3255 = sbr.rel (!%p4218_p6) target bundleno = 618 (0x26a), region = 77 }
 0x25b   : > { %v3226_v38 = vmax.f32 %v3214_v35, 0.0 }
 0x25c   : > { %v3228_v40 = vmax.f32 %v3222_v36, 0.0 }
 0x25d   : > { %v3607_v41 = vpack.c.bf16 %v3226_v38, %v3225_v37 }
 0x25e   : > { %v3612_v42 = vpack.c.bf16 %v3228_v40, %v3227_v39 }
 0x25f   : > { %3608 = vst [vmem:[%s1396_s20] sm:$0xff] %v3607_v41  }
 0x260   : > { %3614 = vst [vmem:[%s1396_s20 + $0x8] sm:$0xff] %v3612_v42  }
 0x266   : > { %v3276_v43 = vld [vmem:[%s1396_s20] sm:$0xf]  ;;  %v3278_v44 = vld [vmem:[%s1396_s20 + $0x4] sm:$0xf] }
 0x267   : > { %v3280_v45 = vld [vmem:[%s1396_s20 + $0x8] sm:$0xf]  ;;  %v3282_v46 = vld [vmem:[%s1396_s20 + $0xc] sm:$0xf]  ;;  %3277 = vst [vmem:[%s3260_s24] sm:$0xf] %v3276_v43 }
 0x268   : > { %3279 = vst [vmem:[%s3260_s24 + $0x8] sm:$0xf] %v3278_v44  ;;  %3281 = vst [vmem:[%s3260_s24 + $0x10] sm:$0xf] %v3280_v45 }
 0x269   : > { %3283 = vst [vmem:[%s3260_s24 + $0x18] sm:$0xf] %v3282_v46 }
 0x26a PF: > { %s13_s16 = sadd.s32 1, %s4161_s16   ;;  %s5103_s12 = smov %s4149_s13 }
 0x26b   : > { %p10_p12 = scmp.ge.s32.totalorder %s13_s16, 4   ;;  %s5104_s13 = smov %s4223_s22 }
 0x26c   : > { %s5105_s14 = smov %s4157_s15  ;;  %s5106_s15 = smov %s5108_s17 }
 0x26d   :  { %12 = sbr.rel (!%p10_p12) target bundleno = 3 (0x3), region = 155 }

</bundles_post_ra>
